<compile_context>
chip_gen: v5e
topology: v5e:2x2
jax: 0.10.0
libtpu: 0.0.40
codegen_flags: <defaults>
</compile_context>

<pallas_src>
import functools

import jax
import jax.numpy as jnp
from jax.experimental import pallas as pl
from jax.experimental.pallas import tpu as pltpu

EPS = 1e-5


def conv_bn_kernel(w_ref, x_ref, gamma_ref, beta_ref, o_ref):
    # 1x1 conv, transposed output:  (Cout_blk, Cin) @ (Cin, M) -> (Cout_blk, M)
    y = jnp.dot(w_ref[...], x_ref[...], preferred_element_type=jnp.float32)

    # BatchNorm2d (training mode): per-channel (row) biased stats over the M
    # pixels, folded into a scale/shift epilogue. rsqrt goes to the EUP slot.
    m = y.shape[1]
    inv_m = 1.0 / m
    s1 = jnp.sum(y, axis=1, keepdims=True)           # (Cout_blk, 1)
    s2 = jnp.sum(y * y, axis=1, keepdims=True)       # (Cout_blk, 1)
    mean = s1 * inv_m
    var = s2 * inv_m - mean * mean                   # biased variance
    inv_std = jax.lax.rsqrt(var + EPS)
    scale = gamma_ref[...] * inv_std                 # (Cout_blk, 1)
    shift = beta_ref[...] - mean * scale             # (Cout_blk, 1)

    o_ref[...] = (y * scale + shift).astype(o_ref.dtype)


def _num_tensorcores():
    """Best-effort detection: v7x has 2 TensorCores per chip, v5e/v6e have 1."""
    try:
        kind = jax.devices()[0].device_kind.lower()
        if "v7" in kind or "7x" in kind:
            return 2
    except Exception:
        pass
    return 1


@functools.partial(jax.jit, static_argnames=("cout_splits",))
def conv2d_1x1_batchnorm(x_nchw, weight, gamma, beta, *, cout_splits=None):
    """x_nchw: (1, Cin, H, W); weight: (Cout, Cin, 1, 1); gamma/beta: (Cout,)"""
    N, Cin, H, W = x_nchw.shape
    Cout = weight.shape[0]
    assert N == 1, "transposed-output layout relies on N=1 (as in the module)"
    M = N * H * W

    # All reshapes below are layout-preserving (contiguous) => no XLA copies.
    x_mat = x_nchw.reshape(Cin, M)            # (Cin, M)
    w_mat = weight.reshape(Cout, Cin)         # (Cout, Cin) -- no transpose
    gamma2d = gamma.reshape(Cout, 1)
    beta2d = beta.reshape(Cout, 1)

    if cout_splits is None:
        cout_splits = _num_tensorcores()
    if Cout % cout_splits != 0 or (Cout // cout_splits) % 8 != 0:
        cout_splits = 1
    cblk = Cout // cout_splits

    itemsize = jnp.dtype(x_nchw.dtype).itemsize
    cost = pl.CostEstimate(
        flops=2 * Cout * Cin * M + 6 * Cout * M,
        transcendentals=Cout,
        bytes_accessed=(w_mat.size + cout_splits * x_mat.size
                        + Cout * M + 4 * Cout) * itemsize,
    )

    out_t = pl.pallas_call(
        conv_bn_kernel,
        out_shape=jax.ShapeDtypeStruct((Cout, M), x_nchw.dtype),
        grid=(cout_splits,),
        in_specs=[
            pl.BlockSpec((cblk, Cin), lambda i: (i, 0)),   # weight block
            pl.BlockSpec((Cin, M), lambda i: (0, 0)),      # full activations
            pl.BlockSpec((cblk, 1), lambda i: (i, 0)),     # gamma block
            pl.BlockSpec((cblk, 1), lambda i: (i, 0)),     # beta block
        ],
        out_specs=pl.BlockSpec((cblk, M), lambda i: (i, 0)),
        compiler_params=pltpu.CompilerParams(
            dimension_semantics=("parallel",),
        ),
        cost_estimate=cost,
    )(w_mat, x_mat, gamma2d, beta2d)

    # (Cout, M) -> (1, Cout, H, W): pure reshape (N=1).
    return out_t.reshape(N, Cout, H, W)


# TODO(synk): torch training-mode BatchNorm2d also updates running_mean /
# running_var buffers (momentum=0.1); only the normalized forward activation
# is produced here.


if __name__ == "__main__":
    key = jax.random.PRNGKey(0)
    k_x, k_w = jax.random.split(key)

    N, C, H, W = 1, 672, 7, 7  # shapes implied by the torch module
    x = jax.random.normal(k_x, (N, C, H, W), dtype=jnp.float32)

    # Deterministic parameter init (Conv2d(672,672,1,1,bias=False);
    # BatchNorm2d(672): weight=1, bias=0 at construction time).
    fan_in = C * 1 * 1
    conv_w = jax.random.normal(k_w, (C, C, 1, 1), dtype=jnp.float32) * (1.0 / (fan_in ** 0.5))
    bn_gamma = jnp.ones((C,), dtype=jnp.float32)
    bn_beta = jnp.zeros((C,), dtype=jnp.float32)

    out = conv2d_1x1_batchnorm(x, conv_w, bn_gamma, bn_beta)
    jax.block_until_ready(out)
    assert out.shape == (N, C, H, W)

    # Pure-JAX reference (same math as Conv2d(1x1) + training-mode BatchNorm2d).
    y_ref = jnp.einsum("oc,nchw->nohw", conv_w.reshape(C, C), x)
    mean_r = jnp.mean(y_ref, axis=(0, 2, 3), keepdims=True)
    var_r = jnp.mean((y_ref - mean_r) ** 2, axis=(0, 2, 3), keepdims=True)
    ref = (y_ref - mean_r) * jax.lax.rsqrt(var_r + EPS) \
        * bn_gamma.reshape(1, C, 1, 1) + bn_beta.reshape(1, C, 1, 1)
    assert jnp.allclose(out, ref, atol=2e-3, rtol=2e-3), "mismatch vs pure-JAX reference"

    print("KERNEL_OK")
</pallas_src>

<mosaic_0001>
module attributes {stable_mosaic.version = 11 : i64} {
  func.func @conv_bn_kernel(%arg0: i32, %arg1: memref<672x672xf32, #tpu.memory_space<vmem>>, %arg2: memref<672x49xf32, #tpu.memory_space<vmem>>, %arg3: memref<672x1xf32, #tpu.memory_space<vmem>>, %arg4: memref<672x1xf32, #tpu.memory_space<vmem>>, %arg5: memref<672x49xf32, #tpu.memory_space<vmem>>) attributes {dimension_semantics = [#tpu.dimension_semantics<parallel>], iteration_bounds = array<i64: 1>, scalar_prefetch = 0 : i64, scratch_operands = 0 : i64, tpu.core_type = #tpu.core_type<tc>, window_params = [{transform_indices = @transform_0, window_bounds = array<i64: 672, 672>}, {pipeline_mode = #tpu.pipeline_mode<synchronous>, transform_indices = @transform_1, window_bounds = array<i64: 672, 49>}, {transform_indices = @transform_2, window_bounds = array<i64: 672, 1>}, {transform_indices = @transform_3, window_bounds = array<i64: 672, 1>}, {transform_indices = @transform_4, window_bounds = array<i64: 672, 49>}]} {
    %c0 = arith.constant 0 : index
    %c0_0 = arith.constant 0 : index
    %0 = vector.load %arg1[%c0, %c0_0] : memref<672x672xf32, #tpu.memory_space<vmem>>, vector<672x672xf32>
    %c0_1 = arith.constant 0 : index
    %c0_2 = arith.constant 0 : index
    %1 = vector.load %arg2[%c0_1, %c0_2] : memref<672x49xf32, #tpu.memory_space<vmem>>, vector<672x49xf32>
    %cst = arith.constant dense<0.000000e+00> : vector<672x49xf32>
    %2 = tpu.matmul %0, %1, %cst {dimension_numbers = #tpu.dot_dimension_numbers<[1], [0], [0], [1], [0, 0, 1, 1], [], []>} : vector<672x672xf32>, vector<672x49xf32>, vector<672x49xf32> -> vector<672x49xf32>
    %cst_3 = arith.constant dense<0.000000e+00> : vector<672xf32>
    %3 = vector.multi_reduction <add>, %2, %cst_3 [1] : vector<672x49xf32> to vector<672xf32>
    %4 = vector.shape_cast %3 : vector<672xf32> to vector<672x1xf32>
    %5 = arith.mulf %2, %2 : vector<672x49xf32>
    %cst_4 = arith.constant dense<0.000000e+00> : vector<672xf32>
    %6 = vector.multi_reduction <add>, %5, %cst_4 [1] : vector<672x49xf32> to vector<672xf32>
    %7 = vector.shape_cast %6 : vector<672xf32> to vector<672x1xf32>
    %cst_5 = arith.constant 0.0204081628 : f32
    %8 = vector.broadcast %cst_5 : f32 to vector<672x1xf32>
    %9 = arith.mulf %4, %8 : vector<672x1xf32>
    %cst_6 = arith.constant 0.0204081628 : f32
    %10 = vector.broadcast %cst_6 : f32 to vector<672x1xf32>
    %11 = arith.mulf %7, %10 : vector<672x1xf32>
    %12 = arith.mulf %9, %9 : vector<672x1xf32>
    %13 = arith.subf %11, %12 : vector<672x1xf32>
    %cst_7 = arith.constant 9.99999974E-6 : f32
    %14 = vector.broadcast %cst_7 : f32 to vector<672x1xf32>
    %15 = arith.addf %13, %14 : vector<672x1xf32>
    %16 = math.rsqrt %15 : vector<672x1xf32>
    %c0_8 = arith.constant 0 : index
    %c0_9 = arith.constant 0 : index
    %17 = vector.load %arg3[%c0_8, %c0_9] : memref<672x1xf32, #tpu.memory_space<vmem>>, vector<672x1xf32>
    %18 = arith.mulf %17, %16 : vector<672x1xf32>
    %c0_10 = arith.constant 0 : index
    %c0_11 = arith.constant 0 : index
    %19 = vector.load %arg4[%c0_10, %c0_11] : memref<672x1xf32, #tpu.memory_space<vmem>>, vector<672x1xf32>
    %20 = arith.mulf %9, %18 : vector<672x1xf32>
    %21 = arith.subf %19, %20 : vector<672x1xf32>
    %22 = vector.broadcast %18 : vector<672x1xf32> to vector<672x49xf32>
    %23 = arith.mulf %2, %22 : vector<672x49xf32>
    %24 = vector.broadcast %21 : vector<672x1xf32> to vector<672x49xf32>
    %25 = arith.addf %23, %24 : vector<672x49xf32>
    %c0_12 = arith.constant 0 : index
    %c0_13 = arith.constant 0 : index
    %26 = vector.load %arg5[%c0_12, %c0_13] : memref<672x49xf32, #tpu.memory_space<vmem>>, vector<672x49xf32>
    tpu.vector_store %arg5[%c0_12, %c0_13], %25 {strides = array<i32>} : memref<672x49xf32, #tpu.memory_space<vmem>>, vector<672x49xf32>,
    return
  }
  func.func @transform_0(%arg0: i32) -> (i32, i32) {
    %c0_i32 = arith.constant 0 : i32
    %c0_i32_0 = arith.constant 0 : i32
    return %arg0, %c0_i32 : i32, i32
  }
  func.func @transform_1(%arg0: i32) -> (i32, i32) {
    %c0_i32 = arith.constant 0 : i32
    %c0_i32_0 = arith.constant 0 : i32
    %c0_i32_1 = arith.constant 0 : i32
    return %c0_i32, %c0_i32_0 : i32, i32
  }
  func.func @transform_2(%arg0: i32) -> (i32, i32) {
    %c0_i32 = arith.constant 0 : i32
    %c0_i32_0 = arith.constant 0 : i32
    return %arg0, %c0_i32 : i32, i32
  }
  func.func @transform_3(%arg0: i32) -> (i32, i32) {
    %c0_i32 = arith.constant 0 : i32
    %c0_i32_0 = arith.constant 0 : i32
    return %arg0, %c0_i32 : i32, i32
  }
  func.func @transform_4(%arg0: i32) -> (i32, i32) {
    %c0_i32 = arith.constant 0 : i32
    %c0_i32_0 = arith.constant 0 : i32
    return %arg0, %c0_i32 : i32, i32
  }
}

</mosaic_0001>

<bundles_post_ra>
// kernel: conv2d_1x1_batchnorm.1
= control target key start
LH: loop header
LB: loop body
LE: loop exit
PB: predicated region body
PF: predicated region fallthrough
CT: control target
= control target key end

     0   :  { %vm605_vm0 = vcmask 261120   ;;  %vm2472_vm1 = vcmask 400384   ;;  %s10949_s1 = inlined_call_operand.vmem [shape: f32[672,49], index: 1, kind: input, shape index: {}]   ;;  %s10950_s0 = inlined_call_operand.vmem [shape: f32[672,672], index: 0, kind: input, shape index: {}]   ;;  %s10951_s2 = inlined_call_operand.vmem [shape: f32[672,1], index: 2, kind: input, shape index: {}]   ;;  %s10952_s3 = inlined_call_operand.vmem [shape: f32[672,1], index: 3, kind: input, shape index: {}]   ;;  %s10953_s4 = inlined_call_operand.vmem [shape: f32[672,49], index: 4, kind: output, shape index: {}]  }
   0x1   :  { %v536_v0 = vld [vmem:[%s10949_s1 + $0x78] sm:$0xff]  ;;  %v535_v2 = vld [vmem:[%s10949_s1 + $0x70] sm:$0xff]  ;;  %v534_v4 = vld [vmem:[%s10949_s1 + $0x68] sm:$0xff] }
   0x2   :  { %v552_v1 = vld [vmem:[%s10949_s1 + $0xf8] sm:$0xff]  ;;  %5921 = vmatpush.msra.mxu2 %v536_v0  ;;  %v551_v3 = vld [vmem:[%s10949_s1 + $0xf0] sm:$0xff]  ;;  %v550_v5 = vld [vmem:[%s10949_s1 + $0xe8] sm:$0xff]  ;;  %858 = vmatpush.msra.mxu0 %v536_v0 }
   0x3   :  { %5937 = vmatpush.msra.mxu3 %v552_v1  ;;  %1127 = vmatpush.msra.mxu1 %v552_v1  ;;  %v533_v6 = vld [vmem:[%s10949_s1 + $0x60] sm:$0xff]  ;;  %v532_v8 = vld [vmem:[%s10949_s1 + $0x58] sm:$0xff]  ;;  %v531_v10 = vld [vmem:[%s10949_s1 + $0x50] sm:$0xff] }
   0x4   :  { %5922 = vmatpush.msra.mxu2 %v535_v2  ;;  %v549_v7 = vld [vmem:[%s10949_s1 + $0xe0] sm:$0xff]  ;;  %859 = vmatpush.msra.mxu0 %v535_v2  ;;  %v548_v9 = vld [vmem:[%s10949_s1 + $0xd8] sm:$0xff]  ;;  %v547_v11 = vld [vmem:[%s10949_s1 + $0xd0] sm:$0xff] }
   0x5   :  { %5938 = vmatpush.msra.mxu3 %v551_v3  ;;  %1128 = vmatpush.msra.mxu1 %v551_v3  ;;  %v530_v12 = vld [vmem:[%s10949_s1 + $0x48] sm:$0xff]  ;;  %v529_v14 = vld [vmem:[%s10949_s1 + $0x40] sm:$0xff]  ;;  %v528_v16 = vld [vmem:[%s10949_s1 + $0x38] sm:$0xff] }
   0x6   :  { %5923 = vmatpush.msra.mxu2 %v534_v4  ;;  %860 = vmatpush.msra.mxu0 %v534_v4  ;;  %v546_v13 = vld [vmem:[%s10949_s1 + $0xc8] sm:$0xff]  ;;  %v545_v15 = vld [vmem:[%s10949_s1 + $0xc0] sm:$0xff]  ;;  %v544_v17 = vld [vmem:[%s10949_s1 + $0xb8] sm:$0xff] }
   0x7   :  { %5939 = vmatpush.msra.mxu3 %v550_v5  ;;  %1129 = vmatpush.msra.mxu1 %v550_v5  ;;  %v527_v18 = vld [vmem:[%s10949_s1 + $0x30] sm:$0xff]  ;;  %v526_v20 = vld [vmem:[%s10949_s1 + $0x28] sm:$0xff]  ;;  %v525_v22 = vld [vmem:[%s10949_s1 + $0x20] sm:$0xff] }
   0x8   :  { %5924 = vmatpush.msra.mxu2 %v533_v6  ;;  %861 = vmatpush.msra.mxu0 %v533_v6  ;;  %v543_v19 = vld [vmem:[%s10949_s1 + $0xb0] sm:$0xff]  ;;  %v542_v21 = vld [vmem:[%s10949_s1 + $0xa8] sm:$0xff]  ;;  %v541_v23 = vld [vmem:[%s10949_s1 + $0xa0] sm:$0xff] }
   0x9   :  { %5940 = vmatpush.msra.mxu3 %v549_v7  ;;  %1130 = vmatpush.msra.mxu1 %v549_v7  ;;  %v524_v24 = vld [vmem:[%s10949_s1 + $0x18] sm:$0xff]  ;;  %v523_v26 = vld [vmem:[%s10949_s1 + $0x10] sm:$0xff]  ;;  %v522_v28 = vld [vmem:[%s10949_s1 + $0x8] sm:$0xff] }
   0xa   :  { %5925 = vmatpush.msra.mxu2 %v532_v8  ;;  %862 = vmatpush.msra.mxu0 %v532_v8  ;;  %v540_v25 = vld [vmem:[%s10949_s1 + $0x98] sm:$0xff]  ;;  %v539_v27 = vld [vmem:[%s10949_s1 + $0x90] sm:$0xff]  ;;  %v538_v29 = vld [vmem:[%s10949_s1 + $0x88] sm:$0xff] }
   0xb   :  { %5941 = vmatpush.msra.mxu3 %v548_v9  ;;  %1131 = vmatpush.msra.mxu1 %v548_v9  ;;  %v521_v30 = vld [vmem:[%s10949_s1] sm:$0xff]  ;;  %v270_v33 = vld [vmem:[%s10950_s0 + $0x7e8] sm:$0xff]  ;;  %v568_v34 = vld [vmem:[%s10949_s1 + $0x178] sm:$0xff] }
   0xc   :  { %5926 = vmatpush.msra.mxu2 %v531_v10  ;;  %863 = vmatpush.msra.mxu0 %v531_v10  ;;  %v537_v31 = vld [vmem:[%s10949_s1 + $0x80] sm:$0xff]  ;;  %v584_v35 = vld [vmem:[%s10949_s1 + $0x1f8] sm:$0xff]  ;;  %v18_v37 = vld [vmem:[%s10950_s0 + $0x8] sm:$0xff] }
   0xd   :  { %5942 = vmatpush.msra.mxu3 %v547_v11  ;;  %1132 = vmatpush.msra.mxu1 %v547_v11  ;;  %v269_v32 = vld [vmem:[%s10950_s0 + $0x7e0] sm:$0xff]  ;;  %v600_v38 = vld [vmem:[%s10949_s1 + $0x278] sm:$0xff]  ;;  %v567_v40 = vld [vmem:[%s10949_s1 + $0x170] sm:$0xff] }
   0xe   :  { %5927 = vmatpush.msra.mxu2 %v530_v12  ;;  %864 = vmatpush.msra.mxu0 %v530_v12  ;;  %v17_v36 = vld [vmem:[%s10950_s0] sm:$0xff]  ;;  %v604_v39 = vld [vmem:[%s10949_s1 + $0x298] sm:$0xff]  ;;  %v583_v41 = vld [vmem:[%s10949_s1 + $0x1f0] sm:$0xff] }
   0xf   :  { %5943 = vmatpush.msra.mxu3 %v546_v13  ;;  %1133 = vmatpush.msra.mxu1 %v546_v13  ;;  %v599_v42 = vld [vmem:[%s10949_s1 + $0x270] sm:$0xff]  ;;  %v276_v44 = vld [vmem:[%s10950_s0 + $0x818] sm:$0xff]  ;;  %v566_v47 = vld [vmem:[%s10949_s1 + $0x168] sm:$0xff] }
  0x10   :  { %5928 = vmatpush.msra.mxu2 %v529_v14  ;;  %865 = vmatpush.msra.mxu0 %v529_v14  ;;  %v275_v43 = vld [vmem:[%s10950_s0 + $0x810] sm:$0xff]  ;;  %v24_v46 = vld [vmem:[%s10950_s0 + $0x38] sm:$0xff]  ;;  %v582_v48 = vld [vmem:[%s10949_s1 + $0x1e8] sm:$0xff] }
  0x11   :  { %5944 = vmatpush.msra.mxu3 %v545_v15  ;;  %1134 = vmatpush.msra.mxu1 %v545_v15  ;;  %v23_v45 = vld [vmem:[%s10950_s0 + $0x30] sm:$0xff]  ;;  %v281_v49 = vld [vmem:[%s10950_s0 + $0x840] sm:$0xff]  ;;  %v282_v50 = vld [vmem:[%s10950_s0 + $0x848] sm:$0xff] }
  0x12   :  { %5929 = vmatpush.msra.mxu2 %v528_v16  ;;  %866 = vmatpush.msra.mxu0 %v528_v16  ;;  %v29_v51 = vld [vmem:[%s10950_s0 + $0x60] sm:$0xff]  ;;  %v30_v52 = vld [vmem:[%s10950_s0 + $0x68] sm:$0xff]  ;;  %v287_v54 = vld [vmem:[%s10950_s0 + $0x870] sm:$0xff] }
  0x13   :  { %5945 = vmatpush.msra.mxu3 %v544_v17  ;;  %1135 = vmatpush.msra.mxu1 %v544_v17  ;;  %v598_v53 = vld [vmem:[%s10949_s1 + $0x268] sm:$0xff]  ;;  %v288_v55 = vld [vmem:[%s10950_s0 + $0x878] sm:$0xff]  ;;  %v35_v56 = vld [vmem:[%s10950_s0 + $0x90] sm:$0xff] }
  0x14   :  { %5930 = vmatpush.msra.mxu2 %v527_v18  ;;  %867 = vmatpush.msra.mxu0 %v527_v18  ;;  %v36_v57 = vld [vmem:[%s10950_s0 + $0x98] sm:$0xff]  ;;  %v565_v58 = vld [vmem:[%s10949_s1 + $0x160] sm:$0xff]  ;;  %v294_v60 = vld [vmem:[%s10950_s0 + $0x8a8] sm:$0xff] }
  0x15   :  { %5946 = vmatpush.msra.mxu3 %v543_v19  ;;  %1136 = vmatpush.msra.mxu1 %v543_v19  ;;  %v293_v59 = vld [vmem:[%s10950_s0 + $0x8a0] sm:$0xff]  ;;  %v42_v62 = vld [vmem:[%s10950_s0 + $0xc8] sm:$0xff]  ;;  %v299_v0 = vld [vmem:[%s10950_s0 + $0x8d0] sm:$0xff] }
  0x16   :  { %5931 = vmatpush.msra.mxu2 %v526_v20  ;;  %868 = vmatpush.msra.mxu0 %v526_v20  ;;  %v41_v61 = vld [vmem:[%s10950_s0 + $0xc0] sm:$0xff]  ;;  %v300_v1 = vld [vmem:[%s10950_s0 + $0x8d8] sm:$0xff]  ;;  %v47_v2 = vld [vmem:[%s10950_s0 + $0xf0] sm:$0xff] }
  0x17   :  { %5947 = vmatpush.msra.mxu3 %v542_v21  ;;  %1137 = vmatpush.msra.mxu1 %v542_v21  ;;  %v581_v63 = vld [vmem:[%s10949_s1 + $0x1e0] sm:$0xff]  ;;  %v48_v3 = vld [vmem:[%s10950_s0 + $0xf8] sm:$0xff]  ;;  %v306_v6 = vld [vmem:[%s10950_s0 + $0x908] sm:$0xff] }
  0x18   :  { %5932 = vmatpush.msra.mxu2 %v525_v22  ;;  %869 = vmatpush.msra.mxu0 %v525_v22  ;;  %v597_v4 = vld [vmem:[%s10949_s1 + $0x260] sm:$0xff]  ;;  %v54_v8 = vld [vmem:[%s10950_s0 + $0x128] sm:$0xff]  ;;  %v564_v9 = vld [vmem:[%s10949_s1 + $0x158] sm:$0xff] }
  0x19   :  { %5948 = vmatpush.msra.mxu3 %v541_v23  ;;  %1138 = vmatpush.msra.mxu1 %v541_v23  ;;  %v305_v5 = vld [vmem:[%s10950_s0 + $0x900] sm:$0xff]  ;;  %v580_v10 = vld [vmem:[%s10949_s1 + $0x1d8] sm:$0xff]  ;;  %v311_v11 = vld [vmem:[%s10950_s0 + $0x930] sm:$0xff] }
  0x1a   :  { %5933 = vmatpush.msra.mxu2 %v524_v24  ;;  %870 = vmatpush.msra.mxu0 %v524_v24  ;;  %v53_v7 = vld [vmem:[%s10950_s0 + $0x120] sm:$0xff]  ;;  %v312_v12 = vld [vmem:[%s10950_s0 + $0x938] sm:$0xff]  ;;  %v59_v13 = vld [vmem:[%s10950_s0 + $0x150] sm:$0xff] }
  0x1b   :  { %5949 = vmatpush.msra.mxu3 %v540_v25  ;;  %1139 = vmatpush.msra.mxu1 %v540_v25  ;;  %v60_v14 = vld [vmem:[%s10950_s0 + $0x158] sm:$0xff]  ;;  %v317_v16 = vld [vmem:[%s10950_s0 + $0x960] sm:$0xff]  ;;  %v318_v17 = vld [vmem:[%s10950_s0 + $0x968] sm:$0xff] }
  0x1c   :  { %5934 = vmatpush.msra.mxu2 %v523_v26  ;;  %871 = vmatpush.msra.mxu0 %v523_v26  ;;  %v596_v15 = vld [vmem:[%s10949_s1 + $0x258] sm:$0xff]  ;;  %v65_v18 = vld [vmem:[%s10950_s0 + $0x180] sm:$0xff]  ;;  %v66_v19 = vld [vmem:[%s10950_s0 + $0x188] sm:$0xff] }
  0x1d   :  { %5950 = vmatpush.msra.mxu3 %v539_v27  ;;  %1140 = vmatpush.msra.mxu1 %v539_v27  ;;  %v603_v20 = vld [vmem:[%s10949_s1 + $0x290] sm:$0xff]  ;;  %v324_v22 = vld [vmem:[%s10950_s0 + $0x998] sm:$0xff]  ;;  %v329_v27 = vld [vmem:[%s10950_s0 + $0x9c0] sm:$0xff] }
  0x1e   :  { %5935 = vmatpush.msra.mxu2 %v522_v28  ;;  %872 = vmatpush.msra.mxu0 %v522_v28  ;;  %v323_v21 = vld [vmem:[%s10950_s0 + $0x990] sm:$0xff]  ;;  %v72_v24 = vld [vmem:[%s10950_s0 + $0x1b8] sm:$0xff]  ;;  %v330_v28 = vld [vmem:[%s10950_s0 + $0x9c8] sm:$0xff] }
  0x1f   :  { %5951 = vmatpush.msra.mxu3 %v538_v29  ;;  %1141 = vmatpush.msra.mxu1 %v538_v29  ;;  %v71_v23 = vld [vmem:[%s10950_s0 + $0x1b0] sm:$0xff]  ;;  %v77_v29 = vld [vmem:[%s10950_s0 + $0x1e0] sm:$0xff] }
  0x20   :  { %5936 = vmatpush.msra.mxu2 %v521_v30  ;;  %873 = vmatpush.msra.mxu0 %v521_v30  ;;  %v563_v25 = vld [vmem:[%s10949_s1 + $0x150] sm:$0xff]  ;;  %v78_v30 = vld [vmem:[%s10950_s0 + $0x1e8] sm:$0xff] }
  0x21   :  { %5952 = vmatpush.msra.mxu3 %v537_v31  ;;  %1000 = vmatmul.f32.vlgmr.msra.gmra.mxu2 %v269_v32  ;;  %v579_v26 = vld [vmem:[%s10949_s1 + $0x1d0] sm:$0xff] }
  0x22   :  { %1269 = vmatmul.f32.vlgmr.msra.gmra.mxu3 %v270_v33  ;;  %1396 = vmatpush.msrb.mxu2 %v568_v34  ;;  %v335_v32 = vld [vmem:[%s10950_s0 + $0x9f0] sm:$0xff]  ;;  %v336_v33 = vld [vmem:[%s10950_s0 + $0x9f8] sm:$0xff] }
  0x23   :  { %1665 = vmatpush.msrb.mxu3 %v584_v35  ;;  %1142 = vmatpush.msra.mxu1 %v537_v31  ;;  %v595_v31 = vld [vmem:[%s10949_s1 + $0x250] sm:$0xff]  ;;  %v84_v35 = vld [vmem:[%s10950_s0 + $0x218] sm:$0xff] }
  0x24   :  { %874 = vmatmul.f32.vlgmr.msra.gmra.mxu0 %v17_v36  ;;  %1143 = vmatmul.f32.vlgmr.msra.gmra.mxu1 %v18_v37  ;;  %v83_v34 = vld [vmem:[%s10950_s0 + $0x210] sm:$0xff]  ;;  %v562_v36 = vld [vmem:[%s10949_s1 + $0x148] sm:$0xff]  ;;  %v341_v37 = vld [vmem:[%s10950_s0 + $0xa20] sm:$0xff] }
  0x25   :  { %1934 = vmatpush.msrb.mxu0 %v600_v38  ;;  %2215 = vmatpush.msrb.mxu1 %v604_v39  ;;  %v342_v38 = vld [vmem:[%s10950_s0 + $0xa28] sm:$0xff]  ;;  %v89_v39 = vld [vmem:[%s10950_s0 + $0x240] sm:$0xff] }
  0x26   :  { %1397 = vmatpush.msrb.mxu2 %v567_v40  ;;  %1666 = vmatpush.msrb.mxu3 %v583_v41  ;;  %v90_v40 = vld [vmem:[%s10950_s0 + $0x248] sm:$0xff] }
  0x27   :  { %1935 = vmatpush.msrb.mxu0 %v599_v42  ;;  %2216 = vmatpush.msrb.mxu1 %v603_v20  ;;  %v578_v41 = vld [vmem:[%s10949_s1 + $0x1c8] sm:$0xff]  ;;  %v347_v42 = vld [vmem:[%s10950_s0 + $0xa50] sm:$0xff]  ;;  %v592_v20 = vld [vmem:[%s10949_s1 + $0x238] sm:$0xff] }
  0x28   :  { %1398 = vmatpush.msrb.mxu2 %v566_v47  ;;  %1667 = vmatpush.msrb.mxu3 %v582_v48  ;;  %v353_v47 = vld [vmem:[%s10950_s0 + $0xa80] sm:$0xff]  ;;  %v354_v48 = vld [vmem:[%s10950_s0 + $0xa88] sm:$0xff] }
  0x29   :  { %1003 = vmatmul.f32.gmra.mxu2 %v275_v43  ;;  %1936 = vmatpush.msrb.mxu0 %v598_v53  ;;  %v348_v43 = vld [vmem:[%s10950_s0 + $0xa58] sm:$0xff]  ;;  %v359_v53 = vld [vmem:[%s10950_s0 + $0xab0] sm:$0xff] }
  0x2a   :  { %1272 = vmatmul.f32.gmra.mxu3 %v276_v44  ;;  %1399 = vmatpush.msrb.mxu2 %v565_v58  ;;  %v95_v44 = vld [vmem:[%s10950_s0 + $0x270] sm:$0xff]  ;;  %v365_v58 = vld [vmem:[%s10950_s0 + $0xae0] sm:$0xff] }
  0x2b   :  { %1668 = vmatpush.msrb.mxu3 %v581_v63  ;;  %1937 = vmatpush.msrb.mxu0 %v597_v4  ;;  %v114_v63 = vld [vmem:[%s10950_s0 + $0x308] sm:$0xff]  ;;  %v372_v4 = vld [vmem:[%s10950_s0 + $0xb18] sm:$0xff] }
  0x2c   :  { %877 = vmatmul.f32.gmra.mxu0 %v23_v45  ;;  %1146 = vmatmul.f32.gmra.mxu1 %v24_v46  ;;  %v96_v45 = vld [vmem:[%s10950_s0 + $0x278] sm:$0xff]  ;;  %v594_v46 = vld [vmem:[%s10949_s1 + $0x248] sm:$0xff] }
  0x2d   :  { %1400 = vmatpush.msrb.mxu2 %v564_v9  ;;  %1669 = vmatpush.msrb.mxu3 %v580_v10  ;;  %v560_v9 = vld [vmem:[%s10949_s1 + $0x138] sm:$0xff] }
  0x2e   :  { %1938 = vmatpush.msrb.mxu0 %v596_v15  ;;  %v576_v10 = vld [vmem:[%s10949_s1 + $0x1b8] sm:$0xff]  ;;  %v378_v15 = vld [vmem:[%s10950_s0 + $0xb48] sm:$0xff] }
  0x2f   :  { %1401 = vmatpush.msrb.mxu2 %v563_v25  ;;  %1670 = vmatpush.msrb.mxu3 %v579_v26  ;;  %v383_v25 = vld [vmem:[%s10950_s0 + $0xb70] sm:$0xff]  ;;  %v384_v26 = vld [vmem:[%s10950_s0 + $0xb78] sm:$0xff] }
  0x30   :  { %1939 = vmatpush.msrb.mxu0 %v595_v31 }
  0x31   :  { %1006 = vmatmul.f32.gmra.mxu2 %v281_v49  ;;  %1671 = vmatpush.msrb.mxu3 %v578_v41  ;;  %v101_v49 = vld [vmem:[%s10950_s0 + $0x2a0] sm:$0xff]  ;;  %v138_v41 = vld [vmem:[%s10950_s0 + $0x3c8] sm:$0xff] }
  0x32   :  { %1275 = vmatmul.f32.gmra.mxu3 %v282_v50  ;;  %1402 = vmatpush.msrb.mxu2 %v562_v36  ;;  %v102_v50 = vld [vmem:[%s10950_s0 + $0x2a8] sm:$0xff]  ;;  %v389_v36 = vld [vmem:[%s10950_s0 + $0xba0] sm:$0xff] }
  0x33   :  { %1940 = vmatpush.msrb.mxu0 %v594_v46  ;;  %v395_v46 = vld [vmem:[%s10950_s0 + $0xbd0] sm:$0xff] }
  0x34   :  { %880 = vmatmul.f32.gmra.mxu0 %v29_v51  ;;  %1149 = vmatmul.f32.gmra.mxu1 %v30_v52  ;;  %v561_v51 = vld [vmem:[%s10949_s1 + $0x140] sm:$0xff] }
  0x35   :  { %v577_v52 = vld [vmem:[%s10949_s1 + $0x1c0] sm:$0xff]  ;;  %1403 = vmatpush.msrb.mxu2 %v561_v51  ;;  %v144_v51 = vld [vmem:[%s10950_s0 + $0x3f8] sm:$0xff] }
  0x36   :  { %1672 = vmatpush.msrb.mxu3 %v577_v52 }
  0x37   :  { %1404 = vmatpush.msrb.mxu2 %v560_v9 }
  0x38   :  { %1673 = vmatpush.msrb.mxu3 %v576_v10 }
  0x39   :  { %1009 = vmatmul.f32.gmra.mxu2 %v287_v54  ;;  %v360_v54 = vld [vmem:[%s10950_s0 + $0xab8] sm:$0xff] }
  0x3a   :  { %1278 = vmatmul.f32.gmra.mxu3 %v288_v55  ;;  %v107_v55 = vld [vmem:[%s10950_s0 + $0x2d0] sm:$0xff] }
  0x3c   :  { %883 = vmatmul.f32.gmra.mxu0 %v35_v56  ;;  %1152 = vmatmul.f32.gmra.mxu1 %v36_v57  ;;  %v108_v56 = vld [vmem:[%s10950_s0 + $0x2d8] sm:$0xff]  ;;  %v593_v57 = vld [vmem:[%s10949_s1 + $0x240] sm:$0xff] }
  0x3d   :  { %1941 = vmatpush.msrb.mxu0 %v593_v57 }
  0x3f   :  { %1942 = vmatpush.msrb.mxu0 %v592_v20  ;;  %v413_v20 = vld [vmem:[%s10950_s0 + $0xc60] sm:$0xff] }
  0x41   :  { %1012 = vmatmul.f32.gmra.mxu2 %v293_v59  ;;  %v366_v59 = vld [vmem:[%s10950_s0 + $0xae8] sm:$0xff] }
  0x42   :  { %1281 = vmatmul.f32.gmra.mxu3 %v294_v60 }
  0x44   :  { %886 = vmatmul.f32.gmra.mxu0 %v41_v61  ;;  %1155 = vmatmul.f32.gmra.mxu1 %v42_v62  ;;  %v113_v62 = vld [vmem:[%s10950_s0 + $0x300] sm:$0xff] }
  0x49   :  { %1015 = vmatmul.f32.gmra.mxu2 %v299_v0 }
  0x4a   :  { %1284 = vmatmul.f32.gmra.mxu3 %v300_v1 }
  0x4c   :  { %889 = vmatmul.f32.gmra.mxu0 %v47_v2  ;;  %1158 = vmatmul.f32.gmra.mxu1 %v48_v3  ;;  %v371_v3 = vld [vmem:[%s10950_s0 + $0xb10] sm:$0xff] }
  0x51   :  { %1018 = vmatmul.f32.gmra.mxu2 %v305_v5 }
  0x52   :  { %1287 = vmatmul.f32.gmra.mxu3 %v306_v6 }
  0x54   :  { %892 = vmatmul.f32.gmra.mxu0 %v53_v7  ;;  %1161 = vmatmul.f32.gmra.mxu1 %v54_v8  ;;  %v119_v7 = vld [vmem:[%s10950_s0 + $0x330] sm:$0xff]  ;;  %v120_v8 = vld [vmem:[%s10950_s0 + $0x338] sm:$0xff] }
  0x59   :  { %1021 = vmatmul.f32.gmra.mxu2 %v311_v11 }
  0x5a   :  { %1290 = vmatmul.f32.gmra.mxu3 %v312_v12 }
  0x5c   :  { %895 = vmatmul.f32.gmra.mxu0 %v59_v13  ;;  %1164 = vmatmul.f32.gmra.mxu1 %v60_v14  ;;  %v377_v14 = vld [vmem:[%s10950_s0 + $0xb40] sm:$0xff] }
  0x61   :  { %1024 = vmatmul.f32.gmra.mxu2 %v317_v16 }
  0x62   :  { %1293 = vmatmul.f32.gmra.mxu3 %v318_v17 }
  0x64   :  { %898 = vmatmul.f32.gmra.mxu0 %v65_v18  ;;  %1167 = vmatmul.f32.gmra.mxu1 %v66_v19  ;;  %v125_v18 = vld [vmem:[%s10950_s0 + $0x360] sm:$0xff]  ;;  %v126_v19 = vld [vmem:[%s10950_s0 + $0x368] sm:$0xff] }
  0x69   :  { %1027 = vmatmul.f32.gmra.mxu2 %v323_v21 }
  0x6a   :  { %1296 = vmatmul.f32.gmra.mxu3 %v324_v22 }
  0x6c   :  { %901 = vmatmul.f32.gmra.mxu0 %v71_v23  ;;  %1170 = vmatmul.f32.gmra.mxu1 %v72_v24  ;;  %v602_v24 = vld [vmem:[%s10949_s1 + $0x288] sm:$0xff] }
  0x6d   :  { %2217 = vmatpush.msrb.mxu1 %v602_v24 }
  0x71   :  { %1030 = vmatmul.f32.gmra.mxu2 %v329_v27 }
  0x72   :  { %1299 = vmatmul.f32.gmra.mxu3 %v330_v28 }
  0x74   :  { %904 = vmatmul.f32.gmra.mxu0 %v77_v29  ;;  %1173 = vmatmul.f32.gmra.mxu1 %v78_v30  ;;  %v131_v29 = vld [vmem:[%s10950_s0 + $0x390] sm:$0xff]  ;;  %v132_v30 = vld [vmem:[%s10950_s0 + $0x398] sm:$0xff] }
  0x79   :  { %1033 = vmatmul.f32.gmra.mxu2 %v335_v32 }
  0x7a   :  { %1302 = vmatmul.f32.gmra.mxu3 %v336_v33 }
  0x7c   :  { %907 = vmatmul.f32.gmra.mxu0 %v83_v34  ;;  %1176 = vmatmul.f32.gmra.mxu1 %v84_v35  ;;  %v559_v34 = vld [vmem:[%s10949_s1 + $0x130] sm:$0xff] }
  0x7d   :  { %v575_v35 = vld [vmem:[%s10949_s1 + $0x1b0] sm:$0xff]  ;;  %1405 = vmatpush.msrb.mxu2 %v559_v34 }
  0x7e   :  { %1674 = vmatpush.msrb.mxu3 %v575_v35  ;;  %v419_v34 = vld [vmem:[%s10950_s0 + $0xc90] sm:$0xff]  ;;  %v420_v35 = vld [vmem:[%s10950_s0 + $0xc98] sm:$0xff] }
  0x81   :  { %1036 = vmatmul.f32.gmra.mxu2 %v341_v37  ;;  %v390_v37 = vld [vmem:[%s10950_s0 + $0xba8] sm:$0xff] }
  0x82   :  { %1305 = vmatmul.f32.gmra.mxu3 %v342_v38 }
  0x84   :  { %910 = vmatmul.f32.gmra.mxu0 %v89_v39  ;;  %1179 = vmatmul.f32.gmra.mxu1 %v90_v40  ;;  %v137_v40 = vld [vmem:[%s10950_s0 + $0x3c0] sm:$0xff] }
  0x89   :  { %1039 = vmatmul.f32.gmra.mxu2 %v347_v42 }
  0x8a   :  { %1308 = vmatmul.f32.gmra.mxu3 %v348_v43 }
  0x8c   :  { %913 = vmatmul.f32.gmra.mxu0 %v95_v44  ;;  %1182 = vmatmul.f32.gmra.mxu1 %v96_v45  ;;  %v591_v45 = vld [vmem:[%s10949_s1 + $0x230] sm:$0xff] }
  0x8d   :  { %1943 = vmatpush.msrb.mxu0 %v591_v45 }
  0x91   :  { %1042 = vmatmul.f32.gmra.mxu2 %v353_v47  ;;  %v396_v47 = vld [vmem:[%s10950_s0 + $0xbd8] sm:$0xff] }
  0x92   :  { %1311 = vmatmul.f32.gmra.mxu3 %v354_v48 }
  0x94   :  { %916 = vmatmul.f32.gmra.mxu0 %v101_v49  ;;  %1185 = vmatmul.f32.gmra.mxu1 %v102_v50  ;;  %v143_v50 = vld [vmem:[%s10950_s0 + $0x3f0] sm:$0xff] }
  0x99   :  { %1045 = vmatmul.f32.gmra.mxu2 %v359_v53 }
  0x9a   :  { %1314 = vmatmul.f32.gmra.mxu3 %v360_v54 }
  0x9c   :  { %919 = vmatmul.f32.gmra.mxu0 %v107_v55  ;;  %1188 = vmatmul.f32.gmra.mxu1 %v108_v56  ;;  %v401_v55 = vld [vmem:[%s10950_s0 + $0xc00] sm:$0xff]  ;;  %v402_v56 = vld [vmem:[%s10950_s0 + $0xc08] sm:$0xff] }
  0xa1   :  { %1048 = vmatmul.f32.gmra.mxu2 %v365_v58  ;;  %v6523_v60 = vpop.f32.mrf.mxu0  ;;  %v6525_v61 = vpop.f32.mrf.mxu1 }
  0xa2   :  { %1317 = vmatmul.f32.gmra.mxu3 %v366_v59  ;;  %v149_v59 = vld [vmem:[%s10950_s0 + $0x420] sm:$0xff] }
  0xa4   :  { %v1001_v0 = vpop.f32.mrf.mxu2  ;;  %922 = vmatmul.f32.gmra.mxu0 %v113_v62  ;;  %1191 = vmatmul.f32.gmra.mxu1 %v114_v63  ;;  %v150_v62 = vld [vmem:[%s10950_s0 + $0x428] sm:$0xff] }
  0xa5   :  { %v1270_v1 = vpop.f32.mrf.mxu3  ;;  %v558_v63 = vld [vmem:[%s10949_s1 + $0x128] sm:$0xff] }
  0xa6   :  { %v6533_v2 = vadd.f32 %v1270_v1, %v1001_v0  ;;  %1406 = vmatpush.msrb.mxu2 %v558_v63 }
  0xa8   :  { %11019 = vst [vmem:[#allocation2_spill] sm:$0xff] %v6533_v2 }
  0xa9   :  { %1051 = vmatmul.f32.gmra.mxu2 %v371_v3  ;;  %v6541_v5 = vpop.f32.mrf.mxu0  ;;  %v6543_v6 = vpop.f32.mrf.mxu1 }
  0xaa   :  { %1320 = vmatmul.f32.gmra.mxu3 %v372_v4  ;;  %v574_v4 = vld [vmem:[%s10949_s1 + $0x1a8] sm:$0xff] }
  0xab   :  { %1675 = vmatpush.msrb.mxu3 %v574_v4 }
  0xac   :  { %v1004_v11 = vpop.f32.mrf.mxu2  ;;  %925 = vmatmul.f32.gmra.mxu0 %v119_v7  ;;  %1194 = vmatmul.f32.gmra.mxu1 %v120_v8  ;;  %v407_v7 = vld [vmem:[%s10950_s0 + $0xc30] sm:$0xff]  ;;  %v408_v8 = vld [vmem:[%s10950_s0 + $0xc38] sm:$0xff] }
  0xad   :  { %v1273_v12 = vpop.f32.mrf.mxu3 }
  0xae   :  { %v6557_v13 = vadd.f32 %v1273_v12, %v1004_v11  ;;  %v155_v11 = vld [vmem:[%s10950_s0 + $0x450] sm:$0xff]  ;;  %v156_v12 = vld [vmem:[%s10950_s0 + $0x458] sm:$0xff] }
  0xb0   :  { %11020 = vst [vmem:[#allocation3_spill] sm:$0xff] %v6557_v13 }
  0xb1   :  { %1054 = vmatmul.f32.gmra.mxu2 %v377_v14  ;;  %v6565_v16 = vpop.f32.mrf.mxu0  ;;  %v6567_v17 = vpop.f32.mrf.mxu1 }
  0xb2   :  { %1323 = vmatmul.f32.gmra.mxu3 %v378_v15 }
  0xb4   :  { %v1007_v21 = vpop.f32.mrf.mxu2  ;;  %928 = vmatmul.f32.gmra.mxu0 %v125_v18  ;;  %1197 = vmatmul.f32.gmra.mxu1 %v126_v19  ;;  %v590_v19 = vld [vmem:[%s10949_s1 + $0x228] sm:$0xff] }
  0xb5   :  { %v1276_v22 = vpop.f32.mrf.mxu3  ;;  %1944 = vmatpush.msrb.mxu0 %v590_v19  ;;  %v556_v19 = vld [vmem:[%s10949_s1 + $0x118] sm:$0xff] }
  0xb6   :  { %v6578_v23 = vadd.f32 %v1276_v22, %v1007_v21  ;;  %v414_v21 = vld [vmem:[%s10950_s0 + $0xc68] sm:$0xff] }
  0xb8   :  { %11021 = vst [vmem:[#allocation4_spill] sm:$0xff] %v6578_v23 }
  0xb9   :  { %1057 = vmatmul.f32.gmra.mxu2 %v383_v25  ;;  %v6589_v27 = vpop.f32.mrf.mxu0  ;;  %v6591_v28 = vpop.f32.mrf.mxu1  ;;  %v161_v25 = vld [vmem:[%s10950_s0 + $0x480] sm:$0xff] }
  0xba   :  { %1326 = vmatmul.f32.gmra.mxu3 %v384_v26  ;;  %v162_v26 = vld [vmem:[%s10950_s0 + $0x488] sm:$0xff] }
  0xbc   :  { %v1010_v31 = vpop.f32.mrf.mxu2  ;;  %931 = vmatmul.f32.gmra.mxu0 %v131_v29  ;;  %1200 = vmatmul.f32.gmra.mxu1 %v132_v30 }
  0xbd   :  { %v1279_v32 = vpop.f32.mrf.mxu3 }
  0xbe   :  { %v6599_v33 = vadd.f32 %v1279_v32, %v1010_v31  ;;  %v557_v32 = vld [vmem:[%s10949_s1 + $0x120] sm:$0xff] }
  0xbf   :  { %1407 = vmatpush.msrb.mxu2 %v557_v32  ;;  %v186_v32 = vld [vmem:[%s10950_s0 + $0x548] sm:$0xff] }
  0xc0   :  { %11022 = vst [vmem:[#allocation5_spill] sm:$0xff] %v6599_v33 }
  0xc1   :  { %1060 = vmatmul.f32.gmra.mxu2 %v389_v36  ;;  %v6613_v38 = vpop.f32.mrf.mxu0  ;;  %v6615_v39 = vpop.f32.mrf.mxu1 }
  0xc2   :  { %1329 = vmatmul.f32.gmra.mxu3 %v390_v37  ;;  %1408 = vmatpush.msrb.mxu2 %v556_v19  ;;  %v555_v19 = vld [vmem:[%s10949_s1 + $0x110] sm:$0xff] }
  0xc4   :  { %v1013_v42 = vpop.f32.mrf.mxu2  ;;  %934 = vmatmul.f32.gmra.mxu0 %v137_v40  ;;  %1203 = vmatmul.f32.gmra.mxu1 %v138_v41  ;;  %v167_v40 = vld [vmem:[%s10950_s0 + $0x4b0] sm:$0xff]  ;;  %v168_v41 = vld [vmem:[%s10950_s0 + $0x4b8] sm:$0xff] }
  0xc5   :  { %v1282_v43 = vpop.f32.mrf.mxu3  ;;  %1409 = vmatpush.msrb.mxu2 %v555_v19  ;;  %v210_v19 = vld [vmem:[%s10950_s0 + $0x608] sm:$0xff] }
  0xc6   :  { %v6623_v44 = vadd.f32 %v1282_v43, %v1013_v42  ;;  %v573_v42 = vld [vmem:[%s10949_s1 + $0x1a0] sm:$0xff] }
  0xc7   :  { %1676 = vmatpush.msrb.mxu3 %v573_v42  ;;  %v443_v42 = vld [vmem:[%s10950_s0 + $0xd50] sm:$0xff] }
  0xc8   :  { %11023 = vst [vmem:[#allocation6_spill] sm:$0xff] %v6623_v44 }
  0xc9   :  { %1063 = vmatmul.f32.gmra.mxu2 %v395_v46  ;;  %v6634_v48 = vpop.f32.mrf.mxu0  ;;  %v6636_v49 = vpop.f32.mrf.mxu1 }
  0xca   :  { %1332 = vmatmul.f32.gmra.mxu3 %v396_v47  ;;  %v425_v47 = vld [vmem:[%s10950_s0 + $0xcc0] sm:$0xff] }
  0xcc   :  { %v1016_v52 = vpop.f32.mrf.mxu2  ;;  %937 = vmatmul.f32.gmra.mxu0 %v143_v50  ;;  %1206 = vmatmul.f32.gmra.mxu1 %v144_v51  ;;  %v426_v50 = vld [vmem:[%s10950_s0 + $0xcc8] sm:$0xff] }
  0xcd   :  { %v1285_v53 = vpop.f32.mrf.mxu3 }
  0xce   :  { %v6644_v54 = vadd.f32 %v1285_v53, %v1016_v52  ;;  %v173_v53 = vld [vmem:[%s10950_s0 + $0x4e0] sm:$0xff] }
  0xd0   :  { %11024 = vst [vmem:[#allocation7_spill] sm:$0xff] %v6644_v54 }
  0xd1   :  { %1066 = vmatmul.f32.gmra.mxu2 %v401_v55  ;;  %v6652_v57 = vpop.f32.mrf.mxu0  ;;  %v6654_v58 = vpop.f32.mrf.mxu1  ;;  %v174_v55 = vld [vmem:[%s10950_s0 + $0x4e8] sm:$0xff] }
  0xd2   :  { %1335 = vmatmul.f32.gmra.mxu3 %v402_v56  ;;  %v589_v56 = vld [vmem:[%s10949_s1 + $0x220] sm:$0xff] }
  0xd3   :  { %1945 = vmatpush.msrb.mxu0 %v589_v56 }
  0xd4   :  { %v1019_v0 = vpop.f32.mrf.mxu2  ;;  %940 = vmatmul.f32.gmra.mxu0 %v149_v59  ;;  %1209 = vmatmul.f32.gmra.mxu1 %v150_v62 }
  0xd5   :  { %v1288_v1 = vpop.f32.mrf.mxu3 }
  0xd6   :  { %v6665_v3 = vadd.f32 %v1288_v1, %v1019_v0  ;;  %v431_v0 = vld [vmem:[%s10950_s0 + $0xcf0] sm:$0xff]  ;;  %v432_v1 = vld [vmem:[%s10950_s0 + $0xcf8] sm:$0xff] }
  0xd8   :  { %11025 = vst [vmem:[#allocation8_spill] sm:$0xff] %v6665_v3 }
  0xd9   :  { %1069 = vmatmul.f32.gmra.mxu2 %v407_v7  ;;  %v6676_v9 = vpop.f32.mrf.mxu0  ;;  %v6678_v10 = vpop.f32.mrf.mxu1 }
  0xda   :  { %1338 = vmatmul.f32.gmra.mxu3 %v408_v8  ;;  %v179_v8 = vld [vmem:[%s10950_s0 + $0x510] sm:$0xff] }
  0xdc   :  { %v1022_v14 = vpop.f32.mrf.mxu2  ;;  %943 = vmatmul.f32.gmra.mxu0 %v155_v11  ;;  %1212 = vmatmul.f32.gmra.mxu1 %v156_v12  ;;  %v180_v11 = vld [vmem:[%s10950_s0 + $0x518] sm:$0xff] }
  0xdd   :  { %v1291_v15 = vpop.f32.mrf.mxu3 }
  0xde   :  { %v6686_v18 = vadd.f32 %v1291_v15, %v1022_v14 }
  0xe0   :  { %11026 = vst [vmem:[#allocation9_spill] sm:$0xff] %v6686_v18 }
  0xe1   :  { %1072 = vmatmul.f32.gmra.mxu2 %v413_v20  ;;  %v6697_v22 = vpop.f32.mrf.mxu0  ;;  %v6699_v24 = vpop.f32.mrf.mxu1  ;;  %v572_v20 = vld [vmem:[%s10949_s1 + $0x198] sm:$0xff] }
  0xe2   :  { %1341 = vmatmul.f32.gmra.mxu3 %v414_v21  ;;  %v437_v21 = vld [vmem:[%s10950_s0 + $0xd20] sm:$0xff] }
  0xe3   :  { %1677 = vmatpush.msrb.mxu3 %v572_v20 }
  0xe4   :  { %v1025_v29 = vpop.f32.mrf.mxu2  ;;  %946 = vmatmul.f32.gmra.mxu0 %v161_v25  ;;  %1215 = vmatmul.f32.gmra.mxu1 %v162_v26  ;;  %v438_v25 = vld [vmem:[%s10950_s0 + $0xd28] sm:$0xff] }
  0xe5   :  { %v1294_v30 = vpop.f32.mrf.mxu3 }
  0xe6   :  { %v6707_v31 = vadd.f32 %v1294_v30, %v1025_v29  ;;  %v185_v30 = vld [vmem:[%s10950_s0 + $0x540] sm:$0xff] }
  0xe8   :  { %11027 = vst [vmem:[#allocation10_spill] sm:$0xff] %v6707_v31 }
  0xe9   :  { %1075 = vmatmul.f32.gmra.mxu2 %v419_v34  ;;  %v6718_v36 = vpop.f32.mrf.mxu0  ;;  %v6720_v37 = vpop.f32.mrf.mxu1 }
  0xea   :  { %1344 = vmatmul.f32.gmra.mxu3 %v420_v35 }
  0xec   :  { %v1028_v43 = vpop.f32.mrf.mxu2  ;;  %949 = vmatmul.f32.gmra.mxu0 %v167_v40  ;;  %1218 = vmatmul.f32.gmra.mxu1 %v168_v41  ;;  %v588_v41 = vld [vmem:[%s10949_s1 + $0x218] sm:$0xff] }
  0xed   :  { %v1297_v45 = vpop.f32.mrf.mxu3  ;;  %1946 = vmatpush.msrb.mxu0 %v588_v41 }
  0xee   :  { %v6731_v46 = vadd.f32 %v1297_v45, %v1028_v43  ;;  %v444_v43 = vld [vmem:[%s10950_s0 + $0xd58] sm:$0xff] }
  0xf0   :  { %11028 = vst [vmem:[#allocation11_spill] sm:$0xff] %v6731_v46 }
  0xf1   :  { %1078 = vmatmul.f32.gmra.mxu2 %v425_v47  ;;  %v6739_v51 = vpop.f32.mrf.mxu0  ;;  %v6741_v52 = vpop.f32.mrf.mxu1 }
  0xf2   :  { %1347 = vmatmul.f32.gmra.mxu3 %v426_v50  ;;  %v191_v50 = vld [vmem:[%s10950_s0 + $0x570] sm:$0xff] }
  0xf4   :  { %v1031_v59 = vpop.f32.mrf.mxu2  ;;  %952 = vmatmul.f32.gmra.mxu0 %v173_v53  ;;  %1221 = vmatmul.f32.gmra.mxu1 %v174_v55  ;;  %v192_v53 = vld [vmem:[%s10950_s0 + $0x578] sm:$0xff]  ;;  %v601_v55 = vld [vmem:[%s10949_s1 + $0x280] sm:$0xff] }
  0xf5   :  { %v1300_v62 = vpop.f32.mrf.mxu3  ;;  %2218 = vmatpush.msrb.mxu1 %v601_v55 }
  0xf6   :  { %v6752_v63 = vadd.f32 %v1300_v62, %v1031_v59 }
  0xf8   :  { %11029 = vst [vmem:[#allocation12_spill] sm:$0xff] %v6752_v63 }
  0xf9   :  { %1081 = vmatmul.f32.gmra.mxu2 %v431_v0  ;;  %v6760_v4 = vpop.f32.mrf.mxu0  ;;  %v6762_v7 = vpop.f32.mrf.mxu1  ;;  %v449_v0 = vld [vmem:[%s10950_s0 + $0xd80] sm:$0xff] }
  0xfa   :  { %1350 = vmatmul.f32.gmra.mxu3 %v432_v1  ;;  %v450_v1 = vld [vmem:[%s10950_s0 + $0xd88] sm:$0xff] }
  0xfc   :  { %v1034_v12 = vpop.f32.mrf.mxu2  ;;  %955 = vmatmul.f32.gmra.mxu0 %v179_v8  ;;  %1224 = vmatmul.f32.gmra.mxu1 %v180_v11 }
  0xfd   :  { %v1303_v14 = vpop.f32.mrf.mxu3 }
  0xfe   :  { %v6770_v15 = vadd.f32 %v1303_v14, %v1034_v12  ;;  %v197_v12 = vld [vmem:[%s10950_s0 + $0x5a0] sm:$0xff]  ;;  %v198_v14 = vld [vmem:[%s10950_s0 + $0x5a8] sm:$0xff] }
 0x100   :  { %11030 = vst [vmem:[#allocation13_spill] sm:$0xff] %v6770_v15 }
 0x101   :  { %1084 = vmatmul.f32.gmra.mxu2 %v437_v21  ;;  %v6784_v26 = vpop.f32.mrf.mxu0  ;;  %v6786_v29 = vpop.f32.mrf.mxu1 }
 0x102   :  { %1353 = vmatmul.f32.gmra.mxu3 %v438_v25 }
 0x104   :  { %v1037_v34 = vpop.f32.mrf.mxu2  ;;  %958 = vmatmul.f32.gmra.mxu0 %v185_v30  ;;  %1227 = vmatmul.f32.gmra.mxu1 %v186_v32  ;;  %v571_v30 = vld [vmem:[%s10949_s1 + $0x190] sm:$0xff] }
 0x105   :  { %v1306_v35 = vpop.f32.mrf.mxu3  ;;  %v455_v32 = vld [vmem:[%s10950_s0 + $0xdb0] sm:$0xff]  ;;  %1678 = vmatpush.msrb.mxu3 %v571_v30 }
 0x106   :  { %v6794_v40 = vadd.f32 %v1306_v35, %v1037_v34  ;;  %v456_v34 = vld [vmem:[%s10950_s0 + $0xdb8] sm:$0xff] }
 0x108   :  { %11031 = vst [vmem:[#allocation14_spill] sm:$0xff] %v6794_v40 }
 0x109   :  { %1087 = vmatmul.f32.gmra.mxu2 %v443_v42  ;;  %v6805_v45 = vpop.f32.mrf.mxu0  ;;  %v6807_v47 = vpop.f32.mrf.mxu1  ;;  %v203_v42 = vld [vmem:[%s10950_s0 + $0x5d0] sm:$0xff] }
 0x10a   :  { %1356 = vmatmul.f32.gmra.mxu3 %v444_v43  ;;  %v204_v43 = vld [vmem:[%s10950_s0 + $0x5d8] sm:$0xff] }
 0x10c   :  { %v1040_v56 = vpop.f32.mrf.mxu2  ;;  %961 = vmatmul.f32.gmra.mxu0 %v191_v50  ;;  %1230 = vmatmul.f32.gmra.mxu1 %v192_v53 }
 0x10d   :  { %v1309_v59 = vpop.f32.mrf.mxu3 }
 0x10e   :  { %v6818_v62 = vadd.f32 %v1309_v59, %v1040_v56  ;;  %v587_v56 = vld [vmem:[%s10949_s1 + $0x210] sm:$0xff]  ;;  %v461_v59 = vld [vmem:[%s10950_s0 + $0xde0] sm:$0xff] }
 0x10f   :  { %1947 = vmatpush.msrb.mxu0 %v587_v56  ;;  %v216_v56 = vld [vmem:[%s10950_s0 + $0x638] sm:$0xff] }
 0x110   :  { %11032 = vst [vmem:[#allocation15_spill] sm:$0xff] %v6818_v62 }
 0x111   :  { %1090 = vmatmul.f32.gmra.mxu2 %v449_v0  ;;  %v6826_v8 = vpop.f32.mrf.mxu0  ;;  %v6828_v11 = vpop.f32.mrf.mxu1  ;;  %v462_v0 = vld [vmem:[%s10950_s0 + $0xde8] sm:$0xff] }
 0x112   :  { %1359 = vmatmul.f32.gmra.mxu3 %v450_v1 }
 0x114   :  { %v1043_v20 = vpop.f32.mrf.mxu2  ;;  %964 = vmatmul.f32.gmra.mxu0 %v197_v12  ;;  %1233 = vmatmul.f32.gmra.mxu1 %v198_v14  ;;  %v209_v14 = vld [vmem:[%s10950_s0 + $0x600] sm:$0xff] }
 0x115   :  { %v1312_v21 = vpop.f32.mrf.mxu3 }
 0x116   :  { %v6839_v25 = vadd.f32 %v1312_v21, %v1043_v20 }
 0x118   :  { %11033 = vst [vmem:[#allocation16_spill] sm:$0xff] %v6839_v25 }
 0x119   :  { %1093 = vmatmul.f32.gmra.mxu2 %v455_v32  ;;  %v6850_v35 = vpop.f32.mrf.mxu0  ;;  %v6852_v41 = vpop.f32.mrf.mxu1  ;;  %v554_v32 = vld [vmem:[%s10949_s1 + $0x108] sm:$0xff] }
 0x11a   :  { %1362 = vmatmul.f32.gmra.mxu3 %v456_v34  ;;  %v467_v34 = vld [vmem:[%s10950_s0 + $0xe10] sm:$0xff]  ;;  %1410 = vmatpush.msrb.mxu2 %v554_v32 }
 0x11c   :  { %v1046_v50 = vpop.f32.mrf.mxu2  ;;  %967 = vmatmul.f32.gmra.mxu0 %v203_v42  ;;  %1236 = vmatmul.f32.gmra.mxu1 %v204_v43  ;;  %v468_v42 = vld [vmem:[%s10950_s0 + $0xe18] sm:$0xff] }
 0x11d   :  { %v1315_v53 = vpop.f32.mrf.mxu3 }
 0x11e   :  { %v6860_v55 = vadd.f32 %v1315_v53, %v1046_v50  ;;  %v215_v53 = vld [vmem:[%s10950_s0 + $0x630] sm:$0xff] }
 0x120   :  { %11034 = vst [vmem:[#allocation17_spill] sm:$0xff] %v6860_v55  ;;  %v486_v55 = vld [vmem:[%s10950_s0 + $0xea8] sm:$0xff] }
 0x121   :  { %1096 = vmatmul.f32.gmra.mxu2 %v461_v59  ;;  %v6871_v1 = vpop.f32.mrf.mxu0  ;;  %v6873_v12 = vpop.f32.mrf.mxu1  ;;  %v570_v59 = vld [vmem:[%s10949_s1 + $0x188] sm:$0xff] }
 0x122   :  { %1365 = vmatmul.f32.gmra.mxu3 %v462_v0 }
 0x123   :  { %1679 = vmatpush.msrb.mxu3 %v570_v59 }
 0x124   :  { %v1049_v20 = vpop.f32.mrf.mxu2  ;;  %970 = vmatmul.f32.gmra.mxu0 %v209_v14  ;;  %1239 = vmatmul.f32.gmra.mxu1 %v210_v19 }
 0x125   :  { %v1318_v21 = vpop.f32.mrf.mxu3 }
 0x126   :  { %v6881_v30 = vadd.f32 %v1318_v21, %v1049_v20  ;;  %v473_v20 = vld [vmem:[%s10950_s0 + $0xe40] sm:$0xff]  ;;  %v474_v21 = vld [vmem:[%s10950_s0 + $0xe48] sm:$0xff] }
 0x128   :  { %11035 = vst [vmem:[#allocation18_spill] sm:$0xff] %v6881_v30 }
 0x129   :  { %1099 = vmatmul.f32.gmra.mxu2 %v467_v34  ;;  %v6892_v43 = vpop.f32.mrf.mxu0  ;;  %v6894_v50 = vpop.f32.mrf.mxu1 }
 0x12a   :  { %1368 = vmatmul.f32.gmra.mxu3 %v468_v42  ;;  %v221_v42 = vld [vmem:[%s10950_s0 + $0x660] sm:$0xff] }
 0x12c   :  { %v1052_v0 = vpop.f32.mrf.mxu2  ;;  %973 = vmatmul.f32.gmra.mxu0 %v215_v53  ;;  %1242 = vmatmul.f32.gmra.mxu1 %v216_v56  ;;  %v222_v53 = vld [vmem:[%s10950_s0 + $0x668] sm:$0xff] }
 0x12d   :  { %v1321_v14 = vpop.f32.mrf.mxu3  ;;  %v586_v56 = vld [vmem:[%s10949_s1 + $0x208] sm:$0xff] }
 0x12e   :  { %v6905_v19 = vadd.f32 %v1321_v14, %v1052_v0  ;;  %1948 = vmatpush.msrb.mxu0 %v586_v56 }
 0x130   :  { %11036 = vst [vmem:[#allocation19_spill] sm:$0xff] %v6905_v19 }
 0x131   :  { %1102 = vmatmul.f32.gmra.mxu2 %v473_v20  ;;  %v6913_v32 = vpop.f32.mrf.mxu0  ;;  %v6915_v34 = vpop.f32.mrf.mxu1  ;;  %v479_v20 = vld [vmem:[%s10950_s0 + $0xe70] sm:$0xff] }
 0x132   :  { %1371 = vmatmul.f32.gmra.mxu3 %v474_v21  ;;  %v480_v21 = vld [vmem:[%s10950_s0 + $0xe78] sm:$0xff] }
 0x134   :  { %v1055_v59 = vpop.f32.mrf.mxu2  ;;  %976 = vmatmul.f32.gmra.mxu0 %v221_v42  ;;  %1245 = vmatmul.f32.gmra.mxu1 %v222_v53  ;;  %v227_v42 = vld [vmem:[%s10950_s0 + $0x690] sm:$0xff]  ;;  %v228_v53 = vld [vmem:[%s10950_s0 + $0x698] sm:$0xff] }
 0x135   :  { %v1324_v0 = vpop.f32.mrf.mxu3 }
 0x136   :  { %v6926_v14 = vadd.f32 %v1324_v0, %v1055_v59 }
 0x138   :  { %11037 = vst [vmem:[#allocation20_spill] sm:$0xff] %v6926_v14  ;;  %v485_v14 = vld [vmem:[%s10950_s0 + $0xea0] sm:$0xff] }
 0x139   :  { %1105 = vmatmul.f32.gmra.mxu2 %v479_v20  ;;  %v6934_v19 = vpop.f32.mrf.mxu0  ;;  %v6936_v30 = vpop.f32.mrf.mxu1  ;;  %v553_v20 = vld [vmem:[%s10949_s1 + $0x100] sm:$0xff] }
 0x13a   :  { %1374 = vmatmul.f32.gmra.mxu3 %v480_v21  ;;  %v569_v21 = vld [vmem:[%s10949_s1 + $0x180] sm:$0xff]  ;;  %1411 = vmatpush.msrb.mxu2 %v553_v20 }
 0x13b   :  { %1680 = vmatpush.msrb.mxu3 %v569_v21  ;;  %v492_v21 = vld [vmem:[%s10950_s0 + $0xed8] sm:$0xff] }
 0x13c   :  { %v1058_v56 = vpop.f32.mrf.mxu2  ;;  %979 = vmatmul.f32.gmra.mxu0 %v227_v42  ;;  %1248 = vmatmul.f32.gmra.mxu1 %v228_v53 }
 0x13d   :  { %v1327_v59 = vpop.f32.mrf.mxu3 }
 0x13e   :  { %v6944_v0 = vadd.f32 %v1327_v59, %v1058_v56  ;;  %v233_v56 = vld [vmem:[%s10950_s0 + $0x6c0] sm:$0xff]  ;;  %v234_v59 = vld [vmem:[%s10950_s0 + $0x6c8] sm:$0xff] }
 0x140   :  { %11038 = vst [vmem:[#allocation21_spill] sm:$0xff] %v6944_v0 }
 0x141   :  { %1108 = vmatmul.f32.gmra.mxu2 %v485_v14  ;;  %v6958_v42 = vpop.f32.mrf.mxu0  ;;  %v6960_v53 = vpop.f32.mrf.mxu1  ;;  %v491_v14 = vld [vmem:[%s10950_s0 + $0xed0] sm:$0xff] }
 0x142   :  { %1377 = vmatmul.f32.gmra.mxu3 %v486_v55  ;;  %v585_v55 = vld [vmem:[%s10949_s1 + $0x200] sm:$0xff] }
 0x143   :  { %1949 = vmatpush.msrb.mxu0 %v585_v55  ;;  %v497_v55 = vld [vmem:[%s10950_s0 + $0xf00] sm:$0xff] }
 0x144   :  { %v1061_v0 = vpop.f32.mrf.mxu2  ;;  %982 = vmatmul.f32.gmra.mxu0 %v233_v56  ;;  %1251 = vmatmul.f32.gmra.mxu1 %v234_v59 }
 0x145   :  { %v1330_v25 = vpop.f32.mrf.mxu3 }
 0x146   :  { %v6968_v20 = vadd.f32 %v1330_v25, %v1061_v0  ;;  %v239_v25 = vld [vmem:[%s10950_s0 + $0x6f0] sm:$0xff]  ;;  %v240_v0 = vld [vmem:[%s10950_s0 + $0x6f8] sm:$0xff] }
 0x148   :  { %11039 = vst [vmem:[#allocation22_spill] sm:$0xff] %v6968_v20 }
 0x149   :  { %1111 = vmatmul.f32.gmra.mxu2 %v491_v14  ;;  %v6979_v62 = vpop.f32.mrf.mxu0  ;;  %v6981_v56 = vpop.f32.mrf.mxu1  ;;  %v498_v14 = vld [vmem:[%s10950_s0 + $0xf08] sm:$0xff] }
 0x14a   :  { %1380 = vmatmul.f32.gmra.mxu3 %v492_v21  ;;  %11040 = vst [vmem:[#allocation23_spill] sm:$0xff] %v6979_v62 }
 0x14b   :  { %11041 = vst [vmem:[#allocation24_spill] sm:$0xff] %v6981_v56 }
 0x14c   :  { %v1064_v59 = vpop.f32.mrf.mxu2  ;;  %985 = vmatmul.f32.gmra.mxu0 %v239_v25  ;;  %1254 = vmatmul.f32.gmra.mxu1 %v240_v0  ;;  %v245_v25 = vld [vmem:[%s10950_s0 + $0x720] sm:$0xff] }
 0x14d   :  { %v1333_v20 = vpop.f32.mrf.mxu3 }
 0x14e   :  { %v6989_v40 = vadd.f32 %v1333_v20, %v1064_v59  ;;  %v246_v20 = vld [vmem:[%s10950_s0 + $0x728] sm:$0xff] }
 0x150   :  { %11042 = vst [vmem:[#allocation25_spill] sm:$0xff] %v6989_v40 }
 0x151   :  { %1114 = vmatmul.f32.gmra.mxu2 %v497_v55  ;;  %v6997_v21 = vpop.f32.mrf.mxu0  ;;  %v6999_v15 = vpop.f32.mrf.mxu1  ;;  %v503_v55 = vld [vmem:[%s10950_s0 + $0xf30] sm:$0xff] }
 0x152   :  { %1383 = vmatmul.f32.gmra.mxu3 %v498_v14  ;;  %v504_v14 = vld [vmem:[%s10950_s0 + $0xf38] sm:$0xff] }
 0x154   :  { %v1067_v0 = vpop.f32.mrf.mxu2  ;;  %988 = vmatmul.f32.gmra.mxu0 %v245_v25  ;;  %1257 = vmatmul.f32.gmra.mxu1 %v246_v20  ;;  %v251_v25 = vld [vmem:[%s10950_s0 + $0x750] sm:$0xff]  ;;  %v252_v20 = vld [vmem:[%s10950_s0 + $0x758] sm:$0xff] }
 0x155   :  { %v1336_v59 = vpop.f32.mrf.mxu3 }
 0x156   :  { %v7007_v40 = vadd.f32 %v1336_v59, %v1067_v0 }
 0x158   :  { %11043 = vst [vmem:[#allocation26_spill] sm:$0xff] %v7007_v40 }
 0x159   :  { %1117 = vmatmul.f32.gmra.mxu2 %v503_v55  ;;  %v7015_v63 = vpop.f32.mrf.mxu0  ;;  %v7017_v46 = vpop.f32.mrf.mxu1  ;;  %v509_v55 = vld [vmem:[%s10950_s0 + $0xf60] sm:$0xff] }
 0x15a   :  { %1386 = vmatmul.f32.gmra.mxu3 %v504_v14  ;;  %11044 = vst [vmem:[#allocation27_spill] sm:$0xff] %v7015_v63  ;;  %v510_v14 = vld [vmem:[%s10950_s0 + $0xf68] sm:$0xff] }
 0x15b   :  { %11045 = vst [vmem:[#allocation28_spill] sm:$0xff] %v7017_v46 }
 0x15c   :  { %v1070_v0 = vpop.f32.mrf.mxu2  ;;  %991 = vmatmul.f32.gmra.mxu0 %v251_v25  ;;  %1260 = vmatmul.f32.gmra.mxu1 %v252_v20  ;;  %v257_v25 = vld [vmem:[%s10950_s0 + $0x780] sm:$0xff]  ;;  %v258_v20 = vld [vmem:[%s10950_s0 + $0x788] sm:$0xff] }
 0x15d   :  { %v1339_v59 = vpop.f32.mrf.mxu3 }
 0x15e   :  { %v7025_v40 = vadd.f32 %v1339_v59, %v1070_v0 }
 0x160   :  { %11046 = vst [vmem:[#allocation29_spill] sm:$0xff] %v7025_v40 }
 0x161   :  { %1120 = vmatmul.f32.gmra.mxu2 %v509_v55  ;;  %v7033_v31 = vpop.f32.mrf.mxu0  ;;  %v7035_v18 = vpop.f32.mrf.mxu1  ;;  %v515_v55 = vld [vmem:[%s10950_s0 + $0xf90] sm:$0xff] }
 0x162   :  { %1389 = vmatmul.f32.gmra.mxu3 %v510_v14  ;;  %v516_v14 = vld [vmem:[%s10950_s0 + $0xf98] sm:$0xff] }
 0x164   :  { %v1073_v0 = vpop.f32.mrf.mxu2  ;;  %994 = vmatmul.f32.gmra.mxu0 %v257_v25  ;;  %1263 = vmatmul.f32.gmra.mxu1 %v258_v20  ;;  %v263_v25 = vld [vmem:[%s10950_s0 + $0x7b0] sm:$0xff]  ;;  %v264_v20 = vld [vmem:[%s10950_s0 + $0x7b8] sm:$0xff] }
 0x165   :  { %v1342_v59 = vpop.f32.mrf.mxu3 }
 0x166   :  { %v7043_v40 = vadd.f32 %v1342_v59, %v1073_v0 }
 0x168   :  { %11047 = vst [vmem:[#allocation30_spill] sm:$0xff] %v7043_v40 }
 0x169   :  { %1123 = vmatmul.f32.gmra.mxu2 %v515_v55  ;;  %v7051_v3 = vpop.f32.mrf.mxu0  ;;  %v7053_v54 = vpop.f32.mrf.mxu1  ;;  %v19_v55 = vld [vmem:[%s10950_s0 + $0x10] sm:$0xff] }
 0x16a   :  { %1392 = vmatmul.f32.gmra.mxu3 %v516_v14  ;;  %v20_v14 = vld [vmem:[%s10950_s0 + $0x18] sm:$0xff] }
 0x16c   :  { %v1076_v0 = vpop.f32.mrf.mxu2  ;;  %997 = vmatmul.f32.gmra.mxu0 %v263_v25  ;;  %1266 = vmatmul.f32.gmra.mxu1 %v264_v20  ;;  %v21_v25 = vld [vmem:[%s10950_s0 + $0x20] sm:$0xff]  ;;  %v22_v20 = vld [vmem:[%s10950_s0 + $0x28] sm:$0xff] }
 0x16d   :  { %v1345_v59 = vpop.f32.mrf.mxu3 }
 0x16e   :  { %v7061_v40 = vadd.f32 %v1345_v59, %v1076_v0 }
 0x170   :  { %11048 = vst [vmem:[#allocation31_spill] sm:$0xff] %v7061_v40  ;;  %v26_v40 = vld [vmem:[%s10950_s0 + $0x48] sm:$0xff] }
 0x171   :  { %1412 = vmatmul.f32.vlgmr.msrb.gmra.mxu2 %v19_v55  ;;  %v7069_v44 = vpop.f32.mrf.mxu0  ;;  %v7071_v33 = vpop.f32.mrf.mxu1 }
 0x172   :  { %1681 = vmatmul.f32.vlgmr.msrb.gmra.mxu3 %v20_v14  ;;  %v25_v14 = vld [vmem:[%s10950_s0 + $0x40] sm:$0xff] }
 0x174   :  { %v1079_v0 = vpop.f32.mrf.mxu2  ;;  %1950 = vmatmul.f32.vlgmr.msrb.gmra.mxu0 %v21_v25  ;;  %5837 = vmatmul.msk.f32.vlgmr.msrb.gmra.mxu1 %vm605_vm0, %v22_v20  ;;  %v27_v25 = vld [vmem:[%s10950_s0 + $0x50] sm:$0xff]  ;;  %v28_v20 = vld [vmem:[%s10950_s0 + $0x58] sm:$0xff] }
 0x175   :  { %v1348_v59 = vpop.f32.mrf.mxu3 }
 0x176   :  { %v7080_v55 = vadd.f32 %v1348_v59, %v1079_v0 }
 0x178   :  { %11049 = vst [vmem:[#allocation32_spill] sm:$0xff] %v7080_v55 }
 0x179   :  { %1415 = vmatmul.f32.gmra.mxu2 %v25_v14  ;;  %v7088_v23 = vpop.f32.mrf.mxu0  ;;  %v7090_v13 = vpop.f32.mrf.mxu1  ;;  %v32_v14 = vld [vmem:[%s10950_s0 + $0x78] sm:$0xff] }
 0x17a   :  { %1684 = vmatmul.f32.gmra.mxu3 %v26_v40  ;;  %11050 = vst [vmem:[#allocation33_spill] sm:$0xff] %v7090_v13  ;;  %v31_v40 = vld [vmem:[%s10950_s0 + $0x70] sm:$0xff] }
 0x17c   :  { %v1082_v0 = vpop.f32.mrf.mxu2  ;;  %1953 = vmatmul.f32.gmra.mxu0 %v27_v25  ;;  %5838 = vmatmul.msk.f32.gmra.mxu1 %vm605_vm0, %v28_v20  ;;  %v33_v25 = vld [vmem:[%s10950_s0 + $0x80] sm:$0xff]  ;;  %v34_v20 = vld [vmem:[%s10950_s0 + $0x88] sm:$0xff] }
 0x17d   :  { %v1351_v59 = vpop.f32.mrf.mxu3 }
 0x17e   :  { %v7099_v55 = vadd.f32 %v1351_v59, %v1082_v0 }
 0x180   :  { %11051 = vst [vmem:[#allocation34_spill] sm:$0xff] %v7099_v55 }
 0x181   :  { %1418 = vmatmul.f32.gmra.mxu2 %v31_v40  ;;  %v7107_v2 = vpop.f32.mrf.mxu0  ;;  %v7109_v46 = vpop.f32.mrf.mxu1  ;;  %v37_v40 = vld [vmem:[%s10950_s0 + $0xa0] sm:$0xff] }
 0x182   :  { %1687 = vmatmul.f32.gmra.mxu3 %v32_v14  ;;  %11052 = vst [vmem:[#allocation35_spill] sm:$0xff] %v7107_v2  ;;  %v38_v14 = vld [vmem:[%s10950_s0 + $0xa8] sm:$0xff] }
 0x183   :  { %11053 = vst [vmem:[#allocation36_spill] sm:$0xff] %v7109_v46 }
 0x184   :  { %v1085_v0 = vpop.f32.mrf.mxu2  ;;  %1956 = vmatmul.f32.gmra.mxu0 %v33_v25  ;;  %5839 = vmatmul.msk.f32.gmra.mxu1 %vm605_vm0, %v34_v20  ;;  %v39_v25 = vld [vmem:[%s10950_s0 + $0xb0] sm:$0xff]  ;;  %v40_v20 = vld [vmem:[%s10950_s0 + $0xb8] sm:$0xff] }
 0x185   :  { %v1354_v59 = vpop.f32.mrf.mxu3 }
 0x186   :  { %v7118_v55 = vadd.f32 %v1354_v59, %v1085_v0 }
 0x188   :  { %11054 = vst [vmem:[#allocation37_spill] sm:$0xff] %v7118_v55 }
 0x189   :  { %1421 = vmatmul.f32.gmra.mxu2 %v37_v40  ;;  %v7126_v63 = vpop.f32.mrf.mxu0  ;;  %v7128_v56 = vpop.f32.mrf.mxu1  ;;  %v43_v40 = vld [vmem:[%s10950_s0 + $0xd0] sm:$0xff] }
 0x18a   :  { %1690 = vmatmul.f32.gmra.mxu3 %v38_v14  ;;  %11055 = vst [vmem:[#allocation38_spill] sm:$0xff] %v7126_v63  ;;  %v44_v14 = vld [vmem:[%s10950_s0 + $0xd8] sm:$0xff]  ;;  %v122_v63 = vld [vmem:[%s10950_s0 + $0x348] sm:$0xff] }
 0x18b   :  { %11056 = vst [vmem:[#allocation39_spill] sm:$0xff] %v7128_v56 }
 0x18c   :  { %v1088_v0 = vpop.f32.mrf.mxu2  ;;  %1959 = vmatmul.f32.gmra.mxu0 %v39_v25  ;;  %5840 = vmatmul.msk.f32.gmra.mxu1 %vm605_vm0, %v40_v20  ;;  %v45_v25 = vld [vmem:[%s10950_s0 + $0xe0] sm:$0xff]  ;;  %v46_v20 = vld [vmem:[%s10950_s0 + $0xe8] sm:$0xff] }
 0x18d   :  { %v1357_v59 = vpop.f32.mrf.mxu3 }
 0x18e   :  { %v7137_v55 = vadd.f32 %v1357_v59, %v1088_v0 }
 0x190   :  { %11057 = vst [vmem:[#allocation40_spill] sm:$0xff] %v7137_v55 }
 0x191   :  { %1424 = vmatmul.f32.gmra.mxu2 %v43_v40  ;;  %v7145_v62 = vpop.f32.mrf.mxu0  ;;  %v7147_v56 = vpop.f32.mrf.mxu1  ;;  %v49_v40 = vld [vmem:[%s10950_s0 + $0x100] sm:$0xff] }
 0x192   :  { %1693 = vmatmul.f32.gmra.mxu3 %v44_v14  ;;  %11058 = vst [vmem:[#allocation41_spill] sm:$0xff] %v7145_v62  ;;  %v50_v14 = vld [vmem:[%s10950_s0 + $0x108] sm:$0xff] }
 0x193   :  { %11059 = vst [vmem:[#allocation42_spill] sm:$0xff] %v7147_v56 }
 0x194   :  { %v1091_v0 = vpop.f32.mrf.mxu2  ;;  %1962 = vmatmul.f32.gmra.mxu0 %v45_v25  ;;  %5841 = vmatmul.msk.f32.gmra.mxu1 %vm605_vm0, %v46_v20  ;;  %v51_v25 = vld [vmem:[%s10950_s0 + $0x110] sm:$0xff]  ;;  %v52_v20 = vld [vmem:[%s10950_s0 + $0x118] sm:$0xff] }
 0x195   :  { %v1360_v59 = vpop.f32.mrf.mxu3 }
 0x196   :  { %v7156_v55 = vadd.f32 %v1360_v59, %v1091_v0 }
 0x198   :  { %11060 = vst [vmem:[#allocation43_spill] sm:$0xff] %v7156_v55 }
 0x199   :  { %1427 = vmatmul.f32.gmra.mxu2 %v49_v40  ;;  %v7164_v56 = vpop.f32.mrf.mxu0  ;;  %v7166_v62 = vpop.f32.mrf.mxu1  ;;  %v55_v40 = vld [vmem:[%s10950_s0 + $0x130] sm:$0xff] }
 0x19a   :  { %1696 = vmatmul.f32.gmra.mxu3 %v50_v14  ;;  %11061 = vst [vmem:[#allocation44_spill] sm:$0xff] %v7164_v56  ;;  %v56_v14 = vld [vmem:[%s10950_s0 + $0x138] sm:$0xff] }
 0x19b   :  { %11062 = vst [vmem:[#allocation45_spill] sm:$0xff] %v7166_v62 }
 0x19c   :  { %v1094_v0 = vpop.f32.mrf.mxu2  ;;  %1965 = vmatmul.f32.gmra.mxu0 %v51_v25  ;;  %5842 = vmatmul.msk.f32.gmra.mxu1 %vm605_vm0, %v52_v20  ;;  %v57_v25 = vld [vmem:[%s10950_s0 + $0x140] sm:$0xff]  ;;  %v58_v20 = vld [vmem:[%s10950_s0 + $0x148] sm:$0xff] }
 0x19d   :  { %v1363_v59 = vpop.f32.mrf.mxu3 }
 0x19e   :  { %v7175_v55 = vadd.f32 %v1363_v59, %v1094_v0 }
 0x1a0   :  { %11063 = vst [vmem:[#allocation46_spill] sm:$0xff] %v7175_v55 }
 0x1a1   :  { %1430 = vmatmul.f32.gmra.mxu2 %v55_v40  ;;  %v7183_v62 = vpop.f32.mrf.mxu0  ;;  %v7185_v56 = vpop.f32.mrf.mxu1  ;;  %v61_v40 = vld [vmem:[%s10950_s0 + $0x160] sm:$0xff] }
 0x1a2   :  { %1699 = vmatmul.f32.gmra.mxu3 %v56_v14  ;;  %11064 = vst [vmem:[#allocation47_spill] sm:$0xff] %v7183_v62  ;;  %v62_v14 = vld [vmem:[%s10950_s0 + $0x168] sm:$0xff] }
 0x1a3   :  { %11065 = vst [vmem:[#allocation48_spill] sm:$0xff] %v7185_v56 }
 0x1a4   :  { %v1097_v0 = vpop.f32.mrf.mxu2  ;;  %1968 = vmatmul.f32.gmra.mxu0 %v57_v25  ;;  %5843 = vmatmul.msk.f32.gmra.mxu1 %vm605_vm0, %v58_v20  ;;  %v63_v25 = vld [vmem:[%s10950_s0 + $0x170] sm:$0xff]  ;;  %v64_v20 = vld [vmem:[%s10950_s0 + $0x178] sm:$0xff] }
 0x1a5   :  { %v1366_v59 = vpop.f32.mrf.mxu3 }
 0x1a6   :  { %v7194_v55 = vadd.f32 %v1366_v59, %v1097_v0 }
 0x1a8   :  { %11066 = vst [vmem:[#allocation49_spill] sm:$0xff] %v7194_v55 }
 0x1a9   :  { %1433 = vmatmul.f32.gmra.mxu2 %v61_v40  ;;  %v7202_v56 = vpop.f32.mrf.mxu0  ;;  %v7204_v62 = vpop.f32.mrf.mxu1  ;;  %v67_v40 = vld [vmem:[%s10950_s0 + $0x190] sm:$0xff] }
 0x1aa   :  { %1702 = vmatmul.f32.gmra.mxu3 %v62_v14  ;;  %11067 = vst [vmem:[#allocation50_spill] sm:$0xff] %v7202_v56  ;;  %v68_v14 = vld [vmem:[%s10950_s0 + $0x198] sm:$0xff] }
 0x1ab   :  { %11068 = vst [vmem:[#allocation51_spill] sm:$0xff] %v7204_v62 }
 0x1ac   :  { %v1100_v0 = vpop.f32.mrf.mxu2  ;;  %1971 = vmatmul.f32.gmra.mxu0 %v63_v25  ;;  %5844 = vmatmul.msk.f32.gmra.mxu1 %vm605_vm0, %v64_v20  ;;  %v69_v25 = vld [vmem:[%s10950_s0 + $0x1a0] sm:$0xff]  ;;  %v70_v20 = vld [vmem:[%s10950_s0 + $0x1a8] sm:$0xff] }
 0x1ad   :  { %v1369_v59 = vpop.f32.mrf.mxu3 }
 0x1ae   :  { %v7213_v55 = vadd.f32 %v1369_v59, %v1100_v0 }
 0x1b0   :  { %11069 = vst [vmem:[#allocation52_spill] sm:$0xff] %v7213_v55 }
 0x1b1   :  { %1436 = vmatmul.f32.gmra.mxu2 %v67_v40  ;;  %v7221_v62 = vpop.f32.mrf.mxu0  ;;  %v7223_v56 = vpop.f32.mrf.mxu1  ;;  %v73_v40 = vld [vmem:[%s10950_s0 + $0x1c0] sm:$0xff] }
 0x1b2   :  { %1705 = vmatmul.f32.gmra.mxu3 %v68_v14  ;;  %11070 = vst [vmem:[#allocation53_spill] sm:$0xff] %v7221_v62  ;;  %v74_v14 = vld [vmem:[%s10950_s0 + $0x1c8] sm:$0xff] }
 0x1b3   :  { %11071 = vst [vmem:[#allocation54_spill] sm:$0xff] %v7223_v56 }
 0x1b4   :  { %v1103_v0 = vpop.f32.mrf.mxu2  ;;  %1974 = vmatmul.f32.gmra.mxu0 %v69_v25  ;;  %5845 = vmatmul.msk.f32.gmra.mxu1 %vm605_vm0, %v70_v20  ;;  %v75_v25 = vld [vmem:[%s10950_s0 + $0x1d0] sm:$0xff]  ;;  %v76_v20 = vld [vmem:[%s10950_s0 + $0x1d8] sm:$0xff] }
 0x1b5   :  { %v1372_v59 = vpop.f32.mrf.mxu3 }
 0x1b6   :  { %v7232_v55 = vadd.f32 %v1372_v59, %v1103_v0 }
 0x1b8   :  { %11072 = vst [vmem:[#allocation55_spill] sm:$0xff] %v7232_v55 }
 0x1b9   :  { %1439 = vmatmul.f32.gmra.mxu2 %v73_v40  ;;  %v7240_v56 = vpop.f32.mrf.mxu0  ;;  %v7242_v62 = vpop.f32.mrf.mxu1  ;;  %v79_v40 = vld [vmem:[%s10950_s0 + $0x1f0] sm:$0xff] }
 0x1ba   :  { %1708 = vmatmul.f32.gmra.mxu3 %v74_v14  ;;  %11073 = vst [vmem:[#allocation56_spill] sm:$0xff] %v7240_v56  ;;  %v80_v14 = vld [vmem:[%s10950_s0 + $0x1f8] sm:$0xff] }
 0x1bb   :  { %11074 = vst [vmem:[#allocation57_spill] sm:$0xff] %v7242_v62 }
 0x1bc   :  { %v1106_v0 = vpop.f32.mrf.mxu2  ;;  %1977 = vmatmul.f32.gmra.mxu0 %v75_v25  ;;  %5846 = vmatmul.msk.f32.gmra.mxu1 %vm605_vm0, %v76_v20  ;;  %v81_v25 = vld [vmem:[%s10950_s0 + $0x200] sm:$0xff]  ;;  %v82_v20 = vld [vmem:[%s10950_s0 + $0x208] sm:$0xff] }
 0x1bd   :  { %v1375_v59 = vpop.f32.mrf.mxu3 }
 0x1be   :  { %v7251_v55 = vadd.f32 %v1375_v59, %v1106_v0 }
 0x1c0   :  { %11075 = vst [vmem:[#allocation58_spill] sm:$0xff] %v7251_v55 }
 0x1c1   :  { %1442 = vmatmul.f32.gmra.mxu2 %v79_v40  ;;  %v7259_v62 = vpop.f32.mrf.mxu0  ;;  %v7261_v56 = vpop.f32.mrf.mxu1  ;;  %v85_v40 = vld [vmem:[%s10950_s0 + $0x220] sm:$0xff] }
 0x1c2   :  { %1711 = vmatmul.f32.gmra.mxu3 %v80_v14  ;;  %11076 = vst [vmem:[#allocation59_spill] sm:$0xff] %v7259_v62  ;;  %v86_v14 = vld [vmem:[%s10950_s0 + $0x228] sm:$0xff] }
 0x1c3   :  { %11077 = vst [vmem:[#allocation60_spill] sm:$0xff] %v7261_v56 }
 0x1c4   :  { %v1109_v0 = vpop.f32.mrf.mxu2  ;;  %1980 = vmatmul.f32.gmra.mxu0 %v81_v25  ;;  %5847 = vmatmul.msk.f32.gmra.mxu1 %vm605_vm0, %v82_v20  ;;  %v87_v25 = vld [vmem:[%s10950_s0 + $0x230] sm:$0xff]  ;;  %v88_v20 = vld [vmem:[%s10950_s0 + $0x238] sm:$0xff] }
 0x1c5   :  { %v1378_v59 = vpop.f32.mrf.mxu3 }
 0x1c6   :  { %v7270_v55 = vadd.f32 %v1378_v59, %v1109_v0 }
 0x1c8   :  { %11078 = vst [vmem:[#allocation61_spill] sm:$0xff] %v7270_v55 }
 0x1c9   :  { %1445 = vmatmul.f32.gmra.mxu2 %v85_v40  ;;  %v7278_v56 = vpop.f32.mrf.mxu0  ;;  %v7280_v62 = vpop.f32.mrf.mxu1  ;;  %v91_v40 = vld [vmem:[%s10950_s0 + $0x250] sm:$0xff] }
 0x1ca   :  { %1714 = vmatmul.f32.gmra.mxu3 %v86_v14  ;;  %11079 = vst [vmem:[#allocation62_spill] sm:$0xff] %v7278_v56  ;;  %v92_v14 = vld [vmem:[%s10950_s0 + $0x258] sm:$0xff] }
 0x1cb   :  { %11080 = vst [vmem:[#allocation63_spill] sm:$0xff] %v7280_v62 }
 0x1cc   :  { %v1112_v0 = vpop.f32.mrf.mxu2  ;;  %1983 = vmatmul.f32.gmra.mxu0 %v87_v25  ;;  %5848 = vmatmul.msk.f32.gmra.mxu1 %vm605_vm0, %v88_v20  ;;  %v93_v25 = vld [vmem:[%s10950_s0 + $0x260] sm:$0xff]  ;;  %v94_v20 = vld [vmem:[%s10950_s0 + $0x268] sm:$0xff] }
 0x1cd   :  { %v1381_v59 = vpop.f32.mrf.mxu3 }
 0x1ce   :  { %v7289_v55 = vadd.f32 %v1381_v59, %v1112_v0 }
 0x1d0   :  { %11081 = vst [vmem:[#allocation64_spill] sm:$0xff] %v7289_v55 }
 0x1d1   :  { %1448 = vmatmul.f32.gmra.mxu2 %v91_v40  ;;  %v7297_v62 = vpop.f32.mrf.mxu0  ;;  %v7299_v56 = vpop.f32.mrf.mxu1  ;;  %v97_v40 = vld [vmem:[%s10950_s0 + $0x280] sm:$0xff] }
 0x1d2   :  { %1717 = vmatmul.f32.gmra.mxu3 %v92_v14  ;;  %11082 = vst [vmem:[#allocation65_spill] sm:$0xff] %v7297_v62  ;;  %v98_v14 = vld [vmem:[%s10950_s0 + $0x288] sm:$0xff] }
 0x1d3   :  { %11083 = vst [vmem:[#allocation66_spill] sm:$0xff] %v7299_v56 }
 0x1d4   :  { %v1115_v0 = vpop.f32.mrf.mxu2  ;;  %1986 = vmatmul.f32.gmra.mxu0 %v93_v25  ;;  %5849 = vmatmul.msk.f32.gmra.mxu1 %vm605_vm0, %v94_v20  ;;  %v99_v25 = vld [vmem:[%s10950_s0 + $0x290] sm:$0xff]  ;;  %v100_v20 = vld [vmem:[%s10950_s0 + $0x298] sm:$0xff] }
 0x1d5   :  { %v1384_v59 = vpop.f32.mrf.mxu3 }
 0x1d6   :  { %v7308_v55 = vadd.f32 %v1384_v59, %v1115_v0 }
 0x1d8   :  { %11084 = vst [vmem:[#allocation67_spill] sm:$0xff] %v7308_v55 }
 0x1d9   :  { %1451 = vmatmul.f32.gmra.mxu2 %v97_v40  ;;  %v7316_v56 = vpop.f32.mrf.mxu0  ;;  %v7318_v62 = vpop.f32.mrf.mxu1  ;;  %v103_v40 = vld [vmem:[%s10950_s0 + $0x2b0] sm:$0xff] }
 0x1da   :  { %1720 = vmatmul.f32.gmra.mxu3 %v98_v14  ;;  %11085 = vst [vmem:[#allocation68_spill] sm:$0xff] %v7316_v56  ;;  %v104_v14 = vld [vmem:[%s10950_s0 + $0x2b8] sm:$0xff] }
 0x1db   :  { %11086 = vst [vmem:[#allocation69_spill] sm:$0xff] %v7318_v62 }
 0x1dc   :  { %v1118_v0 = vpop.f32.mrf.mxu2  ;;  %1989 = vmatmul.f32.gmra.mxu0 %v99_v25  ;;  %5850 = vmatmul.msk.f32.gmra.mxu1 %vm605_vm0, %v100_v20  ;;  %v105_v25 = vld [vmem:[%s10950_s0 + $0x2c0] sm:$0xff]  ;;  %v106_v20 = vld [vmem:[%s10950_s0 + $0x2c8] sm:$0xff] }
 0x1dd   :  { %v1387_v59 = vpop.f32.mrf.mxu3 }
 0x1de   :  { %v7327_v55 = vadd.f32 %v1387_v59, %v1118_v0 }
 0x1e0   :  { %11087 = vst [vmem:[#allocation70_spill] sm:$0xff] %v7327_v55 }
 0x1e1   :  { %1454 = vmatmul.f32.gmra.mxu2 %v103_v40  ;;  %v7335_v62 = vpop.f32.mrf.mxu0  ;;  %v7337_v56 = vpop.f32.mrf.mxu1  ;;  %v109_v40 = vld [vmem:[%s10950_s0 + $0x2e0] sm:$0xff] }
 0x1e2   :  { %1723 = vmatmul.f32.gmra.mxu3 %v104_v14  ;;  %11088 = vst [vmem:[#allocation71_spill] sm:$0xff] %v7335_v62  ;;  %v110_v14 = vld [vmem:[%s10950_s0 + $0x2e8] sm:$0xff] }
 0x1e3   :  { %11089 = vst [vmem:[#allocation72_spill] sm:$0xff] %v7337_v56 }
 0x1e4   :  { %v1121_v0 = vpop.f32.mrf.mxu2  ;;  %1992 = vmatmul.f32.gmra.mxu0 %v105_v25  ;;  %5851 = vmatmul.msk.f32.gmra.mxu1 %vm605_vm0, %v106_v20  ;;  %v111_v25 = vld [vmem:[%s10950_s0 + $0x2f0] sm:$0xff]  ;;  %v112_v20 = vld [vmem:[%s10950_s0 + $0x2f8] sm:$0xff] }
 0x1e5   :  { %v1390_v59 = vpop.f32.mrf.mxu3 }
 0x1e6   :  { %v7346_v55 = vadd.f32 %v1390_v59, %v1121_v0 }
 0x1e8   :  { %11090 = vst [vmem:[#allocation73_spill] sm:$0xff] %v7346_v55 }
 0x1e9   :  { %1457 = vmatmul.f32.gmra.mxu2 %v109_v40  ;;  %v7354_v56 = vpop.f32.mrf.mxu0  ;;  %v7356_v62 = vpop.f32.mrf.mxu1  ;;  %v115_v40 = vld [vmem:[%s10950_s0 + $0x310] sm:$0xff] }
 0x1ea   :  { %1726 = vmatmul.f32.gmra.mxu3 %v110_v14  ;;  %11091 = vst [vmem:[#allocation74_spill] sm:$0xff] %v7354_v56  ;;  %v116_v14 = vld [vmem:[%s10950_s0 + $0x318] sm:$0xff] }
 0x1eb   :  { %11092 = vst [vmem:[#allocation75_spill] sm:$0xff] %v7356_v62 }
 0x1ec   :  { %v1124_v0 = vpop.f32.mrf.mxu2  ;;  %1995 = vmatmul.f32.gmra.mxu0 %v111_v25  ;;  %5852 = vmatmul.msk.f32.gmra.mxu1 %vm605_vm0, %v112_v20  ;;  %v117_v25 = vld [vmem:[%s10950_s0 + $0x320] sm:$0xff]  ;;  %v118_v20 = vld [vmem:[%s10950_s0 + $0x328] sm:$0xff] }
 0x1ed   :  { %v1393_v59 = vpop.f32.mrf.mxu3 }
 0x1ee   :  { %v7365_v55 = vadd.f32 %v1393_v59, %v1124_v0  ;;  %v1145_v0 = vadd.f32 %v6525_v61, %v6523_v60  ;;  %v123_v61 = vld [vmem:[%s10950_s0 + $0x350] sm:$0xff] }
 0x1f0   :  { %11093 = vst [vmem:[#allocation76_spill] sm:$0xff] %v7365_v55 }
 0x1f1   :  { %1460 = vmatmul.f32.gmra.mxu2 %v115_v40  ;;  %v1951_v62 = vpop.f32.mrf.mxu0  ;;  %v2220_v56 = vpop.f32.mrf.mxu1 }
 0x1f2   :  { %1729 = vmatmul.f32.gmra.mxu3 %v116_v14  ;;  %v121_v14 = vld [vmem:[%s10950_s0 + $0x340] sm:$0xff] }
 0x1f4   :  { %v1413_v59 = vpop.f32.mrf.mxu2  ;;  %1998 = vmatmul.f32.gmra.mxu0 %v117_v25  ;;  %5853 = vmatmul.msk.f32.gmra.mxu1 %vm605_vm0, %v118_v20  ;;  %v124_v25 = vld [vmem:[%s10950_s0 + $0x358] sm:$0xff]  ;;  %v1148_v20 = vadd.f32 %v6543_v6, %v6541_v5 }
 0x1f5   :  { %v1682_v55 = vpop.f32.mrf.mxu3  ;;  %v1414_v40 = vadd.f32 %v1413_v59, %v1145_v0  ;;  %v127_v59 = vld [vmem:[%s10950_s0 + $0x370] sm:$0xff]  ;;  %v128_v5 = vld [vmem:[%s10950_s0 + $0x378] sm:$0xff] }
 0x1f7   :  { %v1683_v46 = vadd.f32 %v1682_v55, %v1414_v40 }
 0x1f9   :  { %v1952_v2 = vadd.f32 %v1951_v62, %v1683_v46  ;;  %1463 = vmatmul.f32.gmra.mxu2 %v121_v14  ;;  %v1954_v13 = vpop.f32.mrf.mxu0  ;;  %v2223_v60 = vpop.f32.mrf.mxu1 }
 0x1fa   :  { %1732 = vmatmul.f32.gmra.mxu3 %v122_v63 }
 0x1fb   :  { %v7396_v0 = vadd.f32 %v2220_v56, %v1952_v2 }
 0x1fc   :  { %v1416_v55 = vpop.f32.mrf.mxu2  ;;  %2001 = vmatmul.f32.gmra.mxu0 %v123_v61  ;;  %5854 = vmatmul.msk.f32.gmra.mxu1 %vm605_vm0, %v124_v25  ;;  %v129_v61 = vld [vmem:[%s10950_s0 + $0x380] sm:$0xff]  ;;  %v130_v25 = vld [vmem:[%s10950_s0 + $0x388] sm:$0xff] }
 0x1fd   :  { %v1685_v46 = vpop.f32.mrf.mxu3  ;;  %v1417_v63 = vadd.f32 %v1416_v55, %v1148_v20  ;;  %v2473_v62 = vsel %vm2472_vm1, %v7396_v0, 0.0  ;;  %v2725_v56 = vmul.f32 %v7396_v0, %v7396_v0  ;;  %v1151_v20 = vadd.f32 %v6567_v17, %v6565_v16  ;;  %v134_v16 = vld [vmem:[%s10950_s0 + $0x3a8] sm:$0xff] }
 0x1fe   :  { %2474 = vadd.xlane.f32.xlu0 %v2473_v62 }
 0x1ff   :  { %v1686_v2 = vadd.f32 %v1685_v46, %v1417_v63  ;;  %v2809_v62 = vsel %vm2472_vm1, %v2725_v56, 0.0 }
 0x201   :  { %v1955_v6 = vadd.f32 %v1954_v13, %v1686_v2  ;;  %1466 = vmatmul.f32.gmra.mxu2 %v127_v59  ;;  %v1957_v40 = vpop.f32.mrf.mxu0  ;;  %v2226_v14 = vpop.f32.mrf.mxu1 }
 0x202   :  { %1735 = vmatmul.f32.gmra.mxu3 %v128_v5  ;;  %v133_v5 = vld [vmem:[%s10950_s0 + $0x3a0] sm:$0xff] }
 0x203   :  { %v7417_v55 = vadd.f32 %v2223_v60, %v1955_v6 }
 0x204   :  { %v1419_v13 = vpop.f32.mrf.mxu2  ;;  %2004 = vmatmul.f32.gmra.mxu0 %v129_v61  ;;  %5855 = vmatmul.msk.f32.gmra.mxu1 %vm605_vm0, %v130_v25  ;;  %v135_v61 = vld [vmem:[%s10950_s0 + $0x3b0] sm:$0xff]  ;;  %v136_v25 = vld [vmem:[%s10950_s0 + $0x3b8] sm:$0xff] }
 0x205   :  { %v1688_v46 = vpop.f32.mrf.mxu3  ;;  %v1420_v63 = vadd.f32 %v1419_v13, %v1151_v20  ;;  %v2726_v59 = vmul.f32 %v7417_v55, %v7417_v55  ;;  %v1154_v20 = vadd.f32 %v6591_v28, %v6589_v27  ;;  %v140_v27 = vld [vmem:[%s10950_s0 + $0x3d8] sm:$0xff] }
 0x206   :  { %2810 = vadd.xlane.f32.xlu0 %v2809_v62  ;;  %v2476_v62 = vsel %vm2472_vm1, %v7417_v55, 0.0 }
 0x207   :  { %v1689_v17 = vadd.f32 %v1688_v46, %v1420_v63  ;;  %v2812_v60 = vsel %vm2472_vm1, %v2726_v59, 0.0 }
 0x208   :  { %2813 = vadd.xlane.f32.xlu1 %v2812_v60 }
 0x209   :  { %v1958_v2 = vadd.f32 %v1957_v40, %v1689_v17  ;;  %1469 = vmatmul.f32.gmra.mxu2 %v133_v5  ;;  %v1960_v6 = vpop.f32.mrf.mxu0  ;;  %v2229_v56 = vpop.f32.mrf.mxu1  ;;  %v139_v5 = vld [vmem:[%s10950_s0 + $0x3d0] sm:$0xff] }
 0x20a   :  { %1738 = vmatmul.f32.gmra.mxu3 %v134_v16 }
 0x20b   :  { %v7438_v13 = vadd.f32 %v2226_v14, %v1958_v2 }
 0x20c   :  { %v1422_v46 = vpop.f32.mrf.mxu2  ;;  %2007 = vmatmul.f32.gmra.mxu0 %v135_v61  ;;  %5856 = vmatmul.msk.f32.gmra.mxu1 %vm605_vm0, %v136_v25  ;;  %v141_v61 = vld [vmem:[%s10950_s0 + $0x3e0] sm:$0xff]  ;;  %v142_v25 = vld [vmem:[%s10950_s0 + $0x3e8] sm:$0xff] }
 0x20d   :  { %v1691_v63 = vpop.f32.mrf.mxu3  ;;  %v1423_v40 = vadd.f32 %v1422_v46, %v1154_v20  ;;  %v2727_v59 = vmul.f32 %v7438_v13, %v7438_v13  ;;  %v2479_v16 = vsel %vm2472_vm1, %v7438_v13, 0.0  ;;  %v1157_v20 = vadd.f32 %v6615_v39, %v6613_v38 }
 0x20e   :  { %2477 = vadd.xlane.f32.xlu0 %v2476_v62 }
 0x20f   :  { %v1692_v28 = vadd.f32 %v1691_v63, %v1423_v40  ;;  %v2815_v14 = vsel %vm2472_vm1, %v2727_v59, 0.0  ;;  %v145_v59 = vld [vmem:[%s10950_s0 + $0x400] sm:$0xff] }
 0x210   :  { %2816 = vadd.xlane.f32.xlu2 %v2815_v14  ;;  %2480 = vadd.xlane.f32.xlu1 %v2479_v16  ;;  %v147_v16 = vld [vmem:[%s10950_s0 + $0x410] sm:$0xff] }
 0x211   :  { %v1961_v17 = vadd.f32 %v1960_v6, %v1692_v28  ;;  %1472 = vmatmul.f32.gmra.mxu2 %v139_v5  ;;  %v1963_v60 = vpop.f32.mrf.mxu0  ;;  %v2232_v2 = vpop.f32.mrf.mxu1  ;;  %v146_v5 = vld [vmem:[%s10950_s0 + $0x408] sm:$0xff] }
 0x212   :  { %1741 = vmatmul.f32.gmra.mxu3 %v140_v27 }
 0x213   :  { %v7462_v46 = vadd.f32 %v2229_v56, %v1961_v17  ;;  %v148_v17 = vld [vmem:[%s10950_s0 + $0x418] sm:$0xff] }
 0x214   :  { %v1425_v63 = vpop.f32.mrf.mxu2  ;;  %2010 = vmatmul.f32.gmra.mxu0 %v141_v61  ;;  %5857 = vmatmul.msk.f32.gmra.mxu1 %vm605_vm0, %v142_v25  ;;  %v1160_v61 = vadd.f32 %v6636_v49, %v6634_v48  ;;  %v152_v48 = vld [vmem:[%s10950_s0 + $0x438] sm:$0xff] }
 0x215   :  { %v1694_v40 = vpop.f32.mrf.mxu3  ;;  %v1426_v6 = vadd.f32 %v1425_v63, %v1157_v20  ;;  %v2728_v62 = vmul.f32 %v7462_v46, %v7462_v46  ;;  %v2482_v39 = vsel %vm2472_vm1, %v7462_v46, 0.0 }
 0x217   :  { %v1695_v38 = vadd.f32 %v1694_v40, %v1426_v6  ;;  %v2818_v56 = vsel %vm2472_vm1, %v2728_v62, 0.0  ;;  %v151_v62 = vld [vmem:[%s10950_s0 + $0x430] sm:$0xff] }
 0x218   :  { %2483 = vadd.xlane.f32.xlu1 %v2482_v39  ;;  %2819 = vadd.xlane.f32.xlu0 %v2818_v56  ;;  %v153_v39 = vld [vmem:[%s10950_s0 + $0x440] sm:$0xff]  ;;  %v154_v56 = vld [vmem:[%s10950_s0 + $0x448] sm:$0xff] }
 0x219   :  { %v1964_v27 = vadd.f32 %v1963_v60, %v1695_v38  ;;  %1475 = vmatmul.f32.gmra.mxu2 %v145_v59  ;;  %v1966_v28 = vpop.f32.mrf.mxu0  ;;  %v2235_v14 = vpop.f32.mrf.mxu1 }
 0x21a   :  { %1744 = vmatmul.f32.gmra.mxu3 %v146_v5 }
 0x21b   :  { %v7484_v25 = vadd.f32 %v2232_v2, %v1964_v27  ;;  %v1163_v27 = vadd.f32 %v6654_v58, %v6652_v57  ;;  %v158_v57 = vld [vmem:[%s10950_s0 + $0x468] sm:$0xff] }
 0x21c   :  { %v1428_v20 = vpop.f32.mrf.mxu2  ;;  %2013 = vmatmul.f32.gmra.mxu0 %v147_v16  ;;  %5858 = vmatmul.msk.f32.gmra.mxu1 %vm605_vm0, %v148_v17 }
 0x21d   :  { %v1697_v63 = vpop.f32.mrf.mxu3  ;;  %v1429_v60 = vadd.f32 %v1428_v20, %v1160_v61  ;;  %v2485_v40 = vsel %vm2472_vm1, %v7484_v25, 0.0  ;;  %v2729_v6 = vmul.f32 %v7484_v25, %v7484_v25 }
 0x21e   :  { %2486 = vadd.xlane.f32.xlu2 %v2485_v40 }
 0x21f   :  { %v1698_v49 = vadd.f32 %v1697_v63, %v1429_v60  ;;  %v2821_v2 = vsel %vm2472_vm1, %v2729_v6, 0.0  ;;  %v157_v63 = vld [vmem:[%s10950_s0 + $0x460] sm:$0xff] }
 0x220   :  { %2822 = vadd.xlane.f32.xlu1 %v2821_v2 }
 0x221   :  { %v1967_v59 = vadd.f32 %v1966_v28, %v1698_v49  ;;  %1478 = vmatmul.f32.gmra.mxu2 %v151_v62  ;;  %v1969_v5 = vpop.f32.mrf.mxu0  ;;  %v2238_v38 = vpop.f32.mrf.mxu1  ;;  %v159_v62 = vld [vmem:[%s10950_s0 + $0x470] sm:$0xff]  ;;  %v1166_v49 = vadd.f32 %v6678_v10, %v6676_v9  ;;  %v164_v9 = vld [vmem:[%s10950_s0 + $0x498] sm:$0xff] }
 0x222   :  { %1747 = vmatmul.f32.gmra.mxu3 %v152_v48  ;;  %v160_v48 = vld [vmem:[%s10950_s0 + $0x478] sm:$0xff] }
 0x223   :  { %v7506_v16 = vadd.f32 %v2235_v14, %v1967_v59 }
 0x224   :  { %v1431_v17 = vpop.f32.mrf.mxu2  ;;  %2016 = vmatmul.f32.gmra.mxu0 %v153_v39  ;;  %5859 = vmatmul.msk.f32.gmra.mxu1 %vm605_vm0, %v154_v56 }
 0x225   :  { %v1700_v61 = vpop.f32.mrf.mxu3  ;;  %v1432_v28 = vadd.f32 %v1431_v17, %v1163_v27  ;;  %v2488_v20 = vsel %vm2472_vm1, %v7506_v16, 0.0  ;;  %v2730_v60 = vmul.f32 %v7506_v16, %v7506_v16  ;;  %v163_v17 = vld [vmem:[%s10950_s0 + $0x490] sm:$0xff] }
 0x226   :  { %2489 = vadd.xlane.f32.xlu2 %v2488_v20 }
 0x227   :  { %v1701_v58 = vadd.f32 %v1700_v61, %v1432_v28  ;;  %v2824_v56 = vsel %vm2472_vm1, %v2730_v60, 0.0 }
 0x229   :  { %v1970_v14 = vadd.f32 %v1969_v5, %v1701_v58  ;;  %1481 = vmatmul.f32.gmra.mxu2 %v157_v63  ;;  %v1972_v40 = vpop.f32.mrf.mxu0  ;;  %v2241_v6 = vpop.f32.mrf.mxu1  ;;  %v165_v63 = vld [vmem:[%s10950_s0 + $0x4a0] sm:$0xff]  ;;  %v1169_v58 = vadd.f32 %v6699_v24, %v6697_v22  ;;  %v170_v22 = vld [vmem:[%s10950_s0 + $0x4c8] sm:$0xff] }
 0x22a   :  { %1750 = vmatmul.f32.gmra.mxu3 %v158_v57  ;;  %v166_v57 = vld [vmem:[%s10950_s0 + $0x4a8] sm:$0xff] }
 0x22b   :  { %v7527_v2 = vadd.f32 %v2238_v38, %v1970_v14 }
 0x22c   :  { %v1434_v59 = vpop.f32.mrf.mxu2  ;;  %2019 = vmatmul.f32.gmra.mxu0 %v159_v62  ;;  %5860 = vmatmul.msk.f32.gmra.mxu1 %vm605_vm0, %v160_v48 }
 0x22d   :  { %v1703_v5 = vpop.f32.mrf.mxu3  ;;  %v1435_v39 = vadd.f32 %v1434_v59, %v1166_v49  ;;  %v2491_v27 = vsel %vm2472_vm1, %v7527_v2, 0.0  ;;  %v2731_v61 = vmul.f32 %v7527_v2, %v7527_v2  ;;  %v169_v59 = vld [vmem:[%s10950_s0 + $0x4c0] sm:$0xff] }
 0x22e   :  { %2825 = vadd.xlane.f32.xlu2 %v2824_v56  ;;  %2492 = vadd.xlane.f32.xlu0 %v2491_v27  ;;  %v171_v27 = vld [vmem:[%s10950_s0 + $0x4d0] sm:$0xff] }
 0x22f   :  { %v1704_v10 = vadd.f32 %v1703_v5, %v1435_v39  ;;  %v2827_v49 = vsel %vm2472_vm1, %v2731_v61, 0.0 }
 0x231   :  { %v1973_v38 = vadd.f32 %v1972_v40, %v1704_v10  ;;  %1484 = vmatmul.f32.gmra.mxu2 %v163_v17  ;;  %v1975_v28 = vpop.f32.mrf.mxu0  ;;  %v2244_v20 = vpop.f32.mrf.mxu1  ;;  %v172_v17 = vld [vmem:[%s10950_s0 + $0x4d8] sm:$0xff] }
 0x232   :  { %1753 = vmatmul.f32.gmra.mxu3 %v164_v9  ;;  %v1172_v9 = vadd.f32 %v6720_v37, %v6718_v36  ;;  %v176_v36 = vld [vmem:[%s10950_s0 + $0x4f8] sm:$0xff] }
 0x233   :  { %v7549_v14 = vadd.f32 %v2241_v6, %v1973_v38 }
 0x234   :  { %v1437_v60 = vpop.f32.mrf.mxu2  ;;  %2022 = vmatmul.f32.gmra.mxu0 %v165_v63  ;;  %5861 = vmatmul.msk.f32.gmra.mxu1 %vm605_vm0, %v166_v57 }
 0x235   :  { %v1706_v40 = vpop.f32.mrf.mxu3  ;;  %v1438_v62 = vadd.f32 %v1437_v60, %v1169_v58  ;;  %v2494_v48 = vsel %vm2472_vm1, %v7549_v14, 0.0  ;;  %v2732_v5 = vmul.f32 %v7549_v14, %v7549_v14  ;;  %v175_v58 = vld [vmem:[%s10950_s0 + $0x4f0] sm:$0xff] }
 0x236   :  { %2495 = vadd.xlane.f32.xlu1 %v2494_v48  ;;  %2828 = vadd.xlane.f32.xlu0 %v2827_v49  ;;  %v177_v48 = vld [vmem:[%s10950_s0 + $0x500] sm:$0xff]  ;;  %v178_v49 = vld [vmem:[%s10950_s0 + $0x508] sm:$0xff] }
 0x237   :  { %v1707_v24 = vadd.f32 %v1706_v40, %v1438_v62  ;;  %v2830_v57 = vsel %vm2472_vm1, %v2732_v5, 0.0 }
 0x239   :  { %v1976_v6 = vadd.f32 %v1975_v28, %v1707_v24  ;;  %1487 = vmatmul.f32.gmra.mxu2 %v169_v59  ;;  %v1978_v39 = vpop.f32.mrf.mxu0  ;;  %v2247_v56 = vpop.f32.mrf.mxu1  ;;  %v1175_v59 = vadd.f32 %v6741_v52, %v6739_v51  ;;  %v182_v51 = vld [vmem:[%s10950_s0 + $0x528] sm:$0xff] }
 0x23a   :  { %1756 = vmatmul.f32.gmra.mxu3 %v170_v22 }
 0x23b   :  { %v7571_v10 = vadd.f32 %v2244_v20, %v1976_v6 }
 0x23c   :  { %v1440_v38 = vpop.f32.mrf.mxu2  ;;  %2025 = vmatmul.f32.gmra.mxu0 %v171_v27  ;;  %5862 = vmatmul.msk.f32.gmra.mxu1 %vm605_vm0, %v172_v17  ;;  %v181_v17 = vld [vmem:[%s10950_s0 + $0x520] sm:$0xff] }
 0x23d   :  { %11094 = vst [vmem:[#allocation77_spill] sm:$0xff] %v7571_v10  ;;  %v1709_v61 = vpop.f32.mrf.mxu3  ;;  %v1441_v28 = vadd.f32 %v1440_v38, %v1172_v9  ;;  %v2497_v63 = vsel %vm2472_vm1, %v7571_v10, 0.0  ;;  %v2733_v60 = vmul.f32 %v7571_v10, %v7571_v10 }
 0x23e   :  { %2498 = vadd.xlane.f32.xlu2 %v2497_v63  ;;  %2831 = vadd.xlane.f32.xlu1 %v2830_v57  ;;  %v184_v63 = vld [vmem:[%s10950_s0 + $0x538] sm:$0xff]  ;;  %v1178_v57 = vadd.f32 %v6762_v7, %v6760_v4 }
 0x23f   :  { %v1710_v37 = vadd.f32 %v1709_v61, %v1441_v28  ;;  %v183_v28 = vld [vmem:[%s10950_s0 + $0x530] sm:$0xff]  ;;  %v188_v4 = vld [vmem:[%s10950_s0 + $0x558] sm:$0xff] }
 0x241   :  { %v1979_v20 = vadd.f32 %v1978_v39, %v1710_v37  ;;  %1490 = vmatmul.f32.gmra.mxu2 %v175_v58  ;;  %v1981_v40 = vpop.f32.mrf.mxu0  ;;  %v2250_v62 = vpop.f32.mrf.mxu1  ;;  %v2833_v39 = vsel %vm2472_vm1, %v2733_v60, 0.0 }
 0x242   :  { %1759 = vmatmul.f32.gmra.mxu3 %v176_v36 }
 0x243   :  { %v7593_v22 = vadd.f32 %v2247_v56, %v1979_v20 }
 0x244   :  { %v1443_v24 = vpop.f32.mrf.mxu2  ;;  %2028 = vmatmul.f32.gmra.mxu0 %v177_v48  ;;  %5863 = vmatmul.msk.f32.gmra.mxu1 %vm605_vm0, %v178_v49  ;;  %v187_v48 = vld [vmem:[%s10950_s0 + $0x550] sm:$0xff] }
 0x245   :  { %11095 = vst [vmem:[#allocation78_spill] sm:$0xff] %v7593_v22  ;;  %v1712_v6 = vpop.f32.mrf.mxu3  ;;  %v1444_v5 = vadd.f32 %v1443_v24, %v1175_v59  ;;  %v2500_v27 = vsel %vm2472_vm1, %v7593_v22, 0.0  ;;  %v2734_v9 = vmul.f32 %v7593_v22, %v7593_v22 }
 0x246   :  { %2834 = vadd.xlane.f32.xlu2 %v2833_v39  ;;  %2501 = vadd.xlane.f32.xlu0 %v2500_v27  ;;  %v1181_v39 = vadd.f32 %v6786_v29, %v6784_v26  ;;  %v194_v26 = vld [vmem:[%s10950_s0 + $0x588] sm:$0xff] }
 0x247   :  { %v1713_v52 = vadd.f32 %v1712_v6, %v1444_v5  ;;  %v189_v6 = vld [vmem:[%s10950_s0 + $0x560] sm:$0xff]  ;;  %v190_v5 = vld [vmem:[%s10950_s0 + $0x568] sm:$0xff] }
 0x249   :  { %v1982_v56 = vadd.f32 %v1981_v40, %v1713_v52  ;;  %1493 = vmatmul.f32.gmra.mxu2 %v181_v17  ;;  %v1984_v38 = vpop.f32.mrf.mxu0  ;;  %v2253_v61 = vpop.f32.mrf.mxu1  ;;  %v2836_v40 = vsel %vm2472_vm1, %v2734_v9, 0.0 }
 0x24a   :  { %1762 = vmatmul.f32.gmra.mxu3 %v182_v51 }
 0x24b   :  { %v7615_v58 = vadd.f32 %v2250_v62, %v1982_v56 }
 0x24c   :  { %v1446_v36 = vpop.f32.mrf.mxu2  ;;  %2031 = vmatmul.f32.gmra.mxu0 %v183_v28  ;;  %5864 = vmatmul.msk.f32.gmra.mxu1 %vm605_vm0, %v184_v63 }
 0x24d   :  { %11096 = vst [vmem:[#allocation79_spill] sm:$0xff] %v7615_v58  ;;  %v1715_v37 = vpop.f32.mrf.mxu3  ;;  %v1447_v20 = vadd.f32 %v1446_v36, %v1178_v57  ;;  %v2503_v60 = vsel %vm2472_vm1, %v7615_v58, 0.0  ;;  %v2735_v49 = vmul.f32 %v7615_v58, %v7615_v58  ;;  %v195_v36 = vld [vmem:[%s10950_s0 + $0x590] sm:$0xff]  ;;  %v313_v58 = vld [vmem:[%s10950_s0 + $0x940] sm:$0xff] }
 0x24e   :  { %2504 = vadd.xlane.f32.xlu1 %v2503_v60  ;;  %2837 = vadd.xlane.f32.xlu0 %v2836_v40 }
 0x24f   :  { %v1716_v7 = vadd.f32 %v1715_v37, %v1447_v20  ;;  %v2839_v9 = vsel %vm2472_vm1, %v2735_v49, 0.0  ;;  %v196_v37 = vld [vmem:[%s10950_s0 + $0x598] sm:$0xff]  ;;  %v1184_v20 = vadd.f32 %v6807_v47, %v6805_v45  ;;  %v199_v49 = vld [vmem:[%s10950_s0 + $0x5b0] sm:$0xff] }
 0x250   :  { %v200_v45 = vld [vmem:[%s10950_s0 + $0x5b8] sm:$0xff] }
 0x251   :  { %v1985_v62 = vadd.f32 %v1984_v38, %v1716_v7  ;;  %1496 = vmatmul.f32.gmra.mxu2 %v187_v48  ;;  %v1987_v59 = vpop.f32.mrf.mxu0  ;;  %v2256_v24 = vpop.f32.mrf.mxu1  ;;  %v193_v38 = vld [vmem:[%s10950_s0 + $0x580] sm:$0xff] }
 0x252   :  { %1765 = vmatmul.f32.gmra.mxu3 %v188_v4 }
 0x253   :  { %v7637_v27 = vadd.f32 %v2253_v61, %v1985_v62 }
 0x254   :  { %v1449_v17 = vpop.f32.mrf.mxu2  ;;  %2034 = vmatmul.f32.gmra.mxu0 %v189_v6  ;;  %5865 = vmatmul.msk.f32.gmra.mxu1 %vm605_vm0, %v190_v5 }
 0x255   :  { %11097 = vst [vmem:[#allocation80_spill] sm:$0xff] %v7637_v27  ;;  %v1718_v51 = vpop.f32.mrf.mxu3  ;;  %v1450_v52 = vadd.f32 %v1449_v17, %v1181_v39  ;;  %v2506_v56 = vsel %vm2472_vm1, %v7637_v27, 0.0  ;;  %v2736_v28 = vmul.f32 %v7637_v27, %v7637_v27  ;;  %v201_v39 = vld [vmem:[%s10950_s0 + $0x5c0] sm:$0xff]  ;;  %v202_v17 = vld [vmem:[%s10950_s0 + $0x5c8] sm:$0xff] }
 0x256   :  { %2507 = vadd.xlane.f32.xlu2 %v2506_v56  ;;  %2840 = vadd.xlane.f32.xlu1 %v2839_v9 }
 0x257   :  { %v1719_v29 = vadd.f32 %v1718_v51, %v1450_v52  ;;  %v2842_v7 = vsel %vm2472_vm1, %v2736_v28, 0.0  ;;  %v1187_v51 = vadd.f32 %v6828_v11, %v6826_v8  ;;  %v206_v8 = vld [vmem:[%s10950_s0 + $0x5e8] sm:$0xff] }
 0x259   :  { %v1988_v61 = vadd.f32 %v1987_v59, %v1719_v29  ;;  %1499 = vmatmul.f32.gmra.mxu2 %v193_v38  ;;  %v1990_v63 = vpop.f32.mrf.mxu0  ;;  %v2259_v57 = vpop.f32.mrf.mxu1 }
 0x25a   :  { %1768 = vmatmul.f32.gmra.mxu3 %v194_v26 }
 0x25b   :  { %v7659_v60 = vadd.f32 %v2256_v24, %v1988_v61  ;;  %v205_v61 = vld [vmem:[%s10950_s0 + $0x5e0] sm:$0xff] }
 0x25c   :  { %v1452_v40 = vpop.f32.mrf.mxu2  ;;  %2037 = vmatmul.f32.gmra.mxu0 %v195_v36  ;;  %5866 = vmatmul.msk.f32.gmra.mxu1 %vm605_vm0, %v196_v37  ;;  %v207_v37 = vld [vmem:[%s10950_s0 + $0x5f0] sm:$0xff] }
 0x25d   :  { %11098 = vst [vmem:[#allocation81_spill] sm:$0xff] %v7659_v60  ;;  %v1721_v48 = vpop.f32.mrf.mxu3  ;;  %v1453_v4 = vadd.f32 %v1452_v40, %v1184_v20  ;;  %v2509_v62 = vsel %vm2472_vm1, %v7659_v60, 0.0  ;;  %v2737_v24 = vmul.f32 %v7659_v60, %v7659_v60  ;;  %v208_v20 = vld [vmem:[%s10950_s0 + $0x5f8] sm:$0xff]  ;;  %v1190_v40 = vadd.f32 %v6852_v41, %v6850_v35 }
 0x25e   :  { %2843 = vadd.xlane.f32.xlu2 %v2842_v7  ;;  %2510 = vadd.xlane.f32.xlu0 %v2509_v62  ;;  %v212_v35 = vld [vmem:[%s10950_s0 + $0x618] sm:$0xff] }
 0x25f   :  { %v1722_v47 = vadd.f32 %v1721_v48, %v1453_v4  ;;  %v2845_v29 = vsel %vm2472_vm1, %v2737_v24, 0.0 }
 0x261   :  { %v1991_v59 = vadd.f32 %v1990_v63, %v1722_v47  ;;  %1502 = vmatmul.f32.gmra.mxu2 %v199_v49  ;;  %v1993_v6 = vpop.f32.mrf.mxu0  ;;  %v2262_v5 = vpop.f32.mrf.mxu1  ;;  %v211_v47 = vld [vmem:[%s10950_s0 + $0x610] sm:$0xff] }
 0x262   :  { %1771 = vmatmul.f32.gmra.mxu3 %v200_v45 }
 0x263   :  { %v7681_v52 = vadd.f32 %v2259_v57, %v1991_v59 }
 0x264   :  { %v1455_v56 = vpop.f32.mrf.mxu2  ;;  %2040 = vmatmul.f32.gmra.mxu0 %v201_v39  ;;  %5867 = vmatmul.msk.f32.gmra.mxu1 %vm605_vm0, %v202_v17  ;;  %v213_v39 = vld [vmem:[%s10950_s0 + $0x620] sm:$0xff]  ;;  %v214_v17 = vld [vmem:[%s10950_s0 + $0x628] sm:$0xff] }
 0x265   :  { %11099 = vst [vmem:[#allocation82_spill] sm:$0xff] %v7681_v52  ;;  %v1724_v9 = vpop.f32.mrf.mxu3  ;;  %v1456_v38 = vadd.f32 %v1455_v56, %v1187_v51  ;;  %v2512_v26 = vsel %vm2472_vm1, %v7681_v52, 0.0  ;;  %v2738_v63 = vmul.f32 %v7681_v52, %v7681_v52  ;;  %v1193_v56 = vadd.f32 %v6873_v12, %v6871_v1  ;;  %v217_v1 = vld [vmem:[%s10950_s0 + $0x640] sm:$0xff]  ;;  %v218_v12 = vld [vmem:[%s10950_s0 + $0x648] sm:$0xff] }
 0x266   :  { %2513 = vadd.xlane.f32.xlu1 %v2512_v26  ;;  %2846 = vadd.xlane.f32.xlu0 %v2845_v29 }
 0x267   :  { %v1725_v11 = vadd.f32 %v1724_v9, %v1456_v38  ;;  %v2848_v45 = vsel %vm2472_vm1, %v2738_v63, 0.0 }
 0x269   :  { %v1994_v28 = vadd.f32 %v1993_v6, %v1725_v11  ;;  %1505 = vmatmul.f32.gmra.mxu2 %v205_v61  ;;  %v1996_v57 = vpop.f32.mrf.mxu0  ;;  %v2265_v36 = vpop.f32.mrf.mxu1 }
 0x26a   :  { %1774 = vmatmul.f32.gmra.mxu3 %v206_v8 }
 0x26b   :  { %v7703_v48 = vadd.f32 %v2262_v5, %v1994_v28 }
 0x26c   :  { %v1458_v4 = vpop.f32.mrf.mxu2  ;;  %2043 = vmatmul.f32.gmra.mxu0 %v207_v37  ;;  %5868 = vmatmul.msk.f32.gmra.mxu1 %vm605_vm0, %v208_v20  ;;  %v219_v20 = vld [vmem:[%s10950_s0 + $0x650] sm:$0xff] }
 0x26d   :  { %11100 = vst [vmem:[#allocation83_spill] sm:$0xff] %v7703_v48  ;;  %v1727_v7 = vpop.f32.mrf.mxu3  ;;  %v1459_v62 = vadd.f32 %v1458_v4, %v1190_v40  ;;  %v2515_v49 = vsel %vm2472_vm1, %v7703_v48, 0.0  ;;  %v2739_v6 = vmul.f32 %v7703_v48, %v7703_v48  ;;  %v220_v40 = vld [vmem:[%s10950_s0 + $0x658] sm:$0xff] }
 0x26e   :  { %2516 = vadd.xlane.f32.xlu2 %v2515_v49  ;;  %2849 = vadd.xlane.f32.xlu1 %v2848_v45  ;;  %v1196_v49 = vadd.f32 %v6894_v50, %v6892_v43  ;;  %v223_v43 = vld [vmem:[%s10950_s0 + $0x670] sm:$0xff]  ;;  %v224_v50 = vld [vmem:[%s10950_s0 + $0x678] sm:$0xff] }
 0x26f   :  { %v1728_v41 = vadd.f32 %v1727_v7, %v1459_v62  ;;  %v2851_v61 = vsel %vm2472_vm1, %v2739_v6, 0.0 }
 0x271   :  { %v1997_v59 = vadd.f32 %v1996_v57, %v1728_v41  ;;  %1508 = vmatmul.f32.gmra.mxu2 %v211_v47  ;;  %v2475_v24 = vpop.xlane.xlu0 %2474  ;;  %v1999_v5 = vpop.f32.mrf.mxu0 }
 0x272   :  { %1777 = vmatmul.f32.gmra.mxu3 %v212_v35  ;;  %v2268_v51 = vpop.f32.mrf.mxu1  ;;  %v7731_v11 = vmul.f32 0.020408163, %v2475_v24 }
 0x273   :  { %v7725_v9 = vadd.f32 %v2265_v36, %v1997_v59 }
 0x274   :  { %v1461_v38 = vpop.f32.mrf.mxu2  ;;  %2046 = vmatmul.f32.gmra.mxu0 %v213_v39  ;;  %5869 = vmatmul.msk.f32.gmra.mxu1 %vm605_vm0, %v214_v17  ;;  %v3229_v4 = vmul.f32 %v7731_v11, %v7731_v11 }
 0x275   :  { %11101 = vst [vmem:[#allocation84_spill] sm:$0xff] %v7725_v9  ;;  %v1730_v26 = vpop.f32.mrf.mxu3  ;;  %v1462_v29 = vadd.f32 %v1461_v38, %v1193_v56  ;;  %v2518_v8 = vsel %vm2472_vm1, %v7725_v9, 0.0  ;;  %v2740_v36 = vmul.f32 %v7725_v9, %v7725_v9 }
 0x276   :  { %2852 = vadd.xlane.f32.xlu2 %v2851_v61  ;;  %2519 = vadd.xlane.f32.xlu0 %v2518_v8  ;;  %v226_v61 = vld [vmem:[%s10950_s0 + $0x688] sm:$0xff] }
 0x277   :  { %v1731_v28 = vadd.f32 %v1730_v26, %v1462_v29  ;;  %v225_v29 = vld [vmem:[%s10950_s0 + $0x680] sm:$0xff] }
 0x279   :  { %v2000_v63 = vadd.f32 %v1999_v5, %v1731_v28  ;;  %1511 = vmatmul.f32.gmra.mxu2 %v217_v1  ;;  %v2811_v57 = vpop.xlane.xlu0 %2810  ;;  %v2002_v37 = vpop.f32.mrf.mxu0  ;;  %v2854_v5 = vsel %vm2472_vm1, %v2740_v36, 0.0  ;;  %v1199_v1 = vadd.f32 %v6915_v34, %v6913_v32  ;;  %v229_v32 = vld [vmem:[%s10950_s0 + $0x6a0] sm:$0xff]  ;;  %v230_v34 = vld [vmem:[%s10950_s0 + $0x6a8] sm:$0xff] }
 0x27a   :  { %1780 = vmatmul.f32.gmra.mxu3 %v218_v12  ;;  %v3145_v7 = vmul.f32 0.020408163, %v2811_v57  ;;  %v2271_v62 = vpop.f32.mrf.mxu1 }
 0x27b   :  { %v7751_v45 = vadd.f32 %v2268_v51, %v2000_v63  ;;  %v7753_v47 = vpop.xlane.xlu1 %2813  ;;  %v6125_v51 = vmov 0  }
 0x27c   :  { %v3313_v35 = vsub.f32 %v3145_v7, %v3229_v4  ;;  %v1464_v41 = vpop.f32.mrf.mxu2  ;;  %2049 = vmatmul.f32.gmra.mxu0 %v219_v20  ;;  %5870 = vmatmul.msk.f32.gmra.mxu1 %vm605_vm0, %v220_v40 }
 0x27d   :  { %11102 = vst [vmem:[#allocation85_spill] sm:$0xff] %v7751_v45  ;;  %v1733_v59 = vpop.f32.mrf.mxu3  ;;  %v1465_v24 = vadd.f32 %v1464_v41, %v1196_v49  ;;  %v2521_v6 = vsel %vm2472_vm1, %v7751_v45, 0.0  ;;  %5955 = vset.pattern.permute.xlu1 %v6125_v51  ;;  %5954 = vset.pattern.permute.xlu0 %v6125_v51  ;;  %v2741_v38 = vmul.f32 %v7751_v45, %v7751_v45 }
 0x27e   :  { %v7759_v39 = vadd.f32 1e-05, %v3313_v35  ;;  %2522 = vadd.xlane.f32.xlu1 %v2521_v6  ;;  %2855 = vadd.xlane.f32.xlu0 %v2854_v5  ;;  %v231_v5 = vld [vmem:[%s10950_s0 + $0x6b0] sm:$0xff] }
 0x27f   :  { %v1734_v17 = vadd.f32 %v1733_v59, %v1465_v24  ;;  %5956 = vset.pattern.permute.xlu2 %v6125_v51  ;;  %v2857_v40 = vsel %vm2472_vm1, %v2741_v38, 0.0 }
 0x280   :  { %5957 = vrsqrt.f32 %v7759_v39  ;;  %vm3487_vm3 = vweird.f32 %v7759_v39 }
 0x281   :  { %v2003_v56 = vadd.f32 %v2002_v37, %v1734_v17  ;;  %1514 = vmatmul.f32.gmra.mxu2 %v223_v43  ;;  %v2005_v26 = vpop.f32.mrf.mxu0  ;;  %v232_v43 = vld [vmem:[%s10950_s0 + $0x6b8] sm:$0xff] }
 0x282   :  { %1783 = vmatmul.f32.gmra.mxu3 %v224_v50  ;;  %v2274_v8 = vpop.f32.mrf.mxu1 }
 0x283   :  { %v7778_v12 = vadd.f32 %v2271_v62, %v2003_v56  ;;  %v2481_v28 = vpop.xlane.xlu1 %2480  ;;  %v2817_v62 = vpop.xlane.xlu2 %2816 }
 0x284   :  { %v7780_v63 = vmul.f32 0.020408163, %v2481_v28  ;;  %v1467_v57 = vpop.f32.mrf.mxu2  ;;  %2052 = vmatmul.f32.gmra.mxu0 %v225_v29  ;;  %5871 = vmatmul.msk.f32.gmra.mxu1 %vm605_vm0, %v226_v61  ;;  %v3147_v50 = vmul.f32 0.020408163, %v2817_v62  ;;  %v4321_v62 = vld [vmem:[%s10951_s2] sm:$0xff] }
 0x285   :  { %11103 = vst [vmem:[#allocation86_spill] sm:$0xff] %v7778_v12  ;;  %v1736_v36 = vpop.f32.mrf.mxu3  ;;  %v1468_v37 = vadd.f32 %v1467_v57, %v1199_v1  ;;  %v2524_v20 = vsel %vm2472_vm1, %v7778_v12, 0.0  ;;  %v2742_v24 = vmul.f32 %v7778_v12, %v7778_v12  ;;  %v236_v57 = vld [vmem:[%s10950_s0 + $0x6d8] sm:$0xff] }
 0x286   :  { %v5958_v4 = vpop.eup %5957  ;;  %2525 = vadd.xlane.f32.xlu2 %v2524_v20  ;;  %2858 = vadd.xlane.f32.xlu1 %v2857_v40  ;;  %v3231_v35 = vmul.f32 %v7780_v63, %v7780_v63 }
 0x287   :  { %v3482_v7 = vmul.f32 %v5958_v4, %v7759_v39  ;;  %v1737_v49 = vadd.f32 %v1736_v36, %v1468_v37  ;;  %v2860_v1 = vsel %vm2472_vm1, %v2742_v24, 0.0  ;;  %vm3488_vm2 = vweird.f32 %v5958_v4 }
 0x288   :  { %v3315_v38 = vsub.f32 %v3147_v50, %v3231_v35  ;;  %vm7826_vm4 = vmor %vm3487_vm3, %vm3488_vm2 }
 0x289   :  { %v3483_v41 = vmul.f32 %v5958_v4, %v3482_v7  ;;  %v2006_v59 = vadd.f32 %v2005_v26, %v1737_v49  ;;  %1517 = vmatmul.f32.gmra.mxu2 %v229_v32  ;;  %v7797_v6 = vpop.f32.mrf.mxu0  ;;  %v237_v32 = vld [vmem:[%s10950_s0 + $0x6e0] sm:$0xff]  ;;  %v1205_v49 = vadd.f32 %v6960_v53, %v6958_v42 }
 0x28a   :  { %1786 = vmatmul.f32.gmra.mxu3 %v230_v34  ;;  %v7805_v17 = vpop.f32.mrf.mxu1  ;;  %v7824_v37 = vadd.f32 1e-05, %v3315_v38  ;;  %v238_v34 = vld [vmem:[%s10950_s0 + $0x6e8] sm:$0xff]  ;;  %v244_v38 = vld [vmem:[%s10950_s0 + $0x718] sm:$0xff] }
 0x28b   :  { %v3484_v51 = vmul.f32 0.5, %v3483_v41  ;;  %v7807_v56 = vadd.f32 %v2274_v8, %v2006_v59  ;;  %v235_v8 = vld [vmem:[%s10950_s0 + $0x6d0] sm:$0xff] }
 0x28c   :  { %v7809_v26 = vpop.f32.mrf.mxu2  ;;  %2055 = vmatmul.f32.gmra.mxu0 %v231_v5  ;;  %5872 = vmatmul.msk.f32.gmra.mxu1 %vm605_vm0, %v232_v43  ;;  %5959 = vrsqrt.f32 %v7824_v37  ;;  %v242_v5 = vld [vmem:[%s10950_s0 + $0x708] sm:$0xff]  ;;  %vm3507_vm6 = vweird.f32 %v7824_v37 }
 0x28d   :  { %11104 = vst [vmem:[#allocation87_spill] sm:$0xff] %v7807_v56  ;;  %v7811_v29 = vpop.f32.mrf.mxu3  ;;  %v3485_v61 = vsub.f32 1.5, %v3484_v51  ;;  %v2527_v28 = vsel %vm2472_vm1, %v7807_v56, 0.0  ;;  %v243_v51 = vld [vmem:[%s10950_s0 + $0x710] sm:$0xff] }
 0x28e   :  { %2861 = vadd.xlane.f32.xlu2 %v2860_v1  ;;  %2528 = vadd.xlane.f32.xlu0 %v2527_v28  ;;  %v4489_v1 = vld [vmem:[%s10952_s3] sm:$0xff] }
 0x28f   :  { %v3486_v36 = vmul.f32 %v5958_v4, %v3485_v61 }
 0x291   :  { %1520 = vmatmul.f32.gmra.mxu2 %v235_v8  ;;  %v2011_v40 = vpop.f32.mrf.mxu0  ;;  %v3490_v39 = vsel %vm7826_vm4, %v5958_v4, %v3486_v36  ;;  %v241_v4 = vld [vmem:[%s10950_s0 + $0x700] sm:$0xff] }
 0x292   :  { %1789 = vmatmul.f32.gmra.mxu3 %v236_v57  ;;  %v2280_v7 = vpop.f32.mrf.mxu1  ;;  %v4405_v24 = vmul.f32 %v4321_v62, %v3490_v39  ;;  %v7860_v61 = vpop.eup %5959  ;;  %v249_v39 = vld [vmem:[%s10950_s0 + $0x740] sm:$0xff]  ;;  %v250_v62 = vld [vmem:[%s10950_s0 + $0x748] sm:$0xff] }
 0x293   :  { %v3502_v36 = vmul.f32 %v7860_v61, %v7824_v37  ;;  %vm3508_vm5 = vweird.f32 %v7860_v61 }
 0x294   :  { %v1473_v35 = vpop.f32.mrf.mxu2  ;;  %2058 = vmatmul.f32.gmra.mxu0 %v237_v32  ;;  %5873 = vmatmul.msk.f32.gmra.mxu1 %vm605_vm0, %v238_v34  ;;  %v4573_v42 = vmul.f32 %v4405_v24, %v7731_v11  ;;  %v247_v32 = vld [vmem:[%s10950_s0 + $0x730] sm:$0xff]  ;;  %v248_v34 = vld [vmem:[%s10950_s0 + $0x738] sm:$0xff]  ;;  %vm3509_vm7 = vmor %vm3507_vm6, %vm3508_vm5 }
 0x295   :  { %v1742_v41 = vpop.f32.mrf.mxu3  ;;  %v1474_v59 = vadd.f32 %v1473_v35, %v1205_v49 }
 0x297   :  { %v1743_v43 = vadd.f32 %v1742_v41, %v1474_v59  ;;  %v1211_v41 = vadd.f32 %v6999_v15, %v6997_v21  ;;  %v2478_v59 = vpop.xlane.xlu0 %2477 }
 0x299   :  { %v2012_v50 = vadd.f32 %v2011_v40, %v1743_v43  ;;  %1523 = vmatmul.f32.gmra.mxu2 %v241_v4  ;;  %v7852_v53 = vpop.f32.mrf.mxu0  ;;  %v4657_v40 = vsub.f32 %v4489_v1, %v4573_v42  ;;  %v7894_v42 = vmul.f32 0.020408163, %v2478_v59  ;;  %v255_v1 = vld [vmem:[%s10950_s0 + $0x770] sm:$0xff] }
 0x29a   :  { %1792 = vmatmul.f32.gmra.mxu3 %v242_v5  ;;  %v7865_v28 = vpop.f32.mrf.mxu1  ;;  %v259_v59 = vld [vmem:[%s10950_s0 + $0x790] sm:$0xff] }
 0x29b   :  { %v7867_v8 = vadd.f32 %v2280_v7, %v2012_v50  ;;  %v3503_v7 = vmul.f32 %v7860_v61, %v3502_v36  ;;  %v256_v36 = vld [vmem:[%s10950_s0 + $0x778] sm:$0xff] }
 0x29c   :  { %v7869_v11 = vpop.f32.mrf.mxu2  ;;  %2061 = vmatmul.f32.gmra.mxu0 %v243_v51  ;;  %5874 = vmatmul.msk.f32.gmra.mxu1 %vm605_vm0, %v244_v38  ;;  %v253_v51 = vld [vmem:[%s10950_s0 + $0x760] sm:$0xff] }
 0x29d   :  { %11107 = vst [vmem:[#allocation88_spill] sm:$0xff] %v7867_v8  ;;  %v7871_v57 = vpop.f32.mrf.mxu3  ;;  %v2533_v20 = vsel %vm2472_vm1, %v7867_v8, 0.0  ;;  %v3504_v43 = vmul.f32 0.5, %v3503_v7  ;;  %v3146_v7 = vmul.f32 0.020408163, %v7753_v47  ;;  %v260_v47 = vld [vmem:[%s10950_s0 + $0x798] sm:$0xff] }
 0x29e   :  { %2534 = vadd.xlane.f32.xlu2 %v2533_v20  ;;  %v3230_v20 = vmul.f32 %v7894_v42, %v7894_v42 }
 0x29f   :  { %5247 = vperm.xlu1 %5955, %v4657_v40   ;;  %v3505_v15 = vsub.f32 1.5, %v3504_v43  ;;  %v262_v43 = vld [vmem:[%s10950_s0 + $0x7a8] sm:$0xff] }
 0x2a1   :  { %1526 = vmatmul.f32.gmra.mxu2 %v247_v32  ;;  %v2017_v49 = vpop.f32.mrf.mxu0 }
 0x2a2   :  { %1795 = vmatmul.f32.gmra.mxu3 %v248_v34  ;;  %4743 = vperm.xlu0 %5954, %v4405_v24   ;;  %v2286_v35 = vpop.f32.mrf.mxu1  ;;  %v254_v24 = vld [vmem:[%s10950_s0 + $0x768] sm:$0xff] }
 0x2a4   :  { %v1479_v4 = vpop.f32.mrf.mxu2  ;;  %2064 = vmatmul.f32.gmra.mxu0 %v249_v39  ;;  %5875 = vmatmul.msk.f32.gmra.mxu1 %vm605_vm0, %v250_v62 }
 0x2a5   :  { %v1748_v5 = vpop.f32.mrf.mxu3  ;;  %v1480_v50 = vadd.f32 %v1479_v4, %v1211_v41  ;;  %v3314_v41 = vsub.f32 %v3146_v7, %v3230_v20 }
 0x2a7   :  { %v1749_v38 = vadd.f32 %v1748_v5, %v1480_v50  ;;  %v261_v5 = vld [vmem:[%s10950_s0 + $0x7a0] sm:$0xff]  ;;  %v7941_v50 = vadd.f32 1e-05, %v3314_v41 }
 0x2a9   :  { %v2018_v21 = vadd.f32 %v2017_v49, %v1749_v38  ;;  %1529 = vmatmul.f32.gmra.mxu2 %v253_v51  ;;  %v7910_v40 = vpop.f32.mrf.mxu0  ;;  %v3506_v49 = vmul.f32 %v7860_v61, %v3505_v15  ;;  %5961 = vrsqrt.f32 %v7941_v50  ;;  %vm3497_vm9 = vweird.f32 %v7941_v50 }
 0x2aa   :  { %1798 = vmatmul.f32.gmra.mxu3 %v254_v24  ;;  %v7912_v32 = vpop.f32.mrf.mxu1  ;;  %v1217_v24 = vadd.f32 %v7035_v18, %v7033_v31  ;;  %v266_v18 = vld [vmem:[%s10950_s0 + $0x7c8] sm:$0xff] }
 0x2ab   :  { %v7914_v34 = vadd.f32 %v2286_v35, %v2018_v21  ;;  %v4323_v35 = vld [vmem:[%s10951_s2 + $0x10] sm:$0xff]  ;;  %v3510_v4 = vsel %vm3509_vm7, %v7860_v61, %v3506_v49 }
 0x2ac   :  { %v7917_v39 = vpop.f32.mrf.mxu2  ;;  %2067 = vmatmul.f32.gmra.mxu0 %v255_v1  ;;  %5876 = vmatmul.msk.f32.gmra.mxu1 %vm605_vm0, %v256_v36  ;;  %v7945_v38 = vmul.f32 %v4323_v35, %v3510_v4  ;;  %v1202_v1 = vadd.f32 %v6936_v30, %v6934_v19  ;;  %v265_v36 = vld [vmem:[%s10950_s0 + $0x7c0] sm:$0xff]  ;;  %v267_v30 = vld [vmem:[%s10950_s0 + $0x7d0] sm:$0xff]  ;;  %v268_v19 = vld [vmem:[%s10950_s0 + $0x7d8] sm:$0xff]  ;;  %v7967_v35 = vpop.xlane.xlu0 %2819 }
 0x2ad   :  { %v7919_v62 = vpop.f32.mrf.mxu3 }
 0x2ae   :  { %v1471_v20 = vadd.f32 %v7809_v26, %v1202_v1  ;;  %v274_v1 = vld [vmem:[%s10950_s0 + $0x808] sm:$0xff] }
 0x2af   :  { %v7971_v4 = vpop.eup %5961 }
 0x2b0   :  { %vm3498_vm8 = vweird.f32 %v7971_v4 }
 0x2b1   :  { %1532 = vmatmul.f32.gmra.mxu2 %v259_v59  ;;  %v2023_v37 = vpop.f32.mrf.mxu0  ;;  %v1220_v59 = vadd.f32 %v7053_v54, %v7051_v3  ;;  %v272_v54 = vld [vmem:[%s10950_s0 + $0x7f8] sm:$0xff]  ;;  %v3492_v3 = vmul.f32 %v7971_v4, %v7941_v50  ;;  %vm8045_vm10 = vmor %vm3497_vm9, %vm3498_vm8  ;;  %v286_v50 = vld [vmem:[%s10950_s0 + $0x868] sm:$0xff] }
 0x2b2   :  { %1801 = vmatmul.f32.gmra.mxu3 %v260_v47  ;;  %v2292_v51 = vpop.f32.mrf.mxu1  ;;  %v2484_v47 = vpop.xlane.xlu1 %2483 }
 0x2b4   :  { %v1485_v61 = vpop.f32.mrf.mxu2  ;;  %2070 = vmatmul.f32.gmra.mxu0 %v261_v5  ;;  %5877 = vmatmul.msk.f32.gmra.mxu1 %vm605_vm0, %v262_v43  ;;  %v1740_v5 = vadd.f32 %v7811_v29, %v1471_v20  ;;  %v3493_v20 = vmul.f32 %v7971_v4, %v3492_v3 }
 0x2b5   :  { %v1754_v15 = vpop.f32.mrf.mxu3  ;;  %v1486_v21 = vadd.f32 %v1485_v61, %v1217_v24  ;;  %v271_v61 = vld [vmem:[%s10950_s0 + $0x7f0] sm:$0xff] }
 0x2b6   :  { %4753 = vperm.xlu2 %5956, %v7945_v38   ;;  %v2009_v29 = vadd.f32 %v7797_v6, %v1740_v5 }
 0x2b7   :  { %v1755_v31 = vadd.f32 %v1754_v15, %v1486_v21  ;;  %v273_v21 = vld [vmem:[%s10950_s0 + $0x800] sm:$0xff] }
 0x2b9   :  { %v2024_v7 = vadd.f32 %v2023_v37, %v1755_v31  ;;  %1535 = vmatmul.f32.gmra.mxu2 %v265_v36  ;;  %v2026_v49 = vpop.f32.mrf.mxu0  ;;  %v1223_v31 = vadd.f32 %v7071_v33, %v7069_v44  ;;  %v277_v33 = vld [vmem:[%s10950_s0 + $0x820] sm:$0xff]  ;;  %v3494_v44 = vmul.f32 0.5, %v3493_v20 }
 0x2ba   :  { %1804 = vmatmul.f32.gmra.mxu3 %v266_v18  ;;  %v2295_v41 = vpop.f32.mrf.mxu1 }
 0x2bb   :  { %v7969_v26 = vadd.f32 %v2292_v51, %v2024_v7  ;;  %v7993_v7 = vpop.xlane.xlu0 %2492 }
 0x2bc   :  { %v1488_v43 = vpop.f32.mrf.mxu2  ;;  %2073 = vmatmul.f32.gmra.mxu0 %v267_v30  ;;  %5878 = vmatmul.msk.f32.gmra.mxu1 %vm605_vm0, %v268_v19  ;;  %v7998_v30 = vadd.f32 %v7805_v17, %v2009_v29  ;;  %v2743_v17 = vmul.f32 %v7807_v56, %v7807_v56  ;;  %v11110_v29 = vld [vmem:[#allocation33_spill] sm:$0xff] }
 0x2bd   :  { %11108 = vst [vmem:[#allocation89_spill] sm:$0xff] %v7969_v26  ;;  %v1757_v37 = vpop.f32.mrf.mxu3  ;;  %v1489_v24 = vadd.f32 %v1488_v43, %v1220_v59  ;;  %v8001_v59 = vpop.xlane.xlu1 %2822  ;;  %v11123_v56 = vld [vmem:[#allocation45_spill] sm:$0xff] }
 0x2be   :  { %11109 = vst [vmem:[#allocation90_spill] sm:$0xff] %v7998_v30 }
 0x2bf   :  { %v1758_v51 = vadd.f32 %v1757_v37, %v1489_v24  ;;  %v2530_v37 = vsel %vm2472_vm1, %v7998_v30, 0.0 }
 0x2c1   :  { %v2027_v15 = vadd.f32 %v2026_v49, %v1758_v51  ;;  %1538 = vmatmul.f32.gmra.mxu2 %v271_v61  ;;  %v2029_v36 = vpop.f32.mrf.mxu0  ;;  %v279_v61 = vld [vmem:[%s10950_s0 + $0x830] sm:$0xff]  ;;  %v280_v51 = vld [vmem:[%s10950_s0 + $0x838] sm:$0xff] }
 0x2c2   :  { %1807 = vmatmul.f32.gmra.mxu3 %v272_v54  ;;  %v2298_v18 = vpop.f32.mrf.mxu1 }
 0x2c3   :  { %v7995_v6 = vadd.f32 %v2295_v41, %v2027_v15  ;;  %v278_v41 = vld [vmem:[%s10950_s0 + $0x828] sm:$0xff]  ;;  %v1226_v15 = vadd.f32 %v11110_v29, %v7088_v23  ;;  %v283_v23 = vld [vmem:[%s10950_s0 + $0x850] sm:$0xff] }
 0x2c4   :  { %v1491_v19 = vpop.f32.mrf.mxu2  ;;  %2076 = vmatmul.f32.gmra.mxu0 %v273_v21  ;;  %5879 = vmatmul.msk.f32.gmra.mxu1 %vm605_vm0, %v274_v1  ;;  %v3495_v21 = vsub.f32 1.5, %v3494_v44  ;;  %v11115_v29 = vld [vmem:[#allocation36_spill] sm:$0xff] }
 0x2c5   :  { %v1760_v49 = vpop.f32.mrf.mxu3  ;;  %v1492_v5 = vadd.f32 %v1491_v19, %v1223_v31  ;;  %v8024_v19 = vmul.f32 0.020408163, %v2484_v47  ;;  %v284_v47 = vld [vmem:[%s10950_s0 + $0x858] sm:$0xff] }
 0x2c7   :  { %v1761_v43 = vadd.f32 %v1760_v49, %v1492_v5  ;;  %v8026_v49 = vpop.xlane.xlu1 %2495  ;;  %v8028_v5 = vpop.xlane.xlu0 %2828 }
 0x2c9   :  { %v2030_v24 = vadd.f32 %v2029_v36, %v1761_v43  ;;  %1541 = vmatmul.f32.gmra.mxu2 %v277_v33  ;;  %2531 = vadd.xlane.f32.xlu1 %v2530_v37  ;;  %v2032_v54 = vpop.f32.mrf.mxu0  ;;  %v2863_v36 = vsel %vm2472_vm1, %v2743_v17, 0.0  ;;  %v3232_v43 = vmul.f32 %v8024_v19, %v8024_v19  ;;  %v285_v17 = vld [vmem:[%s10950_s0 + $0x860] sm:$0xff] }
 0x2ca   :  { %1810 = vmatmul.f32.gmra.mxu3 %v278_v41  ;;  %v2301_v3 = vpop.f32.mrf.mxu1 }
 0x2cb   :  { %v8021_v1 = vadd.f32 %v2298_v18, %v2030_v24  ;;  %v3496_v18 = vmul.f32 %v7971_v4, %v3495_v21 }
 0x2cc   :  { %v1494_v31 = vpop.f32.mrf.mxu2  ;;  %2864 = vadd.xlane.f32.xlu0 %v2863_v36  ;;  %2079 = vmatmul.f32.gmra.mxu0 %v279_v61  ;;  %v3148_v36 = vmul.f32 0.020408163, %v7967_v35  ;;  %v290_v35 = vld [vmem:[%s10950_s0 + $0x888] sm:$0xff] }
 0x2cd   :  { %11111 = vst [vmem:[#allocation33_spill] sm:$0xff] %v8021_v1  ;;  %v1763_v20 = vpop.f32.mrf.mxu3  ;;  %v1495_v33 = vadd.f32 %v1494_v31, %v1226_v15  ;;  %5880 = vmatmul.msk.f32.gmra.mxu1 %vm605_vm0, %v280_v51  ;;  %v11114_v51 = vld [vmem:[#allocation35_spill] sm:$0xff]  ;;  %v3500_v21 = vsel %vm8045_vm10, %v7971_v4, %v3496_v18 }
 0x2ce   :  { %v1229_v15 = vadd.f32 %v11115_v29, %v11114_v51  ;;  %v289_v29 = vld [vmem:[%s10950_s0 + $0x880] sm:$0xff] }
 0x2cf   :  { %v1764_v44 = vadd.f32 %v1763_v20, %v1495_v33  ;;  %v8069_v37 = vpop.xlane.xlu1 %2831 }
 0x2d1   :  { %v2033_v41 = vadd.f32 %v2032_v54, %v1764_v44  ;;  %1544 = vmatmul.f32.gmra.mxu2 %v283_v23  ;;  %v2035_v24 = vpop.f32.mrf.mxu0  ;;  %v4322_v54 = vld [vmem:[%s10951_s2 + $0x8] sm:$0xff]  ;;  %v3316_v23 = vsub.f32 %v3148_v36, %v3232_v43  ;;  %v8063_v44 = vpop.xlane.xlu0 %2501  ;;  %v291_v43 = vld [vmem:[%s10950_s0 + $0x890] sm:$0xff] }
 0x2d2   :  { %1813 = vmatmul.f32.gmra.mxu3 %v284_v47  ;;  %v2304_v61 = vpop.f32.mrf.mxu1  ;;  %v4406_v51 = vmul.f32 %v4322_v54, %v3500_v21  ;;  %v292_v54 = vld [vmem:[%s10950_s0 + $0x898] sm:$0xff]  ;;  %v11116_v21 = vld [vmem:[#allocation38_spill] sm:$0xff]  ;;  %v11117_v36 = vld [vmem:[#allocation39_spill] sm:$0xff] }
 0x2d3   :  { %v8061_v31 = vadd.f32 %v2301_v3, %v2033_v41  ;;  %v8074_v3 = vadd.f32 1e-05, %v3316_v23 }
 0x2d4   :  { %v1497_v20 = vpop.f32.mrf.mxu2  ;;  %2082 = vmatmul.f32.gmra.mxu0 %v285_v17  ;;  %v4574_v41 = vmul.f32 %v4406_v51, %v7894_v42  ;;  %v2745_v17 = vmul.f32 %v7867_v8, %v7867_v8  ;;  %v4490_v42 = vld [vmem:[%s10952_s3 + $0x8] sm:$0xff]  ;;  %v301_v8 = vld [vmem:[%s10950_s0 + $0x8e0] sm:$0xff] }
 0x2d5   :  { %v1766_v33 = vpop.f32.mrf.mxu3  ;;  %v1498_v47 = vadd.f32 %v1497_v20, %v1229_v15  ;;  %5881 = vmatmul.msk.f32.gmra.mxu1 %vm605_vm0, %v286_v50  ;;  %v2487_v20 = vpop.xlane.xlu2 %2486  ;;  %5963 = vrsqrt.f32 %v8074_v3  ;;  %vm3517_vm12 = vweird.f32 %v8074_v3 }
 0x2d7   :  { %v1767_v4 = vadd.f32 %v1766_v33, %v1498_v47 }
 0x2d9   :  { %v2036_v18 = vadd.f32 %v2035_v24, %v1767_v4  ;;  %1547 = vmatmul.f32.gmra.mxu2 %v289_v29  ;;  %v2038_v50 = vpop.f32.mrf.mxu0  ;;  %v1232_v24 = vadd.f32 %v11117_v36, %v11116_v21  ;;  %v2869_v4 = vsel %vm2472_vm1, %v2745_v17, 0.0  ;;  %v8100_v21 = vpop.xlane.xlu0 %2837 }
 0x2da   :  { %1816 = vmatmul.f32.gmra.mxu3 %v290_v35  ;;  %v2307_v15 = vpop.f32.mrf.mxu1  ;;  %v4658_v35 = vsub.f32 %v4490_v42, %v4574_v41  ;;  %v297_v41 = vld [vmem:[%s10950_s0 + $0x8c0] sm:$0xff]  ;;  %v298_v42 = vld [vmem:[%s10950_s0 + $0x8c8] sm:$0xff] }
 0x2db   :  { %v8087_v33 = vadd.f32 %v2304_v61, %v2036_v18  ;;  %v295_v61 = vld [vmem:[%s10950_s0 + $0x8b0] sm:$0xff]  ;;  %v8098_v18 = vpop.xlane.xlu1 %2504 }
 0x2dc   :  { %v1500_v23 = vpop.f32.mrf.mxu2  ;;  %2085 = vmatmul.f32.gmra.mxu0 %v291_v43  ;;  %v296_v43 = vld [vmem:[%s10950_s0 + $0x8b8] sm:$0xff] }
 0x2dd   :  { %11118 = vst [vmem:[#allocation35_spill] sm:$0xff] %v8087_v33  ;;  %v1769_v47 = vpop.f32.mrf.mxu3  ;;  %v1501_v29 = vadd.f32 %v1500_v23, %v1232_v24  ;;  %5882 = vmatmul.msk.f32.gmra.mxu1 %vm605_vm0, %v292_v54  ;;  %v8111_v23 = vpop.eup %5963 }
 0x2de   :  { %vm3518_vm11 = vweird.f32 %v8111_v23 }
 0x2df   :  { %v1770_v36 = vadd.f32 %v1769_v47, %v1501_v29  ;;  %2870 = vadd.xlane.f32.xlu2 %v2869_v4  ;;  %v11119_v47 = vld [vmem:[#allocation41_spill] sm:$0xff]  ;;  %v11120_v29 = vld [vmem:[#allocation42_spill] sm:$0xff]  ;;  %vm8195_vm13 = vmor %vm3517_vm12, %vm3518_vm11 }
 0x2e0   :  { %5252 = vperm.xlu0 %5954, %v4658_v35   ;;  %v1235_v4 = vadd.f32 %v11120_v29, %v11119_v47 }
 0x2e1   :  { %v2039_v24 = vadd.f32 %v2038_v50, %v1770_v36  ;;  %1550 = vmatmul.f32.gmra.mxu2 %v295_v61  ;;  %v2041_v17 = vpop.f32.mrf.mxu0  ;;  %v8117_v36 = vpop.xlane.xlu2 %2489 }
 0x2e2   :  { %4748 = vperm.xlu1 %5955, %v4406_v51   ;;  %1819 = vmatmul.f32.gmra.mxu3 %v296_v43  ;;  %v2310_v54 = vpop.f32.mrf.mxu1  ;;  %v3512_v43 = vmul.f32 %v8111_v23, %v8074_v3  ;;  %v8125_v12 = vpop.xlane.xlu0 %2510 }
 0x2e3   :  { %v8115_v35 = vadd.f32 %v2307_v15, %v2039_v24  ;;  %v302_v15 = vld [vmem:[%s10950_s0 + $0x8e8] sm:$0xff]  ;;  %v8130_v24 = vpop.xlane.xlu1 %2840 }
 0x2e4   :  { %v1503_v50 = vpop.f32.mrf.mxu2  ;;  %2088 = vmatmul.f32.gmra.mxu0 %v297_v41  ;;  %v3513_v29 = vmul.f32 %v8111_v23, %v3512_v43 }
 0x2e5   :  { %11121 = vst [vmem:[#allocation36_spill] sm:$0xff] %v8115_v35  ;;  %v1772_v61 = vpop.f32.mrf.mxu3  ;;  %v1504_v51 = vadd.f32 %v1503_v50, %v1235_v4  ;;  %5883 = vmatmul.msk.f32.gmra.mxu1 %vm605_vm0, %v298_v42  ;;  %v303_v42 = vld [vmem:[%s10950_s0 + $0x8f0] sm:$0xff] }
 0x2e6   :  { %v3514_v43 = vmul.f32 0.5, %v3513_v29 }
 0x2e7   :  { %v1773_v47 = vadd.f32 %v1772_v61, %v1504_v51  ;;  %v304_v61 = vld [vmem:[%s10950_s0 + $0x8f8] sm:$0xff]  ;;  %v11122_v51 = vld [vmem:[#allocation44_spill] sm:$0xff] }
 0x2e8   :  { %v1238_v48 = vadd.f32 %v11123_v56, %v11122_v51  ;;  %v308_v56 = vld [vmem:[%s10950_s0 + $0x918] sm:$0xff] }
 0x2e9   :  { %v2042_v41 = vadd.f32 %v2041_v17, %v1773_v47  ;;  %1553 = vmatmul.f32.gmra.mxu2 %v301_v8  ;;  %v2044_v4 = vpop.f32.mrf.mxu0  ;;  %v8143_v17 = vmul.f32 0.020408163, %v2487_v20  ;;  %v8149_v45 = vpop.xlane.xlu2 %2825 }
 0x2ea   :  { %1822 = vmatmul.f32.gmra.mxu3 %v302_v15  ;;  %v2313_v50 = vpop.f32.mrf.mxu1  ;;  %v307_v15 = vld [vmem:[%s10950_s0 + $0x910] sm:$0xff] }
 0x2eb   :  { %v8141_v9 = vadd.f32 %v2310_v54, %v2042_v41  ;;  %v3233_v20 = vmul.f32 %v8143_v17, %v8143_v17  ;;  %v3149_v54 = vmul.f32 0.020408163, %v8001_v59  ;;  %v8159_v41 = vpop.xlane.xlu1 %2513 }
 0x2ec   :  { %v1506_v8 = vpop.f32.mrf.mxu2  ;;  %2091 = vmatmul.f32.gmra.mxu0 %v303_v42  ;;  %v8161_v42 = vpop.xlane.xlu0 %2846 }
 0x2ed   :  { %v1775_v47 = vpop.f32.mrf.mxu3  ;;  %v1507_v27 = vadd.f32 %v1506_v8, %v1238_v48  ;;  %5884 = vmatmul.msk.f32.gmra.mxu1 %vm605_vm0, %v304_v61  ;;  %v4575_v48 = vmul.f32 %v7945_v38, %v7780_v63  ;;  %v4491_v61 = vld [vmem:[%s10952_s3 + $0x10] sm:$0xff]  ;;  %v310_v63 = vld [vmem:[%s10950_s0 + $0x928] sm:$0xff]  ;;  %v3515_v38 = vsub.f32 1.5, %v3514_v43 }
 0x2ee   :  { %v11124_v8 = vld [vmem:[#allocation47_spill] sm:$0xff] }
 0x2ef   :  { %v1776_v60 = vadd.f32 %v1775_v47, %v1507_v27  ;;  %v309_v27 = vld [vmem:[%s10950_s0 + $0x920] sm:$0xff]  ;;  %v11125_v47 = vld [vmem:[#allocation48_spill] sm:$0xff]  ;;  %v4659_v10 = vsub.f32 %v4491_v61, %v4575_v48  ;;  %v3516_v33 = vmul.f32 %v8111_v23, %v3515_v38  ;;  %v11127_v43 = vld [vmem:[#allocation23_spill] sm:$0xff] }
 0x2f0   :  { %v11132_v38 = vld [vmem:[#allocation50_spill] sm:$0xff] }
 0x2f1   :  { %v2045_v29 = vadd.f32 %v2044_v4, %v1776_v60  ;;  %1556 = vmatmul.f32.gmra.mxu2 %v307_v15  ;;  %v2047_v51 = vpop.f32.mrf.mxu0  ;;  %v1241_v60 = vadd.f32 %v11125_v47, %v11124_v8  ;;  %v3317_v15 = vsub.f32 %v3149_v54, %v3233_v20  ;;  %v11128_v8 = vld [vmem:[#allocation24_spill] sm:$0xff]  ;;  %v11133_v47 = vld [vmem:[#allocation51_spill] sm:$0xff] }
 0x2f2   :  { %1825 = vmatmul.f32.gmra.mxu3 %v308_v56  ;;  %v2316_v59 = vpop.f32.mrf.mxu1 }
 0x2f3   :  { %v8174_v4 = vadd.f32 %v2313_v50, %v2045_v29  ;;  %v1208_v50 = vadd.f32 %v11128_v8, %v11127_v43  ;;  %v8184_v29 = vpop.xlane.xlu2 %2498  ;;  %v8189_v54 = vadd.f32 1e-05, %v3317_v15  ;;  %v8213_v15 = vpop.xlane.xlu1 %2849 }
 0x2f4   :  { %v1509_v52 = vpop.f32.mrf.mxu2  ;;  %2094 = vmatmul.f32.gmra.mxu0 %v309_v27  ;;  %v8193_v27 = vpop.xlane.xlu0 %2519 }
 0x2f5   :  { %11126 = vst [vmem:[#allocation38_spill] sm:$0xff] %v8174_v4  ;;  %v1778_v22 = vpop.f32.mrf.mxu3  ;;  %v1510_v56 = vadd.f32 %v1509_v52, %v1241_v60  ;;  %5885 = vmatmul.msk.f32.gmra.mxu1 %vm605_vm0, %v310_v63  ;;  %v314_v52 = vld [vmem:[%s10950_s0 + $0x948] sm:$0xff]  ;;  %v1477_v48 = vadd.f32 %v7869_v11, %v1208_v50  ;;  %v4324_v11 = vld [vmem:[%s10951_s2 + $0x18] sm:$0xff]  ;;  %v1244_v60 = vadd.f32 %v11133_v47, %v11132_v38  ;;  %5965 = vrsqrt.f32 %v8189_v54  ;;  %v11136_v47 = vld [vmem:[#allocation54_spill] sm:$0xff] }
 0x2f6   :  { %11129 = vst [vmem:[#allocation39_spill] sm:$0xff] %v8193_v27  ;;  %v11135_v38 = vld [vmem:[#allocation53_spill] sm:$0xff]  ;;  %vm3527_vm15 = vweird.f32 %v8189_v54 }
 0x2f7   :  { %v1779_v20 = vadd.f32 %v1778_v22, %v1510_v56  ;;  %5257 = vperm.xlu2 %5956, %v4659_v10   ;;  %v315_v10 = vld [vmem:[%s10950_s0 + $0x950] sm:$0xff]  ;;  %v3520_v22 = vsel %vm8195_vm13, %v8111_v23, %v3516_v33  ;;  %v1746_v43 = vadd.f32 %v7871_v57, %v1477_v48  ;;  %v321_v48 = vld [vmem:[%s10950_s0 + $0x980] sm:$0xff] }
 0x2f8   :  { %v8219_v50 = vmul.f32 %v4324_v11, %v3520_v22 }
 0x2f9   :  { %v2048_v61 = vadd.f32 %v2047_v51, %v1779_v20  ;;  %1559 = vmatmul.f32.gmra.mxu2 %v313_v58  ;;  %v2050_v3 = vpop.f32.mrf.mxu0  ;;  %v316_v58 = vld [vmem:[%s10950_s0 + $0x958] sm:$0xff]  ;;  %v319_v20 = vld [vmem:[%s10950_s0 + $0x970] sm:$0xff] }
 0x2fa   :  { %1828 = vmatmul.f32.gmra.mxu3 %v314_v52  ;;  %v2319_v51 = vpop.f32.mrf.mxu1 }
 0x2fb   :  { %v8215_v56 = vadd.f32 %v2316_v59, %v2048_v61  ;;  %v320_v59 = vld [vmem:[%s10950_s0 + $0x978] sm:$0xff]  ;;  %v2015_v61 = vadd.f32 %v7852_v53, %v1746_v43  ;;  %v8230_v63 = vpop.xlane.xlu2 %2834  ;;  %v1247_v53 = vadd.f32 %v11136_v47, %v11135_v38 }
 0x2fc   :  { %v1512_v33 = vpop.f32.mrf.mxu2  ;;  %2097 = vmatmul.f32.gmra.mxu0 %v315_v10  ;;  %v8235_v10 = vpop.eup %5965 }
 0x2fd   :  { %11134 = vst [vmem:[#allocation41_spill] sm:$0xff] %v8215_v56  ;;  %v1781_v23 = vpop.f32.mrf.mxu3  ;;  %v1513_v8 = vadd.f32 %v1512_v33, %v1244_v60  ;;  %5886 = vmatmul.msk.f32.gmra.mxu1 %vm605_vm0, %v316_v58  ;;  %v322_v58 = vld [vmem:[%s10950_s0 + $0x988] sm:$0xff]  ;;  %v8242_v60 = vpop.xlane.xlu1 %2522  ;;  %vm3528_vm14 = vweird.f32 %v8235_v10 }
 0x2fe   :  { %vm8326_vm2 = vmor %vm3527_vm15, %vm3528_vm14 }
 0x2ff   :  { %v1782_v52 = vadd.f32 %v1781_v23, %v1513_v8  ;;  %4758 = vperm.xlu2 %5956, %v8219_v50   ;;  %v3522_v8 = vmul.f32 %v8235_v10, %v8189_v54 }
 0x301   :  { %v2051_v57 = vadd.f32 %v2050_v3, %v1782_v52  ;;  %1562 = vmatmul.f32.gmra.mxu2 %v319_v20  ;;  %v2053_v22 = vpop.f32.mrf.mxu0  ;;  %v8244_v3 = vpop.xlane.xlu0 %2855  ;;  %v8251_v20 = vadd.f32 %v7865_v28, %v2015_v61 }
 0x302   :  { %1831 = vmatmul.f32.gmra.mxu3 %v320_v59  ;;  %v2322_v11 = vpop.f32.mrf.mxu1  ;;  %11137 = vst [vmem:[#allocation42_spill] sm:$0xff] %v8244_v3  ;;  %v325_v59 = vld [vmem:[%s10950_s0 + $0x9a0] sm:$0xff] }
 0x303   :  { %v8246_v33 = vadd.f32 %v2319_v51, %v2051_v57  ;;  %11139 = vst [vmem:[#allocation45_spill] sm:$0xff] %v8251_v20  ;;  %v326_v51 = vld [vmem:[%s10950_s0 + $0x9a8] sm:$0xff]  ;;  %v2744_v57 = vmul.f32 %v7998_v30, %v7998_v30  ;;  %v8263_v47 = vpop.xlane.xlu2 %2507  ;;  %v2536_v61 = vsel %vm2472_vm1, %v8251_v20, 0.0  ;;  %v2746_v3 = vmul.f32 %v8251_v20, %v8251_v20 }
 0x304   :  { %v1515_v23 = vpop.f32.mrf.mxu2  ;;  %2100 = vmatmul.f32.gmra.mxu0 %v321_v48  ;;  %v3523_v48 = vmul.f32 %v8235_v10, %v3522_v8  ;;  %v11140_v8 = vld [vmem:[#allocation56_spill] sm:$0xff] }
 0x305   :  { %11138 = vst [vmem:[#allocation44_spill] sm:$0xff] %v8246_v33  ;;  %v1784_v43 = vpop.f32.mrf.mxu3  ;;  %v1516_v52 = vadd.f32 %v1515_v23, %v1247_v53  ;;  %5887 = vmatmul.msk.f32.gmra.mxu1 %vm605_vm0, %v322_v58  ;;  %v327_v58 = vld [vmem:[%s10950_s0 + $0x9b0] sm:$0xff]  ;;  %v8283_v27 = vpop.xlane.xlu1 %2858 }
 0x307   :  { %v1785_v38 = vadd.f32 %v1784_v43, %v1516_v52  ;;  %v328_v43 = vld [vmem:[%s10950_s0 + $0x9b8] sm:$0xff] }
 0x308   :  { %v11141_v52 = vld [vmem:[#allocation57_spill] sm:$0xff] }
 0x309   :  { %v2054_v28 = vadd.f32 %v2053_v22, %v1785_v38  ;;  %1565 = vmatmul.f32.gmra.mxu2 %v325_v59  ;;  %v2056_v53 = vpop.f32.mrf.mxu0  ;;  %v1250_v30 = vadd.f32 %v11141_v52, %v11140_v8  ;;  %v8275_v22 = vpop.xlane.xlu0 %2528  ;;  %v2866_v38 = vsel %vm2472_vm1, %v2744_v57, 0.0  ;;  %v332_v57 = vld [vmem:[%s10950_s0 + $0x9d8] sm:$0xff]  ;;  %v3150_v8 = vmul.f32 0.020408163, %v8149_v45 }
 0x30a   :  { %2537 = vadd.xlane.f32.xlu0 %v2536_v61  ;;  %1834 = vmatmul.f32.gmra.mxu3 %v326_v51  ;;  %v2325_v23 = vpop.f32.mrf.mxu1  ;;  %11142 = vst [vmem:[#allocation47_spill] sm:$0xff] %v8275_v22  ;;  %v3524_v51 = vmul.f32 0.5, %v3523_v48  ;;  %v2872_v48 = vsel %vm2472_vm1, %v2746_v3, 0.0 }
 0x30b   :  { %v8277_v59 = vadd.f32 %v2322_v11, %v2054_v28  ;;  %v331_v11 = vld [vmem:[%s10950_s0 + $0x9d0] sm:$0xff] }
 0x30c   :  { %v1518_v56 = vpop.f32.mrf.mxu2  ;;  %2867 = vadd.xlane.f32.xlu1 %v2866_v38  ;;  %2103 = vmatmul.f32.gmra.mxu0 %v327_v58  ;;  %v8292_v58 = vmul.f32 0.020408163, %v8117_v36  ;;  %v334_v36 = vld [vmem:[%s10950_s0 + $0x9e8] sm:$0xff] }
 0x30d   :  { %11143 = vst [vmem:[#allocation48_spill] sm:$0xff] %v8277_v59  ;;  %v1787_v4 = vpop.f32.mrf.mxu3  ;;  %v1519_v61 = vadd.f32 %v1518_v56, %v1250_v30  ;;  %5888 = vmatmul.msk.f32.gmra.mxu1 %vm605_vm0, %v328_v43  ;;  %v3525_v30 = vsub.f32 1.5, %v3524_v51  ;;  %v333_v43 = vld [vmem:[%s10950_s0 + $0x9e0] sm:$0xff]  ;;  %v11144_v38 = vld [vmem:[#allocation59_spill] sm:$0xff]  ;;  %v11145_v51 = vld [vmem:[#allocation60_spill] sm:$0xff] }
 0x30e   :  { %v3234_v45 = vmul.f32 %v8292_v58, %v8292_v58 }
 0x30f   :  { %v1788_v28 = vadd.f32 %v1787_v4, %v1519_v61  ;;  %v8304_v61 = vpop.xlane.xlu2 %2843 }
 0x311   :  { %v2057_v56 = vadd.f32 %v2056_v53, %v1788_v28  ;;  %1568 = vmatmul.f32.gmra.mxu2 %v331_v11  ;;  %v2059_v4 = vpop.f32.mrf.mxu0  ;;  %v1253_v53 = vadd.f32 %v11145_v51, %v11144_v38  ;;  %v11147_v11 = vld [vmem:[#allocation27_spill] sm:$0xff]  ;;  %v11148_v28 = vld [vmem:[#allocation28_spill] sm:$0xff]  ;;  %v5248_v38 = vpop.permute.xlu1 %5247  ;;  %v337_v51 = vld [vmem:[%s10950_s0 + $0xa00] sm:$0xff] }
 0x312   :  { %2873 = vadd.xlane.f32.xlu0 %v2872_v48  ;;  %1837 = vmatmul.f32.gmra.mxu3 %v332_v57  ;;  %v2328_v52 = vpop.f32.mrf.mxu1  ;;  %v1214_v20 = vadd.f32 %v11148_v28, %v11147_v11 }
 0x313   :  { %v8306_v3 = vadd.f32 %v2325_v23, %v2057_v56  ;;  %v3526_v23 = vmul.f32 %v8235_v10, %v3525_v30  ;;  %v3318_v56 = vsub.f32 %v3150_v8, %v3234_v45 }
 0x314   :  { %v1521_v57 = vpop.f32.mrf.mxu2  ;;  %v4744_v48 = vpop.permute.xlu0 %4743  ;;  %2106 = vmatmul.f32.gmra.mxu0 %v333_v43  ;;  %v1483_v43 = vadd.f32 %v7917_v39, %v1214_v20  ;;  %v339_v39 = vld [vmem:[%s10950_s0 + $0xa10] sm:$0xff]  ;;  %v4325_v20 = vld [vmem:[%s10951_s2 + $0x20] sm:$0xff] }
 0x315   :  { %11146 = vst [vmem:[#allocation23_spill] sm:$0xff] %v8306_v3  ;;  %v1522_v59 = vadd.f32 %v1521_v57, %v1253_v53  ;;  %v5161_v22 = vmul.f32 %v4744_v48, %v7396_v0  ;;  %v1790_v33 = vpop.f32.mrf.mxu3  ;;  %5889 = vmatmul.msk.f32.gmra.mxu1 %vm605_vm0, %v334_v36  ;;  %v338_v0 = vld [vmem:[%s10950_s0 + $0xa08] sm:$0xff]  ;;  %v11151_v36 = vld [vmem:[#allocation62_spill] sm:$0xff] }
 0x316   :  { %v11152_v53 = vld [vmem:[#allocation63_spill] sm:$0xff]  ;;  %v1752_v57 = vadd.f32 %v7919_v62, %v1483_v43 }
 0x317   :  { %v5665_v11 = vadd.f32 %v5248_v38, %v5161_v22  ;;  %v1791_v28 = vadd.f32 %v1790_v33, %v1522_v59  ;;  %v3530_v33 = vsel %vm8326_vm2, %v8235_v10, %v3526_v23  ;;  %v8343_v22 = vadd.f32 1e-05, %v3318_v56  ;;  %v8351_v48 = vpop.xlane.xlu2 %2516 }
 0x318   :  { %v1256_v45 = vadd.f32 %v11152_v53, %v11151_v36  ;;  %v8355_v56 = vmul.f32 %v4325_v20, %v3530_v33  ;;  %v2021_v62 = vadd.f32 %v7910_v40, %v1752_v57  ;;  %v4493_v40 = vld [vmem:[%s10952_s3 + $0x20] sm:$0xff]  ;;  %v11154_v20 = vld [vmem:[#allocation65_spill] sm:$0xff] }
 0x319   :  { %5749 = vst.msk [vmem:[%s10953_s4] sm:$0xff] %vm2472_vm1, %v5665_v11  ;;  %v2060_v54 = vadd.f32 %v2059_v4, %v1791_v28  ;;  %1571 = vmatmul.f32.gmra.mxu2 %v337_v51  ;;  %v2062_v59 = vpop.f32.mrf.mxu0  ;;  %v340_v4 = vld [vmem:[%s10950_s0 + $0xa18] sm:$0xff]  ;;  %5967 = vrsqrt.f32 %v8343_v22  ;;  %v343_v11 = vld [vmem:[%s10950_s0 + $0xa30] sm:$0xff]  ;;  %v4576_v28 = vmul.f32 %v8219_v50, %v8024_v19  ;;  %v346_v50 = vld [vmem:[%s10950_s0 + $0xa48] sm:$0xff]  ;;  %vm3537_vm4 = vweird.f32 %v8343_v22 }
 0x31a   :  { %1840 = vmatmul.f32.gmra.mxu3 %v338_v0  ;;  %v2331_v8 = vpop.f32.mrf.mxu1  ;;  %v4492_v0 = vld [vmem:[%s10952_s3 + $0x18] sm:$0xff]  ;;  %v4577_v30 = vmul.f32 %v8355_v56, %v8143_v17 }
 0x31b   :  { %v8353_v10 = vadd.f32 %v2328_v52, %v2060_v54  ;;  %v344_v52 = vld [vmem:[%s10950_s0 + $0xa38] sm:$0xff]  ;;  %v4660_v53 = vsub.f32 %v4492_v0, %v4576_v28  ;;  %v351_v0 = vld [vmem:[%s10950_s0 + $0xa70] sm:$0xff] }
 0x31c   :  { %v1524_v23 = vpop.f32.mrf.mxu2  ;;  %2109 = vmatmul.f32.gmra.mxu0 %v339_v39  ;;  %v345_v39 = vld [vmem:[%s10950_s0 + $0xa40] sm:$0xff] }
 0x31d   :  { %11153 = vst [vmem:[#allocation24_spill] sm:$0xff] %v8353_v10  ;;  %v1525_v38 = vadd.f32 %v1524_v23, %v1256_v45  ;;  %v1793_v51 = vpop.f32.mrf.mxu3  ;;  %5890 = vmatmul.msk.f32.gmra.mxu1 %vm605_vm0, %v340_v4  ;;  %v11155_v4 = vld [vmem:[#allocation66_spill] sm:$0xff]  ;;  %v4661_v23 = vsub.f32 %v4493_v40, %v4577_v30  ;;  %v352_v40 = vld [vmem:[%s10950_s0 + $0xa78] sm:$0xff] }
 0x31e   :  { %v1259_v17 = vadd.f32 %v11155_v4, %v11154_v20 }
 0x31f   :  { %v1794_v43 = vadd.f32 %v1793_v51, %v1525_v38  ;;  %v8389_v45 = vpop.eup %5967  ;;  %v8391_v38 = vpop.xlane.xlu2 %2852 }
 0x320   :  { %vm3538_vm3 = vweird.f32 %v8389_v45 }
 0x321   :  { %v2063_v54 = vadd.f32 %v2062_v59, %v1794_v43  ;;  %1574 = vmatmul.f32.gmra.mxu2 %v343_v11  ;;  %v2065_v33 = vpop.f32.mrf.mxu0  ;;  %v8385_v59 = vadd.f32 %v7912_v32, %v2021_v62  ;;  %v349_v32 = vld [vmem:[%s10950_s0 + $0xa60] sm:$0xff]  ;;  %vm3539_vm5 = vmor %vm3537_vm4, %vm3538_vm3 }
 0x322   :  { %1843 = vmatmul.f32.gmra.mxu3 %v344_v52  ;;  %v2334_v19 = vpop.f32.mrf.mxu1  ;;  %v350_v52 = vld [vmem:[%s10950_s0 + $0xa68] sm:$0xff] }
 0x323   :  { %11156 = vst [vmem:[#allocation50_spill] sm:$0xff] %v8385_v59  ;;  %v8387_v36 = vadd.f32 %v2331_v8, %v2063_v54  ;;  %v3532_v8 = vmul.f32 %v8389_v45, %v8343_v22  ;;  %v2542_v43 = vsel %vm2472_vm1, %v8385_v59, 0.0  ;;  %v4326_v22 = vld [vmem:[%s10951_s2 + $0x28] sm:$0xff] }
 0x324   :  { %v1527_v57 = vpop.f32.mrf.mxu2  ;;  %2112 = vmatmul.f32.gmra.mxu0 %v345_v39  ;;  %v11158_v39 = vld [vmem:[#allocation68_spill] sm:$0xff] }
 0x325   :  { %11157 = vst [vmem:[#allocation51_spill] sm:$0xff] %v8387_v36  ;;  %v1528_v51 = vadd.f32 %v1527_v57, %v1259_v17  ;;  %5262 = vperm.xlu1 %5955, %v4660_v53   ;;  %v1796_v11 = vpop.f32.mrf.mxu3  ;;  %5891 = vmatmul.msk.f32.gmra.mxu1 %vm605_vm0, %v346_v50  ;;  %v11159_v50 = vld [vmem:[#allocation69_spill] sm:$0xff]  ;;  %v3533_v4 = vmul.f32 %v8389_v45, %v3532_v8 }
 0x326   :  { %5267 = vperm.xlu0 %5954, %v4661_v23   ;;  %v1262_v20 = vadd.f32 %v11159_v50, %v11158_v39  ;;  %v356_v8 = vld [vmem:[%s10950_s0 + $0xa98] sm:$0xff] }
 0x327   :  { %v1797_v62 = vadd.f32 %v1796_v11, %v1528_v51  ;;  %v8415_v53 = vpop.xlane.xlu2 %2525  ;;  %v355_v51 = vld [vmem:[%s10950_s0 + $0xa90] sm:$0xff]  ;;  %v3534_v11 = vmul.f32 0.5, %v3533_v4 }
 0x328   :  { %2543 = vadd.xlane.f32.xlu2 %v2542_v43 }
 0x329   :  { %v2066_v28 = vadd.f32 %v2065_v33, %v1797_v62  ;;  %1577 = vmatmul.f32.gmra.mxu2 %v349_v32  ;;  %v2068_v30 = vpop.f32.mrf.mxu0  ;;  %v357_v62 = vld [vmem:[%s10950_s0 + $0xaa0] sm:$0xff] }
 0x32a   :  { %1846 = vmatmul.f32.gmra.mxu3 %v350_v52  ;;  %v2337_v54 = vpop.f32.mrf.mxu1 }
 0x32b   :  { %v8413_v17 = vadd.f32 %v2334_v19, %v2066_v28  ;;  %v358_v28 = vld [vmem:[%s10950_s0 + $0xaa8] sm:$0xff] }
 0x32c   :  { %v1530_v33 = vpop.f32.mrf.mxu2  ;;  %2115 = vmatmul.f32.gmra.mxu0 %v351_v0  ;;  %v11161_v0 = vld [vmem:[#allocation71_spill] sm:$0xff] }
 0x32d   :  { %11160 = vst [vmem:[#allocation53_spill] sm:$0xff] %v8413_v17  ;;  %v1531_v57 = vadd.f32 %v1530_v33, %v1262_v20  ;;  %v1799_v23 = vpop.f32.mrf.mxu3  ;;  %5892 = vmatmul.msk.f32.gmra.mxu1 %vm605_vm0, %v352_v40  ;;  %v11162_v40 = vld [vmem:[#allocation72_spill] sm:$0xff]  ;;  %v3535_v20 = vsub.f32 1.5, %v3534_v11 }
 0x32e   :  { %v1265_v39 = vadd.f32 %v11162_v40, %v11161_v0  ;;  %v11164_v0 = vld [vmem:[#allocation74_spill] sm:$0xff]  ;;  %v11165_v40 = vld [vmem:[#allocation75_spill] sm:$0xff] }
 0x32f   :  { %v1800_v32 = vadd.f32 %v1799_v23, %v1531_v57  ;;  %v361_v57 = vld [vmem:[%s10950_s0 + $0xac0] sm:$0xff]  ;;  %v8438_v23 = vpop.xlane.xlu2 %2861 }
 0x331   :  { %v2069_v19 = vadd.f32 %v2068_v30, %v1800_v32  ;;  %1580 = vmatmul.f32.gmra.mxu2 %v355_v51  ;;  %v2071_v43 = vpop.f32.mrf.mxu0  ;;  %v362_v32 = vld [vmem:[%s10950_s0 + $0xac8] sm:$0xff] }
 0x332   :  { %1849 = vmatmul.f32.gmra.mxu3 %v356_v8  ;;  %v2340_v52 = vpop.f32.mrf.mxu1  ;;  %v363_v8 = vld [vmem:[%s10950_s0 + $0xad0] sm:$0xff] }
 0x333   :  { %v8432_v50 = vadd.f32 %v2337_v54, %v2069_v19  ;;  %v3536_v54 = vmul.f32 %v8389_v45, %v3535_v20 }
 0x334   :  { %v1533_v4 = vpop.f32.mrf.mxu2  ;;  %2118 = vmatmul.f32.gmra.mxu0 %v357_v62 }
 0x335   :  { %11163 = vst [vmem:[#allocation54_spill] sm:$0xff] %v8432_v50  ;;  %v1534_v30 = vadd.f32 %v1533_v4, %v1265_v39  ;;  %v1802_v33 = vpop.f32.mrf.mxu3  ;;  %5893 = vmatmul.msk.f32.gmra.mxu1 %vm605_vm0, %v358_v28  ;;  %v364_v28 = vld [vmem:[%s10950_s0 + $0xad8] sm:$0xff]  ;;  %v1268_v39 = vadd.f32 %v11165_v40, %v11164_v0  ;;  %v8461_v4 = vmul.f32 0.020408163, %v8026_v49 }
 0x336   :  { %v368_v49 = vld [vmem:[%s10950_s0 + $0xaf8] sm:$0xff] }
 0x337   :  { %v1803_v51 = vadd.f32 %v1802_v33, %v1534_v30 }
 0x339   :  { %v2072_v11 = vadd.f32 %v2071_v43, %v1803_v51  ;;  %1583 = vmatmul.f32.gmra.mxu2 %v361_v57  ;;  %v2074_v19 = vpop.f32.mrf.mxu0  ;;  %v3540_v43 = vsel %vm3539_vm5, %v8389_v45, %v3536_v54  ;;  %v3152_v51 = vmul.f32 0.020408163, %v8069_v37  ;;  %v367_v45 = vld [vmem:[%s10950_s0 + $0xaf0] sm:$0xff]  ;;  %v369_v37 = vld [vmem:[%s10950_s0 + $0xb00] sm:$0xff] }
 0x33a   :  { %1852 = vmatmul.f32.gmra.mxu3 %v362_v32  ;;  %v2343_v62 = vpop.f32.mrf.mxu1  ;;  %v8465_v32 = vmul.f32 %v4326_v22, %v3540_v43 }
 0x33b   :  { %v8454_v20 = vadd.f32 %v2340_v52, %v2072_v11  ;;  %v8470_v52 = vpop.xlane.xlu2 %2534  ;;  %v3236_v11 = vmul.f32 %v8461_v4, %v8461_v4 }
 0x33c   :  { %v1536_v30 = vpop.f32.mrf.mxu2  ;;  %2121 = vmatmul.f32.gmra.mxu0 %v363_v8  ;;  %11167 = vst [vmem:[#allocation57_spill] sm:$0xff] %v8470_v52  ;;  %v11173_v52 = vld [vmem:[#allocation4_spill] sm:$0xff] }
 0x33d   :  { %11166 = vst [vmem:[#allocation56_spill] sm:$0xff] %v8454_v20  ;;  %v1537_v33 = vadd.f32 %v1536_v30, %v1268_v39  ;;  %v1805_v57 = vpop.f32.mrf.mxu3  ;;  %5894 = vmatmul.msk.f32.gmra.mxu1 %vm605_vm0, %v364_v28  ;;  %v3320_v28 = vsub.f32 %v3152_v51, %v3236_v11  ;;  %v370_v39 = vld [vmem:[%s10950_s0 + $0xb08] sm:$0xff]  ;;  %v11169_v30 = vld [vmem:[#allocation2_spill] sm:$0xff]  ;;  %v375_v11 = vld [vmem:[%s10950_s0 + $0xb30] sm:$0xff] }
 0x33e   :  { %v373_v51 = vld [vmem:[%s10950_s0 + $0xb20] sm:$0xff] }
 0x33f   :  { %v1806_v54 = vadd.f32 %v1805_v57, %v1537_v33  ;;  %v8488_v57 = vadd.f32 1e-05, %v3320_v28  ;;  %v376_v28 = vld [vmem:[%s10950_s0 + $0xb38] sm:$0xff] }
 0x340   :  { %4768 = vperm.xlu2 %5956, %v8465_v32  }
 0x341   :  { %v2075_v8 = vadd.f32 %v2074_v19, %v1806_v54  ;;  %1586 = vmatmul.f32.gmra.mxu2 %v367_v45  ;;  %v2077_v0 = vpop.f32.mrf.mxu0  ;;  %v374_v54 = vld [vmem:[%s10950_s0 + $0xb28] sm:$0xff]  ;;  %5969 = vrsqrt.f32 %v8488_v57  ;;  %vm3557_vm7 = vweird.f32 %v8488_v57 }
 0x342   :  { %1855 = vmatmul.f32.gmra.mxu3 %v368_v49  ;;  %v2346_v40 = vpop.f32.mrf.mxu1 }
 0x343   :  { %v8484_v43 = vadd.f32 %v2343_v62, %v2075_v8  ;;  %v4754_v62 = vpop.permute.xlu2 %4753 }
 0x344   :  { %v1539_v22 = vpop.f32.mrf.mxu2  ;;  %2124 = vmatmul.f32.gmra.mxu0 %v369_v37 }
 0x345   :  { %11168 = vst [vmem:[#allocation59_spill] sm:$0xff] %v8484_v43  ;;  %v1540_v33 = vadd.f32 %v1539_v22, %v11169_v30  ;;  %v1808_v19 = vpop.f32.mrf.mxu3  ;;  %5895 = vmatmul.msk.f32.gmra.mxu1 %vm605_vm0, %v370_v39  ;;  %v8505_v22 = vpop.xlane.xlu1 %2531 }
 0x347   :  { %v1809_v45 = vadd.f32 %v1808_v19, %v1540_v33 }
 0x349   :  { %v2078_v49 = vadd.f32 %v2077_v0, %v1809_v45  ;;  %1589 = vmatmul.f32.gmra.mxu2 %v373_v51  ;;  %v2080_v8 = vpop.f32.mrf.mxu0  ;;  %v11170_v0 = vld [vmem:[#allocation3_spill] sm:$0xff]  ;;  %v8509_v51 = vpop.xlane.xlu0 %2864  ;;  %v2539_v45 = vsel %vm2472_vm1, %v7914_v34, 0.0 }
 0x34a   :  { %1858 = vmatmul.f32.gmra.mxu3 %v374_v54  ;;  %v2349_v37 = vpop.f32.mrf.mxu1  ;;  %v379_v54 = vld [vmem:[%s10950_s0 + $0xb50] sm:$0xff] }
 0x34b   :  { %v8503_v39 = vadd.f32 %v2346_v40, %v2078_v49  ;;  %v2545_v49 = vsel %vm2472_vm1, %v7969_v26, 0.0 }
 0x34c   :  { %v1542_v30 = vpop.f32.mrf.mxu2  ;;  %2127 = vmatmul.f32.gmra.mxu0 %v375_v11  ;;  %v380_v11 = vld [vmem:[%s10950_s0 + $0xb58] sm:$0xff] }
 0x34d   :  { %v1543_v33 = vadd.f32 %v1542_v30, %v11170_v0  ;;  %v1811_v19 = vpop.f32.mrf.mxu3  ;;  %5896 = vmatmul.msk.f32.gmra.mxu1 %vm605_vm0, %v376_v28  ;;  %v8521_v30 = vpop.eup %5969  ;;  %v381_v0 = vld [vmem:[%s10950_s0 + $0xb60] sm:$0xff] }
 0x34e   :  { %vm3558_vm6 = vweird.f32 %v8521_v30 }
 0x34f   :  { %v1812_v40 = vadd.f32 %v1811_v19, %v1543_v33  ;;  %2540 = vadd.xlane.f32.xlu1 %v2539_v45  ;;  %v382_v33 = vld [vmem:[%s10950_s0 + $0xb68] sm:$0xff]  ;;  %v3552_v19 = vmul.f32 %v8521_v30, %v8488_v57  ;;  %vm3559_vm8 = vmor %vm3557_vm7, %vm3558_vm6 }
 0x350   :  { %2546 = vadd.xlane.f32.xlu0 %v2545_v49 }
 0x351   :  { %v2081_v28 = vadd.f32 %v2080_v8, %v1812_v40  ;;  %1592 = vmatmul.f32.gmra.mxu2 %v379_v54  ;;  %v2083_v17 = vpop.f32.mrf.mxu0  ;;  %v2749_v8 = vmul.f32 %v7969_v26, %v7969_v26 }
 0x352   :  { %v8526_v43 = vpop.xlane.xlu2 %2870  ;;  %1861 = vmatmul.f32.gmra.mxu3 %v380_v11  ;;  %v2352_v54 = vpop.f32.mrf.mxu1 }
 0x353   :  { %11171 = vst [vmem:[#allocation60_spill] sm:$0xff] %v8526_v43  ;;  %v8533_v45 = vadd.f32 %v2349_v37, %v2081_v28  ;;  %v5253_v3 = vpop.permute.xlu0 %5252  ;;  %v385_v37 = vld [vmem:[%s10950_s0 + $0xb80] sm:$0xff]  ;;  %v3553_v28 = vmul.f32 %v8521_v30, %v3552_v19  ;;  %v2881_v36 = vsel %vm2472_vm1, %v2749_v8, 0.0 }
 0x354   :  { %v1545_v40 = vpop.f32.mrf.mxu2  ;;  %v4749_v49 = vpop.permute.xlu1 %4748  ;;  %2130 = vmatmul.f32.gmra.mxu0 %v381_v0 }
 0x355   :  { %11172 = vst [vmem:[#allocation27_spill] sm:$0xff] %v8533_v45  ;;  %v1546_v43 = vadd.f32 %v1545_v40, %v11173_v52  ;;  %v5162_v11 = vmul.f32 %v4749_v49, %v7417_v55  ;;  %v1814_v20 = vpop.f32.mrf.mxu3  ;;  %5897 = vmatmul.msk.f32.gmra.mxu1 %vm605_vm0, %v382_v33  ;;  %v386_v52 = vld [vmem:[%s10950_s0 + $0xb88] sm:$0xff]  ;;  %v5163_v55 = vmul.f32 %v4754_v62, %v7438_v13  ;;  %v392_v49 = vld [vmem:[%s10950_s0 + $0xbb8] sm:$0xff] }
 0x357   :  { %v5666_v45 = vadd.f32 %v5253_v3, %v5162_v11  ;;  %v1815_v26 = vadd.f32 %v1814_v20, %v1546_v43  ;;  %v387_v3 = vld [vmem:[%s10950_s0 + $0xb90] sm:$0xff]  ;;  %v388_v43 = vld [vmem:[%s10950_s0 + $0xb98] sm:$0xff] }
 0x358   :  { %2882 = vadd.xlane.f32.xlu0 %v2881_v36  ;;  %v3554_v36 = vmul.f32 0.5, %v3553_v28  ;;  %v393_v28 = vld [vmem:[%s10950_s0 + $0xbc0] sm:$0xff] }
 0x359   :  { %5750 = vst.msk [vmem:[%s10953_s4 + $0x8] sm:$0xff] %vm2472_vm1, %v5666_v45  ;;  %v2084_v0 = vadd.f32 %v2083_v17, %v1815_v26  ;;  %1595 = vmatmul.f32.gmra.mxu2 %v385_v37  ;;  %v2086_v62 = vpop.f32.mrf.mxu0  ;;  %v11175_v26 = vld [vmem:[#allocation5_spill] sm:$0xff] }
 0x35a   :  { %v5258_v20 = vpop.permute.xlu2 %5257  ;;  %1864 = vmatmul.f32.gmra.mxu3 %v386_v52  ;;  %v2355_v19 = vpop.f32.mrf.mxu1  ;;  %v3555_v11 = vsub.f32 1.5, %v3554_v36  ;;  %v394_v52 = vld [vmem:[%s10950_s0 + $0xbc8] sm:$0xff]  ;;  %v2748_v36 = vmul.f32 %v8385_v59, %v8385_v59  ;;  %v11206_v59 = vld [vmem:[#allocation21_spill] sm:$0xff] }
 0x35b   :  { %v8559_v33 = vadd.f32 %v2352_v54, %v2084_v0  ;;  %v5667_v13 = vadd.f32 %v5258_v20, %v5163_v55  ;;  %v391_v54 = vld [vmem:[%s10950_s0 + $0xbb0] sm:$0xff] }
 0x35c   :  { %v1548_v8 = vpop.f32.mrf.mxu2  ;;  %2133 = vmatmul.f32.gmra.mxu0 %v387_v3  ;;  %v3556_v20 = vmul.f32 %v8521_v30, %v3555_v11  ;;  %v2878_v57 = vsel %vm2472_vm1, %v2748_v36, 0.0  ;;  %v403_v36 = vld [vmem:[%s10950_s0 + $0xc10] sm:$0xff] }
 0x35d   :  { %11174 = vst [vmem:[#allocation28_spill] sm:$0xff] %v8559_v33  ;;  %v1549_v17 = vadd.f32 %v1548_v8, %v11175_v26  ;;  %v1817_v45 = vpop.f32.mrf.mxu3  ;;  %5898 = vmatmul.msk.f32.gmra.mxu1 %vm605_vm0, %v388_v43 }
 0x35e   :  { %5751 = vst.msk [vmem:[%s10953_s4 + $0x10] sm:$0xff] %vm2472_vm1, %v5667_v13  ;;  %v11176_v13 = vld [vmem:[#allocation6_spill] sm:$0xff] }
 0x35f   :  { %v1818_v40 = vadd.f32 %v1817_v45, %v1549_v17  ;;  %v398_v17 = vld [vmem:[%s10950_s0 + $0xbe8] sm:$0xff]  ;;  %v3560_v45 = vsel %vm3559_vm8, %v8521_v30, %v3556_v20  ;;  %v400_v30 = vld [vmem:[%s10950_s0 + $0xbf8] sm:$0xff] }
 0x361   :  { %v2087_v37 = vadd.f32 %v2086_v62, %v1818_v40  ;;  %1598 = vmatmul.f32.gmra.mxu2 %v391_v54  ;;  %v2089_v0 = vpop.f32.mrf.mxu0  ;;  %v4328_v54 = vld [vmem:[%s10951_s2 + $0x38] sm:$0xff] }
 0x362   :  { %1867 = vmatmul.f32.gmra.mxu3 %v392_v49  ;;  %v2358_v3 = vpop.f32.mrf.mxu1  ;;  %v399_v49 = vld [vmem:[%s10950_s0 + $0xbf0] sm:$0xff]  ;;  %v4412_v11 = vmul.f32 %v4328_v54, %v3560_v45 }
 0x363   :  { %v8579_v55 = vadd.f32 %v2355_v19, %v2087_v37  ;;  %v397_v19 = vld [vmem:[%s10950_s0 + $0xbe0] sm:$0xff] }
 0x364   :  { %v1551_v43 = vpop.f32.mrf.mxu2  ;;  %2136 = vmatmul.f32.gmra.mxu0 %v393_v28 }
 0x365   :  { %v1552_v62 = vadd.f32 %v1551_v43, %v11176_v13  ;;  %v1820_v8 = vpop.f32.mrf.mxu3  ;;  %5899 = vmatmul.msk.f32.gmra.mxu1 %vm605_vm0, %v394_v52  ;;  %v4580_v13 = vmul.f32 %v4412_v11, %v8461_v4  ;;  %v406_v4 = vld [vmem:[%s10950_s0 + $0xc28] sm:$0xff] }
 0x367   :  { %v1821_v26 = vadd.f32 %v1820_v8, %v1552_v62  ;;  %v4496_v8 = vld [vmem:[%s10952_s3 + $0x38] sm:$0xff] }
 0x368   :  { %4763 = vperm.xlu1 %5955, %v8355_v56  }
 0x369   :  { %v2090_v40 = vadd.f32 %v2089_v0, %v1821_v26  ;;  %1601 = vmatmul.f32.gmra.mxu2 %v397_v19  ;;  %2879 = vadd.xlane.f32.xlu2 %v2878_v57  ;;  %v2092_v28 = vpop.f32.mrf.mxu0  ;;  %v11177_v0 = vld [vmem:[#allocation7_spill] sm:$0xff]  ;;  %v405_v26 = vld [vmem:[%s10950_s0 + $0xc20] sm:$0xff] }
 0x36a   :  { %1870 = vmatmul.f32.gmra.mxu3 %v398_v17  ;;  %v2361_v52 = vpop.f32.mrf.mxu1  ;;  %v4664_v17 = vsub.f32 %v4496_v8, %v4580_v13 }
 0x36b   :  { %v8606_v37 = vadd.f32 %v2358_v3, %v2090_v40  ;;  %v404_v3 = vld [vmem:[%s10950_s0 + $0xc18] sm:$0xff] }
 0x36c   :  { %v1554_v56 = vpop.f32.mrf.mxu2  ;;  %4778 = vperm.xlu0 %5954, %v4412_v11   ;;  %2139 = vmatmul.f32.gmra.mxu0 %v399_v49  ;;  %v11179_v49 = vld [vmem:[#allocation8_spill] sm:$0xff] }
 0x36d   :  { %v1555_v20 = vadd.f32 %v1554_v56, %v11177_v0  ;;  %v1823_v43 = vpop.f32.mrf.mxu3  ;;  %5900 = vmatmul.msk.f32.gmra.mxu1 %vm605_vm0, %v400_v30 }
 0x36f   :  { %v1824_v62 = vadd.f32 %v1823_v43, %v1555_v20  ;;  %v411_v20 = vld [vmem:[%s10950_s0 + $0xc50] sm:$0xff]  ;;  %v8640_v43 = vmul.f32 0.020408163, %v7993_v7  ;;  %v4494_v7 = vld [vmem:[%s10952_s3 + $0x28] sm:$0xff] }
 0x371   :  { %v2093_v19 = vadd.f32 %v2092_v28, %v1824_v62  ;;  %1604 = vmatmul.f32.gmra.mxu2 %v403_v36  ;;  %v2095_v54 = vpop.f32.mrf.mxu0  ;;  %v409_v28 = vld [vmem:[%s10950_s0 + $0xc40] sm:$0xff]  ;;  %v412_v36 = vld [vmem:[%s10950_s0 + $0xc58] sm:$0xff] }
 0x372   :  { %1873 = vmatmul.f32.gmra.mxu3 %v404_v3  ;;  %v2364_v57 = vpop.f32.mrf.mxu1  ;;  %v4578_v3 = vmul.f32 %v8465_v32, %v8292_v58  ;;  %v415_v58 = vld [vmem:[%s10950_s0 + $0xc70] sm:$0xff] }
 0x373   :  { %v8626_v45 = vadd.f32 %v2361_v52, %v2093_v19  ;;  %v410_v52 = vld [vmem:[%s10950_s0 + $0xc48] sm:$0xff]  ;;  %v3151_v19 = vmul.f32 0.020408163, %v8028_v5 }
 0x374   :  { %v1557_v40 = vpop.f32.mrf.mxu2  ;;  %5282 = vperm.xlu0 %5954, %v4664_v17   ;;  %2142 = vmatmul.f32.gmra.mxu0 %v405_v26  ;;  %v11180_v17 = vld [vmem:[#allocation9_spill] sm:$0xff]  ;;  %v4662_v5 = vsub.f32 %v4494_v7, %v4578_v3 }
 0x375   :  { %11178 = vst [vmem:[#allocation62_spill] sm:$0xff] %v8626_v45  ;;  %v1558_v11 = vadd.f32 %v1557_v40, %v11179_v49  ;;  %v1826_v30 = vpop.f32.mrf.mxu3  ;;  %5901 = vmatmul.msk.f32.gmra.mxu1 %vm605_vm0, %v406_v4  ;;  %v416_v40 = vld [vmem:[%s10950_s0 + $0xc78] sm:$0xff] }
 0x377   :  { %v1827_v56 = vadd.f32 %v1826_v30, %v1558_v11  ;;  %v417_v30 = vld [vmem:[%s10950_s0 + $0xc80] sm:$0xff] }
 0x379   :  { %v2096_v0 = vadd.f32 %v2095_v54, %v1827_v56  ;;  %1607 = vmatmul.f32.gmra.mxu2 %v409_v28  ;;  %v2098_v62 = vpop.f32.mrf.mxu0  ;;  %v418_v28 = vld [vmem:[%s10950_s0 + $0xc88] sm:$0xff] }
 0x37a   :  { %1876 = vmatmul.f32.gmra.mxu3 %v410_v52  ;;  %v2367_v8 = vpop.f32.mrf.mxu1 }
 0x37b   :  { %v8645_v13 = vadd.f32 %v2364_v57, %v2096_v0  ;;  %v3235_v57 = vmul.f32 %v8640_v43, %v8640_v43 }
 0x37c   :  { %v1560_v26 = vpop.f32.mrf.mxu2  ;;  %2145 = vmatmul.f32.gmra.mxu0 %v411_v20 }
 0x37d   :  { %v1561_v4 = vadd.f32 %v1560_v26, %v11180_v17  ;;  %v1829_v54 = vpop.f32.mrf.mxu3  ;;  %5902 = vmatmul.msk.f32.gmra.mxu1 %vm605_vm0, %v412_v36  ;;  %v3319_v49 = vsub.f32 %v3151_v19, %v3235_v57  ;;  %v421_v26 = vld [vmem:[%s10950_s0 + $0xca0] sm:$0xff]  ;;  %v424_v57 = vld [vmem:[%s10950_s0 + $0xcb8] sm:$0xff] }
 0x37f   :  { %v1830_v32 = vadd.f32 %v1829_v54, %v1561_v4  ;;  %v8671_v20 = vadd.f32 1e-05, %v3319_v49  ;;  %v423_v4 = vld [vmem:[%s10950_s0 + $0xcb0] sm:$0xff]  ;;  %v8686_v54 = vmul.f32 0.020408163, %v8098_v18  ;;  %v2747_v18 = vmul.f32 %v7914_v34, %v7914_v34 }
 0x381   :  { %v2099_v11 = vadd.f32 %v2098_v62, %v1830_v32  ;;  %1610 = vmatmul.f32.gmra.mxu2 %v415_v58  ;;  %5272 = vperm.xlu2 %5956, %v4662_v5   ;;  %v2101_v52 = vpop.f32.mrf.mxu0  ;;  %v11182_v62 = vld [vmem:[#allocation10_spill] sm:$0xff]  ;;  %5971 = vrsqrt.f32 %v8671_v20  ;;  %vm3547_vm10 = vweird.f32 %v8671_v20 }
 0x382   :  { %1879 = vmatmul.f32.gmra.mxu3 %v416_v40  ;;  %v2370_v0 = vpop.f32.mrf.mxu1  ;;  %v3155_v40 = vmul.f32 0.020408163, %v8130_v24  ;;  %v8705_v24 = vpop.xlane.xlu1 %2867 }
 0x383   :  { %v8669_v56 = vadd.f32 %v2367_v8, %v2099_v11  ;;  %v422_v8 = vld [vmem:[%s10950_s0 + $0xca8] sm:$0xff] }
 0x384   :  { %v1563_v36 = vpop.f32.mrf.mxu2  ;;  %2148 = vmatmul.f32.gmra.mxu0 %v417_v30  ;;  %v11184_v11 = vld [vmem:[#allocation11_spill] sm:$0xff] }
 0x385   :  { %11181 = vst [vmem:[#allocation63_spill] sm:$0xff] %v8669_v56  ;;  %v1564_v3 = vadd.f32 %v1563_v36, %v11182_v62  ;;  %v1832_v19 = vpop.f32.mrf.mxu3  ;;  %5903 = vmatmul.msk.f32.gmra.mxu1 %vm605_vm0, %v418_v28  ;;  %v427_v36 = vld [vmem:[%s10950_s0 + $0xcd0] sm:$0xff] }
 0x387   :  { %v1833_v7 = vadd.f32 %v1832_v19, %v1564_v3  ;;  %v428_v3 = vld [vmem:[%s10950_s0 + $0xcd8] sm:$0xff] }
 0x389   :  { %v2102_v17 = vadd.f32 %v2101_v52, %v1833_v7  ;;  %1613 = vmatmul.f32.gmra.mxu2 %v421_v26  ;;  %v2104_v32 = vpop.f32.mrf.mxu0  ;;  %v8698_v52 = vpop.eup %5971 }
 0x38a   :  { %1882 = vmatmul.f32.gmra.mxu3 %v422_v8  ;;  %v2373_v5 = vpop.f32.mrf.mxu1  ;;  %v3542_v26 = vmul.f32 %v8698_v52, %v8671_v20  ;;  %v2875_v8 = vsel %vm2472_vm1, %v2747_v18, 0.0  ;;  %vm3548_vm9 = vweird.f32 %v8698_v52 }
 0x38b   :  { %v8691_v58 = vadd.f32 %v2370_v0, %v2102_v17  ;;  %v3239_v0 = vmul.f32 %v8686_v54, %v8686_v54  ;;  %v429_v17 = vld [vmem:[%s10950_s0 + $0xce0] sm:$0xff]  ;;  %vm3549_vm11 = vmor %vm3547_vm10, %vm3548_vm9 }
 0x38c   :  { %v1566_v49 = vpop.f32.mrf.mxu2  ;;  %2151 = vmatmul.f32.gmra.mxu0 %v423_v4  ;;  %v8717_v4 = vmul.f32 0.020408163, %v8184_v29  ;;  %v3543_v29 = vmul.f32 %v8698_v52, %v3542_v26  ;;  %v434_v26 = vld [vmem:[%s10950_s0 + $0xd08] sm:$0xff] }
 0x38d   :  { %11183 = vst [vmem:[#allocation65_spill] sm:$0xff] %v8691_v58  ;;  %v1567_v30 = vadd.f32 %v1566_v49, %v11184_v11  ;;  %v1835_v28 = vpop.f32.mrf.mxu3  ;;  %5904 = vmatmul.msk.f32.gmra.mxu1 %vm605_vm0, %v424_v57  ;;  %v3323_v19 = vsub.f32 %v3155_v40, %v3239_v0  ;;  %v4759_v57 = vpop.permute.xlu2 %4758  ;;  %v430_v40 = vld [vmem:[%s10950_s0 + $0xce8] sm:$0xff]  ;;  %v11186_v0 = vld [vmem:[#allocation12_spill] sm:$0xff] }
 0x38f   :  { %v1836_v62 = vadd.f32 %v1835_v28, %v1567_v30  ;;  %v3153_v30 = vmul.f32 0.020408163, %v8230_v63  ;;  %v8725_v28 = vadd.f32 1e-05, %v3323_v19  ;;  %v433_v63 = vld [vmem:[%s10950_s0 + $0xd00] sm:$0xff] }
 0x391   :  { %v2105_v7 = vadd.f32 %v2104_v32, %v1836_v62  ;;  %1616 = vmatmul.f32.gmra.mxu2 %v427_v36  ;;  %v2107_v32 = vpop.f32.mrf.mxu0  ;;  %5973 = vrsqrt.f32 %v8725_v28  ;;  %vm3587_vm13 = vweird.f32 %v8725_v28 }
 0x392   :  { %2876 = vadd.xlane.f32.xlu1 %v2875_v8  ;;  %1885 = vmatmul.f32.gmra.mxu3 %v428_v3  ;;  %v2376_v11 = vpop.f32.mrf.mxu1  ;;  %v3237_v3 = vmul.f32 %v8717_v4, %v8717_v4 }
 0x393   :  { %v8722_v49 = vadd.f32 %v2373_v5, %v2105_v7  ;;  %v5164_v5 = vmul.f32 %v4759_v57, %v7462_v46  ;;  %v435_v46 = vld [vmem:[%s10950_s0 + $0xd10] sm:$0xff]  ;;  %v436_v57 = vld [vmem:[%s10950_s0 + $0xd18] sm:$0xff] }
 0x394   :  { %v1569_v18 = vpop.f32.mrf.mxu2  ;;  %2154 = vmatmul.f32.gmra.mxu0 %v429_v17  ;;  %v3321_v8 = vsub.f32 %v3153_v30, %v3237_v3 }
 0x395   :  { %11185 = vst [vmem:[#allocation66_spill] sm:$0xff] %v8722_v49  ;;  %v1570_v36 = vadd.f32 %v1569_v18, %v11186_v0  ;;  %v1838_v62 = vpop.f32.mrf.mxu3  ;;  %5905 = vmatmul.msk.f32.gmra.mxu1 %vm605_vm0, %v430_v40  ;;  %v3544_v40 = vmul.f32 0.5, %v3543_v29 }
 0x396   :  { %v8752_v29 = vadd.f32 1e-05, %v3321_v8  ;;  %v440_v8 = vld [vmem:[%s10950_s0 + $0xd38] sm:$0xff] }
 0x397   :  { %v1839_v19 = vadd.f32 %v1838_v62, %v1570_v36  ;;  %v5263_v7 = vpop.permute.xlu1 %5262  ;;  %v11188_v62 = vld [vmem:[#allocation13_spill] sm:$0xff] }
 0x398   :  { %v5668_v17 = vadd.f32 %v5263_v7, %v5164_v5  ;;  %v8758_v7 = vpop.eup %5973  ;;  %5975 = vrsqrt.f32 %v8752_v29  ;;  %vm3567_vm2 = vweird.f32 %v8752_v29 }
 0x399   :  { %v2108_v18 = vadd.f32 %v2107_v32, %v1839_v19  ;;  %1619 = vmatmul.f32.gmra.mxu2 %v433_v63  ;;  %v2110_v0 = vpop.f32.mrf.mxu0  ;;  %v2554_v63 = vsel %vm2472_vm1, %v8061_v31, 0.0  ;;  %v3545_v19 = vsub.f32 1.5, %v3544_v40  ;;  %vm3588_vm12 = vweird.f32 %v8758_v7 }
 0x39a   :  { %5752 = vst.msk [vmem:[%s10953_s4 + $0x18] sm:$0xff] %vm2472_vm1, %v5668_v17  ;;  %1888 = vmatmul.f32.gmra.mxu3 %v434_v26  ;;  %v2379_v36 = vpop.f32.mrf.mxu1  ;;  %v3582_v17 = vmul.f32 %v8758_v7, %v8725_v28  ;;  %vm3589_vm14 = vmor %vm3587_vm13, %vm3588_vm12  ;;  %v457_v28 = vld [vmem:[%s10950_s0 + $0xdc0] sm:$0xff] }
 0x39b   :  { %v8750_v30 = vadd.f32 %v2376_v11, %v2108_v18  ;;  %v439_v11 = vld [vmem:[%s10950_s0 + $0xd30] sm:$0xff]  ;;  %v2752_v18 = vmul.f32 %v8061_v31, %v8061_v31 }
 0x39c   :  { %v1572_v32 = vpop.f32.mrf.mxu2  ;;  %2157 = vmatmul.f32.gmra.mxu0 %v435_v46  ;;  %v441_v46 = vld [vmem:[%s10950_s0 + $0xd40] sm:$0xff] }
 0x39d   :  { %11187 = vst [vmem:[#allocation68_spill] sm:$0xff] %v8750_v30  ;;  %v1573_v3 = vadd.f32 %v1572_v32, %v11188_v62  ;;  %v1841_v5 = vpop.f32.mrf.mxu3  ;;  %5906 = vmatmul.msk.f32.gmra.mxu1 %vm605_vm0, %v436_v57  ;;  %v3546_v57 = vmul.f32 %v8698_v52, %v3545_v19  ;;  %v442_v32 = vld [vmem:[%s10950_s0 + $0xd48] sm:$0xff]  ;;  %v11208_v30 = vld [vmem:[#allocation22_spill] sm:$0xff] }
 0x39e   :  { %2555 = vadd.xlane.f32.xlu0 %v2554_v63  ;;  %v3583_v63 = vmul.f32 %v8758_v7, %v3582_v17  ;;  %v8792_v20 = vpop.eup %5975  ;;  %v445_v17 = vld [vmem:[%s10950_s0 + $0xd60] sm:$0xff] }
 0x39f   :  { %v1842_v26 = vadd.f32 %v1841_v5, %v1573_v3  ;;  %v3550_v58 = vsel %vm3549_vm11, %v8698_v52, %v3546_v57  ;;  %v3562_v52 = vmul.f32 %v8792_v20, %v8752_v29  ;;  %vm3568_vm15 = vweird.f32 %v8792_v20 }
 0x3a0   :  { %v3584_v57 = vmul.f32 0.5, %v3583_v63  ;;  %vm3569_vm3 = vmor %vm3567_vm2, %vm3568_vm15 }
 0x3a1   :  { %v2111_v40 = vadd.f32 %v2110_v0, %v1842_v26  ;;  %1622 = vmatmul.f32.gmra.mxu2 %v439_v11  ;;  %v2113_v3 = vpop.f32.mrf.mxu0  ;;  %v11190_v11 = vld [vmem:[#allocation14_spill] sm:$0xff] }
 0x3a2   :  { %1891 = vmatmul.f32.gmra.mxu3 %v440_v8  ;;  %v2382_v5 = vpop.f32.mrf.mxu1  ;;  %v2890_v8 = vsel %vm2472_vm1, %v2752_v18, 0.0  ;;  %v446_v18 = vld [vmem:[%s10950_s0 + $0xd68] sm:$0xff] }
 0x3a3   :  { %v8779_v62 = vadd.f32 %v2379_v36, %v2111_v40  ;;  %v4327_v36 = vld [vmem:[%s10951_s2 + $0x30] sm:$0xff] }
 0x3a4   :  { %v1575_v0 = vpop.f32.mrf.mxu2  ;;  %2160 = vmatmul.f32.gmra.mxu0 %v441_v46  ;;  %v4411_v46 = vmul.f32 %v4327_v36, %v3550_v58  ;;  %v3563_v36 = vmul.f32 %v8792_v20, %v3562_v52 }
 0x3a5   :  { %11189 = vst [vmem:[#allocation69_spill] sm:$0xff] %v8779_v62  ;;  %v1576_v19 = vadd.f32 %v1575_v0, %v11190_v11  ;;  %v1844_v26 = vpop.f32.mrf.mxu3  ;;  %5907 = vmatmul.msk.f32.gmra.mxu1 %vm605_vm0, %v442_v32  ;;  %v2551_v32 = vsel %vm2472_vm1, %v8021_v1, 0.0  ;;  %v447_v11 = vld [vmem:[%s10950_s0 + $0xd70] sm:$0xff] }
 0x3a6   :  { %2891 = vadd.xlane.f32.xlu0 %v2890_v8  ;;  %v4579_v8 = vmul.f32 %v4411_v46, %v8640_v43  ;;  %v452_v43 = vld [vmem:[%s10950_s0 + $0xd98] sm:$0xff]  ;;  %v3564_v52 = vmul.f32 0.5, %v3563_v36 }
 0x3a7   :  { %v1845_v40 = vadd.f32 %v1844_v26, %v1576_v19  ;;  %v448_v19 = vld [vmem:[%s10950_s0 + $0xd78] sm:$0xff] }
 0x3a9   :  { %v2114_v0 = vadd.f32 %v2113_v3, %v1845_v40  ;;  %1625 = vmatmul.f32.gmra.mxu2 %v445_v17  ;;  %v2116_v26 = vpop.f32.mrf.mxu0  ;;  %v11192_v17 = vld [vmem:[#allocation15_spill] sm:$0xff] }
 0x3aa   :  { %2552 = vadd.xlane.f32.xlu2 %v2551_v32  ;;  %1894 = vmatmul.f32.gmra.mxu3 %v446_v18  ;;  %v2385_v3 = vpop.f32.mrf.mxu1  ;;  %v4495_v18 = vld [vmem:[%s10952_s3 + $0x30] sm:$0xff] }
 0x3ab   :  { %v8810_v58 = vadd.f32 %v2382_v5, %v2114_v0  ;;  %4773 = vperm.xlu1 %5955, %v4411_v46   ;;  %v3585_v5 = vsub.f32 1.5, %v3584_v57  ;;  %v451_v0 = vld [vmem:[%s10950_s0 + $0xd90] sm:$0xff]  ;;  %v4663_v46 = vsub.f32 %v4495_v18, %v4579_v8  ;;  %v453_v57 = vld [vmem:[%s10950_s0 + $0xda0] sm:$0xff] }
 0x3ac   :  { %v1578_v63 = vpop.f32.mrf.mxu2  ;;  %2163 = vmatmul.f32.gmra.mxu0 %v447_v11  ;;  %v8825_v11 = vpop.xlane.xlu0 %2537 }
 0x3ad   :  { %11191 = vst [vmem:[#allocation71_spill] sm:$0xff] %v8810_v58  ;;  %v1579_v40 = vadd.f32 %v1578_v63, %v11192_v17  ;;  %v1847_v62 = vpop.f32.mrf.mxu3  ;;  %5908 = vmatmul.msk.f32.gmra.mxu1 %vm605_vm0, %v448_v19  ;;  %v3586_v17 = vmul.f32 %v8758_v7, %v3585_v5 }
 0x3af   :  { %v1848_v32 = vadd.f32 %v1847_v62, %v1579_v40  ;;  %v454_v62 = vld [vmem:[%s10950_s0 + $0xda8] sm:$0xff]  ;;  %v11194_v40 = vld [vmem:[#allocation16_spill] sm:$0xff] }
 0x3b1   :  { %v2117_v63 = vadd.f32 %v2116_v26, %v1848_v32  ;;  %1628 = vmatmul.f32.gmra.mxu2 %v451_v0  ;;  %v2119_v8 = vpop.f32.mrf.mxu0  ;;  %v3590_v0 = vsel %vm3589_vm14, %v8758_v7, %v3586_v17  ;;  %v4331_v32 = vld [vmem:[%s10951_s2 + $0x50] sm:$0xff]  ;;  %v460_v17 = vld [vmem:[%s10950_s0 + $0xdd8] sm:$0xff] }
 0x3b2   :  { %1897 = vmatmul.f32.gmra.mxu3 %v452_v43  ;;  %v2388_v36 = vpop.f32.mrf.mxu1 }
 0x3b3   :  { %v8835_v19 = vadd.f32 %v2385_v3, %v2117_v63  ;;  %5277 = vperm.xlu1 %5955, %v4663_v46   ;;  %v3565_v3 = vsub.f32 1.5, %v3564_v52  ;;  %v458_v46 = vld [vmem:[%s10950_s0 + $0xdc8] sm:$0xff]  ;;  %v4415_v63 = vmul.f32 %v4331_v32, %v3590_v0  ;;  %v459_v52 = vld [vmem:[%s10950_s0 + $0xdd0] sm:$0xff]  ;;  %v11196_v0 = vld [vmem:[#allocation17_spill] sm:$0xff] }
 0x3b4   :  { %v1581_v26 = vpop.f32.mrf.mxu2  ;;  %2166 = vmatmul.f32.gmra.mxu0 %v453_v57 }
 0x3b5   :  { %11193 = vst [vmem:[#allocation72_spill] sm:$0xff] %v8835_v19  ;;  %v1582_v18 = vadd.f32 %v1581_v26, %v11194_v40  ;;  %v1850_v5 = vpop.f32.mrf.mxu3  ;;  %5909 = vmatmul.msk.f32.gmra.mxu1 %vm605_vm0, %v454_v62  ;;  %v3566_v7 = vmul.f32 %v8792_v20, %v3565_v3  ;;  %v8858_v62 = vpop.xlane.xlu0 %2873 }
 0x3b7   :  { %v1851_v43 = vadd.f32 %v1850_v5, %v1582_v18  ;;  %v4583_v5 = vmul.f32 %v4415_v63, %v8686_v54  ;;  %v463_v54 = vld [vmem:[%s10950_s0 + $0xdf0] sm:$0xff] }
 0x3b9   :  { %v2120_v57 = vadd.f32 %v2119_v8, %v1851_v43  ;;  %1631 = vmatmul.f32.gmra.mxu2 %v457_v28  ;;  %v2122_v8 = vpop.f32.mrf.mxu0  ;;  %v4499_v28 = vld [vmem:[%s10952_s3 + $0x50] sm:$0xff]  ;;  %v3570_v43 = vsel %vm3569_vm3, %v8792_v20, %v3566_v7  ;;  %v465_v20 = vld [vmem:[%s10950_s0 + $0xe00] sm:$0xff]  ;;  %v466_v7 = vld [vmem:[%s10950_s0 + $0xe08] sm:$0xff] }
 0x3ba   :  { %4793 = vperm.xlu0 %5954, %v4415_v63   ;;  %1900 = vmatmul.f32.gmra.mxu3 %v458_v46  ;;  %v2391_v18 = vpop.f32.mrf.mxu1  ;;  %v4667_v46 = vsub.f32 %v4499_v28, %v4583_v5 }
 0x3bb   :  { %v8860_v26 = vadd.f32 %v2388_v36, %v2120_v57  ;;  %v4329_v36 = vld [vmem:[%s10951_s2 + $0x40] sm:$0xff]  ;;  %v464_v57 = vld [vmem:[%s10950_s0 + $0xdf8] sm:$0xff] }
 0x3bc   :  { %v1584_v40 = vpop.f32.mrf.mxu2  ;;  %2169 = vmatmul.f32.gmra.mxu0 %v459_v52  ;;  %v8876_v63 = vmul.f32 %v4329_v36, %v3570_v43  ;;  %v469_v43 = vld [vmem:[%s10950_s0 + $0xe20] sm:$0xff] }
 0x3bd   :  { %11195 = vst [vmem:[#allocation74_spill] sm:$0xff] %v8860_v26  ;;  %v1585_v32 = vadd.f32 %v1584_v40, %v11196_v0  ;;  %v1853_v3 = vpop.f32.mrf.mxu3  ;;  %5910 = vmatmul.msk.f32.gmra.mxu1 %vm605_vm0, %v460_v17  ;;  %v8888_v17 = vpop.permute.xlu0 %5267 }
 0x3bf   :  { %v1854_v29 = vadd.f32 %v1853_v3, %v1585_v32  ;;  %v11198_v32 = vld [vmem:[#allocation18_spill] sm:$0xff] }
 0x3c1   :  { %v2123_v52 = vadd.f32 %v2122_v8, %v1854_v29  ;;  %1634 = vmatmul.f32.gmra.mxu2 %v463_v54  ;;  %v2125_v5 = vpop.f32.mrf.mxu0  ;;  %v8900_v54 = vpop.xlane.xlu2 %2543 }
 0x3c2   :  { %5297 = vperm.xlu0 %5954, %v4667_v46   ;;  %4783 = vperm.xlu2 %5956, %v8876_v63   ;;  %v2394_v8 = vpop.f32.mrf.mxu1  ;;  %v471_v46 = vld [vmem:[%s10950_s0 + $0xe30] sm:$0xff] }
 0x3c3   :  { %v8890_v40 = vadd.f32 %v2391_v18, %v2123_v52  ;;  %1903 = vmatmul.f32.gmra.mxu3 %v464_v57  ;;  %v470_v18 = vld [vmem:[%s10950_s0 + $0xe28] sm:$0xff]  ;;  %v472_v57 = vld [vmem:[%s10950_s0 + $0xe38] sm:$0xff] }
 0x3c4   :  { %v1587_v0 = vpop.f32.mrf.mxu2  ;;  %2172 = vmatmul.f32.gmra.mxu0 %v465_v20 }
 0x3c5   :  { %11197 = vst [vmem:[#allocation75_spill] sm:$0xff] %v8890_v40  ;;  %v1588_v3 = vadd.f32 %v1587_v0, %v11198_v32  ;;  %v1856_v28 = vpop.f32.mrf.mxu3  ;;  %5911 = vmatmul.msk.f32.gmra.mxu1 %vm605_vm0, %v466_v7  ;;  %v8908_v52 = vpop.xlane.xlu0 %2546 }
 0x3c7   :  { %v1857_v36 = vadd.f32 %v1856_v28, %v1588_v3  ;;  %v11200_v3 = vld [vmem:[#allocation19_spill] sm:$0xff] }
 0x3c9   :  { %v2126_v29 = vadd.f32 %v2125_v5, %v1857_v36  ;;  %1637 = vmatmul.f32.gmra.mxu2 %v469_v43  ;;  %v2128_v7 = vpop.f32.mrf.mxu0  ;;  %v8913_v5 = vmul.f32 0.020408163, %v8063_v44  ;;  %v475_v36 = vld [vmem:[%s10950_s0 + $0xe50] sm:$0xff] }
 0x3ca   :  { %v2397_v32 = vpop.f32.mrf.mxu1 }
 0x3cb   :  { %v8910_v20 = vadd.f32 %v2394_v8, %v2126_v29  ;;  %1906 = vmatmul.f32.gmra.mxu3 %v470_v18  ;;  %v3154_v8 = vmul.f32 0.020408163, %v8100_v21  ;;  %v476_v18 = vld [vmem:[%s10950_s0 + $0xe58] sm:$0xff]  ;;  %v3238_v44 = vmul.f32 %v8913_v5, %v8913_v5  ;;  %v478_v21 = vld [vmem:[%s10950_s0 + $0xe68] sm:$0xff] }
 0x3cc   :  { %v1590_v0 = vpop.f32.mrf.mxu2  ;;  %2175 = vmatmul.f32.gmra.mxu0 %v471_v46 }
 0x3cd   :  { %11199 = vst [vmem:[#allocation2_spill] sm:$0xff] %v8910_v20  ;;  %v1591_v28 = vadd.f32 %v1590_v0, %v11200_v3  ;;  %v1859_v43 = vpop.f32.mrf.mxu3  ;;  %5912 = vmatmul.msk.f32.gmra.mxu1 %vm605_vm0, %v472_v57  ;;  %v477_v57 = vld [vmem:[%s10950_s0 + $0xe60] sm:$0xff]  ;;  %v8929_v0 = vpop.xlane.xlu1 %2540  ;;  %v3322_v3 = vsub.f32 %v3154_v8, %v3238_v44  ;;  %v482_v44 = vld [vmem:[%s10950_s0 + $0xe88] sm:$0xff] }
 0x3ce   :  { %v481_v8 = vld [vmem:[%s10950_s0 + $0xe80] sm:$0xff] }
 0x3cf   :  { %v1860_v29 = vadd.f32 %v1859_v43, %v1591_v28  ;;  %v4769_v28 = vpop.permute.xlu2 %4768 }
 0x3d1   :  { %v2129_v46 = vadd.f32 %v2128_v7, %v1860_v29  ;;  %1640 = vmatmul.f32.gmra.mxu2 %v475_v36  ;;  %v8936_v26 = vpop.f32.mrf.mxu0  ;;  %v8945_v29 = vpop.xlane.xlu0 %2882 }
 0x3d2   :  { %11202 = vst [vmem:[#allocation4_spill] sm:$0xff] %v8936_v26  ;;  %v8940_v7 = vpop.f32.mrf.mxu1 }
 0x3d3   :  { %v8934_v43 = vadd.f32 %v2397_v32, %v2129_v46  ;;  %1909 = vmatmul.f32.gmra.mxu3 %v476_v18  ;;  %11204 = vst [vmem:[#allocation6_spill] sm:$0xff] %v8940_v7  ;;  %v8950_v32 = vadd.f32 1e-05, %v3322_v3  ;;  %v8953_v18 = vmul.f32 0.020408163, %v8159_v41  ;;  %v483_v46 = vld [vmem:[%s10950_s0 + $0xe90] sm:$0xff] }
 0x3d4   :  { %v8938_v20 = vpop.f32.mrf.mxu2  ;;  %2178 = vmatmul.f32.gmra.mxu0 %v477_v57  ;;  %v3158_v57 = vmul.f32 0.020408163, %v8213_v15  ;;  %v484_v3 = vld [vmem:[%s10950_s0 + $0xe98] sm:$0xff]  ;;  %v2548_v15 = vsel %vm2472_vm1, %v7995_v6, 0.0 }
 0x3d5   :  { %11201 = vst [vmem:[#allocation3_spill] sm:$0xff] %v8934_v43  ;;  %v8942_v36 = vpop.f32.mrf.mxu3  ;;  %5913 = vmatmul.msk.f32.gmra.mxu1 %vm605_vm0, %v478_v21  ;;  %5977 = vrsqrt.f32 %v8950_v32  ;;  %vm3577_vm5 = vweird.f32 %v8950_v32 }
 0x3d6   :  { %11203 = vst [vmem:[#allocation5_spill] sm:$0xff] %v8938_v20 }
 0x3d7   :  { %11205 = vst [vmem:[#allocation7_spill] sm:$0xff] %v8942_v36 }
 0x3d9   :  { %1643 = vmatmul.f32.gmra.mxu2 %v481_v8  ;;  %v2134_v43 = vpop.f32.mrf.mxu0  ;;  %v3242_v8 = vmul.f32 %v8953_v18, %v8953_v18 }
 0x3da   :  { %v4764_v21 = vpop.permute.xlu1 %4763  ;;  %v2403_v20 = vpop.f32.mrf.mxu1 }
 0x3db   :  { %v5165_v41 = vmul.f32 %v4764_v21, %v7484_v25  ;;  %1912 = vmatmul.f32.gmra.mxu3 %v482_v44  ;;  %v3326_v25 = vsub.f32 %v3158_v57, %v3242_v8  ;;  %v487_v21 = vld [vmem:[%s10950_s0 + $0xeb0] sm:$0xff] }
 0x3dc   :  { %v1596_v45 = vpop.f32.mrf.mxu2  ;;  %v8969_v19 = vpop.xlane.xlu2 %2879  ;;  %2181 = vmatmul.f32.gmra.mxu0 %v483_v46 }
 0x3dd   :  { %v5669_v7 = vadd.f32 %v8888_v17, %v5165_v41  ;;  %v1597_v26 = vadd.f32 %v1596_v45, %v11206_v59  ;;  %2549 = vadd.xlane.f32.xlu1 %v2548_v15  ;;  %v1865_v36 = vpop.f32.mrf.mxu3  ;;  %5914 = vmatmul.msk.f32.gmra.mxu1 %vm605_vm0, %v484_v3  ;;  %v488_v59 = vld [vmem:[%s10950_s0 + $0xeb8] sm:$0xff]  ;;  %v2750_v45 = vmul.f32 %v7995_v6, %v7995_v6  ;;  %v8988_v17 = vpop.eup %5977  ;;  %v489_v3 = vld [vmem:[%s10950_s0 + $0xec0] sm:$0xff]  ;;  %v8993_v41 = vadd.f32 1e-05, %v3326_v25 }
 0x3de   :  { %v4779_v44 = vpop.permute.xlu0 %4778  ;;  %vm3578_vm4 = vweird.f32 %v8988_v17 }
 0x3df   :  { %5753 = vst.msk [vmem:[%s10953_s4 + $0x20] sm:$0xff] %vm2472_vm1, %v5669_v7  ;;  %v1866_v46 = vadd.f32 %v1865_v36, %v1597_v26  ;;  %v490_v26 = vld [vmem:[%s10950_s0 + $0xec8] sm:$0xff]  ;;  %v5166_v7 = vmul.f32 %v4769_v28, %v7506_v16  ;;  %v5168_v25 = vmul.f32 %v4779_v44, %v7549_v14  ;;  %5979 = vrsqrt.f32 %v8993_v41  ;;  %v493_v28 = vld [vmem:[%s10950_s0 + $0xee0] sm:$0xff]  ;;  %vm3579_vm6 = vmor %vm3577_vm5, %vm3578_vm4 }
 0x3e0   :  { %v494_v44 = vld [vmem:[%s10950_s0 + $0xee8] sm:$0xff]  ;;  %vm3617_vm8 = vweird.f32 %v8993_v41 }
 0x3e1   :  { %v2135_v57 = vadd.f32 %v2134_v43, %v1866_v46  ;;  %1646 = vmatmul.f32.gmra.mxu2 %v487_v21  ;;  %v2137_v8 = vpop.f32.mrf.mxu0  ;;  %v3572_v43 = vmul.f32 %v8988_v17, %v8950_v32  ;;  %v2884_v46 = vsel %vm2472_vm1, %v2750_v45, 0.0  ;;  %v508_v32 = vld [vmem:[%s10950_s0 + $0xf58] sm:$0xff] }
 0x3e2   :  { %v2406_v16 = vpop.f32.mrf.mxu1 }
 0x3e3   :  { %v8999_v36 = vadd.f32 %v2403_v20, %v2135_v57  ;;  %1915 = vmatmul.f32.gmra.mxu3 %v488_v59  ;;  %v2751_v59 = vmul.f32 %v8021_v1, %v8021_v1  ;;  %v3573_v45 = vmul.f32 %v8988_v17, %v3572_v43 }
 0x3e4   :  { %v1599_v15 = vpop.f32.mrf.mxu2  ;;  %v5273_v21 = vpop.permute.xlu2 %5272  ;;  %2184 = vmatmul.f32.gmra.mxu0 %v489_v3  ;;  %v495_v3 = vld [vmem:[%s10950_s0 + $0xef0] sm:$0xff] }
 0x3e5   :  { %11207 = vst [vmem:[#allocation8_spill] sm:$0xff] %v8999_v36  ;;  %v1600_v33 = vadd.f32 %v1599_v15, %v11208_v30  ;;  %v5670_v40 = vadd.f32 %v5273_v21, %v5166_v7  ;;  %2885 = vadd.xlane.f32.xlu1 %v2884_v46  ;;  %v1868_v56 = vpop.f32.mrf.mxu3  ;;  %5915 = vmatmul.msk.f32.gmra.mxu1 %vm605_vm0, %v490_v26  ;;  %v2563_v26 = vsel %vm2472_vm1, %v8141_v9, 0.0  ;;  %v3574_v15 = vmul.f32 0.5, %v3573_v45 }
 0x3e6   :  { %v5283_v20 = vpop.permute.xlu0 %5282 }
 0x3e7   :  { %5754 = vst.msk [vmem:[%s10953_s4 + $0x28] sm:$0xff] %vm2472_vm1, %v5670_v40  ;;  %v1869_v14 = vadd.f32 %v1868_v56, %v1600_v33  ;;  %v5672_v30 = vadd.f32 %v5283_v20, %v5168_v25  ;;  %v2887_v33 = vsel %vm2472_vm1, %v2751_v59, 0.0  ;;  %v496_v56 = vld [vmem:[%s10950_s0 + $0xef8] sm:$0xff]  ;;  %v499_v25 = vld [vmem:[%s10950_s0 + $0xf10] sm:$0xff]  ;;  %v2755_v20 = vmul.f32 %v8141_v9, %v8141_v9  ;;  %v501_v59 = vld [vmem:[%s10950_s0 + $0xf20] sm:$0xff] }
 0x3e9   :  { %5756 = vst.msk [vmem:[%s10953_s4 + $0x38] sm:$0xff] %vm2472_vm1, %v5672_v30  ;;  %v2138_v57 = vadd.f32 %v2137_v8, %v1869_v14  ;;  %1649 = vmatmul.f32.gmra.mxu2 %v493_v28  ;;  %v9036_v7 = vpop.f32.mrf.mxu0  ;;  %v9038_v8 = vpop.eup %5979  ;;  %v500_v28 = vld [vmem:[%s10950_s0 + $0xf18] sm:$0xff]  ;;  %v3575_v14 = vsub.f32 1.5, %v3574_v15  ;;  %v502_v30 = vld [vmem:[%s10950_s0 + $0xf28] sm:$0xff]  ;;  %v2899_v45 = vsel %vm2472_vm1, %v2755_v20, 0.0 }
 0x3ea   :  { %11210 = vst [vmem:[#allocation10_spill] sm:$0xff] %v9036_v7  ;;  %v9044_v46 = vpop.f32.mrf.mxu1  ;;  %vm3618_vm7 = vweird.f32 %v9038_v8 }
 0x3eb   :  { %v9032_v40 = vadd.f32 %v2406_v16, %v2138_v57  ;;  %1918 = vmatmul.f32.gmra.mxu3 %v494_v44  ;;  %2888 = vadd.xlane.f32.xlu2 %v2887_v33  ;;  %11211 = vst [vmem:[#allocation11_spill] sm:$0xff] %v9044_v46  ;;  %v3612_v16 = vmul.f32 %v9038_v8, %v8993_v41  ;;  %v11212_v33 = vld [vmem:[#allocation26_spill] sm:$0xff]  ;;  %vm3619_vm9 = vmor %vm3617_vm8, %vm3618_vm7  ;;  %v4334_v41 = vld [vmem:[%s10951_s2 + $0x68] sm:$0xff] }
 0x3ec   :  { %v9040_v43 = vpop.f32.mrf.mxu2  ;;  %2564 = vadd.xlane.f32.xlu0 %v2563_v26  ;;  %2187 = vmatmul.f32.gmra.mxu0 %v495_v3  ;;  %v3576_v15 = vmul.f32 %v8988_v17, %v3575_v14  ;;  %v4330_v14 = vld [vmem:[%s10951_s2 + $0x48] sm:$0xff] }
 0x3ed   :  { %11209 = vst [vmem:[#allocation9_spill] sm:$0xff] %v9032_v40  ;;  %v9042_v21 = vpop.f32.mrf.mxu3  ;;  %5916 = vmatmul.msk.f32.gmra.mxu1 %vm605_vm0, %v496_v56  ;;  %v3613_v44 = vmul.f32 %v9038_v8, %v3612_v16  ;;  %v505_v16 = vld [vmem:[%s10950_s0 + $0xf40] sm:$0xff]  ;;  %v4581_v40 = vmul.f32 %v8876_v63, %v8717_v4  ;;  %v512_v4 = vld [vmem:[%s10950_s0 + $0xf78] sm:$0xff] }
 0x3f1   :  { %1652 = vmatmul.f32.gmra.mxu2 %v499_v25  ;;  %v2143_v57 = vpop.f32.mrf.mxu0 }
 0x3f2   :  { %v2412_v25 = vpop.f32.mrf.mxu1 }
 0x3f3   :  { %1921 = vmatmul.f32.gmra.mxu3 %v500_v28  ;;  %v3614_v28 = vmul.f32 0.5, %v3613_v44  ;;  %v507_v44 = vld [vmem:[%s10950_s0 + $0xf50] sm:$0xff] }
 0x3f4   :  { %v1605_v3 = vpop.f32.mrf.mxu2  ;;  %2900 = vadd.xlane.f32.xlu0 %v2899_v45  ;;  %2190 = vmatmul.f32.gmra.mxu0 %v501_v59  ;;  %v506_v59 = vld [vmem:[%s10950_s0 + $0xf48] sm:$0xff] }
 0x3f5   :  { %v1606_v56 = vadd.f32 %v1605_v3, %v11212_v33  ;;  %v1874_v26 = vpop.f32.mrf.mxu3  ;;  %5917 = vmatmul.msk.f32.gmra.mxu1 %vm605_vm0, %v502_v30  ;;  %v3580_v30 = vsel %vm3579_vm6, %v8988_v17, %v3576_v15  ;;  %v11214_v17 = vld [vmem:[#allocation29_spill] sm:$0xff] }
 0x3f7   :  { %v1875_v20 = vadd.f32 %v1874_v26, %v1606_v56  ;;  %v4414_v26 = vmul.f32 %v4330_v14, %v3580_v30 }
 0x3f9   :  { %v2144_v45 = vadd.f32 %v2143_v57, %v1875_v20  ;;  %1655 = vmatmul.f32.gmra.mxu2 %v505_v16  ;;  %v2146_v33 = vpop.f32.mrf.mxu0  ;;  %v3615_v57 = vsub.f32 1.5, %v3614_v28  ;;  %v4497_v28 = vld [vmem:[%s10952_s3 + $0x40] sm:$0xff]  ;;  %v4582_v63 = vmul.f32 %v4414_v26, %v8913_v5 }
 0x3fa   :  { %v2415_v20 = vpop.f32.mrf.mxu1  ;;  %v4665_v14 = vsub.f32 %v4497_v28, %v4581_v40 }
 0x3fb   :  { %v9086_v3 = vadd.f32 %v2412_v25, %v2144_v45  ;;  %1924 = vmatmul.f32.gmra.mxu3 %v506_v59  ;;  %v511_v25 = vld [vmem:[%s10950_s0 + $0xf70] sm:$0xff]  ;;  %v3616_v45 = vmul.f32 %v9038_v8, %v3615_v57  ;;  %v514_v57 = vld [vmem:[%s10950_s0 + $0xf88] sm:$0xff] }
 0x3fc   :  { %v1608_v56 = vpop.f32.mrf.mxu2  ;;  %2193 = vmatmul.f32.gmra.mxu0 %v507_v44  ;;  %v4498_v44 = vld [vmem:[%s10952_s3 + $0x48] sm:$0xff] }
 0x3fd   :  { %11213 = vst [vmem:[#allocation12_spill] sm:$0xff] %v9086_v3  ;;  %v1609_v15 = vadd.f32 %v1608_v56, %v11214_v17  ;;  %v1877_v16 = vpop.f32.mrf.mxu3  ;;  %5918 = vmatmul.msk.f32.gmra.mxu1 %vm605_vm0, %v508_v32  ;;  %v513_v32 = vld [vmem:[%s10950_s0 + $0xf80] sm:$0xff]  ;;  %v3620_v40 = vsel %vm3619_vm9, %v9038_v8, %v3616_v45  ;;  %v518_v8 = vld [vmem:[%s10950_s0 + $0xfa8] sm:$0xff] }
 0x3fe   :  { %4788 = vperm.xlu1 %5955, %v4414_v26   ;;  %v4666_v26 = vsub.f32 %v4498_v44, %v4582_v63 }
 0x3ff   :  { %v1878_v59 = vadd.f32 %v1877_v16, %v1609_v15  ;;  %v4418_v15 = vmul.f32 %v4334_v41, %v3620_v40  ;;  %v517_v16 = vld [vmem:[%s10950_s0 + $0xfa0] sm:$0xff] }
 0x401   :  { %v2147_v30 = vadd.f32 %v2146_v33, %v1878_v59  ;;  %1658 = vmatmul.f32.gmra.mxu2 %v511_v25  ;;  %v9116_v5 = vpop.f32.mrf.mxu0  ;;  %v519_v25 = vld [vmem:[%s10950_s0 + $0xfb0] sm:$0xff]  ;;  %v4586_v28 = vmul.f32 %v4418_v15, %v8953_v18  ;;  %v520_v59 = vld [vmem:[%s10950_s0 + $0xfb8] sm:$0xff] }
 0x402   :  { %11216 = vst [vmem:[#allocation14_spill] sm:$0xff] %v9116_v5 }
 0x403   :  { %v9114_v56 = vadd.f32 %v2415_v20, %v2147_v30  ;;  %1927 = vmatmul.f32.gmra.mxu3 %v512_v4  ;;  %5287 = vperm.xlu2 %5956, %v4665_v14   ;;  %v9130_v20 = vpop.f32.mrf.mxu1  ;;  %v4502_v4 = vld [vmem:[%s10952_s3 + $0x68] sm:$0xff] }
 0x404   :  { %v9122_v33 = vpop.f32.mrf.mxu2  ;;  %2196 = vmatmul.f32.gmra.mxu0 %v513_v32  ;;  %11219 = vst [vmem:[#allocation17_spill] sm:$0xff] %v9130_v20  ;;  %v11220_v30 = vld [vmem:[#allocation31_spill] sm:$0xff]  ;;  %v4670_v32 = vsub.f32 %v4502_v4, %v4586_v28 }
 0x405   :  { %11215 = vst [vmem:[#allocation13_spill] sm:$0xff] %v9114_v56  ;;  %v9124_v17 = vpop.f32.mrf.mxu3  ;;  %5919 = vmatmul.msk.f32.gmra.mxu1 %vm605_vm0, %v514_v57 }
 0x406   :  { %11217 = vst [vmem:[#allocation15_spill] sm:$0xff] %v9122_v33  ;;  %5292 = vperm.xlu1 %5955, %v4666_v26  }
 0x407   :  { %11218 = vst [vmem:[#allocation16_spill] sm:$0xff] %v9124_v17 }
 0x408   :  { %4808 = vperm.xlu0 %5954, %v4418_v15   ;;  %v9150_v15 = vmul.f32 0.020408163, %v8263_v47 }
 0x409   :  { %1661 = vmatmul.f32.gmra.mxu2 %v517_v16  ;;  %v2152_v45 = vpop.f32.mrf.mxu0 }
 0x40a   :  { %v3240_v4 = vmul.f32 %v9150_v15, %v9150_v15 }
 0x40b   :  { %1930 = vmatmul.f32.gmra.mxu3 %v518_v8  ;;  %v2421_v57 = vpop.f32.mrf.mxu1  ;;  %v9152_v8 = vpop.xlane.xlu1 %2876 }
 0x40c   :  { %v1614_v63 = vpop.f32.mrf.mxu2  ;;  %2199 = vmatmul.f32.gmra.mxu0 %v519_v25  ;;  %v11222_v25 = vld [vmem:[#allocation32_spill] sm:$0xff] }
 0x40d   :  { %v1615_v14 = vadd.f32 %v1614_v63, %v11220_v30  ;;  %v1883_v44 = vpop.f32.mrf.mxu3  ;;  %5920 = vmatmul.msk.f32.gmra.mxu1 %vm605_vm0, %v520_v59  ;;  %v3156_v30 = vmul.f32 0.020408163, %v8304_v61 }
 0x40f   :  { %v1884_v18 = vadd.f32 %v1883_v44, %v1615_v14  ;;  %v3324_v14 = vsub.f32 %v3156_v30, %v3240_v4  ;;  %v11228_v4 = vld [vmem:[#allocation37_spill] sm:$0xff] }
 0x410   :  { %5312 = vperm.xlu0 %5954, %v4670_v32  }
 0x411   :  { %v2153_v40 = vadd.f32 %v2152_v45, %v1884_v18  ;;  %v2155_v26 = vpop.f32.mrf.mxu0  ;;  %v9158_v44 = vpop.xlane.xlu0 %2555 }
 0x413   :  { %v9147_v41 = vadd.f32 %v2421_v57, %v2153_v40  ;;  %v2424_v59 = vpop.f32.mrf.mxu1  ;;  %v9166_v40 = vadd.f32 1e-05, %v3324_v14 }
 0x414   :  { %v1617_v16 = vpop.f32.mrf.mxu2 }
 0x415   :  { %11221 = vst [vmem:[#allocation18_spill] sm:$0xff] %v9147_v41  ;;  %v1618_v56 = vadd.f32 %v1617_v16, %v11222_v25  ;;  %v1886_v63 = vpop.f32.mrf.mxu3  ;;  %5981 = vrsqrt.f32 %v9166_v40  ;;  %vm3597_vm10 = vweird.f32 %v9166_v40 }
 0x417   :  { %v1887_v28 = vadd.f32 %v1886_v63, %v1618_v56  ;;  %v9173_v56 = vmul.f32 0.020408163, %v8125_v12 }
 0x419   :  { %v2156_v45 = vadd.f32 %v2155_v26, %v1887_v28  ;;  %v9162_v47 = vpop.f32.mrf.mxu0  ;;  %v3157_v26 = vmul.f32 0.020408163, %v8161_v42  ;;  %v9177_v63 = vpop.xlane.xlu0 %2891  ;;  %v3241_v28 = vmul.f32 %v9173_v56, %v9173_v56 }
 0x41a   :  { %11224 = vst [vmem:[#allocation21_spill] sm:$0xff] %v9162_v47 }
 0x41b   :  { %v9160_v32 = vadd.f32 %v2424_v59, %v2156_v45  ;;  %v9170_v61 = vpop.f32.mrf.mxu1  ;;  %v9186_v47 = vpop.eup %5981 }
 0x41c   :  { %v9164_v57 = vpop.f32.mrf.mxu2  ;;  %11227 = vst [vmem:[#allocation29_spill] sm:$0xff] %v9170_v61  ;;  %v3325_v61 = vsub.f32 %v3157_v26, %v3241_v28  ;;  %vm3598_vm0 = vweird.f32 %v9186_v47 }
 0x41d   :  { %11223 = vst [vmem:[#allocation19_spill] sm:$0xff] %v9160_v32  ;;  %v4774_v18 = vpop.permute.xlu1 %4773  ;;  %v9168_v16 = vpop.f32.mrf.mxu3  ;;  %v9184_v32 = vmul.f32 0.020408163, %v8242_v60  ;;  %v3592_v60 = vmul.f32 %v9186_v47, %v9166_v40  ;;  %vm3599_vm11 = vmor %vm3597_vm10, %vm3598_vm0 }
 0x41e   :  { %11225 = vst [vmem:[#allocation22_spill] sm:$0xff] %v9164_v57  ;;  %v5167_v30 = vmul.f32 %v4774_v18, %v7527_v2  ;;  %v11231_v57 = vld [vmem:[#allocation35_spill] sm:$0xff] }
 0x41f   :  { %11226 = vst [vmem:[#allocation26_spill] sm:$0xff] %v9168_v16  ;;  %v3161_v16 = vmul.f32 0.020408163, %v8283_v27  ;;  %v3245_v18 = vmul.f32 %v9184_v32, %v9184_v32 }
 0x421   :  { %v2161_v25 = vpop.f32.mrf.mxu0 }
 0x423   :  { %v2430_v3 = vpop.f32.mrf.mxu1 }
 0x424   :  { %v1623_v59 = vpop.f32.mrf.mxu2 }
 0x425   :  { %v1624_v45 = vadd.f32 %v1623_v59, %v11228_v4  ;;  %v5278_v14 = vpop.permute.xlu1 %5277  ;;  %v1892_v41 = vpop.f32.mrf.mxu3  ;;  %v3329_v59 = vsub.f32 %v3161_v16, %v3245_v18  ;;  %v11232_v18 = vld [vmem:[#allocation79_spill] sm:$0xff] }
 0x426   :  { %v5671_v12 = vadd.f32 %v5278_v14, %v5167_v30  ;;  %v9197_v30 = vadd.f32 1e-05, %v3325_v61 }
 0x427   :  { %v1893_v42 = vadd.f32 %v1892_v41, %v1624_v45  ;;  %v2560_v41 = vsel %vm2472_vm1, %v8115_v35, 0.0  ;;  %v11230_v45 = vld [vmem:[#allocation40_spill] sm:$0xff] }
 0x428   :  { %5755 = vst.msk [vmem:[%s10953_s4 + $0x30] sm:$0xff] %vm2472_vm1, %v5671_v12  ;;  %5983 = vrsqrt.f32 %v9197_v30  ;;  %vm3607_vm13 = vweird.f32 %v9197_v30 }
 0x429   :  { %v2162_v2 = vadd.f32 %v2161_v25, %v1893_v42  ;;  %v2164_v27 = vpop.f32.mrf.mxu0  ;;  %v3593_v42 = vmul.f32 %v9186_v47, %v3592_v60  ;;  %v2753_v60 = vmul.f32 %v11231_v57, %v11231_v57 }
 0x42b   :  { %v9199_v26 = vadd.f32 %v2430_v3, %v2162_v2  ;;  %v2433_v12 = vpop.f32.mrf.mxu1  ;;  %v2557_v3 = vsel %vm2472_vm1, %v11231_v57, 0.0  ;;  %v9208_v2 = vadd.f32 1e-05, %v3329_v59  ;;  %v3594_v16 = vmul.f32 0.5, %v3593_v42  ;;  %v11238_v42 = vld [vmem:[#allocation44_spill] sm:$0xff] }
 0x42c   :  { %v1626_v28 = vpop.f32.mrf.mxu2  ;;  %2561 = vadd.xlane.f32.xlu2 %v2560_v41  ;;  %v4794_v4 = vpop.permute.xlu0 %4793 }
 0x42d   :  { %11229 = vst [vmem:[#allocation31_spill] sm:$0xff] %v9199_v26  ;;  %v1627_v25 = vadd.f32 %v1626_v28, %v11230_v45  ;;  %v1895_v14 = vpop.f32.mrf.mxu3  ;;  %v5171_v41 = vmul.f32 %v4794_v4, %v11232_v18  ;;  %5985 = vrsqrt.f32 %v9208_v2  ;;  %v3595_v4 = vsub.f32 1.5, %v3594_v16 }
 0x42e   :  { %v2758_v16 = vmul.f32 %v11238_v42, %v11238_v42  ;;  %vm3647_vm2 = vweird.f32 %v9208_v2 }
 0x42f   :  { %v1896_v61 = vadd.f32 %v1895_v14, %v1627_v25  ;;  %v5984_v14 = vpop.eup %5983 }
 0x430   :  { %2558 = vadd.xlane.f32.xlu1 %v2557_v3  ;;  %vm3608_vm12 = vweird.f32 %v5984_v14 }
 0x431   :  { %v2165_v26 = vadd.f32 %v2164_v27, %v1896_v61  ;;  %v9213_v28 = vpop.f32.mrf.mxu0  ;;  %v2572_v61 = vsel %vm2472_vm1, %v11238_v42, 0.0  ;;  %vm3609_vm14 = vmor %vm3607_vm13, %vm3608_vm12 }
 0x432   :  { %11234 = vst [vmem:[#allocation37_spill] sm:$0xff] %v9213_v28 }
 0x433   :  { %v9211_v36 = vadd.f32 %v2433_v12, %v2165_v26  ;;  %v9222_v27 = vpop.f32.mrf.mxu1  ;;  %v2893_v26 = vsel %vm2472_vm1, %v2753_v60, 0.0  ;;  %v3602_v12 = vmul.f32 %v5984_v14, %v9197_v30  ;;  %v5986_v3 = vpop.eup %5985 }
 0x434   :  { %v9218_v45 = vpop.f32.mrf.mxu2  ;;  %v5298_v25 = vpop.permute.xlu0 %5297  ;;  %11237 = vst [vmem:[#allocation79_spill] sm:$0xff] %v9222_v27  ;;  %v11239_v27 = vld [vmem:[#allocation46_spill] sm:$0xff]  ;;  %vm3648_vm15 = vweird.f32 %v5986_v3 }
 0x435   :  { %11233 = vst [vmem:[#allocation32_spill] sm:$0xff] %v9211_v36  ;;  %v5675_v59 = vadd.f32 %v5298_v25, %v5171_v41  ;;  %v9220_v20 = vpop.f32.mrf.mxu3  ;;  %v3596_v41 = vmul.f32 %v9186_v47, %v3595_v4  ;;  %v3603_v25 = vmul.f32 %v5984_v14, %v3602_v12  ;;  %v4332_v4 = vld [vmem:[%s10951_s2 + $0x58] sm:$0xff]  ;;  %vm3649_vm3 = vmor %vm3647_vm2, %vm3648_vm15 }
 0x436   :  { %11235 = vst [vmem:[#allocation40_spill] sm:$0xff] %v9218_v45 }
 0x437   :  { %11236 = vst [vmem:[#allocation35_spill] sm:$0xff] %v9220_v20  ;;  %v3600_v20 = vsel %vm3599_vm11, %v9186_v47, %v3596_v41  ;;  %v3604_v12 = vmul.f32 0.5, %v3603_v25  ;;  %v11241_v41 = vld [vmem:[#allocation49_spill] sm:$0xff] }
 0x438   :  { %5759 = vst.msk [vmem:[%s10953_s4 + $0x50] sm:$0xff] %vm2472_vm1, %v5675_v59  ;;  %2894 = vadd.xlane.f32.xlu1 %v2893_v26  ;;  %v3642_v59 = vmul.f32 %v5986_v3, %v9208_v2 }
 0x439   :  { %v2170_v18 = vpop.f32.mrf.mxu0 }
 0x43a   :  { %2573 = vadd.xlane.f32.xlu0 %v2572_v61  ;;  %v3643_v45 = vmul.f32 %v5986_v3, %v3642_v59 }
 0x43b   :  { %v2439_v28 = vpop.f32.mrf.mxu1 }
 0x43c   :  { %v1632_v36 = vpop.f32.mrf.mxu2  ;;  %v3644_v47 = vmul.f32 0.5, %v3643_v45 }
 0x43d   :  { %v1633_v60 = vadd.f32 %v1632_v36, %v11239_v27  ;;  %v1901_v26 = vpop.f32.mrf.mxu3  ;;  %v2908_v36 = vsel %vm2472_vm1, %v2758_v16, 0.0  ;;  %v9244_v27 = vmul.f32 %v4332_v4, %v3600_v20  ;;  %v9251_v20 = vpop.xlane.xlu2 %2552 }
 0x43e   :  { %v3645_v16 = vsub.f32 1.5, %v3644_v47 }
 0x43f   :  { %v1902_v61 = vadd.f32 %v1901_v26, %v1633_v60  ;;  %v3605_v60 = vsub.f32 1.5, %v3604_v12 }
 0x441   :  { %v2171_v5 = vadd.f32 %v2170_v18, %v1902_v61  ;;  %v2173_v40 = vpop.f32.mrf.mxu0  ;;  %v3606_v59 = vmul.f32 %v5984_v14, %v3605_v60 }
 0x442   :  { %2909 = vadd.xlane.f32.xlu0 %v2908_v36 }
 0x443   :  { %v9246_v17 = vadd.f32 %v2439_v28, %v2171_v5  ;;  %v2442_v46 = vpop.f32.mrf.mxu1  ;;  %v3610_v45 = vsel %vm3609_vm14, %v5984_v14, %v3606_v59  ;;  %v4337_v14 = vld [vmem:[%s10951_s2 + $0x80] sm:$0xff] }
 0x444   :  { %v1635_v33 = vpop.f32.mrf.mxu2  ;;  %4798 = vperm.xlu2 %5956, %v9244_v27  }
 0x445   :  { %11240 = vst [vmem:[#allocation44_spill] sm:$0xff] %v9246_v17  ;;  %v1636_v26 = vadd.f32 %v1635_v33, %v11241_v41  ;;  %v3646_v33 = vmul.f32 %v5986_v3, %v3645_v16  ;;  %v4501_v41 = vld [vmem:[%s10952_s3 + $0x60] sm:$0xff] }
 0x446   :  { %v1904_v1 = vpop.f32.mrf.mxu3 }
 0x447   :  { %v1905_v25 = vadd.f32 %v1904_v1, %v1636_v26  ;;  %v4333_v1 = vld [vmem:[%s10951_s2 + $0x60] sm:$0xff]  ;;  %v4784_v26 = vpop.permute.xlu2 %4783 }
 0x448   :  { %v4417_v30 = vmul.f32 %v4333_v1, %v3610_v45 }
 0x449   :  { %v2174_v18 = vadd.f32 %v2173_v40, %v1905_v25  ;;  %v9255_v28 = vpop.f32.mrf.mxu0  ;;  %v11247_v25 = vld [vmem:[#allocation55_spill] sm:$0xff] }
 0x44a   :  { %11243 = vst [vmem:[#allocation49_spill] sm:$0xff] %v9255_v28  ;;  %v4585_v40 = vmul.f32 %v4417_v30, %v9173_v56  ;;  %v4505_v56 = vld [vmem:[%s10952_s3 + $0x80] sm:$0xff] }
 0x44b   :  { %v9253_v5 = vadd.f32 %v2442_v46, %v2174_v18  ;;  %v9264_v12 = vpop.f32.mrf.mxu1  ;;  %v3650_v46 = vsel %vm3649_vm3, %v5986_v3, %v3646_v33 }
 0x44c   :  { %v9257_v61 = vpop.f32.mrf.mxu2  ;;  %11246 = vst [vmem:[#allocation93_spill] sm:$0xff] %v9264_v12  ;;  %v4421_v47 = vmul.f32 %v4337_v14, %v3650_v46  ;;  %v4669_v16 = vsub.f32 %v4501_v41, %v4585_v40 }
 0x44d   :  { %11242 = vst [vmem:[#allocation46_spill] sm:$0xff] %v9253_v5 }
 0x44e   :  { %11244 = vst [vmem:[#allocation91_spill] sm:$0xff] %v9257_v61  ;;  %v9262_v4 = vpop.f32.mrf.mxu3  ;;  %v4589_v45 = vmul.f32 %v4421_v47, %v9184_v32  ;;  %v11270_v61 = vld [vmem:[#allocation80_spill] sm:$0xff] }
 0x44f   :  { %11245 = vst [vmem:[#allocation92_spill] sm:$0xff] %v9262_v4 }
 0x450   :  { %v4673_v14 = vsub.f32 %v4505_v56, %v4589_v45  ;;  %v9281_v5 = vpop.xlane.xlu1 %2549 }
 0x451   :  { %4803 = vperm.xlu1 %5955, %v4417_v30   ;;  %v2179_v36 = vpop.f32.mrf.mxu0 }
 0x453   :  { %v2448_v18 = vpop.f32.mrf.mxu1 }
 0x454   :  { %v1641_v60 = vpop.f32.mrf.mxu2 }
 0x455   :  { %v1642_v59 = vadd.f32 %v1641_v60, %v11247_v25  ;;  %v11249_v60 = vld [vmem:[#allocation58_spill] sm:$0xff] }
 0x456   :  { %v1910_v2 = vpop.f32.mrf.mxu3  ;;  %4823 = vperm.xlu0 %5954, %v4421_v47  }
 0x457   :  { %v1911_v3 = vadd.f32 %v1910_v2, %v1642_v59 }
 0x459   :  { %v2180_v1 = vadd.f32 %v2179_v36, %v1911_v3  ;;  %5307 = vperm.xlu1 %5955, %v4669_v16   ;;  %v2182_v30 = vpop.f32.mrf.mxu0 }
 0x45b   :  { %v9279_v33 = vadd.f32 %v2448_v18, %v2180_v1  ;;  %v2451_v36 = vpop.f32.mrf.mxu1  ;;  %v11253_v18 = vld [vmem:[#allocation77_spill] sm:$0xff] }
 0x45c   :  { %v1644_v46 = vpop.f32.mrf.mxu2  ;;  %v5169_v3 = vmul.f32 %v4784_v26, %v11253_v18 }
 0x45d   :  { %11248 = vst [vmem:[#allocation55_spill] sm:$0xff] %v9279_v33  ;;  %v1645_v25 = vadd.f32 %v1644_v46, %v11249_v60  ;;  %v9297_v46 = vpop.xlane.xlu1 %2885  ;;  %v11257_v33 = vld [vmem:[#allocation39_spill] sm:$0xff] }
 0x45e   :  { %v1913_v17 = vpop.f32.mrf.mxu3  ;;  %5327 = vperm.xlu0 %5954, %v4673_v14   ;;  %v9284_v40 = vpop.xlane.xlu2 %2888 }
 0x45f   :  { %v1914_v32 = vadd.f32 %v1913_v17, %v1645_v25  ;;  %v9299_v14 = vpop.xlane.xlu0 %2564  ;;  %v2754_v17 = vmul.f32 %v8115_v35, %v8115_v35  ;;  %v11256_v25 = vld [vmem:[#allocation64_spill] sm:$0xff] }
 0x461   :  { %v2183_v47 = vadd.f32 %v2182_v30, %v1914_v32  ;;  %v9288_v59 = vpop.f32.mrf.mxu0  ;;  %v2896_v26 = vsel %vm2472_vm1, %v2754_v17, 0.0 }
 0x462   :  { %11251 = vst [vmem:[#allocation94_spill] sm:$0xff] %v9288_v59 }
 0x463   :  { %v9286_v41 = vadd.f32 %v2451_v36, %v2183_v47  ;;  %v9295_v56 = vpop.f32.mrf.mxu1 }
 0x464   :  { %v9290_v2 = vpop.f32.mrf.mxu2  ;;  %11255 = vst [vmem:[#allocation96_spill] sm:$0xff] %v9295_v56  ;;  %v9312_v56 = vmul.f32 0.020408163, %v11257_v33 }
 0x465   :  { %11250 = vst [vmem:[#allocation58_spill] sm:$0xff] %v9286_v41 }
 0x466   :  { %11252 = vst [vmem:[#allocation95_spill] sm:$0xff] %v9290_v2  ;;  %v9293_v16 = vpop.f32.mrf.mxu3  ;;  %v5288_v45 = vpop.permute.xlu2 %5287 }
 0x467   :  { %11254 = vst [vmem:[#allocation77_spill] sm:$0xff] %v9293_v16  ;;  %v5673_v1 = vadd.f32 %v5288_v45, %v5169_v3  ;;  %v9309_v41 = vpop.xlane.xlu0 %2900  ;;  %v11259_v16 = vld [vmem:[#allocation42_spill] sm:$0xff] }
 0x468   :  { %v3160_v2 = vmul.f32 0.020408163, %v11259_v16 }
 0x469   :  { %5757 = vst.msk [vmem:[%s10953_s4 + $0x40] sm:$0xff] %vm2472_vm1, %v5673_v1  ;;  %v2188_v60 = vpop.f32.mrf.mxu0  ;;  %v9317_v1 = vmul.f32 0.020408163, %v8505_v22 }
 0x46b   :  { %v2457_v18 = vpop.f32.mrf.mxu1 }
 0x46c   :  { %v1650_v30 = vpop.f32.mrf.mxu2 }
 0x46d   :  { %v1651_v32 = vadd.f32 %v1650_v30, %v11256_v25  ;;  %2897 = vadd.xlane.f32.xlu2 %v2896_v26  ;;  %v11260_v30 = vld [vmem:[#allocation67_spill] sm:$0xff]  ;;  %v3164_v25 = vmul.f32 0.020408163, %v8705_v24 }
 0x46e   :  { %v1919_v36 = vpop.f32.mrf.mxu3 }
 0x46f   :  { %v1920_v47 = vadd.f32 %v1919_v36, %v1651_v32 }
 0x470   :  { %v4789_v3 = vpop.permute.xlu1 %4788 }
 0x471   :  { %v2189_v45 = vadd.f32 %v2188_v60, %v1920_v47  ;;  %v2191_v36 = vpop.f32.mrf.mxu0  ;;  %v3244_v60 = vmul.f32 %v9312_v56, %v9312_v56  ;;  %v11261_v47 = vld [vmem:[#allocation78_spill] sm:$0xff] }
 0x472   :  { %v5170_v33 = vmul.f32 %v4789_v3, %v11261_v47 }
 0x473   :  { %v9314_v59 = vadd.f32 %v2457_v18, %v2189_v45  ;;  %v3248_v18 = vmul.f32 %v9317_v1, %v9317_v1  ;;  %v2460_v45 = vpop.f32.mrf.mxu1 }
 0x474   :  { %v1653_v17 = vpop.f32.mrf.mxu2 }
 0x475   :  { %11258 = vst [vmem:[#allocation64_spill] sm:$0xff] %v9314_v59  ;;  %v1654_v26 = vadd.f32 %v1653_v17, %v11260_v30  ;;  %v3328_v59 = vsub.f32 %v3160_v2, %v3244_v60  ;;  %v3332_v4 = vsub.f32 %v3164_v25, %v3248_v18  ;;  %v4500_v2 = vld [vmem:[%s10952_s3 + $0x58] sm:$0xff] }
 0x476   :  { %v1922_v32 = vpop.f32.mrf.mxu3 }
 0x477   :  { %v1923_v12 = vadd.f32 %v1922_v32, %v1654_v26  ;;  %v3412_v30 = vadd.f32 1e-05, %v3328_v59  ;;  %v3416_v3 = vadd.f32 1e-05, %v3332_v4  ;;  %v4584_v26 = vmul.f32 %v9244_v27, %v9150_v15 }
 0x478   :  { %v5293_v22 = vpop.permute.xlu1 %5292  ;;  %v2581_v4 = vsel %vm2472_vm1, %v8353_v10, 0.0 }
 0x479   :  { %v2192_v28 = vadd.f32 %v2191_v36, %v1923_v12  ;;  %v5674_v16 = vadd.f32 %v5293_v22, %v5170_v33  ;;  %5987 = vrsqrt.f32 %v3412_v30  ;;  %v11263_v12 = vld [vmem:[#allocation82_spill] sm:$0xff]  ;;  %vm3637_vm6 = vweird.f32 %v3412_v30 }
 0x47a   :  { %v4809_v17 = vpop.permute.xlu0 %4808  ;;  %5989 = vrsqrt.f32 %v3416_v3  ;;  %v11264_v36 = vld [vmem:[#allocation38_spill] sm:$0xff]  ;;  %vm3677_vm7 = vweird.f32 %v3416_v3 }
 0x47b   :  { %5758 = vst.msk [vmem:[%s10953_s4 + $0x48] sm:$0xff] %vm2472_vm1, %v5674_v16  ;;  %v9331_v24 = vadd.f32 %v2460_v45, %v2192_v28  ;;  %v5174_v25 = vmul.f32 %v4809_v17, %v11263_v12  ;;  %v2566_v60 = vsel %vm2472_vm1, %v11264_v36, 0.0  ;;  %v4668_v28 = vsub.f32 %v4500_v2, %v4584_v26 }
 0x47c   :  { %v2756_v15 = vmul.f32 %v11264_v36, %v11264_v36  ;;  %v2761_v45 = vmul.f32 %v8353_v10, %v8353_v10 }
 0x47d   :  { %11262 = vst [vmem:[#allocation39_spill] sm:$0xff] %v9331_v24 }
 0x47e   :  { %v2902_v33 = vsel %vm2472_vm1, %v2756_v15, 0.0  ;;  %v2917_v26 = vsel %vm2472_vm1, %v2761_v45, 0.0 }
 0x47f   :  { %v5988_v27 = vpop.eup %5987 }
 0x480   :  { %v5990_v59 = vpop.eup %5989  ;;  %v3632_v18 = vmul.f32 %v5988_v27, %v3412_v30  ;;  %vm3638_vm4 = vweird.f32 %v5988_v27 }
 0x481   :  { %v3672_v22 = vmul.f32 %v5990_v59, %v3416_v3  ;;  %vm3678_vm5 = vweird.f32 %v5990_v59  ;;  %vm3639_vm8 = vmor %vm3637_vm6, %vm3638_vm4 }
 0x482   :  { %v5313_v32 = vpop.permute.xlu0 %5312  ;;  %v3633_v16 = vmul.f32 %v5988_v27, %v3632_v18  ;;  %vm3679_vm9 = vmor %vm3677_vm7, %vm3678_vm5 }
 0x483   :  { %v5678_v47 = vadd.f32 %v5313_v32, %v5174_v25  ;;  %2567 = vadd.xlane.f32.xlu1 %v2566_v60  ;;  %v3673_v17 = vmul.f32 %v5990_v59, %v3672_v22  ;;  %v9354_v25 = vmul.f32 0.020408163, %v8351_v48  ;;  %v4340_v48 = vld [vmem:[%s10951_s2 + $0x98] sm:$0xff] }
 0x484   :  { %v3634_v2 = vmul.f32 0.5, %v3633_v16 }
 0x485   :  { %5762 = vst.msk [vmem:[%s10953_s4 + $0x68] sm:$0xff] %vm2472_vm1, %v5678_v47  ;;  %5302 = vperm.xlu2 %5956, %v4668_v28   ;;  %v3674_v12 = vmul.f32 0.5, %v3673_v17  ;;  %v3159_v47 = vmul.f32 0.020408163, %v8391_v38  ;;  %v3243_v28 = vmul.f32 %v9354_v25, %v9354_v25  ;;  %v4336_v38 = vld [vmem:[%s10951_s2 + $0x78] sm:$0xff] }
 0x486   :  { %v3635_v60 = vsub.f32 1.5, %v3634_v2 }
 0x487   :  { %v3675_v32 = vsub.f32 1.5, %v3674_v12 }
 0x488   :  { %2582 = vadd.xlane.f32.xlu0 %v2581_v4  ;;  %v3636_v4 = vmul.f32 %v5988_v27, %v3635_v60  ;;  %v11265_v60 = vld [vmem:[#allocation41_spill] sm:$0xff] }
 0x489   :  { %v3676_v15 = vmul.f32 %v5990_v59, %v3675_v32 }
 0x48a   :  { %v3640_v22 = vsel %vm3639_vm8, %v5988_v27, %v3636_v4  ;;  %v4504_v27 = vld [vmem:[%s10952_s3 + $0x78] sm:$0xff] }
 0x48b   :  { %2903 = vadd.xlane.f32.xlu1 %v2902_v33  ;;  %v3327_v33 = vsub.f32 %v3159_v47, %v3243_v28  ;;  %v3680_v18 = vsel %vm3679_vm9, %v5990_v59, %v3676_v15  ;;  %v4420_v17 = vmul.f32 %v4336_v38, %v3640_v22  ;;  %v4508_v59 = vld [vmem:[%s10952_s3 + $0x98] sm:$0xff]  ;;  %v2569_v47 = vsel %vm2472_vm1, %v11265_v60, 0.0  ;;  %v4335_v38 = vld [vmem:[%s10951_s2 + $0x70] sm:$0xff] }
 0x48c   :  { %v4424_v16 = vmul.f32 %v4340_v48, %v3680_v18 }
 0x48d   :  { %v3411_v45 = vadd.f32 1e-05, %v3327_v33  ;;  %v4588_v3 = vmul.f32 %v4420_v17, %v9312_v56 }
 0x48e   :  { %v4592_v30 = vmul.f32 %v4424_v16, %v9317_v1 }
 0x48f   :  { %5991 = vrsqrt.f32 %v3411_v45  ;;  %v4672_v12 = vsub.f32 %v4504_v27, %v4588_v3  ;;  %vm3627_vm10 = vweird.f32 %v3411_v45 }
 0x490   :  { %2918 = vadd.xlane.f32.xlu0 %v2917_v26  ;;  %v4676_v2 = vsub.f32 %v4508_v59, %v4592_v30  ;;  %v3167_v30 = vmul.f32 0.020408163, %v9152_v8 }
 0x495   :  { %v5992_v26 = vpop.eup %5991 }
 0x496   :  { %v3622_v32 = vmul.f32 %v5992_v26, %v3411_v45  ;;  %vm3628_vm0 = vweird.f32 %v5992_v26  ;;  %v11266_v45 = vld [vmem:[#allocation47_spill] sm:$0xff] }
 0x497   :  { %vm3629_vm11 = vmor %vm3627_vm10, %vm3628_vm0  ;;  %v9396_v27 = vmul.f32 0.020408163, %v11266_v45  ;;  %v11269_v45 = vld [vmem:[#allocation48_spill] sm:$0xff] }
 0x498   :  { %v3623_v1 = vmul.f32 %v5992_v26, %v3622_v32  ;;  %v11267_v32 = vld [vmem:[#allocation81_spill] sm:$0xff] }
 0x49a   :  { %v3624_v28 = vmul.f32 0.5, %v3623_v1 }
 0x49c   :  { %v3625_v4 = vsub.f32 1.5, %v3624_v28 }
 0x49e   :  { %v3626_v18 = vmul.f32 %v5992_v26, %v3625_v4 }
 0x4a0   :  { %v3630_v22 = vsel %vm3629_vm11, %v5992_v26, %v3626_v18  ;;  %v9402_v18 = vpop.xlane.xlu2 %2561 }
 0x4a1   :  { %v9390_v3 = vmul.f32 %v4335_v38, %v3630_v22  ;;  %v11268_v22 = vld [vmem:[#allocation85_spill] sm:$0xff] }
 0x4a3   :  { %v9375_v56 = vpop.xlane.xlu1 %2558 }
 0x4a4   :  { %4838 = vperm.xlu0 %5954, %v4424_v16   ;;  %4818 = vperm.xlu1 %5955, %v4420_v17   ;;  %v9387_v16 = vmul.f32 0.020408163, %v8929_v0 }
 0x4a6   :  { %v3251_v59 = vmul.f32 %v9387_v16, %v9387_v16 }
 0x4a8   :  { %v3335_v26 = vsub.f32 %v3167_v30, %v3251_v59  ;;  %v2590_v59 = vsel %vm2472_vm1, %v8432_v50, 0.0 }
 0x4aa   :  { %v3419_v1 = vadd.f32 1e-05, %v3335_v26  ;;  %v2575_v26 = vsel %vm2472_vm1, %v11269_v45, 0.0 }
 0x4ab   :  { %v9379_v33 = vpop.xlane.xlu1 %2894 }
 0x4ac   :  { %5342 = vperm.xlu0 %5954, %v4676_v2   ;;  %5322 = vperm.xlu1 %5955, %v4672_v12   ;;  %v3163_v12 = vmul.f32 0.020408163, %v8509_v51  ;;  %5993 = vrsqrt.f32 %v3419_v1  ;;  %vm3707_vm13 = vweird.f32 %v3419_v1 }
 0x4ad   :  { %v9377_v15 = vpop.xlane.xlu0 %2573 }
 0x4ae   :  { %2570 = vadd.xlane.f32.xlu2 %v2569_v47  ;;  %v3247_v47 = vmul.f32 %v9396_v27, %v9396_v27 }
 0x4b0   :  { %v3331_v4 = vsub.f32 %v3163_v12, %v3247_v47  ;;  %v2759_v47 = vmul.f32 %v11269_v45, %v11269_v45 }
 0x4b2   :  { %v3415_v30 = vadd.f32 1e-05, %v3331_v4  ;;  %v5994_v12 = vpop.eup %5993 }
 0x4b3   :  { %vm3708_vm12 = vweird.f32 %v5994_v12 }
 0x4b4   :  { %5995 = vrsqrt.f32 %v3415_v30  ;;  %vm3709_vm14 = vmor %vm3707_vm13, %vm3708_vm12  ;;  %vm3667_vm2 = vweird.f32 %v3415_v30 }
 0x4b5   :  { %v9381_v48 = vpop.xlane.xlu0 %2909 }
 0x4c3   :  { %v4804_v17 = vpop.permute.xlu1 %4803 }
 0x4c4   :  { %v5173_v0 = vmul.f32 %v4804_v17, %v11267_v32  ;;  %v3702_v32 = vmul.f32 %v5994_v12, %v3419_v1 }
 0x4c6   :  { %4813 = vperm.xlu2 %5956, %v9390_v3  }
 0x4c8   :  { %v4824_v2 = vpop.permute.xlu0 %4823 }
 0x4c9   :  { %v5177_v38 = vmul.f32 %v4824_v2, %v11268_v22  ;;  %v4799_v2 = vpop.permute.xlu2 %4798  ;;  %v2911_v22 = vsel %vm2472_vm1, %v2759_v47, 0.0 }
 0x4ca   :  { %v5172_v35 = vmul.f32 %v4799_v2, %v11270_v61  ;;  %v4343_v61 = vld [vmem:[%s10951_s2 + $0xb0] sm:$0xff] }
 0x4cb   :  { %v5308_v8 = vpop.permute.xlu1 %5307 }
 0x4cc   :  { %v5677_v28 = vadd.f32 %v5308_v8, %v5173_v0  ;;  %v2764_v0 = vmul.f32 %v8432_v50, %v8432_v50  ;;  %v5996_v8 = vpop.eup %5995 }
 0x4cd   :  { %vm3668_vm15 = vweird.f32 %v5996_v8 }
 0x4ce   :  { %5761 = vst.msk [vmem:[%s10953_s4 + $0x60] sm:$0xff] %vm2472_vm1, %v5677_v28  ;;  %v3703_v28 = vmul.f32 %v5994_v12, %v3702_v32  ;;  %v2926_v4 = vsel %vm2472_vm1, %v2764_v0, 0.0  ;;  %v2757_v32 = vmul.f32 %v11265_v60, %v11265_v60  ;;  %vm3669_vm3 = vmor %vm3667_vm2, %vm3668_vm15 }
 0x4d0   :  { %v5328_v51 = vpop.permute.xlu0 %5327 }
 0x4d1   :  { %v5681_v17 = vadd.f32 %v5328_v51, %v5177_v38  ;;  %v3662_v38 = vmul.f32 %v5996_v8, %v3415_v30  ;;  %v4507_v30 = vld [vmem:[%s10952_s3 + $0x90] sm:$0xff] }
 0x4d3   :  { %5765 = vst.msk [vmem:[%s10953_s4 + $0x80] sm:$0xff] %vm2472_vm1, %v5681_v17  ;;  %v3704_v17 = vmul.f32 0.5, %v3703_v28 }
 0x4d6   :  { %2591 = vadd.xlane.f32.xlu0 %v2590_v59  ;;  %2576 = vadd.xlane.f32.xlu1 %v2575_v26  ;;  %v3663_v59 = vmul.f32 %v5996_v8, %v3662_v38  ;;  %v3705_v26 = vsub.f32 1.5, %v3704_v17 }
 0x4d8   :  { %v3664_v24 = vmul.f32 0.5, %v3663_v59  ;;  %v3706_v7 = vmul.f32 %v5994_v12, %v3705_v26 }
 0x4da   :  { %v3665_v0 = vsub.f32 1.5, %v3664_v24  ;;  %v3710_v47 = vsel %vm3709_vm14, %v5994_v12, %v3706_v7  ;;  %v4511_v12 = vld [vmem:[%s10952_s3 + $0xb0] sm:$0xff] }
 0x4db   :  { %v4427_v2 = vmul.f32 %v4343_v61, %v3710_v47 }
 0x4dd   :  { %v4595_v7 = vmul.f32 %v4427_v2, %v9387_v16  ;;  %v4503_v16 = vld [vmem:[%s10952_s3 + $0x70] sm:$0xff] }
 0x4de   :  { %2927 = vadd.xlane.f32.xlu0 %v2926_v4  ;;  %2912 = vadd.xlane.f32.xlu1 %v2911_v22  ;;  %v4587_v22 = vmul.f32 %v9390_v3, %v9354_v25 }
 0x4df   :  { %v4679_v28 = vsub.f32 %v4511_v12, %v4595_v7 }
 0x4e0   :  { %v9423_v51 = vpop.xlane.xlu2 %2897  ;;  %v4671_v59 = vsub.f32 %v4503_v16, %v4587_v22  ;;  %v2599_v22 = vsel %vm2472_vm1, %v8503_v39, 0.0 }
 0x4e8   :  { %v5303_v50 = vpop.permute.xlu2 %5302 }
 0x4e9   :  { %v5676_v10 = vadd.f32 %v5303_v50, %v5172_v35  ;;  %v2905_v35 = vsel %vm2472_vm1, %v2757_v32, 0.0  ;;  %v3666_v50 = vmul.f32 %v5996_v8, %v3665_v0  ;;  %v9461_v32 = vmul.f32 0.020408163, %v9281_v5 }
 0x4ea   :  { %v3170_v0 = vmul.f32 0.020408163, %v9297_v46  ;;  %v3166_v46 = vmul.f32 0.020408163, %v8858_v62 }
 0x4eb   :  { %5760 = vst.msk [vmem:[%s10953_s4 + $0x58] sm:$0xff] %vm2472_vm1, %v5676_v10  ;;  %v3670_v24 = vsel %vm3669_vm3, %v5996_v8, %v3666_v50  ;;  %v4339_v10 = vld [vmem:[%s10951_s2 + $0x90] sm:$0xff]  ;;  %v3254_v25 = vmul.f32 %v9461_v32, %v9461_v32  ;;  %v3162_v50 = vmul.f32 0.020408163, %v8438_v23 }
 0x4ec   :  { %v4423_v1 = vmul.f32 %v4339_v10, %v3670_v24  ;;  %v11271_v10 = vld [vmem:[#allocation84_spill] sm:$0xff] }
 0x4ed   :  { %v3338_v3 = vsub.f32 %v3170_v0, %v3254_v25  ;;  %v2767_v25 = vmul.f32 %v8503_v39, %v8503_v39 }
 0x4ee   :  { %v4591_v4 = vmul.f32 %v4423_v1, %v9396_v27 }
 0x4ef   :  { %2906 = vadd.xlane.f32.xlu2 %v2905_v35  ;;  %v9467_v35 = vmul.f32 0.020408163, %v8415_v53  ;;  %v3422_v24 = vadd.f32 1e-05, %v3338_v3  ;;  %v11273_v3 = vld [vmem:[#allocation51_spill] sm:$0xff] }
 0x4f0   :  { %v4675_v8 = vsub.f32 %v4507_v30, %v4591_v4 }
 0x4f1   :  { %v3246_v5 = vmul.f32 %v9467_v35, %v9467_v35  ;;  %5997 = vrsqrt.f32 %v3422_v24  ;;  %vm3737_vm5 = vweird.f32 %v3422_v24 }
 0x4f2   :  { %4853 = vperm.xlu0 %5954, %v4427_v2   ;;  %v9471_v2 = vmul.f32 0.020408163, %v8825_v11 }
 0x4f4   :  { %v3250_v53 = vmul.f32 %v9471_v2, %v9471_v2 }
 0x4f6   :  { %v9452_v38 = vpop.xlane.xlu1 %2567 }
 0x4f7   :  { %4833 = vperm.xlu1 %5955, %v4423_v1   ;;  %v11272_v1 = vld [vmem:[#allocation90_spill] sm:$0xff]  ;;  %v5998_v16 = vpop.eup %5997 }
 0x4f8   :  { %v3732_v0 = vmul.f32 %v5998_v16, %v3422_v24  ;;  %vm3738_vm4 = vweird.f32 %v5998_v16  ;;  %v4338_v24 = vld [vmem:[%s10951_s2 + $0x88] sm:$0xff] }
 0x4f9   :  { %vm3739_vm6 = vmor %vm3737_vm5, %vm3738_vm4 }
 0x4fa   :  { %5357 = vperm.xlu0 %5954, %v4679_v28   ;;  %v3330_v28 = vsub.f32 %v3162_v50, %v3246_v5  ;;  %v2935_v50 = vsel %vm2472_vm1, %v2767_v25, 0.0 }
 0x4fb   :  { %v9454_v17 = vpop.xlane.xlu0 %2582 }
 0x4fc   :  { %v3414_v62 = vadd.f32 1e-05, %v3330_v28 }
 0x4fe   :  { %v9456_v27 = vpop.xlane.xlu1 %2903  ;;  %5999 = vrsqrt.f32 %v3414_v62  ;;  %vm3657_vm8 = vweird.f32 %v3414_v62 }
 0x4ff   :  { %5337 = vperm.xlu1 %5955, %v4675_v8   ;;  %v3334_v8 = vsub.f32 %v3166_v46, %v3250_v53  ;;  %v2762_v46 = vmul.f32 %v11273_v3, %v11273_v3 }
 0x501   :  { %v2920_v53 = vsel %vm2472_vm1, %v2762_v46, 0.0 }
 0x503   :  { %v9458_v26 = vpop.xlane.xlu0 %2918 }
 0x504   :  { %v6000_v5 = vpop.eup %5999 }
 0x505   :  { %vm3658_vm7 = vweird.f32 %v6000_v5 }
 0x506   :  { %vm3659_vm0 = vmor %vm3657_vm8, %vm3658_vm7 }
 0x507   :  { %5317 = vperm.xlu2 %5956, %v4671_v59   ;;  %v3418_v59 = vadd.f32 1e-05, %v3334_v8 }
 0x509   :  { %6001 = vrsqrt.f32 %v3418_v59  ;;  %vm3697_vm10 = vweird.f32 %v3418_v59 }
 0x516   :  { %v4819_v47 = vpop.permute.xlu1 %4818  ;;  %v4839_v61 = vpop.permute.xlu0 %4838 }
 0x517   :  { %v5176_v7 = vmul.f32 %v4819_v47, %v11271_v10  ;;  %v5180_v12 = vmul.f32 %v4839_v61, %v11272_v1  ;;  %v2584_v47 = vsel %vm2472_vm1, %v11273_v3, 0.0  ;;  %v3733_v61 = vmul.f32 %v5998_v16, %v3732_v0  ;;  %v6002_v10 = vpop.eup %6001 }
 0x518   :  { %vm3698_vm9 = vweird.f32 %v6002_v10 }
 0x519   :  { %v3734_v1 = vmul.f32 0.5, %v3733_v61  ;;  %vm3699_vm11 = vmor %vm3697_vm10, %vm3698_vm9 }
 0x51e   :  { %v5323_v4 = vpop.permute.xlu1 %5322  ;;  %v5343_v23 = vpop.permute.xlu0 %5342 }
 0x51f   :  { %v5680_v30 = vadd.f32 %v5323_v4, %v5176_v7  ;;  %v5684_v11 = vadd.f32 %v5343_v23, %v5180_v12  ;;  %v3652_v7 = vmul.f32 %v6000_v5, %v3414_v62  ;;  %v11274_v12 = vld [vmem:[#allocation23_spill] sm:$0xff]  ;;  %v3692_v4 = vmul.f32 %v6002_v10, %v3418_v59 }
 0x520   :  { %v2578_v28 = vsel %vm2472_vm1, %v11274_v12, 0.0  ;;  %v4342_v62 = vld [vmem:[%s10951_s2 + $0xa8] sm:$0xff] }
 0x521   :  { %5764 = vst.msk [vmem:[%s10953_s4 + $0x78] sm:$0xff] %vm2472_vm1, %v5680_v30  ;;  %v3653_v23 = vmul.f32 %v6000_v5, %v3652_v7  ;;  %v3735_v30 = vsub.f32 1.5, %v3734_v1 }
 0x522   :  { %5768 = vst.msk [vmem:[%s10953_s4 + $0x98] sm:$0xff] %vm2472_vm1, %v5684_v11  ;;  %v3693_v11 = vmul.f32 %v6002_v10, %v3692_v4 }
 0x523   :  { %v3654_v8 = vmul.f32 0.5, %v3653_v23 }
 0x524   :  { %2600 = vadd.xlane.f32.xlu0 %v2599_v22  ;;  %v3736_v22 = vmul.f32 %v5998_v16, %v3735_v30  ;;  %v3694_v0 = vmul.f32 0.5, %v3693_v11  ;;  %v4510_v11 = vld [vmem:[%s10952_s3 + $0xa8] sm:$0xff] }
 0x525   :  { %v3655_v61 = vsub.f32 1.5, %v3654_v8  ;;  %v9517_v8 = vpop.xlane.xlu2 %2570 }
 0x526   :  { %v3740_v25 = vsel %vm3739_vm6, %v5998_v16, %v3736_v22  ;;  %v4514_v16 = vld [vmem:[%s10952_s3 + $0xc8] sm:$0xff] }
 0x527   :  { %v3656_v46 = vmul.f32 %v6000_v5, %v3655_v61  ;;  %v3173_v61 = vmul.f32 0.020408163, %v9379_v33  ;;  %v3085_v33 = vmul.f32 0.020408163, %v8908_v52 }
 0x529   :  { %2585 = vadd.xlane.f32.xlu1 %v2584_v47  ;;  %v4346_v47 = vld [vmem:[%s10951_s2 + $0xc8] sm:$0xff] }
 0x52c   :  { %2936 = vadd.xlane.f32.xlu0 %v2935_v50  ;;  %v3695_v50 = vsub.f32 1.5, %v3694_v0 }
 0x52d   :  { %v4814_v0 = vpop.permute.xlu2 %4813 }
 0x52e   :  { %v3696_v7 = vmul.f32 %v6002_v10, %v3695_v50 }
 0x530   :  { %2579 = vadd.xlane.f32.xlu2 %v2578_v28  ;;  %v4430_v28 = vmul.f32 %v4346_v47, %v3740_v25  ;;  %v3700_v4 = vsel %vm3699_vm11, %v6002_v10, %v3696_v7  ;;  %v3089_v47 = vmul.f32 0.020408163, %v9375_v56  ;;  %v2760_v56 = vmul.f32 %v11274_v12, %v11274_v12 }
 0x531   :  { %2921 = vadd.xlane.f32.xlu1 %v2920_v53  ;;  %v3660_v53 = vsel %vm3659_vm0, %v6000_v5, %v3656_v46 }
 0x532   :  { %v4598_v1 = vmul.f32 %v4430_v28, %v9461_v32  ;;  %v4422_v23 = vmul.f32 %v4338_v24, %v3660_v53  ;;  %v4426_v32 = vmul.f32 %v4342_v62, %v3700_v4  ;;  %v3257_v50 = vmul.f32 %v3089_v47, %v3089_v47  ;;  %v11275_v53 = vld [vmem:[#allocation83_spill] sm:$0xff] }
 0x533   :  { %v5175_v24 = vmul.f32 %v4814_v0, %v11275_v53  ;;  %v2914_v0 = vsel %vm2472_vm1, %v2760_v56, 0.0 }
 0x534   :  { %v4682_v30 = vsub.f32 %v4514_v16, %v4598_v1  ;;  %v4594_v5 = vmul.f32 %v4426_v32, %v9471_v2  ;;  %v3341_v46 = vsub.f32 %v3173_v61, %v3257_v50  ;;  %v3253_v61 = vmul.f32 %v3085_v33, %v3085_v33 }
 0x535   :  { %v2608_v50 = vsel %vm2472_vm1, %v8579_v55, 0.0 }
 0x536   :  { %v4678_v59 = vsub.f32 %v4510_v11, %v4594_v5  ;;  %v3425_v1 = vadd.f32 1e-05, %v3341_v46  ;;  %v3169_v11 = vmul.f32 0.020408163, %v8945_v29 }
 0x538   :  { %6003 = vrsqrt.f32 %v3425_v1  ;;  %v3337_v53 = vsub.f32 %v3169_v11, %v3253_v61  ;;  %vm3767_vm13 = vweird.f32 %v3425_v1 }
 0x53e   :  { %v6004_v46 = vpop.eup %6003 }
 0x53f   :  { %v3762_v29 = vmul.f32 %v6004_v46, %v3425_v1  ;;  %vm3768_vm12 = vweird.f32 %v6004_v46 }
 0x540   :  { %4868 = vperm.xlu0 %5954, %v4430_v28   ;;  %vm3769_vm14 = vmor %vm3767_vm13, %vm3768_vm12 }
 0x548   :  { %4828 = vperm.xlu2 %5956, %v4422_v23   ;;  %5372 = vperm.xlu0 %5954, %v4682_v30  }
 0x549   :  { %v9519_v10 = vpop.xlane.xlu0 %2591  ;;  %v9521_v22 = vpop.xlane.xlu1 %2576 }
 0x54a   :  { %4848 = vperm.xlu1 %5955, %v4426_v32  }
 0x551   :  { %v9523_v25 = vpop.xlane.xlu0 %2927  ;;  %v9527_v2 = vpop.xlane.xlu1 %2912 }
 0x552   :  { %5352 = vperm.xlu1 %5955, %v4678_v59  }
 0x562   :  { %v9529_v28 = vpop.xlane.xlu2 %2906 }
 0x564   :  { %v4854_v7 = vpop.permute.xlu0 %4853 }
 0x565   :  { %v5183_v62 = vmul.f32 %v4854_v7, %v7914_v34  ;;  %v11276_v34 = vld [vmem:[#allocation87_spill] sm:$0xff] }
 0x569   :  { %v4834_v16 = vpop.permute.xlu1 %4833 }
 0x56a   :  { %v5318_v4 = vpop.permute.xlu2 %5317  ;;  %v5179_v59 = vmul.f32 %v4834_v16, %v11276_v34  ;;  %v3421_v16 = vadd.f32 1e-05, %v3337_v53 }
 0x56b   :  { %v5679_v30 = vadd.f32 %v5318_v4, %v5175_v24  ;;  %v2770_v24 = vmul.f32 %v8579_v55, %v8579_v55  ;;  %v3763_v4 = vmul.f32 %v6004_v46, %v3762_v29 }
 0x56c   :  { %v5358_v32 = vpop.permute.xlu0 %5357  ;;  %6005 = vrsqrt.f32 %v3421_v16  ;;  %vm3727_vm2 = vweird.f32 %v3421_v16 }
 0x56d   :  { %5763 = vst.msk [vmem:[%s10953_s4 + $0x70] sm:$0xff] %vm2472_vm1, %v5679_v30  ;;  %v5687_v5 = vadd.f32 %v5358_v32, %v5183_v62  ;;  %v2944_v62 = vsel %vm2472_vm1, %v2770_v24, 0.0  ;;  %v11277_v30 = vld [vmem:[#allocation56_spill] sm:$0xff]  ;;  %v3764_v56 = vmul.f32 0.5, %v3763_v4  ;;  %v4349_v24 = vld [vmem:[%s10951_s2 + $0xe0] sm:$0xff] }
 0x56e   :  { %v2593_v32 = vsel %vm2472_vm1, %v11277_v30, 0.0 }
 0x56f   :  { %5771 = vst.msk [vmem:[%s10953_s4 + $0xb0] sm:$0xff] %vm2472_vm1, %v5687_v5  ;;  %v2765_v5 = vmul.f32 %v11277_v30, %v11277_v30  ;;  %v3765_v34 = vsub.f32 1.5, %v3764_v56 }
 0x571   :  { %2915 = vadd.xlane.f32.xlu2 %v2914_v0  ;;  %v5338_v52 = vpop.permute.xlu1 %5337  ;;  %v4590_v0 = vmul.f32 %v4422_v23, %v9467_v35 }
 0x572   :  { %v5683_v7 = vadd.f32 %v5338_v52, %v5179_v59  ;;  %2609 = vadd.xlane.f32.xlu0 %v2608_v50  ;;  %v6006_v11 = vpop.eup %6005  ;;  %v2929_v59 = vsel %vm2472_vm1, %v2765_v5, 0.0  ;;  %v4506_v52 = vld [vmem:[%s10952_s3 + $0x88] sm:$0xff]  ;;  %v3766_v50 = vmul.f32 %v6004_v46, %v3765_v34  ;;  %v4345_v5 = vld [vmem:[%s10951_s2 + $0xc0] sm:$0xff]  ;;  %v11278_v34 = vld [vmem:[#allocation57_spill] sm:$0xff] }
 0x573   :  { %v3722_v61 = vmul.f32 %v6006_v11, %v3421_v16  ;;  %vm3728_vm15 = vweird.f32 %v6006_v11  ;;  %v4513_v16 = vld [vmem:[%s10952_s3 + $0xc0] sm:$0xff] }
 0x574   :  { %5767 = vst.msk [vmem:[%s10953_s4 + $0x90] sm:$0xff] %vm2472_vm1, %v5683_v7  ;;  %v4674_v7 = vsub.f32 %v4506_v52, %v4590_v0  ;;  %v3770_v29 = vsel %vm3769_vm14, %v6004_v46, %v3766_v50  ;;  %vm3729_vm3 = vmor %vm3727_vm2, %vm3728_vm15  ;;  %v11279_v0 = vld [vmem:[#allocation60_spill] sm:$0xff] }
 0x575   :  { %v3723_v53 = vmul.f32 %v6006_v11, %v3722_v61  ;;  %v4433_v35 = vmul.f32 %v4349_v24, %v3770_v29  ;;  %v3165_v61 = vmul.f32 0.020408163, %v11279_v0 }
 0x577   :  { %v3724_v4 = vmul.f32 0.5, %v3723_v53  ;;  %v4601_v23 = vmul.f32 %v4433_v35, %v3089_v47 }
 0x57a   :  { %2945 = vadd.xlane.f32.xlu0 %v2944_v62  ;;  %v3725_v62 = vsub.f32 1.5, %v3724_v4 }
 0x57c   :  { %2594 = vadd.xlane.f32.xlu1 %v2593_v32  ;;  %v4517_v32 = vld [vmem:[%s10952_s3 + $0xe0] sm:$0xff]  ;;  %v3726_v1 = vmul.f32 %v6006_v11, %v3725_v62 }
 0x57d   :  { %v4685_v56 = vsub.f32 %v4517_v32, %v4601_v23 }
 0x57e   :  { %v3730_v46 = vsel %vm3729_vm3, %v6006_v11, %v3726_v1 }
 0x57f   :  { %v4429_v47 = vmul.f32 %v4345_v5, %v3730_v46 }
 0x581   :  { %v4597_v50 = vmul.f32 %v4429_v47, %v3085_v33  ;;  %v3176_v33 = vmul.f32 0.020408163, %v9456_v27 }
 0x583   :  { %v4681_v11 = vsub.f32 %v4513_v16, %v4597_v50  ;;  %v2617_v16 = vsel %vm2472_vm1, %v8645_v13, 0.0 }
 0x584   :  { %2930 = vadd.xlane.f32.xlu1 %v2929_v59  ;;  %v9575_v59 = vmul.f32 0.020408163, %v11278_v34 }
 0x586   :  { %v3249_v52 = vmul.f32 %v9575_v59, %v9575_v59 }
 0x589   :  { %5332 = vperm.xlu2 %5956, %v4674_v7   ;;  %v3333_v7 = vsub.f32 %v3165_v61, %v3249_v52 }
 0x58b   :  { %v3417_v29 = vadd.f32 1e-05, %v3333_v7 }
 0x58d   :  { %6007 = vrsqrt.f32 %v3417_v29  ;;  %vm3687_vm5 = vweird.f32 %v3417_v29 }
 0x58e   :  { %4883 = vperm.xlu0 %5954, %v4433_v35   ;;  %v9590_v35 = vmul.f32 0.020408163, %v9452_v38 }
 0x590   :  { %v3260_v62 = vmul.f32 %v9590_v35, %v9590_v35 }
 0x592   :  { %v3344_v46 = vsub.f32 %v3176_v33, %v3260_v62  ;;  %v9607_v33 = vmul.f32 0.020408163, %v9158_v44 }
 0x593   :  { %v6008_v23 = vpop.eup %6007 }
 0x594   :  { %v3682_v32 = vmul.f32 %v6008_v23, %v3417_v29  ;;  %v3428_v0 = vadd.f32 1e-05, %v3344_v46  ;;  %vm3688_vm4 = vweird.f32 %v6008_v23 }
 0x595   :  { %vm3689_vm6 = vmor %vm3687_vm5, %vm3688_vm4 }
 0x596   :  { %5387 = vperm.xlu0 %5954, %v4685_v56   ;;  %v11280_v56 = vld [vmem:[#allocation53_spill] sm:$0xff]  ;;  %6009 = vrsqrt.f32 %v3428_v0  ;;  %vm3797_vm8 = vweird.f32 %v3428_v0 }
 0x597   :  { %v9580_v53 = vpop.xlane.xlu0 %2600  ;;  %v2587_v1 = vsel %vm2472_vm1, %v11280_v56, 0.0 }
 0x59c   :  { %v9585_v24 = vpop.xlane.xlu1 %2585 }
 0x59d   :  { %4863 = vperm.xlu1 %5955, %v4429_v47   ;;  %v3683_v47 = vmul.f32 %v6008_v23, %v3682_v32 }
 0x59f   :  { %v9587_v4 = vpop.xlane.xlu0 %2936  ;;  %v3684_v61 = vmul.f32 0.5, %v3683_v47  ;;  %v3256_v47 = vmul.f32 %v9607_v33, %v9607_v33 }
 0x5a1   :  { %v3685_v7 = vsub.f32 1.5, %v3684_v61 }
 0x5a3   :  { %v3686_v62 = vmul.f32 %v6008_v23, %v3685_v7 }
 0x5a4   :  { %v9597_v34 = vpop.xlane.xlu1 %2921 }
 0x5a5   :  { %5367 = vperm.xlu1 %5955, %v4681_v11   ;;  %v6010_v11 = vpop.eup %6009  ;;  %v3690_v44 = vsel %vm3689_vm6, %v6008_v23, %v3686_v62  ;;  %v11282_v23 = vld [vmem:[#allocation27_spill] sm:$0xff] }
 0x5a6   :  { %v3792_v32 = vmul.f32 %v6010_v11, %v3428_v0  ;;  %v2602_v62 = vsel %vm2472_vm1, %v11282_v23, 0.0  ;;  %vm3798_vm7 = vweird.f32 %v6010_v11  ;;  %v4520_v0 = vld [vmem:[%s10952_s3 + $0xf8] sm:$0xff] }
 0x5a7   :  { %vm3799_vm9 = vmor %vm3797_vm8, %vm3798_vm7 }
 0x5b2   :  { %2588 = vadd.xlane.f32.xlu2 %v2587_v1  ;;  %v4869_v5 = vpop.permute.xlu0 %4868  ;;  %v11281_v1 = vld [vmem:[#allocation45_spill] sm:$0xff] }
 0x5b3   :  { %v5186_v38 = vmul.f32 %v4869_v5, %v7995_v6  ;;  %v3172_v6 = vmul.f32 0.020408163, %v9177_v63  ;;  %v2773_v5 = vmul.f32 %v8645_v13, %v8645_v13  ;;  %v3793_v63 = vmul.f32 %v6010_v11, %v3792_v32 }
 0x5b4   :  { %v2768_v32 = vmul.f32 %v11282_v23, %v11282_v23 }
 0x5b5   :  { %v2953_v29 = vsel %vm2472_vm1, %v2773_v5, 0.0 }
 0x5b6   :  { %v2938_v5 = vsel %vm2472_vm1, %v2768_v32, 0.0 }
 0x5ba   :  { %v5373_v52 = vpop.permute.xlu0 %5372 }
 0x5bb   :  { %v5690_v27 = vadd.f32 %v5373_v52, %v5186_v38  ;;  %v4341_v52 = vld [vmem:[%s10951_s2 + $0xa0] sm:$0xff] }
 0x5bc   :  { %v4849_v50 = vpop.permute.xlu1 %4848 }
 0x5bd   :  { %5774 = vst.msk [vmem:[%s10953_s4 + $0xc8] sm:$0xff] %vm2472_vm1, %v5690_v27  ;;  %v5182_v46 = vmul.f32 %v4849_v50, %v11281_v1  ;;  %v3340_v27 = vsub.f32 %v3172_v6, %v3256_v47  ;;  %v4425_v50 = vmul.f32 %v4341_v52, %v3690_v44  ;;  %v9625_v6 = vpop.xlane.xlu2 %2579  ;;  %v4352_v44 = vld [vmem:[%s10951_s2 + $0xf8] sm:$0xff] }
 0x5bf   :  { %v3424_v7 = vadd.f32 1e-05, %v3340_v27 }
 0x5c0   :  { %2618 = vadd.xlane.f32.xlu0 %v2617_v16  ;;  %v3794_v16 = vmul.f32 0.5, %v3793_v63 }
 0x5c1   :  { %6011 = vrsqrt.f32 %v3424_v7  ;;  %vm3757_vm10 = vweird.f32 %v3424_v7 }
 0x5c2   :  { %v3795_v1 = vsub.f32 1.5, %v3794_v16 }
 0x5c4   :  { %v5353_v61 = vpop.permute.xlu1 %5352 }
 0x5c5   :  { %v5686_v38 = vadd.f32 %v5353_v61, %v5182_v46  ;;  %v3796_v46 = vmul.f32 %v6010_v11, %v3795_v1  ;;  %v4829_v63 = vpop.permute.xlu2 %4828 }
 0x5c7   :  { %5770 = vst.msk [vmem:[%s10953_s4 + $0xa8] sm:$0xff] %vm2472_vm1, %v5686_v38  ;;  %v6012_v47 = vpop.eup %6011  ;;  %v3800_v38 = vsel %vm3799_vm9, %v6010_v11, %v3796_v46  ;;  %v11283_v46 = vld [vmem:[#allocation86_spill] sm:$0xff] }
 0x5c8   :  { %2954 = vadd.xlane.f32.xlu0 %v2953_v29  ;;  %v3752_v61 = vmul.f32 %v6012_v47, %v3424_v7  ;;  %v4436_v52 = vmul.f32 %v4352_v44, %v3800_v38  ;;  %vm3758_vm0 = vweird.f32 %v6012_v47 }
 0x5c9   :  { %vm3759_vm11 = vmor %vm3757_vm10, %vm3758_vm0 }
 0x5ca   :  { %4843 = vperm.xlu2 %5956, %v4425_v50   ;;  %v3753_v27 = vmul.f32 %v6012_v47, %v3752_v61  ;;  %v4604_v29 = vmul.f32 %v4436_v52, %v9590_v35  ;;  %v4348_v35 = vld [vmem:[%s10951_s2 + $0xd8] sm:$0xff] }
 0x5cc   :  { %v3754_v16 = vmul.f32 0.5, %v3753_v27 }
 0x5ce   :  { %v3755_v1 = vsub.f32 1.5, %v3754_v16 }
 0x5cf   :  { %2603 = vadd.xlane.f32.xlu1 %v2602_v62  ;;  %v4688_v62 = vsub.f32 %v4520_v0, %v4604_v29  ;;  %v2763_v29 = vmul.f32 %v11280_v56, %v11280_v56 }
 0x5d0   :  { %v3756_v11 = vmul.f32 %v6012_v47, %v3755_v1  ;;  %v3179_v1 = vmul.f32 0.020408163, %v9527_v2 }
 0x5d2   :  { %v3760_v61 = vsel %vm3759_vm11, %v6012_v47, %v3756_v11  ;;  %v2923_v47 = vsel %vm2472_vm1, %v2763_v29, 0.0 }
 0x5d3   :  { %v4432_v27 = vmul.f32 %v4348_v35, %v3760_v61  ;;  %v4593_v35 = vmul.f32 %v4425_v50, %v9575_v59  ;;  %v2626_v59 = vsel %vm2472_vm1, %v8722_v49, 0.0 }
 0x5d5   :  { %v4600_v7 = vmul.f32 %v4432_v27, %v9607_v33 }
 0x5d7   :  { %2939 = vadd.xlane.f32.xlu1 %v2938_v5  ;;  %v5178_v5 = vmul.f32 %v4829_v63, %v11283_v46  ;;  %v4516_v63 = vld [vmem:[%s10952_s3 + $0xd8] sm:$0xff] }
 0x5d8   :  { %v4684_v16 = vsub.f32 %v4516_v63, %v4600_v7  ;;  %v3091_v63 = vmul.f32 0.020408163, %v9299_v14  ;;  %v9686_v14 = vmul.f32 0.020408163, %v8900_v54  ;;  %v4355_v54 = vld [vmem:[%s10951_s2 + $0x110] sm:$0xff] }
 0x5dc   :  { %4898 = vperm.xlu0 %5954, %v4436_v52  }
 0x5e4   :  { %v9637_v32 = vpop.xlane.xlu2 %2915  ;;  %5402 = vperm.xlu0 %5954, %v4688_v62   ;;  %v3095_v62 = vmul.f32 0.020408163, %v9521_v22 }
 0x5e5   :  { %v9643_v52 = vpop.xlane.xlu0 %2609 }
 0x5e6   :  { %v3263_v46 = vmul.f32 %v3095_v62, %v3095_v62 }
 0x5ec   :  { %v5333_v38 = vpop.permute.xlu2 %5332 }
 0x5ed   :  { %v5682_v44 = vadd.f32 %v5333_v38, %v5178_v5  ;;  %v9656_v0 = vpop.xlane.xlu0 %2945  ;;  %v3347_v5 = vsub.f32 %v3179_v1, %v3263_v46  ;;  %v4509_v38 = vld [vmem:[%s10952_s3 + $0xa0] sm:$0xff] }
 0x5ee   :  { %v4677_v2 = vsub.f32 %v4509_v38, %v4593_v35  ;;  %v3259_v35 = vmul.f32 %v3091_v63, %v3091_v63 }
 0x5ef   :  { %5766 = vst.msk [vmem:[%s10953_s4 + $0x88] sm:$0xff] %vm2472_vm1, %v5682_v44  ;;  %v9660_v11 = vpop.xlane.xlu1 %2594  ;;  %v3431_v61 = vadd.f32 1e-05, %v3347_v5  ;;  %v11284_v5 = vld [vmem:[#allocation89_spill] sm:$0xff] }
 0x5f0   :  { %4878 = vperm.xlu1 %5955, %v4432_v27  }
 0x5f1   :  { %6013 = vrsqrt.f32 %v3431_v61  ;;  %vm3827_vm13 = vweird.f32 %v3431_v61 }
 0x5f3   :  { %2924 = vadd.xlane.f32.xlu2 %v2923_v47 }
 0x5f7   :  { %v9666_v44 = vpop.xlane.xlu1 %2930  ;;  %v6014_v50 = vpop.eup %6013 }
 0x5f8   :  { %5382 = vperm.xlu1 %5955, %v4684_v16   ;;  %v3822_v47 = vmul.f32 %v6014_v50, %v3431_v61  ;;  %v3175_v16 = vmul.f32 0.020408163, %v9309_v41  ;;  %vm3828_vm12 = vweird.f32 %v6014_v50  ;;  %v4523_v61 = vld [vmem:[%s10952_s3 + $0x110] sm:$0xff] }
 0x5f9   :  { %vm3829_vm14 = vmor %vm3827_vm13, %vm3828_vm12 }
 0x5fa   :  { %v3823_v1 = vmul.f32 %v6014_v50, %v3822_v47  ;;  %v2611_v47 = vsel %vm2472_vm1, %v8606_v37, 0.0 }
 0x600   :  { %v4884_v33 = vpop.permute.xlu0 %4883 }
 0x601   :  { %v5189_v27 = vmul.f32 %v4884_v33, %v11231_v57  ;;  %v2776_v57 = vmul.f32 %v8722_v49, %v8722_v49 }
 0x603   :  { %v2962_v46 = vsel %vm2472_vm1, %v2776_v57, 0.0 }
 0x608   :  { %v5388_v22 = vpop.permute.xlu0 %5387 }
 0x609   :  { %v5693_v29 = vadd.f32 %v5388_v22, %v5189_v27  ;;  %v3343_v22 = vsub.f32 %v3175_v16, %v3259_v35 }
 0x60b   :  { %5777 = vst.msk [vmem:[%s10953_s4 + $0xe0] sm:$0xff] %vm2472_vm1, %v5693_v29  ;;  %5347 = vperm.xlu2 %5956, %v4677_v2   ;;  %v3824_v29 = vmul.f32 0.5, %v3823_v1  ;;  %v3427_v41 = vadd.f32 1e-05, %v3343_v22 }
 0x60d   :  { %v3825_v2 = vsub.f32 1.5, %v3824_v29  ;;  %6015 = vrsqrt.f32 %v3427_v41  ;;  %vm3787_vm2 = vweird.f32 %v3427_v41 }
 0x60e   :  { %2627 = vadd.xlane.f32.xlu0 %v2626_v59  ;;  %v3168_v59 = vmul.f32 0.020408163, %v8969_v19  ;;  %v2771_v19 = vmul.f32 %v8606_v37, %v8606_v37 }
 0x60f   :  { %v4864_v7 = vpop.permute.xlu1 %4863  ;;  %v3826_v57 = vmul.f32 %v6014_v50, %v3825_v2 }
 0x610   :  { %v5185_v33 = vmul.f32 %v4864_v7, %v11284_v5  ;;  %v3252_v7 = vmul.f32 %v9686_v14, %v9686_v14  ;;  %v2947_v35 = vsel %vm2472_vm1, %v2771_v19, 0.0 }
 0x611   :  { %v3830_v1 = vsel %vm3829_vm14, %v6014_v50, %v3826_v57 }
 0x612   :  { %v3336_v16 = vsub.f32 %v3168_v59, %v3252_v7  ;;  %v11285_v7 = vld [vmem:[#allocation59_spill] sm:$0xff] }
 0x613   :  { %v6016_v5 = vpop.eup %6015 }
 0x614   :  { %vm3788_vm15 = vweird.f32 %v6016_v5 }
 0x615   :  { %vm3789_vm3 = vmor %vm3787_vm2, %vm3788_vm15 }
 0x616   :  { %2963 = vadd.xlane.f32.xlu0 %v2962_v46  ;;  %v3420_v46 = vadd.f32 1e-05, %v3336_v16 }
 0x617   :  { %v5368_v38 = vpop.permute.xlu1 %5367 }
 0x618   :  { %v5689_v27 = vadd.f32 %v5368_v38, %v5185_v33  ;;  %v4439_v33 = vmul.f32 %v4355_v54, %v3830_v1  ;;  %6017 = vrsqrt.f32 %v3420_v46  ;;  %v3782_v38 = vmul.f32 %v6016_v5, %v3427_v41  ;;  %v4519_v41 = vld [vmem:[%s10952_s3 + $0xf0] sm:$0xff] }
 0x619   :  { %vm3717_vm5 = vweird.f32 %v3420_v46 }
 0x61a   :  { %5773 = vst.msk [vmem:[%s10953_s4 + $0xc0] sm:$0xff] %vm2472_vm1, %v5689_v27  ;;  %v4607_v27 = vmul.f32 %v4439_v33, %v3095_v62  ;;  %v3783_v50 = vmul.f32 %v6016_v5, %v3782_v38 }
 0x61c   :  { %v4691_v29 = vsub.f32 %v4523_v61, %v4607_v27  ;;  %v3784_v2 = vmul.f32 0.5, %v3783_v50 }
 0x61e   :  { %v6018_v22 = vpop.eup %6017  ;;  %v3785_v57 = vsub.f32 1.5, %v3784_v2  ;;  %v3098_v2 = vmul.f32 0.020408163, %v9585_v24 }
 0x61f   :  { %v3712_v59 = vmul.f32 %v6018_v22, %v3420_v46  ;;  %vm3718_vm4 = vweird.f32 %v6018_v22 }
 0x620   :  { %v3786_v1 = vmul.f32 %v6016_v5, %v3785_v57  ;;  %vm3719_vm6 = vmor %vm3717_vm5, %vm3718_vm4 }
 0x621   :  { %v3713_v16 = vmul.f32 %v6018_v22, %v3712_v59 }
 0x622   :  { %2612 = vadd.xlane.f32.xlu1 %v2611_v47  ;;  %v2596_v47 = vsel %vm2472_vm1, %v11285_v7, 0.0  ;;  %v3790_v19 = vsel %vm3789_vm3, %v6016_v5, %v3786_v1  ;;  %v4344_v5 = vld [vmem:[%s10951_s2 + $0xb8] sm:$0xff] }
 0x623   :  { %v3714_v54 = vmul.f32 0.5, %v3713_v16 }
 0x62a   :  { %4913 = vperm.xlu0 %5954, %v4439_v33   ;;  %2948 = vadd.xlane.f32.xlu1 %v2947_v35  ;;  %v4351_v33 = vld [vmem:[%s10951_s2 + $0xf0] sm:$0xff]  ;;  %v3715_v35 = vsub.f32 1.5, %v3714_v54  ;;  %v9724_v54 = vpop.xlane.xlu2 %2588 }
 0x62b   :  { %v4435_v38 = vmul.f32 %v4351_v33, %v3790_v19 }
 0x62c   :  { %v3716_v27 = vmul.f32 %v6018_v22, %v3715_v35  ;;  %v2635_v35 = vsel %vm2472_vm1, %v8810_v58, 0.0 }
 0x62d   :  { %v4603_v61 = vmul.f32 %v4435_v38, %v3091_v63  ;;  %v3266_v63 = vmul.f32 %v3098_v2, %v3098_v2 }
 0x62f   :  { %v4687_v59 = vsub.f32 %v4519_v41, %v4603_v61 }
 0x632   :  { %5417 = vperm.xlu0 %5954, %v4691_v29   ;;  %v3720_v29 = vsel %vm3719_vm6, %v6018_v22, %v3716_v27  ;;  %v4844_v27 = vpop.permute.xlu2 %4843 }
 0x633   :  { %v9704_v62 = vpop.xlane.xlu0 %2618  ;;  %v9719_v57 = vmul.f32 %v4344_v5, %v3720_v29 }
 0x634   :  { %2597 = vadd.xlane.f32.xlu2 %v2596_v47  ;;  %v3182_v47 = vmul.f32 0.020408163, %v9597_v34 }
 0x636   :  { %v3350_v46 = vsub.f32 %v3182_v47, %v3266_v63 }
 0x638   :  { %v3434_v22 = vadd.f32 1e-05, %v3350_v46  ;;  %v3178_v46 = vmul.f32 0.020408163, %v9381_v48  ;;  %v4358_v48 = vld [vmem:[%s10951_s2 + $0x128] sm:$0xff] }
 0x63a   :  { %6019 = vrsqrt.f32 %v3434_v22  ;;  %vm3857_vm8 = vweird.f32 %v3434_v22 }
 0x63b   :  { %v9709_v50 = vpop.xlane.xlu0 %2954 }
 0x642   :  { %v9722_v1 = vpop.xlane.xlu1 %2603 }
 0x643   :  { %4893 = vperm.xlu1 %5955, %v4435_v38   ;;  %v6020_v38 = vpop.eup %6019 }
 0x644   :  { %v3852_v61 = vmul.f32 %v6020_v38, %v3434_v22  ;;  %vm3858_vm7 = vweird.f32 %v6020_v38 }
 0x645   :  { %vm3859_vm9 = vmor %vm3857_vm8, %vm3858_vm7 }
 0x646   :  { %v3853_v29 = vmul.f32 %v6020_v38, %v3852_v61 }
 0x648   :  { %v3854_v63 = vmul.f32 0.5, %v3853_v29 }
 0x64a   :  { %v9731_v34 = vpop.xlane.xlu1 %2939 }
 0x64b   :  { %5397 = vperm.xlu1 %5955, %v4687_v59   ;;  %v3094_v59 = vmul.f32 0.020408163, %v9377_v15 }
 0x64c   :  { %4858 = vperm.xlu2 %5956, %v9719_v57  }
 0x64e   :  { %v4899_v16 = vpop.permute.xlu0 %4898 }
 0x64f   :  { %v5192_v19 = vmul.f32 %v4899_v16, %v11264_v36  ;;  %v2779_v36 = vmul.f32 %v8810_v58, %v8810_v58  ;;  %v11286_v58 = vld [vmem:[#allocation88_spill] sm:$0xff] }
 0x650   :  { %v5181_v49 = vmul.f32 %v4844_v27, %v11286_v58  ;;  %v11287_v27 = vld [vmem:[#allocation63_spill] sm:$0xff] }
 0x651   :  { %v2971_v5 = vsel %vm2472_vm1, %v2779_v36, 0.0 }
 0x656   :  { %v5403_v24 = vpop.permute.xlu0 %5402 }
 0x657   :  { %v5696_v33 = vadd.f32 %v5403_v24, %v5192_v19  ;;  %v3262_v19 = vmul.f32 %v3094_v59, %v3094_v59 }
 0x659   :  { %5780 = vst.msk [vmem:[%s10953_s4 + $0xf8] sm:$0xff] %vm2472_vm1, %v5696_v33  ;;  %v3855_v33 = vsub.f32 1.5, %v3854_v63  ;;  %v3346_v56 = vsub.f32 %v3178_v46, %v3262_v19 }
 0x65b   :  { %v3856_v36 = vmul.f32 %v6020_v38, %v3855_v33  ;;  %v3430_v29 = vadd.f32 1e-05, %v3346_v56 }
 0x65c   :  { %2636 = vadd.xlane.f32.xlu0 %v2635_v35 }
 0x65d   :  { %v3860_v58 = vsel %vm3859_vm9, %v6020_v38, %v3856_v36  ;;  %6021 = vrsqrt.f32 %v3430_v29  ;;  %v4526_v38 = vld [vmem:[%s10952_s3 + $0x128] sm:$0xff]  ;;  %vm3817_vm10 = vweird.f32 %v3430_v29 }
 0x65e   :  { %v4442_v22 = vmul.f32 %v4358_v48, %v3860_v58  ;;  %v4354_v48 = vld [vmem:[%s10951_s2 + $0x108] sm:$0xff] }
 0x660   :  { %v4610_v63 = vmul.f32 %v4442_v22, %v3098_v2 }
 0x662   :  { %v4879_v41 = vpop.permute.xlu1 %4878  ;;  %v4694_v19 = vsub.f32 %v4526_v38, %v4610_v63 }
 0x663   :  { %v5188_v16 = vmul.f32 %v4879_v41, %v8061_v31  ;;  %v2766_v31 = vmul.f32 %v11285_v7, %v11285_v7  ;;  %v2774_v41 = vmul.f32 %v11287_v27, %v11287_v27 }
 0x664   :  { %2972 = vadd.xlane.f32.xlu0 %v2971_v5  ;;  %v6022_v5 = vpop.eup %6021 }
 0x665   :  { %v2932_v56 = vsel %vm2472_vm1, %v2766_v31, 0.0  ;;  %v2956_v46 = vsel %vm2472_vm1, %v2774_v41, 0.0  ;;  %vm3818_vm0 = vweird.f32 %v6022_v5 }
 0x666   :  { %v9739_v47 = vpop.xlane.xlu2 %2924  ;;  %vm3819_vm11 = vmor %vm3817_vm10, %vm3818_vm0 }
 0x66a   :  { %v5383_v24 = vpop.permute.xlu1 %5382 }
 0x66b   :  { %v5692_v35 = vadd.f32 %v5383_v24, %v5188_v16  ;;  %v3812_v16 = vmul.f32 %v6022_v5, %v3430_v29  ;;  %v4522_v29 = vld [vmem:[%s10952_s3 + $0x108] sm:$0xff] }
 0x66d   :  { %5776 = vst.msk [vmem:[%s10953_s4 + $0xd8] sm:$0xff] %vm2472_vm1, %v5692_v35  ;;  %v3813_v24 = vmul.f32 %v6022_v5, %v3812_v16  ;;  %v4596_v35 = vmul.f32 %v9719_v57, %v9686_v14  ;;  %v9779_v57 = vmul.f32 0.020408163, %v9660_v11  ;;  %v3171_v11 = vmul.f32 0.020408163, %v9284_v40 }
 0x66e   :  { %v5348_v15 = vpop.permute.xlu2 %5347 }
 0x66f   :  { %v5685_v61 = vadd.f32 %v5348_v15, %v5181_v49  ;;  %v2620_v49 = vsel %vm2472_vm1, %v11287_v27, 0.0  ;;  %v3814_v33 = vmul.f32 0.5, %v3813_v24  ;;  %v4512_v15 = vld [vmem:[%s10952_s3 + $0xb8] sm:$0xff]  ;;  %v3269_v41 = vmul.f32 %v9779_v57, %v9779_v57 }
 0x670   :  { %v4680_v36 = vsub.f32 %v4512_v15, %v4596_v35  ;;  %v11288_v15 = vld [vmem:[#allocation75_spill] sm:$0xff] }
 0x671   :  { %5769 = vst.msk [vmem:[%s10953_s4 + $0xa0] sm:$0xff] %vm2472_vm1, %v5685_v61  ;;  %v3815_v2 = vsub.f32 1.5, %v3814_v33  ;;  %v2644_v40 = vsel %vm2472_vm1, %v11288_v15, 0.0 }
 0x673   :  { %v3816_v31 = vmul.f32 %v6022_v5, %v3815_v2 }
 0x675   :  { %2621 = vadd.xlane.f32.xlu1 %v2620_v49  ;;  %2933 = vadd.xlane.f32.xlu2 %v2932_v56  ;;  %v3820_v58 = vsel %vm3819_vm11, %v6022_v5, %v3816_v31  ;;  %v3185_v56 = vmul.f32 0.020408163, %v9666_v44 }
 0x676   :  { %v4438_v14 = vmul.f32 %v4354_v48, %v3820_v58 }
 0x677   :  { %v3353_v5 = vsub.f32 %v3185_v56, %v3269_v41  ;;  %v11289_v41 = vld [vmem:[#allocation28_spill] sm:$0xff] }
 0x678   :  { %4928 = vperm.xlu0 %5954, %v4442_v22   ;;  %v4606_v22 = vmul.f32 %v4438_v14, %v3094_v59 }
 0x679   :  { %v3437_v16 = vadd.f32 1e-05, %v3353_v5  ;;  %v2605_v5 = vsel %vm2472_vm1, %v11289_v41, 0.0 }
 0x67a   :  { %v4690_v38 = vsub.f32 %v4522_v29, %v4606_v22 }
 0x67b   :  { %6023 = vrsqrt.f32 %v3437_v16  ;;  %vm3887_vm13 = vweird.f32 %v3437_v16 }
 0x67d   :  { %2957 = vadd.xlane.f32.xlu1 %v2956_v46  ;;  %v9788_v46 = vmul.f32 0.020408163, %v9251_v20 }
 0x67f   :  { %v3255_v44 = vmul.f32 %v9788_v46, %v9788_v46 }
 0x680   :  { %5432 = vperm.xlu0 %5954, %v4694_v19  }
 0x681   :  { %v9771_v61 = vpop.xlane.xlu0 %2627  ;;  %v3339_v24 = vsub.f32 %v3171_v11, %v3255_v44  ;;  %v6024_v2 = vpop.eup %6023  ;;  %v3181_v44 = vmul.f32 0.020408163, %v9458_v26 }
 0x682   :  { %vm3888_vm12 = vweird.f32 %v6024_v2 }
 0x683   :  { %v3423_v20 = vadd.f32 1e-05, %v3339_v24  ;;  %vm3889_vm14 = vmor %vm3887_vm13, %vm3888_vm12 }
 0x685   :  { %6025 = vrsqrt.f32 %v3423_v20  ;;  %vm3747_vm2 = vweird.f32 %v3423_v20 }
 0x689   :  { %v9776_v49 = vpop.xlane.xlu0 %2963 }
 0x68d   :  { %5362 = vperm.xlu2 %5956, %v4680_v36   ;;  %v3882_v36 = vmul.f32 %v6024_v2, %v3437_v16 }
 0x68f   :  { %v3883_v58 = vmul.f32 %v6024_v2, %v3882_v36 }
 0x691   :  { %v3884_v22 = vmul.f32 0.5, %v3883_v58 }
 0x693   :  { %v3885_v11 = vsub.f32 1.5, %v3884_v22  ;;  %v11290_v22 = vld [vmem:[#allocation68_spill] sm:$0xff] }
 0x694   :  { %v2629_v16 = vsel %vm2472_vm1, %v11290_v22, 0.0 }
 0x695   :  { %v9793_v59 = vpop.xlane.xlu1 %2612 }
 0x696   :  { %4908 = vperm.xlu1 %5955, %v4438_v14   ;;  %v6026_v14 = vpop.eup %6025 }
 0x697   :  { %v3742_v56 = vmul.f32 %v6026_v14, %v3423_v20  ;;  %vm3748_vm15 = vweird.f32 %v6026_v14 }
 0x698   :  { %vm3749_vm3 = vmor %vm3747_vm2, %vm3748_vm15 }
 0x69c   :  { %v4914_v63 = vpop.permute.xlu0 %4913 }
 0x69d   :  { %v5195_v19 = vmul.f32 %v4914_v63, %v11269_v45  ;;  %v9802_v31 = vpop.xlane.xlu1 %2948  ;;  %v2782_v45 = vmul.f32 %v11288_v15, %v11288_v15  ;;  %v3743_v63 = vmul.f32 %v6026_v14, %v3742_v56 }
 0x69e   :  { %5412 = vperm.xlu1 %5955, %v4690_v38   ;;  %v9810_v38 = vmul.f32 0.020408163, %v9454_v17 }
 0x69f   :  { %v2980_v48 = vsel %vm2472_vm1, %v2782_v45, 0.0  ;;  %v3744_v24 = vmul.f32 0.5, %v3743_v63  ;;  %v4347_v63 = vld [vmem:[%s10951_s2 + $0xd0] sm:$0xff] }
 0x6a1   :  { %v3745_v26 = vsub.f32 1.5, %v3744_v24 }
 0x6a3   :  { %v3746_v56 = vmul.f32 %v6026_v14, %v3745_v26  ;;  %v9842_v26 = vmul.f32 0.020408163, %v9722_v1 }
 0x6a4   :  { %v5418_v33 = vpop.permute.xlu0 %5417 }
 0x6a5   :  { %v5699_v35 = vadd.f32 %v5418_v33, %v5195_v19  ;;  %v3265_v33 = vmul.f32 %v9810_v38, %v9810_v38 }
 0x6a7   :  { %5783 = vst.msk [vmem:[%s10953_s4 + $0x110] sm:$0xff] %vm2472_vm1, %v5699_v35  ;;  %v3349_v45 = vsub.f32 %v3181_v44, %v3265_v33 }
 0x6a9   :  { %v3433_v58 = vadd.f32 1e-05, %v3349_v45 }
 0x6aa   :  { %2645 = vadd.xlane.f32.xlu0 %v2644_v40  ;;  %v3886_v40 = vmul.f32 %v6024_v2, %v3885_v11  ;;  %v2777_v11 = vmul.f32 %v11290_v22, %v11290_v22 }
 0x6ab   :  { %6027 = vrsqrt.f32 %v3433_v58  ;;  %vm3847_vm5 = vweird.f32 %v3433_v58 }
 0x6ac   :  { %v3890_v17 = vsel %vm3889_vm14, %v6024_v2, %v3886_v40  ;;  %v4529_v2 = vld [vmem:[%s10952_s3 + $0x140] sm:$0xff] }
 0x6b1   :  { %v6028_v24 = vpop.eup %6027 }
 0x6b2   :  { %2981 = vadd.xlane.f32.xlu0 %v2980_v48  ;;  %v3842_v20 = vmul.f32 %v6028_v24, %v3433_v58  ;;  %vm3848_vm4 = vweird.f32 %v6028_v24  ;;  %v3272_v58 = vmul.f32 %v9842_v26, %v9842_v26 }
 0x6b3   :  { %vm3849_vm6 = vmor %vm3847_vm5, %vm3848_vm4 }
 0x6b4   :  { %v3843_v33 = vmul.f32 %v6028_v24, %v3842_v20 }
 0x6b5   :  { %v4894_v29 = vpop.permute.xlu1 %4893 }
 0x6b6   :  { %2606 = vadd.xlane.f32.xlu2 %v2605_v5  ;;  %v5191_v19 = vmul.f32 %v4894_v29, %v8141_v9  ;;  %v4361_v9 = vld [vmem:[%s10951_s2 + $0x140] sm:$0xff]  ;;  %v3750_v5 = vsel %vm3749_vm3, %v6026_v14, %v3746_v56  ;;  %v3844_v14 = vmul.f32 0.5, %v3843_v33 }
 0x6b7   :  { %v4445_v48 = vmul.f32 %v4361_v9, %v3890_v17  ;;  %v4357_v56 = vld [vmem:[%s10951_s2 + $0x120] sm:$0xff] }
 0x6b9   :  { %v4613_v29 = vmul.f32 %v4445_v48, %v9779_v57  ;;  %v2965_v57 = vsel %vm2472_vm1, %v2777_v11, 0.0 }
 0x6bb   :  { %v4697_v44 = vsub.f32 %v4529_v2, %v4613_v29  ;;  %v11291_v29 = vld [vmem:[#allocation20_spill] sm:$0xff]  ;;  %v11292_v2 = vld [vmem:[#allocation5_spill] sm:$0xff] }
 0x6bd   :  { %v5398_v35 = vpop.permute.xlu1 %5397 }
 0x6be   :  { %v5695_v36 = vadd.f32 %v5398_v35, %v5191_v19  ;;  %v4431_v19 = vmul.f32 %v4347_v63, %v3750_v5  ;;  %v9835_v35 = vpop.xlane.xlu2 %2597  ;;  %v1594_v5 = vadd.f32 %v11292_v2, %v11291_v29 }
 0x6c0   :  { %5779 = vst.msk [vmem:[%s10953_s4 + $0xf0] sm:$0xff] %vm2472_vm1, %v5695_v36  ;;  %v3845_v36 = vsub.f32 1.5, %v3844_v14  ;;  %v11294_v14 = vld [vmem:[#allocation4_spill] sm:$0xff] }
 0x6c2   :  { %v3846_v17 = vmul.f32 %v6028_v24, %v3845_v36 }
 0x6c6   :  { %4943 = vperm.xlu0 %5954, %v4445_v48   ;;  %v4859_v45 = vpop.permute.xlu2 %4858  ;;  %v3850_v48 = vsel %vm3849_vm6, %v6028_v24, %v3846_v17  ;;  %v11295_v17 = vld [vmem:[#allocation50_spill] sm:$0xff] }
 0x6c7   :  { %v4441_v63 = vmul.f32 %v4357_v56, %v3850_v48  ;;  %v5184_v48 = vmul.f32 %v4859_v45, %v11295_v17 }
 0x6c8   :  { %2630 = vadd.xlane.f32.xlu1 %v2629_v16  ;;  %v3188_v16 = vmul.f32 0.020408163, %v9731_v34  ;;  %v4525_v34 = vld [vmem:[%s10952_s3 + $0x120] sm:$0xff] }
 0x6c9   :  { %v4609_v20 = vmul.f32 %v4441_v63, %v9810_v38  ;;  %v2769_v38 = vmul.f32 %v11289_v41, %v11289_v41 }
 0x6cb   :  { %v4693_v56 = vsub.f32 %v4525_v34, %v4609_v20 }
 0x6ce   :  { %5447 = vperm.xlu0 %5954, %v4697_v44   ;;  %4873 = vperm.xlu2 %5956, %v4431_v19   ;;  %v3356_v44 = vsub.f32 %v3188_v16, %v3272_v58  ;;  %v2941_v58 = vsel %vm2472_vm1, %v2769_v38, 0.0  ;;  %v3184_v38 = vmul.f32 0.020408163, %v9523_v25 }
 0x6cf   :  { %v9837_v40 = vpop.xlane.xlu0 %2636 }
 0x6d0   :  { %2966 = vadd.xlane.f32.xlu1 %v2965_v57  ;;  %v11293_v57 = vld [vmem:[#allocation7_spill] sm:$0xff]  ;;  %v3440_v33 = vadd.f32 1e-05, %v3356_v44 }
 0x6d1   :  { %v1863_v24 = vadd.f32 %v11293_v57, %v1594_v5  ;;  %v11296_v5 = vld [vmem:[#allocation6_spill] sm:$0xff] }
 0x6d2   :  { %6029 = vrsqrt.f32 %v3440_v33  ;;  %vm3917_vm8 = vweird.f32 %v3440_v33 }
 0x6d3   :  { %v2132_v36 = vadd.f32 %v11294_v14, %v1863_v24 }
 0x6d7   :  { %v9839_v9 = vpop.xlane.xlu0 %2972 }
 0x6e8   :  { %v9852_v11 = vpop.xlane.xlu2 %2933 }
 0x6e9   :  { %4923 = vperm.xlu1 %5955, %v4441_v63   ;;  %v9865_v63 = vadd.f32 %v11296_v5, %v2132_v36 }
 0x6ea   :  { %v4929_v1 = vpop.permute.xlu0 %4928 }
 0x6eb   :  { %v5198_v2 = vmul.f32 %v4929_v1, %v11273_v3  ;;  %v9875_v3 = vpop.xlane.xlu1 %2621  ;;  %v2653_v44 = vsel %vm2472_vm1, %v9865_v63, 0.0  ;;  %v6030_v1 = vpop.eup %6029 }
 0x6ec   :  { %v3912_v57 = vmul.f32 %v6030_v1, %v3440_v33  ;;  %vm3918_vm7 = vweird.f32 %v6030_v1  ;;  %v4532_v33 = vld [vmem:[%s10952_s3 + $0x158] sm:$0xff] }
 0x6ed   :  { %vm3919_vm9 = vmor %vm3917_vm8, %vm3918_vm7 }
 0x6ee   :  { %v3913_v24 = vmul.f32 %v6030_v1, %v3912_v57 }
 0x6f0   :  { %v5363_v29 = vpop.permute.xlu2 %5362  ;;  %v3914_v14 = vmul.f32 0.5, %v3913_v24 }
 0x6f1   :  { %v5688_v7 = vadd.f32 %v5363_v29, %v5184_v48  ;;  %5427 = vperm.xlu1 %5955, %v4693_v56   ;;  %v4599_v48 = vmul.f32 %v4431_v19, %v9788_v46  ;;  %v4515_v56 = vld [vmem:[%s10952_s3 + $0xd0] sm:$0xff]  ;;  %v4364_v46 = vld [vmem:[%s10951_s2 + $0x158] sm:$0xff] }
 0x6f2   :  { %v5433_v16 = vpop.permute.xlu0 %5432  ;;  %v3915_v36 = vsub.f32 1.5, %v3914_v14 }
 0x6f3   :  { %5772 = vst.msk [vmem:[%s10953_s4 + $0xb8] sm:$0xff] %vm2472_vm1, %v5688_v7  ;;  %v5702_v45 = vadd.f32 %v5433_v16, %v5198_v2  ;;  %v2785_v7 = vmul.f32 %v9865_v63, %v9865_v63  ;;  %v9883_v34 = vpop.xlane.xlu1 %2957  ;;  %v9890_v2 = vmul.f32 0.020408163, %v9519_v10  ;;  %v4683_v16 = vsub.f32 %v4515_v56, %v4599_v48 }
 0x6f4   :  { %v3916_v29 = vmul.f32 %v6030_v1, %v3915_v36 }
 0x6f5   :  { %5786 = vst.msk [vmem:[%s10953_s4 + $0x128] sm:$0xff] %vm2472_vm1, %v5702_v45  ;;  %v2989_v20 = vsel %vm2472_vm1, %v2785_v7, 0.0  ;;  %v3268_v19 = vmul.f32 %v9890_v2, %v9890_v2 }
 0x6f6   :  { %v3920_v45 = vsel %vm3919_vm9, %v6030_v1, %v3916_v29  ;;  %v11297_v1 = vld [vmem:[#allocation72_spill] sm:$0xff] }
 0x6f7   :  { %2942 = vadd.xlane.f32.xlu2 %v2941_v58  ;;  %v3352_v10 = vsub.f32 %v3184_v38, %v3268_v19  ;;  %v4448_v57 = vmul.f32 %v4364_v46, %v3920_v45  ;;  %v2638_v7 = vsel %vm2472_vm1, %v11297_v1, 0.0  ;;  %v2780_v14 = vmul.f32 %v11297_v1, %v11297_v1 }
 0x6f8   :  { %2654 = vadd.xlane.f32.xlu0 %v2653_v44 }
 0x6f9   :  { %v4616_v25 = vmul.f32 %v4448_v57, %v9842_v26  ;;  %v3174_v26 = vmul.f32 0.020408163, %v9423_v51  ;;  %v2974_v56 = vsel %vm2472_vm1, %v2780_v14, 0.0  ;;  %v11298_v14 = vld [vmem:[#allocation25_spill] sm:$0xff] }
 0x6fb   :  { %v4700_v24 = vsub.f32 %v4532_v33, %v4616_v25  ;;  %v9919_v25 = vmul.f32 0.020408163, %v9793_v59 }
 0x700   :  { %2990 = vadd.xlane.f32.xlu0 %v2989_v20 }
 0x708   :  { %v4909_v17 = vpop.permute.xlu1 %4908 }
 0x709   :  { %v5194_v5 = vmul.f32 %v4909_v17, %v11238_v42  ;;  %v3436_v42 = vadd.f32 1e-05, %v3352_v10  ;;  %v9912_v17 = vmul.f32 0.020408163, %v9402_v18 }
 0x70b   :  { %6031 = vrsqrt.f32 %v3436_v42  ;;  %vm3877_vm10 = vweird.f32 %v3436_v42 }
 0x70f   :  { %5377 = vperm.xlu2 %5956, %v4683_v16   ;;  %v3258_v16 = vmul.f32 %v9912_v17, %v9912_v17 }
 0x710   :  { %v5413_v58 = vpop.permute.xlu1 %5412 }
 0x711   :  { %v5698_v44 = vadd.f32 %v5413_v58, %v5194_v5  ;;  %v6032_v36 = vpop.eup %6031  ;;  %v3342_v5 = vsub.f32 %v3174_v26, %v3258_v16  ;;  %v1603_v26 = vadd.f32 %v9040_v43, %v11298_v14 }
 0x712   :  { %v3872_v29 = vmul.f32 %v6032_v36, %v3436_v42  ;;  %vm3878_vm0 = vweird.f32 %v6032_v36 }
 0x713   :  { %5782 = vst.msk [vmem:[%s10953_s4 + $0x108] sm:$0xff] %vm2472_vm1, %v5698_v44  ;;  %v3426_v44 = vadd.f32 1e-05, %v3342_v5  ;;  %vm3879_vm11 = vmor %vm3877_vm10, %vm3878_vm0  ;;  %v11299_v5 = vld [vmem:[#allocation62_spill] sm:$0xff]  ;;  %v1872_v43 = vadd.f32 %v9042_v21, %v1603_v26 }
 0x714   :  { %4958 = vperm.xlu0 %5954, %v4448_v57   ;;  %v3873_v19 = vmul.f32 %v6032_v36, %v3872_v29  ;;  %v3275_v29 = vmul.f32 %v9919_v25, %v9919_v25  ;;  %v2614_v59 = vsel %vm2472_vm1, %v11299_v5, 0.0 }
 0x715   :  { %vm3777_vm2 = vweird.f32 %v3426_v44 }
 0x716   :  { %v3874_v18 = vmul.f32 0.5, %v3873_v19 }
 0x718   :  { %v3875_v51 = vsub.f32 1.5, %v3874_v18 }
 0x71b   :  { %2639 = vadd.xlane.f32.xlu1 %v2638_v7  ;;  %v3876_v7 = vmul.f32 %v6032_v36, %v3875_v51 }
 0x71c   :  { %5462 = vperm.xlu0 %5954, %v4700_v24  }
 0x71d   :  { %v2646_v20 = vpop.xlane.xlu0 %2645 }
 0x71e   :  { %v3118_v48 = vmul.f32 0.020408163, %v2646_v20  ;;  %v3191_v20 = vmul.f32 0.020408163, %v9802_v31 }
 0x720   :  { %v3286_v45 = vmul.f32 %v3118_v48, %v3118_v48  ;;  %v3359_v31 = vsub.f32 %v3191_v20, %v3275_v29 }
 0x723   :  { %2975 = vadd.xlane.f32.xlu1 %v2974_v56 }
 0x725   :  { %v2982_v38 = vpop.xlane.xlu0 %2981 }
 0x726   :  { %v3202_v46 = vmul.f32 0.020408163, %v2982_v38 }
 0x728   :  { %v3370_v58 = vsub.f32 %v3202_v46, %v3286_v45  ;;  %v3880_v45 = vsel %vm3879_vm11, %v6032_v36, %v3876_v7  ;;  %v4360_v46 = vld [vmem:[%s10951_s2 + $0x138] sm:$0xff]  ;;  %v3443_v36 = vadd.f32 1e-05, %v3359_v31  ;;  %v11300_v7 = vld [vmem:[#allocation10_spill] sm:$0xff] }
 0x729   :  { %v2141_v14 = vadd.f32 %v11300_v7, %v1872_v43 }
 0x72a   :  { %v3454_v10 = vadd.f32 1e-05, %v3370_v58  ;;  %v4444_v58 = vmul.f32 %v4360_v46, %v3880_v45  ;;  %vm3947_vm5 = vweird.f32 %v3443_v36 }
 0x72c   :  { %6033 = vrsqrt.f32 %v3454_v10  ;;  %vm4057_vm13 = vweird.f32 %v3454_v10 }
 0x72d   :  { %6035 = vrsqrt.f32 %v3426_v44 }
 0x72e   :  { %6037 = vrsqrt.f32 %v3443_v36 }
 0x732   :  { %v6034_v57 = vpop.eup %6033 }
 0x733   :  { %v4052_v33 = vmul.f32 %v6034_v57, %v3454_v10  ;;  %v6036_v24 = vpop.eup %6035  ;;  %vm4058_vm12 = vweird.f32 %v6034_v57  ;;  %v4528_v10 = vld [vmem:[%s10952_s3 + $0x138] sm:$0xff] }
 0x734   :  { %v3772_v16 = vmul.f32 %v6036_v24, %v3426_v44  ;;  %vm4059_vm14 = vmor %vm4057_vm13, %vm4058_vm12  ;;  %v6038_v31 = vpop.eup %6037  ;;  %vm3778_vm15 = vweird.f32 %v6036_v24 }
 0x735   :  { %v4053_v56 = vmul.f32 %v6034_v57, %v4052_v33  ;;  %v4378_v33 = vld [vmem:[%s10951_s2 + $0x1c8] sm:$0xff]  ;;  %vm3779_vm3 = vmor %vm3777_vm2, %vm3778_vm15  ;;  %vm3948_vm4 = vweird.f32 %v6038_v31 }
 0x736   :  { %v3773_v18 = vmul.f32 %v6036_v24, %v3772_v16  ;;  %vm3949_vm6 = vmor %vm3947_vm5, %vm3948_vm4 }
 0x737   :  { %v4054_v38 = vmul.f32 0.5, %v4053_v56  ;;  %v4612_v56 = vmul.f32 %v4444_v58, %v9890_v2 }
 0x738   :  { %v4944_v19 = vpop.permute.xlu0 %4943  ;;  %2615 = vadd.xlane.f32.xlu2 %v2614_v59  ;;  %v3774_v21 = vmul.f32 0.5, %v3773_v18  ;;  %v11301_v59 = vld [vmem:[#allocation11_spill] sm:$0xff] }
 0x739   :  { %v4055_v42 = vsub.f32 1.5, %v4054_v38  ;;  %v5201_v26 = vmul.f32 %v4944_v19, %v11277_v30  ;;  %v9947_v45 = vadd.f32 %v11301_v59, %v2141_v14  ;;  %v4696_v46 = vsub.f32 %v4528_v10, %v4612_v56  ;;  %v4350_v18 = vld [vmem:[%s10951_s2 + $0xe8] sm:$0xff]  ;;  %v9968_v56 = vpop.xlane.xlu2 %2606  ;;  %v4367_v10 = vld [vmem:[%s10951_s2 + $0x170] sm:$0xff] }
 0x73a   :  { %v3775_v2 = vsub.f32 1.5, %v3774_v21  ;;  %v3942_v19 = vmul.f32 %v6038_v31, %v3443_v36 }
 0x73b   :  { %v4056_v51 = vmul.f32 %v6034_v57, %v4055_v42  ;;  %v2662_v30 = vsel %vm2472_vm1, %v9947_v45, 0.0  ;;  %v9955_v43 = vpop.xlane.xlu1 %2630  ;;  %v2788_v42 = vmul.f32 %v9947_v45, %v9947_v45 }
 0x73c   :  { %4938 = vperm.xlu1 %5955, %v4444_v58  }
 0x73d   :  { %v4060_v20 = vsel %vm4059_vm14, %v6034_v57, %v4056_v51  ;;  %v3943_v51 = vmul.f32 %v6038_v31, %v3942_v19 }
 0x73e   :  { %v9937_v29 = vmul.f32 %v4378_v33, %v4060_v20  ;;  %v2998_v33 = vsel %vm2472_vm1, %v2788_v42, 0.0 }
 0x73f   :  { %v3944_v44 = vmul.f32 0.5, %v3943_v51 }
 0x740   :  { %v5448_v16 = vpop.permute.xlu0 %5447  ;;  %v9944_v38 = vmul.f32 %v9937_v29, %v3118_v48  ;;  %v3776_v48 = vmul.f32 %v6036_v24, %v3775_v2  ;;  %v11302_v2 = vld [vmem:[#allocation24_spill] sm:$0xff] }
 0x741   :  { %v5705_v57 = vadd.f32 %v5448_v16, %v5201_v26  ;;  %v3945_v20 = vsub.f32 1.5, %v3944_v44  ;;  %v9974_v16 = vmul.f32 0.020408163, %v9580_v53  ;;  %v4535_v53 = vld [vmem:[%s10952_s3 + $0x170] sm:$0xff] }
 0x742   :  { %v3780_v58 = vsel %vm3779_vm3, %v6036_v24, %v3776_v48 }
 0x743   :  { %5789 = vst.msk [vmem:[%s10953_s4 + $0x140] sm:$0xff] %vm2472_vm1, %v5705_v57  ;;  %v9963_v7 = vmul.f32 %v4350_v18, %v3780_v58  ;;  %v9966_v14 = vpop.xlane.xlu1 %2966  ;;  %v3946_v24 = vmul.f32 %v6038_v31, %v3945_v20  ;;  %v3187_v57 = vmul.f32 0.020408163, %v9587_v4  ;;  %v3271_v36 = vmul.f32 %v9974_v16, %v9974_v16  ;;  %v11304_v20 = vld [vmem:[#allocation33_spill] sm:$0xff] }
 0x744   :  { %5442 = vperm.xlu1 %5955, %v4696_v46   ;;  %v4874_v46 = vpop.permute.xlu2 %4873 }
 0x745   :  { %v3950_v26 = vsel %vm3949_vm6, %v6038_v31, %v3946_v24  ;;  %v3355_v42 = vsub.f32 %v3187_v57, %v3271_v36  ;;  %v5187_v24 = vmul.f32 %v4874_v46, %v11304_v20  ;;  %v2772_v36 = vmul.f32 %v11299_v5, %v11299_v5 }
 0x746   :  { %2663 = vadd.xlane.f32.xlu0 %v2662_v30  ;;  %v4451_v59 = vmul.f32 %v4367_v10, %v3950_v26 }
 0x747   :  { %v3439_v58 = vadd.f32 1e-05, %v3355_v42  ;;  %v2950_v42 = vsel %vm2472_vm1, %v2772_v36, 0.0 }
 0x748   :  { %v4619_v31 = vmul.f32 %v4451_v59, %v9919_v25 }
 0x749   :  { %6039 = vrsqrt.f32 %v3439_v58  ;;  %vm3907_vm9 = vweird.f32 %v3439_v58 }
 0x74a   :  { %v4703_v4 = vsub.f32 %v4535_v53, %v4619_v31 }
 0x74e   :  { %2999 = vadd.xlane.f32.xlu0 %v2998_v33  ;;  %v11303_v33 = vld [vmem:[#allocation2_spill] sm:$0xff] }
 0x74f   :  { %v2647_v25 = vsel %vm2472_vm1, %v11303_v33, 0.0  ;;  %v6040_v10 = vpop.eup %6039 }
 0x750   :  { %4888 = vperm.xlu2 %5956, %v9963_v7   ;;  %v3902_v46 = vmul.f32 %v6040_v10, %v3439_v58  ;;  %vm3908_vm7 = vweird.f32 %v6040_v10 }
 0x751   :  { %vm3909_vm0 = vmor %vm3907_vm9, %vm3908_vm7 }
 0x752   :  { %v3903_v53 = vmul.f32 %v6040_v10, %v3902_v46 }
 0x75b   :  { %v4924_v21 = vpop.permute.xlu1 %4923 }
 0x75c   :  { %v5197_v30 = vmul.f32 %v4924_v21, %v11302_v2  ;;  %v2783_v21 = vmul.f32 %v11303_v33, %v11303_v33 }
 0x762   :  { %4973 = vperm.xlu0 %5954, %v4451_v59  }
 0x763   :  { %v5428_v48 = vpop.permute.xlu1 %5427 }
 0x764   :  { %v5701_v19 = vadd.f32 %v5428_v48, %v5197_v30  ;;  %v2983_v48 = vsel %vm2472_vm1, %v2783_v21, 0.0  ;;  %v11306_v21 = vld [vmem:[#allocation15_spill] sm:$0xff] }
 0x766   :  { %5785 = vst.msk [vmem:[%s10953_s4 + $0x120] sm:$0xff] %vm2472_vm1, %v5701_v19 }
 0x76a   :  { %5477 = vperm.xlu0 %5954, %v4703_v4   ;;  %v9988_v18 = vpop.xlane.xlu2 %2942  ;;  %v3904_v4 = vmul.f32 0.5, %v3903_v53 }
 0x76b   :  { %v2655_v51 = vpop.xlane.xlu0 %2654 }
 0x76c   :  { %v3121_v44 = vmul.f32 0.020408163, %v2655_v51 }
 0x76e   :  { %2648 = vadd.xlane.f32.xlu1 %v2647_v25  ;;  %v3289_v2 = vmul.f32 %v3121_v44, %v3121_v44  ;;  %v10004_v25 = vmul.f32 0.020408163, %v9875_v3 }
 0x772   :  { %v5378_v26 = vpop.permute.xlu2 %5377 }
 0x773   :  { %v5691_v59 = vadd.f32 %v5378_v26, %v5187_v24  ;;  %v2991_v57 = vpop.xlane.xlu0 %2990  ;;  %v3905_v24 = vsub.f32 1.5, %v3904_v4  ;;  %v3194_v26 = vmul.f32 0.020408163, %v9883_v34  ;;  %v4381_v34 = vld [vmem:[%s10951_s2 + $0x1e0] sm:$0xff] }
 0x774   :  { %v3205_v30 = vmul.f32 0.020408163, %v2991_v57 }
 0x775   :  { %5775 = vst.msk [vmem:[%s10953_s4 + $0xd0] sm:$0xff] %vm2472_vm1, %v5691_v59  ;;  %v11305_v59 = vld [vmem:[#allocation30_spill] sm:$0xff] }
 0x776   :  { %v3373_v19 = vsub.f32 %v3205_v30, %v3289_v2  ;;  %2984 = vadd.xlane.f32.xlu1 %v2983_v48  ;;  %v1612_v57 = vadd.f32 %v11306_v21, %v11305_v59  ;;  %v3278_v30 = vmul.f32 %v10004_v25, %v10004_v25 }
 0x778   :  { %v3457_v31 = vadd.f32 1e-05, %v3373_v19  ;;  %v3362_v48 = vsub.f32 %v3194_v26, %v3278_v30  ;;  %v3906_v19 = vmul.f32 %v6040_v10, %v3905_v24  ;;  %v4363_v26 = vld [vmem:[%s10951_s2 + $0x150] sm:$0xff]  ;;  %v11308_v24 = vld [vmem:[#allocation14_spill] sm:$0xff] }
 0x779   :  { %2951 = vadd.xlane.f32.xlu2 %v2950_v42  ;;  %v11307_v42 = vld [vmem:[#allocation16_spill] sm:$0xff] }
 0x77a   :  { %6041 = vrsqrt.f32 %v3457_v31  ;;  %v1881_v53 = vadd.f32 %v11307_v42, %v1612_v57  ;;  %vm4087_vm10 = vweird.f32 %v3457_v31  ;;  %v3910_v59 = vsel %vm3909_vm0, %v6040_v10, %v3906_v19  ;;  %v11309_v19 = vld [vmem:[#allocation17_spill] sm:$0xff] }
 0x77b   :  { %v4602_v57 = vmul.f32 %v9963_v7, %v9912_v17  ;;  %v4531_v7 = vld [vmem:[%s10952_s3 + $0x150] sm:$0xff] }
 0x77c   :  { %v2150_v21 = vadd.f32 %v11308_v24, %v1881_v53  ;;  %v10049_v24 = vmul.f32 0.020408163, %v9517_v8 }
 0x77e   :  { %v10031_v42 = vadd.f32 %v11309_v19, %v2150_v21  ;;  %v4370_v19 = vld [vmem:[%s10951_s2 + $0x188] sm:$0xff] }
 0x780   :  { %v6042_v51 = vpop.eup %6041  ;;  %11310 = vst [vmem:[#allocation42_spill] sm:$0xff] %v10031_v42 }
 0x781   :  { %v4082_v20 = vmul.f32 %v6042_v51, %v3457_v31  ;;  %vm4088_vm8 = vweird.f32 %v6042_v51  ;;  %v4518_v31 = vld [vmem:[%s10952_s3 + $0xe8] sm:$0xff] }
 0x782   :  { %vm4089_vm11 = vmor %vm4087_vm10, %vm4088_vm8  ;;  %v4686_v17 = vsub.f32 %v4518_v31, %v4602_v57  ;;  %v3177_v57 = vmul.f32 0.020408163, %v9529_v28  ;;  %v10060_v28 = vmul.f32 0.020408163, %v9643_v52 }
 0x783   :  { %v4083_v2 = vmul.f32 %v6042_v51, %v4082_v20  ;;  %v3446_v20 = vadd.f32 1e-05, %v3362_v48 }
 0x785   :  { %v4084_v36 = vmul.f32 0.5, %v4083_v2  ;;  %6043 = vrsqrt.f32 %v3446_v20  ;;  %vm3977_vm13 = vweird.f32 %v3446_v20 }
 0x786   :  { %v4959_v46 = vpop.permute.xlu0 %4958 }
 0x787   :  { %v4085_v3 = vsub.f32 1.5, %v4084_v36  ;;  %v5204_v30 = vmul.f32 %v4959_v46, %v11282_v23  ;;  %v4447_v36 = vmul.f32 %v4363_v26, %v3910_v59 }
 0x789   :  { %v4086_v4 = vmul.f32 %v6042_v51, %v4085_v3  ;;  %v4615_v23 = vmul.f32 %v4447_v36, %v9974_v16 }
 0x78b   :  { %v4090_v58 = vsel %vm4089_vm11, %v6042_v51, %v4086_v4  ;;  %v6044_v51 = vpop.eup %6043  ;;  %v4699_v46 = vsub.f32 %v4531_v7, %v4615_v23  ;;  %v2791_v4 = vmul.f32 %v10031_v42, %v10031_v42  ;;  %v3190_v7 = vmul.f32 0.020408163, %v9656_v0 }
 0x78c   :  { %v10024_v2 = vmul.f32 %v4381_v34, %v4090_v58  ;;  %v3972_v3 = vmul.f32 %v6044_v51, %v3446_v20  ;;  %v3261_v58 = vmul.f32 %v10049_v24, %v10049_v24  ;;  %vm3978_vm12 = vweird.f32 %v6044_v51  ;;  %v4538_v20 = vld [vmem:[%s10952_s3 + $0x188] sm:$0xff] }
 0x78d   :  { %v3007_v59 = vsel %vm2472_vm1, %v2791_v4, 0.0  ;;  %vm3979_vm14 = vmor %vm3977_vm13, %vm3978_vm12 }
 0x78e   :  { %v5463_v10 = vpop.permute.xlu0 %5462  ;;  %v10028_v48 = vmul.f32 %v10024_v2, %v3121_v44  ;;  %v2671_v44 = vsel %vm2472_vm1, %v10031_v42, 0.0  ;;  %v3973_v34 = vmul.f32 %v6044_v51, %v3972_v3  ;;  %v10046_v26 = vpop.xlane.xlu1 %2639  ;;  %v3274_v3 = vmul.f32 %v10060_v28, %v10060_v28 }
 0x78f   :  { %v5708_v53 = vadd.f32 %v5463_v10, %v5204_v30  ;;  %4953 = vperm.xlu1 %5955, %v4447_v36   ;;  %v3345_v36 = vsub.f32 %v3177_v57, %v3261_v58 }
 0x790   :  { %v3974_v16 = vmul.f32 0.5, %v3973_v34 }
 0x791   :  { %5792 = vst.msk [vmem:[%s10953_s4 + $0x158] sm:$0xff] %vm2472_vm1, %v5708_v53  ;;  %5392 = vperm.xlu2 %5956, %v4686_v17   ;;  %v3429_v8 = vadd.f32 1e-05, %v3345_v36  ;;  %v11313_v36 = vld [vmem:[#allocation8_spill] sm:$0xff] }
 0x792   :  { %v3975_v21 = vsub.f32 1.5, %v3974_v16  ;;  %v3358_v16 = vsub.f32 %v3190_v7, %v3274_v3  ;;  %v2786_v7 = vmul.f32 %v11313_v36, %v11313_v36 }
 0x793   :  { %6045 = vrsqrt.f32 %v3429_v8  ;;  %vm3807_vm2 = vweird.f32 %v3429_v8 }
 0x794   :  { %2672 = vadd.xlane.f32.xlu0 %v2671_v44  ;;  %v3976_v30 = vmul.f32 %v6044_v51, %v3975_v21  ;;  %v11311_v44 = vld [vmem:[#allocation54_spill] sm:$0xff]  ;;  %v11312_v21 = vld [vmem:[#allocation65_spill] sm:$0xff]  ;;  %v3442_v57 = vadd.f32 1e-05, %v3358_v16 }
 0x795   :  { %v2623_v0 = vsel %vm2472_vm1, %v11312_v21, 0.0 }
 0x796   :  { %v10054_v31 = vpop.xlane.xlu1 %2975  ;;  %v3980_v10 = vsel %vm3979_vm14, %v6044_v51, %v3976_v30  ;;  %6047 = vrsqrt.f32 %v3442_v57  ;;  %vm3937_vm8 = vweird.f32 %v3442_v57 }
 0x797   :  { %5457 = vperm.xlu1 %5955, %v4699_v46   ;;  %v4454_v17 = vmul.f32 %v4370_v19, %v3980_v10  ;;  %v2656_v10 = vsel %vm2472_vm1, %v11313_v36, 0.0 }
 0x799   :  { %v4622_v23 = vmul.f32 %v4454_v17, %v10004_v25  ;;  %v6046_v46 = vpop.eup %6045 }
 0x79a   :  { %v3802_v52 = vmul.f32 %v6046_v46, %v3429_v8  ;;  %vm3808_vm15 = vweird.f32 %v6046_v46 }
 0x79b   :  { %v4706_v34 = vsub.f32 %v4538_v20, %v4622_v23  ;;  %vm3809_vm3 = vmor %vm3807_vm2, %vm3808_vm15 }
 0x79c   :  { %3008 = vadd.xlane.f32.xlu0 %v3007_v59  ;;  %v3803_v58 = vmul.f32 %v6046_v46, %v3802_v52 }
 0x79e   :  { %v3804_v19 = vmul.f32 0.5, %v3803_v58  ;;  %v10085_v58 = vmul.f32 0.020408163, %v9955_v43  ;;  %v11316_v43 = vld [vmem:[#allocation26_spill] sm:$0xff] }
 0x7ae   :  { %v4939_v53 = vpop.permute.xlu1 %4938 }
 0x7af   :  { %v5200_v51 = vmul.f32 %v4939_v53, %v11311_v44  ;;  %v3805_v44 = vsub.f32 1.5, %v3804_v19  ;;  %v3197_v19 = vmul.f32 0.020408163, %v9966_v14 }
 0x7b0   :  { %4988 = vperm.xlu0 %5954, %v4454_v17  }
 0x7b6   :  { %v5443_v4 = vpop.permute.xlu1 %5442 }
 0x7b7   :  { %v5704_v59 = vadd.f32 %v5443_v4, %v5200_v51  ;;  %v6048_v51 = vpop.eup %6047  ;;  %v2992_v4 = vsel %vm2472_vm1, %v2786_v7, 0.0 }
 0x7b8   :  { %5492 = vperm.xlu0 %5954, %v4706_v34   ;;  %v3932_v34 = vmul.f32 %v6048_v51, %v3442_v57  ;;  %vm3938_vm7 = vweird.f32 %v6048_v51 }
 0x7b9   :  { %5788 = vst.msk [vmem:[%s10953_s4 + $0x138] sm:$0xff] %vm2472_vm1, %v5704_v59  ;;  %v2664_v25 = vpop.xlane.xlu0 %2663  ;;  %v3806_v59 = vmul.f32 %v6046_v46, %v3805_v44  ;;  %vm3939_vm9 = vmor %vm3937_vm8, %vm3938_vm7 }
 0x7ba   :  { %2624 = vadd.xlane.f32.xlu2 %v2623_v0  ;;  %v3124_v30 = vmul.f32 0.020408163, %v2664_v25  ;;  %v3933_v16 = vmul.f32 %v6048_v51, %v3932_v34  ;;  %v4353_v25 = vld [vmem:[%s10951_s2 + $0x100] sm:$0xff] }
 0x7bb   :  { %v3810_v52 = vsel %vm3809_vm3, %v6046_v46, %v3806_v59  ;;  %v3281_v46 = vmul.f32 %v10085_v58, %v10085_v58 }
 0x7bc   :  { %v3292_v17 = vmul.f32 %v3124_v30, %v3124_v30  ;;  %v3934_v8 = vmul.f32 0.5, %v3933_v16  ;;  %v4384_v16 = vld [vmem:[%s10951_s2 + $0x1f8] sm:$0xff] }
 0x7be   :  { %v3935_v5 = vsub.f32 1.5, %v3934_v8  ;;  %v11318_v8 = vld [vmem:[#allocation29_spill] sm:$0xff] }
 0x7c1   :  { %2657 = vadd.xlane.f32.xlu1 %v2656_v10  ;;  %v3000_v53 = vpop.xlane.xlu0 %2999 }
 0x7c2   :  { %v3208_v23 = vmul.f32 0.020408163, %v3000_v53  ;;  %v10088_v53 = vmul.f32 %v4353_v25, %v3810_v52  ;;  %v11317_v25 = vld [vmem:[#allocation21_spill] sm:$0xff] }
 0x7c4   :  { %v3376_v20 = vsub.f32 %v3208_v23, %v3292_v17  ;;  %v11314_v17 = vld [vmem:[#allocation34_spill] sm:$0xff] }
 0x7c5   :  { %v11315_v23 = vld [vmem:[#allocation22_spill] sm:$0xff] }
 0x7c6   :  { %v3460_v3 = vadd.f32 1e-05, %v3376_v20  ;;  %v1621_v20 = vadd.f32 %v11315_v23, %v11314_v17  ;;  %v3936_v17 = vmul.f32 %v6048_v51, %v3935_v5  ;;  %v4366_v5 = vld [vmem:[%s10951_s2 + $0x168] sm:$0xff] }
 0x7c8   :  { %6049 = vrsqrt.f32 %v3460_v3  ;;  %v1890_v59 = vadd.f32 %v11316_v43, %v1621_v20  ;;  %vm4117_vm5 = vweird.f32 %v3460_v3 }
 0x7c9   :  { %2993 = vadd.xlane.f32.xlu1 %v2992_v4  ;;  %v3365_v4 = vsub.f32 %v3197_v19, %v3281_v46  ;;  %v10100_v19 = vpop.xlane.xlu2 %2615 }
 0x7cb   :  { %v3449_v52 = vadd.f32 1e-05, %v3365_v4  ;;  %v3940_v4 = vsel %vm3939_vm9, %v6048_v51, %v3936_v17 }
 0x7cd   :  { %6051 = vrsqrt.f32 %v3449_v52  ;;  %vm4007_vm10 = vweird.f32 %v3449_v52 }
 0x7ce   :  { %v6050_v0 = vpop.eup %6049 }
 0x7cf   :  { %v4112_v10 = vmul.f32 %v6050_v0, %v3460_v3  ;;  %vm4118_vm4 = vweird.f32 %v6050_v0 }
 0x7d0   :  { %vm4119_vm6 = vmor %vm4117_vm5, %vm4118_vm4 }
 0x7d1   :  { %v4113_v7 = vmul.f32 %v6050_v0, %v4112_v10  ;;  %v2159_v10 = vadd.f32 %v11317_v25, %v1890_v59 }
 0x7d2   :  { %4903 = vperm.xlu2 %5956, %v10088_v53  }
 0x7d3   :  { %v4114_v44 = vmul.f32 0.5, %v4113_v7  ;;  %v10109_v46 = vadd.f32 %v11318_v8, %v2159_v10 }
 0x7d4   :  { %v4974_v34 = vpop.permute.xlu0 %4973 }
 0x7d5   :  { %v4115_v42 = vsub.f32 1.5, %v4114_v44  ;;  %v5207_v20 = vmul.f32 %v4974_v34, %v8606_v37  ;;  %11319 = vst [vmem:[#allocation67_spill] sm:$0xff] %v10109_v46  ;;  %v4450_v37 = vmul.f32 %v4366_v5, %v3940_v4  ;;  %v4889_v34 = vpop.permute.xlu2 %4888  ;;  %v2794_v59 = vmul.f32 %v10109_v46, %v10109_v46 }
 0x7d7   :  { %v4116_v14 = vmul.f32 %v6050_v0, %v4115_v42  ;;  %v4618_v51 = vmul.f32 %v4450_v37, %v10060_v28 }
 0x7d9   :  { %v4120_v23 = vsel %vm4119_vm6, %v6050_v0, %v4116_v14  ;;  %v6052_v0 = vpop.eup %6051  ;;  %v4534_v14 = vld [vmem:[%s10952_s3 + $0x168] sm:$0xff] }
 0x7da   :  { %v10102_v7 = vmul.f32 %v4384_v16, %v4120_v23  ;;  %v4002_v43 = vmul.f32 %v6052_v0, %v3449_v52  ;;  %v4702_v25 = vsub.f32 %v4534_v14, %v4618_v51  ;;  %v3016_v23 = vsel %vm2472_vm1, %v2794_v59, 0.0 }
 0x7db   :  { %vm4008_vm0 = vweird.f32 %v6052_v0  ;;  %v2775_v59 = vmul.f32 %v11312_v21, %v11312_v21 }
 0x7dc   :  { %v5478_v42 = vpop.permute.xlu0 %5477  ;;  %v10106_v3 = vmul.f32 %v10102_v7, %v3124_v30  ;;  %v2680_v30 = vsel %vm2472_vm1, %v10109_v46, 0.0  ;;  %v4003_v10 = vmul.f32 %v6052_v0, %v4002_v43  ;;  %vm4009_vm11 = vmor %vm4007_vm10, %vm4008_vm0 }
 0x7dd   :  { %v5711_v44 = vadd.f32 %v5478_v42, %v5207_v20 }
 0x7df   :  { %5795 = vst.msk [vmem:[%s10953_s4 + $0x170] sm:$0xff] %vm2472_vm1, %v5711_v44  ;;  %v4004_v44 = vmul.f32 0.5, %v4003_v10 }
 0x7e1   :  { %v2649_v57 = vpop.xlane.xlu1 %2648  ;;  %v4005_v5 = vsub.f32 1.5, %v4004_v44  ;;  %v4541_v44 = vld [vmem:[%s10952_s3 + $0x1a0] sm:$0xff] }
 0x7e2   :  { %2681 = vadd.xlane.f32.xlu0 %v2680_v30  ;;  %4968 = vperm.xlu1 %5955, %v4450_v37   ;;  %v3119_v16 = vmul.f32 0.020408163, %v2649_v57  ;;  %v11320_v37 = vld [vmem:[#allocation36_spill] sm:$0xff] }
 0x7e3   :  { %v5190_v30 = vmul.f32 %v4889_v34, %v11320_v37  ;;  %v4006_v51 = vmul.f32 %v6052_v0, %v4005_v5  ;;  %v4373_v34 = vld [vmem:[%s10951_s2 + $0x1a0] sm:$0xff] }
 0x7e4   :  { %v3287_v20 = vmul.f32 %v3119_v16, %v3119_v16 }
 0x7e5   :  { %v4010_v10 = vsel %vm4009_vm11, %v6052_v0, %v4006_v51  ;;  %v3193_v51 = vmul.f32 0.020408163, %v9709_v50  ;;  %v4521_v50 = vld [vmem:[%s10952_s3 + $0x100] sm:$0xff] }
 0x7e9   :  { %v2985_v17 = vpop.xlane.xlu1 %2984 }
 0x7ea   :  { %v3203_v42 = vmul.f32 0.020408163, %v2985_v17  ;;  %3017 = vadd.xlane.f32.xlu0 %v3016_v23  ;;  %5472 = vperm.xlu1 %5955, %v4702_v25   ;;  %v4457_v23 = vmul.f32 %v4373_v34, %v4010_v10 }
 0x7ec   :  { %v3371_v8 = vsub.f32 %v3203_v42, %v3287_v20  ;;  %v10127_v28 = vpop.xlane.xlu2 %2951  ;;  %v4379_v42 = vld [vmem:[%s10951_s2 + $0x1d0] sm:$0xff]  ;;  %v4625_v0 = vmul.f32 %v4457_v23, %v10085_v58 }
 0x7ee   :  { %v3455_v4 = vadd.f32 1e-05, %v3371_v8 }
 0x7f0   :  { %6053 = vrsqrt.f32 %v3455_v4  ;;  %vm4067_vm13 = vweird.f32 %v3455_v4 }
 0x7f4   :  { %v5393_v46 = vpop.permute.xlu2 %5392 }
 0x7f5   :  { %v5694_v57 = vadd.f32 %v5393_v46, %v5190_v30  ;;  %v2959_v46 = vsel %vm2472_vm1, %v2775_v59, 0.0  ;;  %v4709_v30 = vsub.f32 %v4541_v44, %v4625_v0 }
 0x7f6   :  { %v6054_v43 = vpop.eup %6053 }
 0x7f7   :  { %v4062_v14 = vmul.f32 %v6054_v43, %v3455_v4  ;;  %5778 = vst.msk [vmem:[%s10953_s4 + $0xe8] sm:$0xff] %vm2472_vm1, %v5694_v57  ;;  %vm4068_vm12 = vweird.f32 %v6054_v43  ;;  %v10153_v4 = vmul.f32 0.020408163, %v9704_v62  ;;  %v4605_v62 = vmul.f32 %v10088_v53, %v10049_v24 }
 0x7f8   :  { %vm4069_vm14 = vmor %vm4067_vm13, %vm4068_vm12 }
 0x7f9   :  { %v4063_v25 = vmul.f32 %v6054_v43, %v4062_v14  ;;  %v3277_v14 = vmul.f32 %v10153_v4, %v10153_v4 }
 0x7fb   :  { %v4064_v17 = vmul.f32 0.5, %v4063_v25  ;;  %2960 = vadd.xlane.f32.xlu2 %v2959_v46  ;;  %v3361_v10 = vsub.f32 %v3193_v51, %v3277_v14  ;;  %v11323_v14 = vld [vmem:[#allocation40_spill] sm:$0xff] }
 0x7fd   :  { %v4065_v20 = vsub.f32 1.5, %v4064_v17 }
 0x7fe   :  { %5003 = vperm.xlu0 %5954, %v4457_v23   ;;  %v4689_v23 = vsub.f32 %v4521_v50, %v4605_v62 }
 0x7ff   :  { %v4066_v52 = vmul.f32 %v6054_v43, %v4065_v20 }
 0x801   :  { %v4954_v8 = vpop.permute.xlu1 %4953  ;;  %v4070_v5 = vsel %vm4069_vm14, %v6054_v43, %v4066_v52  ;;  %v11321_v52 = vld [vmem:[#allocation12_spill] sm:$0xff] }
 0x802   :  { %v10147_v37 = vmul.f32 %v4379_v42, %v4070_v5  ;;  %v5203_v58 = vmul.f32 %v4954_v8, %v8503_v39  ;;  %v3445_v39 = vadd.f32 1e-05, %v3361_v10  ;;  %v2665_v42 = vsel %vm2472_vm1, %v11321_v52, 0.0 }
 0x803   :  { %v2789_v24 = vmul.f32 %v11321_v52, %v11321_v52 }
 0x804   :  { %v10150_v57 = vmul.f32 %v10147_v37, %v3119_v16  ;;  %6055 = vrsqrt.f32 %v3445_v39  ;;  %vm3967_vm5 = vweird.f32 %v3445_v39 }
 0x805   :  { %v3001_v8 = vsel %vm2472_vm1, %v2789_v24, 0.0  ;;  %v4387_v24 = vld [vmem:[%s10951_s2 + $0x210] sm:$0xff] }
 0x806   :  { %5507 = vperm.xlu0 %5954, %v4709_v30   ;;  %v10174_v30 = vmul.f32 0.020408163, %v10046_v26  ;;  %v10183_v26 = vmul.f32 0.020408163, %v9625_v6 }
 0x807   :  { %v2673_v59 = vpop.xlane.xlu0 %2672 }
 0x808   :  { %v3127_v34 = vmul.f32 0.020408163, %v2673_v59  ;;  %v3200_v59 = vmul.f32 0.020408163, %v10054_v31  ;;  %v3284_v62 = vmul.f32 %v10174_v30, %v10174_v30 }
 0x809   :  { %v5458_v25 = vpop.permute.xlu1 %5457 }
 0x80a   :  { %v5707_v43 = vadd.f32 %v5458_v25, %v5203_v58  ;;  %v3295_v46 = vmul.f32 %v3127_v34, %v3127_v34  ;;  %v6056_v53 = vpop.eup %6055  ;;  %v11322_v58 = vld [vmem:[#allocation43_spill] sm:$0xff] }
 0x80b   :  { %v3962_v5 = vmul.f32 %v6056_v53, %v3445_v39  ;;  %v1630_v25 = vadd.f32 %v11323_v14, %v11322_v58  ;;  %v3264_v14 = vmul.f32 %v10183_v26, %v10183_v26  ;;  %vm3968_vm4 = vweird.f32 %v6056_v53 }
 0x80c   :  { %5791 = vst.msk [vmem:[%s10953_s4 + $0x150] sm:$0xff] %vm2472_vm1, %v5707_v43  ;;  %vm3969_vm6 = vmor %vm3967_vm5, %vm3968_vm4 }
 0x80d   :  { %v3963_v10 = vmul.f32 %v6056_v53, %v3962_v5 }
 0x80f   :  { %v3009_v16 = vpop.xlane.xlu0 %3008 }
 0x810   :  { %v3211_v17 = vmul.f32 0.020408163, %v3009_v16  ;;  %v3368_v16 = vsub.f32 %v3200_v59, %v3284_v62 }
 0x812   :  { %v3379_v20 = vsub.f32 %v3211_v17, %v3295_v46  ;;  %v11324_v17 = vld [vmem:[#allocation35_spill] sm:$0xff]  ;;  %v3452_v5 = vadd.f32 1e-05, %v3368_v16 }
 0x813   :  { %5407 = vperm.xlu2 %5956, %v4689_v23   ;;  %v1899_v23 = vadd.f32 %v11324_v17, %v1630_v25 }
 0x814   :  { %v3463_v0 = vadd.f32 1e-05, %v3379_v20  ;;  %2666 = vadd.xlane.f32.xlu1 %v2665_v42  ;;  %v3964_v42 = vmul.f32 0.5, %v3963_v10  ;;  %vm4037_vm8 = vweird.f32 %v3452_v5 }
 0x816   :  { %6057 = vrsqrt.f32 %v3463_v0  ;;  %vm4147_vm2 = vweird.f32 %v3463_v0  ;;  %v3965_v25 = vsub.f32 1.5, %v3964_v42 }
 0x817   :  { %6059 = vrsqrt.f32 %v3452_v5 }
 0x81c   :  { %v6058_v44 = vpop.eup %6057  ;;  %3002 = vadd.xlane.f32.xlu1 %v3001_v8  ;;  %v3180_v8 = vmul.f32 0.020408163, %v9637_v32  ;;  %v11326_v32 = vld [vmem:[#allocation79_spill] sm:$0xff] }
 0x81d   :  { %v4142_v51 = vmul.f32 %v6058_v44, %v3463_v0  ;;  %vm4148_vm15 = vweird.f32 %v6058_v44 }
 0x81e   :  { %vm4149_vm3 = vmor %vm4147_vm2, %vm4148_vm15  ;;  %v3348_v0 = vsub.f32 %v3180_v8, %v3264_v14 }
 0x81f   :  { %v4143_v43 = vmul.f32 %v6058_v44, %v4142_v51  ;;  %v11325_v51 = vld [vmem:[#allocation37_spill] sm:$0xff] }
 0x820   :  { %v2168_v59 = vadd.f32 %v11325_v51, %v1899_v23  ;;  %v3432_v17 = vadd.f32 1e-05, %v3348_v0  ;;  %v4369_v23 = vld [vmem:[%s10951_s2 + $0x180] sm:$0xff] }
 0x821   :  { %v4144_v50 = vmul.f32 0.5, %v4143_v43 }
 0x822   :  { %v4989_v46 = vpop.permute.xlu0 %4988  ;;  %6061 = vrsqrt.f32 %v3432_v17  ;;  %vm3837_vm10 = vweird.f32 %v3432_v17 }
 0x823   :  { %v4145_v20 = vsub.f32 1.5, %v4144_v50  ;;  %v5210_v43 = vmul.f32 %v4989_v46, %v11287_v27  ;;  %v10199_v50 = vadd.f32 %v11326_v32, %v2168_v59  ;;  %v6060_v46 = vpop.eup %6059 }
 0x824   :  { %vm4038_vm7 = vweird.f32 %v6060_v46 }
 0x825   :  { %v4146_v31 = vmul.f32 %v6058_v44, %v4145_v20  ;;  %11327 = vst [vmem:[#allocation78_spill] sm:$0xff] %v10199_v50  ;;  %v2689_v27 = vsel %vm2472_vm1, %v10199_v50, 0.0  ;;  %v4032_v20 = vmul.f32 %v6060_v46, %v3452_v5  ;;  %vm4039_vm9 = vmor %vm4037_vm8, %vm4038_vm7  ;;  %v4544_v5 = vld [vmem:[%s10952_s3 + $0x1b8] sm:$0xff] }
 0x827   :  { %v4150_v58 = vsel %vm4149_vm3, %v6058_v44, %v4146_v31  ;;  %v3966_v44 = vmul.f32 %v6056_v53, %v3965_v25  ;;  %v2797_v31 = vmul.f32 %v10199_v50, %v10199_v50  ;;  %v4033_v39 = vmul.f32 %v6060_v46, %v4032_v20 }
 0x828   :  { %v10192_v6 = vmul.f32 %v4387_v24, %v4150_v58  ;;  %v6062_v59 = vpop.eup %6061 }
 0x829   :  { %v3025_v8 = vsel %vm2472_vm1, %v2797_v31, 0.0  ;;  %v3832_v14 = vmul.f32 %v6062_v59, %v3432_v17  ;;  %v4034_v25 = vmul.f32 0.5, %v4033_v39  ;;  %v4376_v39 = vld [vmem:[%s10951_s2 + $0x1b8] sm:$0xff]  ;;  %vm3838_vm0 = vweird.f32 %v6062_v59 }
 0x82a   :  { %v5493_v10 = vpop.permute.xlu0 %5492  ;;  %v10196_v62 = vmul.f32 %v10192_v6, %v3127_v34  ;;  %v3970_v34 = vsel %vm3969_vm6, %v6056_v53, %v3966_v44  ;;  %v4537_v53 = vld [vmem:[%s10952_s3 + $0x180] sm:$0xff]  ;;  %vm3839_vm11 = vmor %vm3837_vm10, %vm3838_vm0 }
 0x82b   :  { %v5714_v16 = vadd.f32 %v5493_v10, %v5210_v43  ;;  %v4453_v42 = vmul.f32 %v4369_v23, %v3970_v34  ;;  %v11328_v43 = vld [vmem:[#allocation69_spill] sm:$0xff] }
 0x82c   :  { %v2632_v0 = vsel %vm2472_vm1, %v11328_v43, 0.0 }
 0x82d   :  { %5798 = vst.msk [vmem:[%s10953_s4 + $0x188] sm:$0xff] %vm2472_vm1, %v5714_v16  ;;  %v4621_v51 = vmul.f32 %v4453_v42, %v10153_v4  ;;  %v4035_v4 = vsub.f32 1.5, %v4034_v25 }
 0x82f   :  { %v4705_v10 = vsub.f32 %v4537_v53, %v4621_v51 }
 0x830   :  { %2690 = vadd.xlane.f32.xlu0 %v2689_v27  ;;  %v3833_v27 = vmul.f32 %v6062_v59, %v3832_v14 }
 0x832   :  { %v3834_v20 = vmul.f32 0.5, %v3833_v27 }
 0x834   :  { %v2658_v24 = vpop.xlane.xlu1 %2657  ;;  %v3835_v31 = vsub.f32 1.5, %v3834_v20 }
 0x835   :  { %4983 = vperm.xlu1 %5955, %v4453_v42   ;;  %v3122_v58 = vmul.f32 0.020408163, %v2658_v24  ;;  %v4036_v42 = vmul.f32 %v6060_v46, %v4035_v4 }
 0x836   :  { %v3836_v14 = vmul.f32 %v6062_v59, %v3835_v31  ;;  %v3196_v31 = vmul.f32 0.020408163, %v9776_v49 }
 0x837   :  { %v3290_v16 = vmul.f32 %v3122_v58, %v3122_v58  ;;  %v4040_v24 = vsel %vm4039_vm9, %v6060_v46, %v4036_v42 }
 0x838   :  { %3026 = vadd.xlane.f32.xlu0 %v3025_v8  ;;  %v4460_v53 = vmul.f32 %v4376_v39, %v4040_v24  ;;  %v3840_v46 = vsel %vm3839_vm11, %v6062_v59, %v3836_v14 }
 0x83c   :  { %v2994_v32 = vpop.xlane.xlu1 %2993  ;;  %2633 = vadd.xlane.f32.xlu2 %v2632_v0 }
 0x83d   :  { %v3206_v44 = vmul.f32 0.020408163, %v2994_v32  ;;  %5487 = vperm.xlu1 %5955, %v4705_v10   ;;  %v4628_v10 = vmul.f32 %v4460_v53, %v10174_v30  ;;  %v4356_v32 = vld [vmem:[%s10951_s2 + $0x118] sm:$0xff]  ;;  %v4382_v30 = vld [vmem:[%s10951_s2 + $0x1e8] sm:$0xff] }
 0x83e   :  { %v10229_v4 = vmul.f32 %v4356_v32, %v3840_v46  ;;  %v11329_v46 = vld [vmem:[#allocation18_spill] sm:$0xff] }
 0x83f   :  { %v3374_v34 = vsub.f32 %v3206_v44, %v3290_v16  ;;  %v4712_v27 = vsub.f32 %v4544_v5, %v4628_v10  ;;  %v2674_v32 = vsel %vm2472_vm1, %v11329_v46, 0.0 }
 0x841   :  { %v3458_v23 = vadd.f32 1e-05, %v3374_v34 }
 0x843   :  { %6063 = vrsqrt.f32 %v3458_v23  ;;  %vm4097_vm13 = vweird.f32 %v3458_v23 }
 0x849   :  { %v6064_v8 = vpop.eup %6063 }
 0x84a   :  { %v4092_v51 = vmul.f32 %v6064_v8, %v3458_v23  ;;  %vm4098_vm12 = vweird.f32 %v6064_v8  ;;  %v10241_v23 = vmul.f32 0.020408163, %v9771_v61 }
 0x84b   :  { %vm4099_vm14 = vmor %vm4097_vm13, %vm4098_vm12 }
 0x84c   :  { %v4093_v25 = vmul.f32 %v6064_v8, %v4092_v51  ;;  %5018 = vperm.xlu0 %5954, %v4460_v53   ;;  %v3280_v51 = vmul.f32 %v10241_v23, %v10241_v23  ;;  %v10247_v53 = vpop.xlane.xlu2 %2624 }
 0x84e   :  { %v4094_v0 = vmul.f32 0.5, %v4093_v25 }
 0x850   :  { %v4095_v16 = vsub.f32 1.5, %v4094_v0  ;;  %v3364_v0 = vsub.f32 %v3196_v31, %v3280_v51 }
 0x852   :  { %v4096_v44 = vmul.f32 %v6064_v8, %v4095_v16  ;;  %v3448_v49 = vadd.f32 1e-05, %v3364_v0  ;;  %v11333_v0 = vld [vmem:[#allocation92_spill] sm:$0xff] }
 0x854   :  { %5522 = vperm.xlu0 %5954, %v4712_v27   ;;  %v4969_v17 = vpop.permute.xlu1 %4968  ;;  %4918 = vperm.xlu2 %5956, %v10229_v4   ;;  %v4100_v59 = vsel %vm4099_vm14, %v6064_v8, %v4096_v44  ;;  %v2792_v44 = vmul.f32 %v11329_v46, %v11329_v46  ;;  %vm3997_vm5 = vweird.f32 %v3448_v49 }
 0x855   :  { %v2682_v34 = vpop.xlane.xlu0 %2681  ;;  %v10235_v20 = vmul.f32 %v4382_v30, %v4100_v59  ;;  %v5206_v39 = vmul.f32 %v4969_v17, %v8579_v55  ;;  %v4904_v55 = vpop.permute.xlu2 %4903  ;;  %v11330_v17 = vld [vmem:[#allocation52_spill] sm:$0xff]  ;;  %v11331_v59 = vld [vmem:[#allocation91_spill] sm:$0xff] }
 0x856   :  { %v3130_v24 = vmul.f32 0.020408163, %v2682_v34  ;;  %v1639_v34 = vadd.f32 %v11331_v59, %v11330_v17  ;;  %v3010_v51 = vsel %vm2472_vm1, %v2792_v44, 0.0  ;;  %v4390_v17 = vld [vmem:[%s10951_s2 + $0x228] sm:$0xff]  ;;  %v5193_v44 = vmul.f32 %v4904_v55, %v11265_v60 }
 0x857   :  { %v10238_v42 = vmul.f32 %v10235_v20, %v3122_v58 }
 0x858   :  { %v3298_v10 = vmul.f32 %v3130_v24, %v3130_v24 }
 0x85c   :  { %v5473_v8 = vpop.permute.xlu1 %5472 }
 0x85d   :  { %v5710_v14 = vadd.f32 %v5473_v8, %v5206_v39  ;;  %v3018_v25 = vpop.xlane.xlu0 %3017 }
 0x85e   :  { %v3214_v58 = vmul.f32 0.020408163, %v3018_v25 }
 0x85f   :  { %5794 = vst.msk [vmem:[%s10953_s4 + $0x168] sm:$0xff] %vm2472_vm1, %v5710_v14 }
 0x860   :  { %v3382_v61 = vsub.f32 %v3214_v58, %v3298_v10  ;;  %v1908_v10 = vadd.f32 %v11333_v0, %v1639_v34 }
 0x862   :  { %v3466_v5 = vadd.f32 1e-05, %v3382_v61 }
 0x864   :  { %6065 = vrsqrt.f32 %v3466_v5  ;;  %vm4177_vm2 = vweird.f32 %v3466_v5 }
 0x865   :  { %6067 = vrsqrt.f32 %v3448_v49 }
 0x867   :  { %2675 = vadd.xlane.f32.xlu1 %v2674_v32 }
 0x86a   :  { %v6066_v16 = vpop.eup %6065 }
 0x86b   :  { %v4172_v27 = vmul.f32 %v6066_v16, %v3466_v5  ;;  %v6068_v30 = vpop.eup %6067  ;;  %vm4178_vm15 = vweird.f32 %v6066_v16  ;;  %v2778_v5 = vmul.f32 %v11328_v43, %v11328_v43 }
 0x86c   :  { %v3992_v8 = vmul.f32 %v6068_v30, %v3448_v49  ;;  %vm4179_vm3 = vmor %vm4177_vm2, %vm4178_vm15  ;;  %vm3998_vm4 = vweird.f32 %v6068_v30  ;;  %v4540_v49 = vld [vmem:[%s10952_s3 + $0x198] sm:$0xff] }
 0x86d   :  { %v4173_v31 = vmul.f32 %v6066_v16, %v4172_v27  ;;  %v11334_v27 = vld [vmem:[#allocation49_spill] sm:$0xff]  ;;  %vm3999_vm6 = vmor %vm3997_vm5, %vm3998_vm4 }
 0x86e   :  { %v10259_v39 = vpop.xlane.xlu2 %2960  ;;  %v3993_v61 = vmul.f32 %v6068_v30, %v3992_v8  ;;  %v2177_v59 = vadd.f32 %v11334_v27, %v1908_v10 }
 0x86f   :  { %11332 = vst [vmem:[#allocation82_spill] sm:$0xff] %v10259_v39  ;;  %v4174_v14 = vmul.f32 0.5, %v4173_v31  ;;  %3011 = vadd.xlane.f32.xlu1 %v3010_v51 }
 0x870   :  { %v5004_v25 = vpop.permute.xlu0 %5003  ;;  %v3994_v50 = vmul.f32 0.5, %v3993_v61 }
 0x871   :  { %v4175_v58 = vsub.f32 1.5, %v4174_v14  ;;  %v5213_v34 = vmul.f32 %v5004_v25, %v11290_v22  ;;  %v2968_v22 = vsel %vm2472_vm1, %v2778_v5, 0.0  ;;  %v4372_v25 = vld [vmem:[%s10951_s2 + $0x198] sm:$0xff] }
 0x873   :  { %v4176_v32 = vmul.f32 %v6066_v16, %v4175_v58  ;;  %v11335_v58 = vld [vmem:[#allocation93_spill] sm:$0xff] }
 0x874   :  { %v10277_v39 = vadd.f32 %v11335_v58, %v2177_v59 }
 0x875   :  { %v4180_v21 = vsel %vm4179_vm3, %v6066_v16, %v4176_v32 }
 0x876   :  { %v5408_v31 = vpop.permute.xlu2 %5407  ;;  %v10268_v51 = vmul.f32 %v4390_v17, %v4180_v21  ;;  %v3995_v21 = vsub.f32 1.5, %v3994_v50  ;;  %v2800_v16 = vmul.f32 %v10277_v39, %v10277_v39 }
 0x877   :  { %v5697_v14 = vadd.f32 %v5408_v31, %v5193_v44 }
 0x878   :  { %v5508_v8 = vpop.permute.xlu0 %5507  ;;  %v10274_v0 = vmul.f32 %v10268_v51, %v3130_v24  ;;  %v2698_v24 = vsel %vm2472_vm1, %v10277_v39, 0.0  ;;  %v3996_v55 = vmul.f32 %v6068_v30, %v3995_v21  ;;  %v3034_v10 = vsel %vm2472_vm1, %v2800_v16, 0.0 }
 0x879   :  { %5781 = vst.msk [vmem:[%s10953_s4 + $0x100] sm:$0xff] %vm2472_vm1, %v5697_v14  ;;  %v5717_v60 = vadd.f32 %v5508_v8, %v5213_v34  ;;  %v4524_v14 = vld [vmem:[%s10952_s3 + $0x118] sm:$0xff] }
 0x87a   :  { %v4000_v50 = vsel %vm3999_vm6, %v6068_v30, %v3996_v55  ;;  %v4608_v30 = vmul.f32 %v10229_v4, %v10183_v26  ;;  %v4547_v26 = vld [vmem:[%s10952_s3 + $0x1d0] sm:$0xff] }
 0x87b   :  { %5801 = vst.msk [vmem:[%s10953_s4 + $0x1a0] sm:$0xff] %vm2472_vm1, %v5717_v60  ;;  %v4456_v61 = vmul.f32 %v4372_v25, %v4000_v50  ;;  %v4715_v21 = vsub.f32 %v4547_v26, %v10150_v57  ;;  %v10314_v50 = vmul.f32 0.020408163, %v9724_v54  ;;  %v11336_v26 = vld [vmem:[#allocation31_spill] sm:$0xff] }
 0x87c   :  { %v4692_v5 = vsub.f32 %v4524_v14, %v4608_v30 }
 0x87d   :  { %2969 = vadd.xlane.f32.xlu2 %v2968_v22  ;;  %v4624_v17 = vmul.f32 %v4456_v61, %v10241_v23 }
 0x87e   :  { %2699 = vadd.xlane.f32.xlu0 %v2698_v24 }
 0x87f   :  { %v4708_v59 = vsub.f32 %v4540_v49, %v4624_v17  ;;  %v3267_v17 = vmul.f32 %v10314_v50, %v10314_v50 }
 0x886   :  { %3035 = vadd.xlane.f32.xlu0 %v3034_v10 }
 0x887   :  { %v2667_v32 = vpop.xlane.xlu1 %2666 }
 0x888   :  { %4998 = vperm.xlu1 %5955, %v4456_v61   ;;  %v3125_v27 = vmul.f32 0.020408163, %v2667_v32  ;;  %v3183_v61 = vmul.f32 0.020408163, %v9739_v47 }
 0x88a   :  { %v3293_v31 = vmul.f32 %v3125_v27, %v3125_v27  ;;  %v3351_v54 = vsub.f32 %v3183_v61, %v3267_v17  ;;  %v2795_v17 = vmul.f32 %v11336_v26, %v11336_v26 }
 0x88f   :  { %v3003_v44 = vpop.xlane.xlu1 %3002 }
 0x890   :  { %v3209_v34 = vmul.f32 0.020408163, %v3003_v44  ;;  %5502 = vperm.xlu1 %5955, %v4708_v59   ;;  %v10325_v59 = vmul.f32 0.020408163, %v9837_v40 }
 0x892   :  { %v3377_v8 = vsub.f32 %v3209_v34, %v3293_v31  ;;  %v3199_v34 = vmul.f32 0.020408163, %v9839_v9 }
 0x894   :  { %v3461_v23 = vadd.f32 1e-05, %v3377_v8  ;;  %v3283_v8 = vmul.f32 %v10325_v59, %v10325_v59 }
 0x895   :  { %5422 = vperm.xlu2 %5956, %v4692_v5  }
 0x896   :  { %6069 = vrsqrt.f32 %v3461_v23  ;;  %vm4127_vm8 = vweird.f32 %v3461_v23 }
 0x89a   :  { %5033 = vperm.xlu0 %5954, %v10147_v37   ;;  %v4385_v37 = vld [vmem:[%s10951_s2 + $0x200] sm:$0xff] }
 0x89c   :  { %v6070_v58 = vpop.eup %6069 }
 0x89d   :  { %v4122_v60 = vmul.f32 %v6070_v58, %v3461_v23  ;;  %vm4128_vm7 = vweird.f32 %v6070_v58  ;;  %v3435_v23 = vadd.f32 1e-05, %v3351_v54 }
 0x89e   :  { %vm4129_vm9 = vmor %vm4127_vm8, %vm4128_vm7 }
 0x89f   :  { %v4123_v4 = vmul.f32 %v6070_v58, %v4122_v60  ;;  %v3367_v60 = vsub.f32 %v3199_v34, %v3283_v8  ;;  %v3019_v8 = vsel %vm2472_vm1, %v2795_v17, 0.0  ;;  %vm3867_vm13 = vweird.f32 %v3435_v23 }
 0x8a1   :  { %v4124_v22 = vmul.f32 0.5, %v4123_v4  ;;  %v3451_v40 = vadd.f32 1e-05, %v3367_v60  ;;  %v2683_v4 = vsel %vm2472_vm1, %v11336_v26, 0.0  ;;  %v11341_v60 = vld [vmem:[#allocation94_spill] sm:$0xff] }
 0x8a2   :  { %5537 = vperm.xlu0 %5954, %v4715_v21  }
 0x8a3   :  { %v4125_v24 = vsub.f32 1.5, %v4124_v22  ;;  %v2691_v55 = vpop.xlane.xlu0 %2690  ;;  %v11337_v22 = vld [vmem:[#allocation61_spill] sm:$0xff]  ;;  %vm4027_vm2 = vweird.f32 %v3451_v40 }
 0x8a4   :  { %v3133_v57 = vmul.f32 0.020408163, %v2691_v55 }
 0x8a5   :  { %v4126_v16 = vmul.f32 %v6070_v58, %v4125_v24  ;;  %v11338_v24 = vld [vmem:[#allocation95_spill] sm:$0xff] }
 0x8a6   :  { %v3301_v30 = vmul.f32 %v3133_v57, %v3133_v57  ;;  %v1648_v55 = vadd.f32 %v11338_v24, %v11337_v22 }
 0x8a7   :  { %v4984_v25 = vpop.permute.xlu1 %4983  ;;  %v4130_v10 = vsel %vm4129_vm9, %v6070_v58, %v4126_v16 }
 0x8a8   :  { %v10317_v32 = vmul.f32 %v4385_v37, %v4130_v10  ;;  %v5209_v47 = vmul.f32 %v4984_v25, %v8645_v13  ;;  %v11339_v10 = vld [vmem:[#allocation74_spill] sm:$0xff] }
 0x8a9   :  { %v2641_v61 = vsel %vm2472_vm1, %v11339_v10, 0.0 }
 0x8aa   :  { %v10322_v49 = vmul.f32 %v10317_v32, %v3125_v27 }
 0x8ab   :  { %v3027_v44 = vpop.xlane.xlu0 %3026 }
 0x8ac   :  { %v3217_v31 = vmul.f32 0.020408163, %v3027_v44 }
 0x8ae   :  { %v3385_v14 = vsub.f32 %v3217_v31, %v3301_v30  ;;  %v11340_v30 = vld [vmem:[#allocation77_spill] sm:$0xff] }
 0x8af   :  { %v5488_v5 = vpop.permute.xlu1 %5487  ;;  %v1917_v31 = vadd.f32 %v11340_v30, %v1648_v55 }
 0x8b0   :  { %v3469_v58 = vadd.f32 1e-05, %v3385_v14  ;;  %v5713_v27 = vadd.f32 %v5488_v5, %v5209_v47  ;;  %v4393_v5 = vld [vmem:[%s10951_s2 + $0x240] sm:$0xff] }
 0x8b2   :  { %6071 = vrsqrt.f32 %v3469_v58  ;;  %5797 = vst.msk [vmem:[%s10953_s4 + $0x180] sm:$0xff] %vm2472_vm1, %v5713_v27  ;;  %vm4207_vm10 = vweird.f32 %v3469_v58 }
 0x8b3   :  { %6073 = vrsqrt.f32 %v3435_v23 }
 0x8b4   :  { %6075 = vrsqrt.f32 %v3451_v40 }
 0x8b8   :  { %v6072_v9 = vpop.eup %6071 }
 0x8b9   :  { %v4202_v13 = vmul.f32 %v6072_v9, %v3469_v58  ;;  %v6074_v21 = vpop.eup %6073  ;;  %vm4208_vm0 = vweird.f32 %v6072_v9 }
 0x8ba   :  { %2684 = vadd.xlane.f32.xlu1 %v2683_v4  ;;  %v3862_v37 = vmul.f32 %v6074_v21, %v3435_v23  ;;  %v6076_v54 = vpop.eup %6075  ;;  %vm4209_vm11 = vmor %vm4207_vm10, %vm4208_vm0  ;;  %vm3868_vm12 = vweird.f32 %v6074_v21  ;;  %v4375_v23 = vld [vmem:[%s10951_s2 + $0x1b0] sm:$0xff] }
 0x8bb   :  { %v4203_v16 = vmul.f32 %v6072_v9, %v4202_v13  ;;  %v4022_v27 = vmul.f32 %v6076_v54, %v3451_v40  ;;  %v2186_v13 = vadd.f32 %v11341_v60, %v1917_v31  ;;  %vm3869_vm14 = vmor %vm3867_vm13, %vm3868_vm12  ;;  %vm4028_vm15 = vweird.f32 %v6076_v54 }
 0x8bc   :  { %v3863_v47 = vmul.f32 %v6074_v21, %v3862_v37  ;;  %vm4029_vm3 = vmor %vm4027_vm2, %vm4028_vm15 }
 0x8bd   :  { %v4204_v25 = vmul.f32 0.5, %v4203_v16  ;;  %v4023_v16 = vmul.f32 %v6076_v54, %v4022_v27 }
 0x8be   :  { %v5019_v44 = vpop.permute.xlu0 %5018  ;;  %2642 = vadd.xlane.f32.xlu2 %v2641_v61  ;;  %v3864_v24 = vmul.f32 0.5, %v3863_v47  ;;  %v4359_v47 = vld [vmem:[%s10951_s2 + $0x130] sm:$0xff] }
 0x8bf   :  { %v4205_v34 = vsub.f32 1.5, %v4204_v25  ;;  %v5216_v55 = vmul.f32 %v5019_v44, %v11297_v1  ;;  %v11342_v25 = vld [vmem:[#allocation96_spill] sm:$0xff] }
 0x8c0   :  { %v10356_v61 = vadd.f32 %v11342_v25, %v2186_v13  ;;  %v3865_v30 = vsub.f32 1.5, %v3864_v24  ;;  %v10374_v13 = vpop.xlane.xlu2 %2633 }
 0x8c1   :  { %v4206_v14 = vmul.f32 %v6072_v9, %v4205_v34 }
 0x8c2   :  { %3020 = vadd.xlane.f32.xlu1 %v3019_v8  ;;  %v2707_v31 = vsel %vm2472_vm1, %v10356_v61, 0.0  ;;  %v3866_v1 = vmul.f32 %v6074_v21, %v3865_v30 }
 0x8c3   :  { %v4210_v4 = vsel %vm4209_vm11, %v6072_v9, %v4206_v14  ;;  %v4024_v9 = vmul.f32 0.5, %v4023_v16 }
 0x8c4   :  { %v10349_v22 = vmul.f32 %v4393_v5, %v4210_v4  ;;  %v3870_v34 = vsel %vm3869_vm14, %v6074_v21, %v3866_v1  ;;  %v4543_v4 = vld [vmem:[%s10952_s3 + $0x1b0] sm:$0xff] }
 0x8c5   :  { %v4025_v44 = vsub.f32 1.5, %v4024_v9  ;;  %v4443_v5 = vmul.f32 %v4359_v47, %v3870_v34  ;;  %v2781_v34 = vmul.f32 %v11339_v10, %v11339_v10 }
 0x8c6   :  { %v5523_v37 = vpop.permute.xlu0 %5522  ;;  %v10353_v58 = vmul.f32 %v10349_v22, %v3133_v57  ;;  %v2803_v57 = vmul.f32 %v10356_v61, %v10356_v61 }
 0x8c7   :  { %v5720_v17 = vadd.f32 %v5523_v37, %v5216_v55  ;;  %v4026_v14 = vmul.f32 %v6076_v54, %v4025_v44 }
 0x8c8   :  { %v3043_v8 = vsel %vm2472_vm1, %v2803_v57, 0.0  ;;  %v4919_v24 = vpop.permute.xlu2 %4918 }
 0x8c9   :  { %5804 = vst.msk [vmem:[%s10953_s4 + $0x1b8] sm:$0xff] %vm2472_vm1, %v5720_v17  ;;  %v4030_v27 = vsel %vm4029_vm3, %v6076_v54, %v4026_v14  ;;  %v4550_v54 = vld [vmem:[%s10952_s3 + $0x1e8] sm:$0xff]  ;;  %v5196_v30 = vmul.f32 %v4919_v24, %v11274_v12  ;;  %v2977_v14 = vsel %vm2472_vm1, %v2781_v34, 0.0  ;;  %v11343_v12 = vld [vmem:[#allocation66_spill] sm:$0xff]  ;;  %v4396_v34 = vld [vmem:[%s10951_s2 + $0x258] sm:$0xff] }
 0x8ca   :  { %v4459_v60 = vmul.f32 %v4375_v23, %v4030_v27  ;;  %v4718_v16 = vsub.f32 %v4550_v54, %v10238_v42 }
 0x8cc   :  { %2708 = vadd.xlane.f32.xlu0 %v2707_v31  ;;  %v4627_v21 = vmul.f32 %v4459_v60, %v10325_v59 }
 0x8ce   :  { %v4711_v40 = vsub.f32 %v4543_v4, %v4627_v21  ;;  %v1656_v21 = vpop.f32.mrf.mxu2 }
 0x8d4   :  { %3044 = vadd.xlane.f32.xlu0 %v3043_v8 }
 0x8d6   :  { %4933 = vperm.xlu2 %5956, %v4443_v5  }
 0x8da   :  { %v2676_v55 = vpop.xlane.xlu1 %2675 }
 0x8db   :  { %5013 = vperm.xlu1 %5955, %v4459_v60  }
 0x8e2   :  { %v3012_v25 = vpop.xlane.xlu1 %3011 }
 0x8e3   :  { %5517 = vperm.xlu1 %5955, %v4711_v40   ;;  %v11344_v40 = vld [vmem:[#allocation70_spill] sm:$0xff] }
 0x8e4   :  { %v1657_v24 = vadd.f32 %v1656_v21, %v11344_v40 }
 0x8e8   :  { %5048 = vperm.xlu0 %5954, %v10235_v20  }
 0x8f0   :  { %5552 = vperm.xlu0 %5954, %v4718_v16   ;;  %v10384_v59 = vpop.xlane.xlu2 %2969  ;;  %v1925_v16 = vpop.f32.mrf.mxu3 }
 0x8f1   :  { %v2700_v37 = vpop.xlane.xlu0 %2699 }
 0x8f2   :  { %v3136_v17 = vmul.f32 0.020408163, %v2700_v37 }
 0x8f4   :  { %v3304_v44 = vmul.f32 %v3136_v17, %v3136_v17 }
 0x8f8   :  { %v5423_v9 = vpop.permute.xlu2 %5422 }
 0x8f9   :  { %v5700_v31 = vadd.f32 %v5423_v9, %v5196_v30  ;;  %v3036_v1 = vpop.xlane.xlu0 %3035  ;;  %v11345_v9 = vld [vmem:[#allocation44_spill] sm:$0xff] }
 0x8fa   :  { %v3220_v57 = vmul.f32 0.020408163, %v3036_v1  ;;  %v4999_v20 = vpop.permute.xlu1 %4998  ;;  %v1926_v1 = vadd.f32 %v1925_v16, %v1657_v24 }
 0x8fb   :  { %5784 = vst.msk [vmem:[%s10953_s4 + $0x118] sm:$0xff] %vm2472_vm1, %v5700_v31  ;;  %v5212_v8 = vmul.f32 %v4999_v20, %v11343_v12  ;;  %v2692_v31 = vsel %vm2472_vm1, %v11345_v9, 0.0  ;;  %v4611_v12 = vmul.f32 %v4443_v5, %v10314_v50  ;;  %v10420_v5 = vmul.f32 0.020408163, %v2676_v55 }
 0x8fc   :  { %v3388_v42 = vsub.f32 %v3220_v57, %v3304_v44  ;;  %v2194_v57 = vpop.f32.mrf.mxu0 }
 0x8fe   :  { %v3472_v47 = vadd.f32 1e-05, %v3388_v42  ;;  %v2798_v42 = vmul.f32 %v11345_v9, %v11345_v9 }
 0x8ff   :  { %2978 = vadd.xlane.f32.xlu2 %v2977_v14  ;;  %v2195_v14 = vadd.f32 %v2194_v57, %v1926_v1  ;;  %v10434_v1 = vmul.f32 0.020408163, %v9835_v35 }
 0x900   :  { %6077 = vrsqrt.f32 %v3472_v47  ;;  %vm4237_vm5 = vweird.f32 %v3472_v47  ;;  %v3028_v40 = vsel %vm2472_vm1, %v2798_v42, 0.0 }
 0x901   :  { %v3270_v57 = vmul.f32 %v10434_v1, %v10434_v1 }
 0x902   :  { %v5503_v27 = vpop.permute.xlu1 %5502 }
 0x903   :  { %v5716_v23 = vadd.f32 %v5503_v27, %v5212_v8  ;;  %v2463_v27 = vpop.f32.mrf.mxu1 }
 0x905   :  { %5800 = vst.msk [vmem:[%s10953_s4 + $0x198] sm:$0xff] %vm2472_vm1, %v5716_v23  ;;  %v4527_v23 = vld [vmem:[%s10952_s3 + $0x130] sm:$0xff] }
 0x906   :  { %v6078_v60 = vpop.eup %6077  ;;  %v4695_v50 = vsub.f32 %v4527_v23, %v4611_v12  ;;  %v4546_v12 = vld [vmem:[%s10952_s3 + $0x1c8] sm:$0xff] }
 0x907   :  { %v4232_v4 = vmul.f32 %v6078_v60, %v3472_v47  ;;  %vm4238_vm4 = vweird.f32 %v6078_v60  ;;  %v4714_v35 = vsub.f32 %v4546_v12, %v9944_v38 }
 0x908   :  { %vm4239_vm6 = vmor %vm4237_vm5, %vm4238_vm4 }
 0x909   :  { %v4233_v54 = vmul.f32 %v6078_v60, %v4232_v4 }
 0x90b   :  { %v4234_v37 = vmul.f32 0.5, %v4233_v54  ;;  %v10418_v54 = vadd.f32 %v2463_v27, %v2195_v14 }
 0x90c   :  { %v5034_v30 = vpop.permute.xlu0 %5033 }
 0x90d   :  { %v4235_v44 = vsub.f32 1.5, %v4234_v37  ;;  %2693 = vadd.xlane.f32.xlu1 %v2692_v31  ;;  %v5219_v47 = vmul.f32 %v5034_v30, %v11303_v33  ;;  %v3212_v33 = vmul.f32 0.020408163, %v3012_v25  ;;  %v2806_v30 = vmul.f32 %v10418_v54, %v10418_v54 }
 0x90f   :  { %v4236_v20 = vmul.f32 %v6078_v60, %v4235_v44  ;;  %v3052_v31 = vsel %vm2472_vm1, %v2806_v30, 0.0  ;;  %v3186_v44 = vmul.f32 0.020408163, %v9852_v11  ;;  %v11346_v30 = vld [vmem:[#allocation3_spill] sm:$0xff] }
 0x911   :  { %v4240_v8 = vsel %vm4239_vm6, %v6078_v60, %v4236_v20  ;;  %v2716_v60 = vsel %vm2472_vm1, %v10418_v54, 0.0  ;;  %v3354_v42 = vsub.f32 %v3186_v44, %v3270_v57  ;;  %v4388_v44 = vld [vmem:[%s10951_s2 + $0x218] sm:$0xff] }
 0x912   :  { %v10411_v21 = vmul.f32 %v4396_v34, %v4240_v8 }
 0x913   :  { %v3438_v8 = vadd.f32 1e-05, %v3354_v42 }
 0x914   :  { %v5538_v4 = vpop.permute.xlu0 %5537  ;;  %v10416_v24 = vmul.f32 %v10411_v21, %v3136_v17  ;;  %v3296_v17 = vmul.f32 %v10420_v5, %v10420_v5 }
 0x915   :  { %v5723_v16 = vadd.f32 %v5538_v4, %v5219_v47  ;;  %3029 = vadd.xlane.f32.xlu1 %v3028_v40  ;;  %vm3897_vm13 = vweird.f32 %v3438_v8 }
 0x916   :  { %v3380_v37 = vsub.f32 %v3212_v33, %v3296_v17 }
 0x917   :  { %5807 = vst.msk [vmem:[%s10953_s4 + $0x1d0] sm:$0xff] %vm2472_vm1, %v5723_v16  ;;  %5437 = vperm.xlu2 %5956, %v4695_v50   ;;  %v4553_v16 = vld [vmem:[%s10952_s3 + $0x200] sm:$0xff] }
 0x918   :  { %v3464_v55 = vadd.f32 1e-05, %v3380_v37  ;;  %v4721_v38 = vsub.f32 %v4553_v16, %v10322_v49 }
 0x91a   :  { %2717 = vadd.xlane.f32.xlu0 %v2716_v60  ;;  %6079 = vrsqrt.f32 %v3464_v55  ;;  %vm4157_vm8 = vweird.f32 %v3464_v55 }
 0x91b   :  { %6081 = vrsqrt.f32 %v3438_v8 }
 0x920   :  { %v6080_v25 = vpop.eup %6079 }
 0x921   :  { %v4152_v20 = vmul.f32 %v6080_v25, %v3464_v55  ;;  %v6082_v33 = vpop.eup %6081  ;;  %vm4158_vm7 = vweird.f32 %v6080_v25 }
 0x922   :  { %3053 = vadd.xlane.f32.xlu0 %v3052_v31  ;;  %v3892_v17 = vmul.f32 %v6082_v33, %v3438_v8  ;;  %vm4159_vm9 = vmor %vm4157_vm8, %vm4158_vm7  ;;  %vm3898_vm10 = vweird.f32 %v6082_v33 }
 0x923   :  { %v4153_v14 = vmul.f32 %v6080_v25, %v4152_v20  ;;  %vm3899_vm14 = vmor %vm3897_vm13, %vm3898_vm10 }
 0x924   :  { %v3893_v20 = vmul.f32 %v6082_v33, %v3892_v17 }
 0x925   :  { %v4154_v23 = vmul.f32 0.5, %v4153_v14 }
 0x926   :  { %v3894_v12 = vmul.f32 0.5, %v3893_v20 }
 0x927   :  { %v4155_v40 = vsub.f32 1.5, %v4154_v23 }
 0x929   :  { %v4156_v60 = vmul.f32 %v6080_v25, %v4155_v40  ;;  %v3895_v40 = vsub.f32 1.5, %v3894_v12 }
 0x92b   :  { %v4160_v31 = vsel %vm4159_vm9, %v6080_v25, %v4156_v60  ;;  %v4556_v25 = vld [vmem:[%s10952_s3 + $0x218] sm:$0xff] }
 0x92c   :  { %v4472_v42 = vmul.f32 %v4388_v44, %v4160_v31  ;;  %v4362_v44 = vld [vmem:[%s10951_s2 + $0x148] sm:$0xff] }
 0x92d   :  { %v2685_v34 = vpop.xlane.xlu1 %2684 }
 0x92e   :  { %5028 = vperm.xlu1 %5955, %v9937_v29   ;;  %v10443_v27 = vmul.f32 0.020408163, %v2685_v34 }
 0x930   :  { %v3299_v47 = vmul.f32 %v10443_v27, %v10443_v27 }
 0x935   :  { %v3021_v11 = vpop.xlane.xlu1 %3020 }
 0x936   :  { %v3215_v4 = vmul.f32 0.020408163, %v3021_v11  ;;  %5063 = vperm.xlu0 %5954, %v10317_v32   ;;  %5532 = vperm.xlu1 %5955, %v4714_v35   ;;  %v2650_v32 = vsel %vm2472_vm1, %v11346_v30, 0.0 }
 0x938   :  { %v3383_v29 = vsub.f32 %v3215_v4, %v3299_v47  ;;  %v4640_v47 = vmul.f32 %v4472_v42, %v10420_v5 }
 0x93a   :  { %v3467_v50 = vadd.f32 1e-05, %v3383_v29 }
 0x93c   :  { %6083 = vrsqrt.f32 %v3467_v50  ;;  %vm4187_vm11 = vweird.f32 %v3467_v50 }
 0x93e   :  { %5567 = vperm.xlu0 %5954, %v4721_v38   ;;  %v4724_v38 = vsub.f32 %v4556_v25, %v4640_v47 }
 0x93f   :  { %v2709_v37 = vpop.xlane.xlu0 %2708 }
 0x940   :  { %2651 = vadd.xlane.f32.xlu2 %v2650_v32  ;;  %v3139_v49 = vmul.f32 0.020408163, %v2709_v37  ;;  %v3896_v37 = vmul.f32 %v6082_v33, %v3895_v40  ;;  %v4391_v32 = vld [vmem:[%s10951_s2 + $0x230] sm:$0xff]  ;;  %v11348_v40 = vld [vmem:[#allocation55_spill] sm:$0xff] }
 0x942   :  { %v6084_v57 = vpop.eup %6083  ;;  %v3307_v23 = vmul.f32 %v3139_v49, %v3139_v49  ;;  %v3900_v31 = vsel %vm3899_vm14, %v6082_v33, %v3896_v37 }
 0x943   :  { %v4182_v34 = vmul.f32 %v6084_v57, %v3467_v50  ;;  %vm4188_vm0 = vweird.f32 %v6084_v57  ;;  %v4446_v8 = vmul.f32 %v4362_v44, %v3900_v31  ;;  %v2801_v31 = vmul.f32 %v11348_v40, %v11348_v40 }
 0x944   :  { %vm4189_vm12 = vmor %vm4187_vm11, %vm4188_vm0 }
 0x945   :  { %v4183_v14 = vmul.f32 %v6084_v57, %v4182_v34  ;;  %v11347_v34 = vld [vmem:[#allocation71_spill] sm:$0xff]  ;;  %v3037_v44 = vsel %vm2472_vm1, %v2801_v31, 0.0 }
 0x946   :  { %5078 = vperm.xlu0 %5954, %v4472_v42  }
 0x947   :  { %v4184_v55 = vmul.f32 0.5, %v4183_v14  ;;  %v3045_v35 = vpop.xlane.xlu0 %3044 }
 0x948   :  { %v3223_v11 = vmul.f32 0.020408163, %v3045_v35 }
 0x949   :  { %v4185_v4 = vsub.f32 1.5, %v4184_v55 }
 0x94a   :  { %v3391_v29 = vsub.f32 %v3223_v11, %v3307_v23  ;;  %v4559_v23 = vld [vmem:[%s10952_s3 + $0x230] sm:$0xff] }
 0x94b   :  { %v4186_v60 = vmul.f32 %v6084_v57, %v4185_v4 }
 0x94c   :  { %v3475_v16 = vadd.f32 1e-05, %v3391_v29  ;;  %v4399_v29 = vld [vmem:[%s10951_s2 + $0x270] sm:$0xff] }
 0x94d   :  { %v5014_v17 = vpop.permute.xlu1 %5013  ;;  %v4190_v5 = vsel %vm4189_vm12, %v6084_v57, %v4186_v60  ;;  %v10482_v60 = vpop.xlane.xlu2 %2642 }
 0x94e   :  { %6085 = vrsqrt.f32 %v3475_v16  ;;  %5582 = vperm.xlu0 %5954, %v4724_v38   ;;  %v5215_v42 = vmul.f32 %v5014_v17, %v11347_v34  ;;  %v4475_v14 = vmul.f32 %v4391_v32, %v4190_v5  ;;  %vm4267_vm2 = vweird.f32 %v3475_v16 }
 0x950   :  { %v4643_v33 = vmul.f32 %v4475_v14, %v10443_v27  ;;  %v2701_v27 = vsel %vm2472_vm1, %v11348_v40, 0.0 }
 0x952   :  { %v4727_v4 = vsub.f32 %v4559_v23, %v4643_v33 }
 0x954   :  { %v6086_v20 = vpop.eup %6085 }
 0x955   :  { %v4262_v12 = vmul.f32 %v6086_v20, %v3475_v16  ;;  %v5518_v50 = vpop.permute.xlu1 %5517  ;;  %vm4268_vm15 = vweird.f32 %v6086_v20 }
 0x956   :  { %v5719_v55 = vadd.f32 %v5518_v50, %v5215_v42  ;;  %5093 = vperm.xlu0 %5954, %v4475_v14   ;;  %vm4269_vm3 = vmor %vm4267_vm2, %vm4268_vm15 }
 0x957   :  { %v4263_v57 = vmul.f32 %v6086_v20, %v4262_v12  ;;  %v2784_v12 = vmul.f32 %v11346_v30, %v11346_v30 }
 0x958   :  { %5803 = vst.msk [vmem:[%s10953_s4 + $0x1b0] sm:$0xff] %vm2472_vm1, %v5719_v55  ;;  %4948 = vperm.xlu2 %5956, %v4446_v8  }
 0x959   :  { %v4264_v35 = vmul.f32 0.5, %v4263_v57  ;;  %v2986_v55 = vsel %vm2472_vm1, %v2784_v12, 0.0  ;;  %v4549_v57 = vld [vmem:[%s10952_s3 + $0x1e0] sm:$0xff] }
 0x95a   :  { %v5049_v11 = vpop.permute.xlu0 %5048 }
 0x95b   :  { %v4265_v47 = vsub.f32 1.5, %v4264_v35  ;;  %v5222_v37 = vmul.f32 %v5049_v11, %v11313_v36  ;;  %v11349_v36 = vld [vmem:[#allocation53_spill] sm:$0xff]  ;;  %v4717_v35 = vsub.f32 %v4549_v57, %v10028_v48 }
 0x95d   :  { %v4266_v25 = vmul.f32 %v6086_v20, %v4265_v47 }
 0x95e   :  { %5597 = vperm.xlu0 %5954, %v4727_v4  }
 0x95f   :  { %v4270_v38 = vsel %vm4269_vm3, %v6086_v20, %v4266_v25  ;;  %v4934_v20 = vpop.permute.xlu2 %4933 }
 0x960   :  { %2702 = vadd.xlane.f32.xlu1 %v2701_v27  ;;  %v10484_v17 = vmul.f32 %v4399_v29, %v4270_v38  ;;  %v5199_v42 = vmul.f32 %v4934_v20, %v11349_v36  ;;  %v4614_v38 = vmul.f32 %v4446_v8, %v10434_v1  ;;  %v4394_v1 = vld [vmem:[%s10951_s2 + $0x248] sm:$0xff] }
 0x962   :  { %v5553_v5 = vpop.permute.xlu0 %5552  ;;  %v10488_v16 = vmul.f32 %v10484_v17, %v3139_v49 }
 0x963   :  { %v5726_v32 = vadd.f32 %v5553_v5, %v5222_v37 }
 0x965   :  { %5810 = vst.msk [vmem:[%s10953_s4 + $0x1e8] sm:$0xff] %vm2472_vm1, %v5726_v32 }
 0x968   :  { %3038 = vadd.xlane.f32.xlu1 %v3037_v44 }
 0x972   :  { %v10497_v34 = vpop.xlane.xlu2 %2978 }
 0x97a   :  { %v5438_v14 = vpop.permute.xlu2 %5437 }
 0x97b   :  { %v5703_v49 = vadd.f32 %v5438_v14, %v5199_v42 }
 0x97d   :  { %5787 = vst.msk [vmem:[%s10953_s4 + $0x130] sm:$0xff] %vm2472_vm1, %v5703_v49 }
 0x980   :  { %v2694_v50 = vpop.xlane.xlu1 %2693 }
 0x981   :  { %5043 = vperm.xlu1 %5955, %v10024_v2   ;;  %2987 = vadd.xlane.f32.xlu2 %v2986_v55  ;;  %v3134_v33 = vmul.f32 0.020408163, %v2694_v50  ;;  %v4530_v2 = vld [vmem:[%s10952_s3 + $0x148] sm:$0xff] }
 0x982   :  { %v4698_v44 = vsub.f32 %v4530_v2, %v4614_v38 }
 0x983   :  { %v3302_v11 = vmul.f32 %v3134_v33, %v3134_v33 }
 0x988   :  { %v3030_v23 = vpop.xlane.xlu1 %3029 }
 0x989   :  { %v3218_v47 = vmul.f32 0.020408163, %v3030_v23  ;;  %5547 = vperm.xlu1 %5955, %v4717_v35  }
 0x98b   :  { %v3386_v4 = vsub.f32 %v3218_v47, %v3302_v11  ;;  %v4562_v47 = vld [vmem:[%s10952_s3 + $0x248] sm:$0xff] }
 0x98d   :  { %v3470_v25 = vadd.f32 1e-05, %v3386_v4  ;;  %v2718_v29 = vpop.xlane.xlu0 %2717 }
 0x98e   :  { %v3142_v27 = vmul.f32 0.020408163, %v2718_v29 }
 0x98f   :  { %6087 = vrsqrt.f32 %v3470_v25  ;;  %vm4217_vm5 = vweird.f32 %v3470_v25 }
 0x990   :  { %v3310_v31 = vmul.f32 %v3142_v27, %v3142_v27 }
 0x995   :  { %v6088_v37 = vpop.eup %6087  ;;  %v3054_v5 = vpop.xlane.xlu0 %3053 }
 0x996   :  { %v4212_v32 = vmul.f32 %v6088_v37, %v3470_v25  ;;  %v3226_v48 = vmul.f32 0.020408163, %v3054_v5  ;;  %vm4218_vm4 = vweird.f32 %v6088_v37 }
 0x997   :  { %vm4219_vm6 = vmor %vm4217_vm5, %vm4218_vm4 }
 0x998   :  { %v4213_v20 = vmul.f32 %v6088_v37, %v4212_v32  ;;  %v3394_v36 = vsub.f32 %v3226_v48, %v3310_v31 }
 0x999   :  { %5452 = vperm.xlu2 %5956, %v4698_v44  }
 0x99a   :  { %v4214_v42 = vmul.f32 0.5, %v4213_v20  ;;  %v3478_v14 = vadd.f32 1e-05, %v3394_v36 }
 0x99c   :  { %v4215_v49 = vsub.f32 1.5, %v4214_v42  ;;  %6089 = vrsqrt.f32 %v3478_v14  ;;  %vm4297_vm8 = vweird.f32 %v3478_v14 }
 0x99e   :  { %v4216_v12 = vmul.f32 %v6088_v37, %v4215_v49 }
 0x9a0   :  { %v5029_v8 = vpop.permute.xlu1 %5028  ;;  %v4220_v50 = vsel %vm4219_vm6, %v6088_v37, %v4216_v12  ;;  %v10524_v37 = vmul.f32 0.020408163, %v9968_v56  ;;  %v11350_v12 = vld [vmem:[#allocation64_spill] sm:$0xff] }
 0x9a1   :  { %v4478_v55 = vmul.f32 %v4394_v1, %v4220_v50  ;;  %v5218_v25 = vmul.f32 %v5029_v8, %v11288_v15  ;;  %v4402_v15 = vld [vmem:[%s10951_s2 + $0x288] sm:$0xff]  ;;  %v2710_v1 = vsel %vm2472_vm1, %v11350_v12, 0.0  ;;  %v2804_v8 = vmul.f32 %v11350_v12, %v11350_v12 }
 0x9a2   :  { %v6090_v57 = vpop.eup %6089  ;;  %v3273_v56 = vmul.f32 %v10524_v37, %v10524_v37 }
 0x9a3   :  { %v4292_v35 = vmul.f32 %v6090_v57, %v3478_v14  ;;  %5108 = vperm.xlu0 %5954, %v4478_v55   ;;  %v4646_v11 = vmul.f32 %v4478_v55, %v3134_v33  ;;  %vm4298_vm7 = vweird.f32 %v6090_v57  ;;  %v3189_v33 = vmul.f32 0.020408163, %v9988_v18 }
 0x9a4   :  { %vm4299_vm9 = vmor %vm4297_vm8, %vm4298_vm7  ;;  %v3046_v50 = vsel %vm2472_vm1, %v2804_v8, 0.0 }
 0x9a5   :  { %v4293_v23 = vmul.f32 %v6090_v57, %v4292_v35  ;;  %v4730_v32 = vsub.f32 %v4562_v47, %v4646_v11  ;;  %v3357_v36 = vsub.f32 %v3189_v33, %v3273_v56  ;;  %v11351_v11 = vld [vmem:[#allocation9_spill] sm:$0xff]  ;;  %v4365_v33 = vld [vmem:[%s10951_s2 + $0x160] sm:$0xff] }
 0x9a6   :  { %v2659_v47 = vsel %vm2472_vm1, %v11351_v11, 0.0 }
 0x9a7   :  { %v4294_v4 = vmul.f32 0.5, %v4293_v23  ;;  %v3441_v18 = vadd.f32 1e-05, %v3357_v36 }
 0x9a8   :  { %v5533_v29 = vpop.permute.xlu1 %5532  ;;  %v5064_v38 = vpop.permute.xlu0 %5063 }
 0x9a9   :  { %v4295_v2 = vsub.f32 1.5, %v4294_v4  ;;  %v5722_v5 = vadd.f32 %v5533_v29, %v5218_v25  ;;  %v5225_v20 = vmul.f32 %v5064_v38, %v11321_v52  ;;  %6091 = vrsqrt.f32 %v3441_v18 }
 0x9aa   :  { %vm3927_vm10 = vweird.f32 %v3441_v18 }
 0x9ab   :  { %v4296_v31 = vmul.f32 %v6090_v57, %v4295_v2  ;;  %5806 = vst.msk [vmem:[%s10953_s4 + $0x1c8] sm:$0xff] %vm2472_vm1, %v5722_v5  ;;  %5612 = vperm.xlu0 %5954, %v4730_v32  }
 0x9ad   :  { %v4300_v48 = vsel %vm4299_vm9, %v6090_v57, %v4296_v31 }
 0x9ae   :  { %v10536_v44 = vmul.f32 %v4402_v15, %v4300_v48 }
 0x9b0   :  { %v5568_v42 = vpop.permute.xlu0 %5567  ;;  %v10540_v14 = vmul.f32 %v10536_v44, %v3142_v27  ;;  %v6092_v27 = vpop.eup %6091 }
 0x9b1   :  { %v5729_v49 = vadd.f32 %v5568_v42, %v5225_v20  ;;  %v3922_v35 = vmul.f32 %v6092_v27, %v3441_v18  ;;  %vm3928_vm0 = vweird.f32 %v6092_v27 }
 0x9b2   :  { %vm3929_vm11 = vmor %vm3927_vm10, %vm3928_vm0 }
 0x9b3   :  { %5813 = vst.msk [vmem:[%s10953_s4 + $0x200] sm:$0xff] %vm2472_vm1, %v5729_v49  ;;  %2711 = vadd.xlane.f32.xlu1 %v2710_v1  ;;  %v3923_v4 = vmul.f32 %v6092_v27, %v3922_v35  ;;  %v10571_v18 = vpop.xlane.xlu2 %2651 }
 0x9b5   :  { %v3924_v29 = vmul.f32 0.5, %v3923_v4 }
 0x9b7   :  { %v3925_v38 = vsub.f32 1.5, %v3924_v29 }
 0x9b8   :  { %v5079_v52 = vpop.permute.xlu0 %5078 }
 0x9b9   :  { %v5228_v55 = vmul.f32 %v5079_v52, %v11329_v46  ;;  %v3926_v32 = vmul.f32 %v6092_v27, %v3925_v38  ;;  %v11352_v38 = vld [vmem:[#allocation73_spill] sm:$0xff] }
 0x9bb   :  { %3047 = vadd.xlane.f32.xlu1 %v3046_v50  ;;  %v3930_v15 = vsel %vm3929_vm11, %v6092_v27, %v3926_v32  ;;  %v4949_v27 = vpop.permute.xlu2 %4948 }
 0x9bc   :  { %v4449_v56 = vmul.f32 %v4365_v33, %v3930_v15  ;;  %v2197_v15 = vpop.f32.mrf.mxu0 }
 0x9c0   :  { %v5583_v57 = vpop.permute.xlu0 %5582 }
 0x9c1   :  { %v5732_v23 = vadd.f32 %v5583_v57, %v5228_v55 }
 0x9c2   :  { %2660 = vadd.xlane.f32.xlu2 %v2659_v47 }
 0x9c3   :  { %5816 = vst.msk [vmem:[%s10953_s4 + $0x218] sm:$0xff] %vm2472_vm1, %v5732_v23  ;;  %v1659_v23 = vpop.f32.mrf.mxu2 }
 0x9c8   :  { %v5094_v25 = vpop.permute.xlu0 %5093 }
 0x9c9   :  { %v5231_v2 = vmul.f32 %v5094_v25, %v11336_v26  ;;  %v4552_v26 = vld [vmem:[%s10952_s3 + $0x1f8] sm:$0xff] }
 0x9ca   :  { %v4720_v20 = vsub.f32 %v4552_v26, %v10106_v3  ;;  %v4397_v3 = vld [vmem:[%s10951_s2 + $0x260] sm:$0xff]  ;;  %v11353_v26 = vld [vmem:[#allocation59_spill] sm:$0xff] }
 0x9d0   :  { %v5598_v5 = vpop.permute.xlu0 %5597 }
 0x9d1   :  { %v5735_v46 = vadd.f32 %v5598_v5, %v5231_v2  ;;  %v1660_v2 = vadd.f32 %v1659_v23, %v11352_v38  ;;  %v1928_v5 = vpop.f32.mrf.mxu3  ;;  %v4533_v23 = vld [vmem:[%s10952_s3 + $0x160] sm:$0xff] }
 0x9d3   :  { %5819 = vst.msk [vmem:[%s10953_s4 + $0x230] sm:$0xff] %vm2472_vm1, %v5735_v46  ;;  %v2703_v31 = vpop.xlane.xlu1 %2702  ;;  %v1929_v32 = vadd.f32 %v1928_v5, %v1660_v2  ;;  %v10616_v5 = vmul.f32 0.020408163, %v10100_v19  ;;  %v4558_v19 = vld [vmem:[%s10952_s3 + $0x228] sm:$0xff] }
 0x9d4   :  { %5058 = vperm.xlu1 %5955, %v10102_v7   ;;  %v3137_v48 = vmul.f32 0.020408163, %v2703_v31  ;;  %v4565_v31 = vld [vmem:[%s10952_s3 + $0x260] sm:$0xff] }
 0x9d6   :  { %v3305_v42 = vmul.f32 %v3137_v48, %v3137_v48 }
 0x9da   :  { %4963 = vperm.xlu2 %5956, %v4449_v56  }
 0x9db   :  { %v3039_v36 = vpop.xlane.xlu1 %3038 }
 0x9dc   :  { %v3221_v49 = vmul.f32 0.020408163, %v3039_v36  ;;  %5562 = vperm.xlu1 %5955, %v4720_v20   ;;  %v5202_v20 = vmul.f32 %v4949_v27, %v11353_v26 }
 0x9de   :  { %v3389_v1 = vsub.f32 %v3221_v49, %v3305_v42 }
 0x9e0   :  { %v3473_v7 = vadd.f32 1e-05, %v3389_v1 }
 0x9e2   :  { %6093 = vrsqrt.f32 %v3473_v7  ;;  %vm4247_vm13 = vweird.f32 %v3473_v7 }
 0x9e8   :  { %v6094_v8 = vpop.eup %6093 }
 0x9e9   :  { %v4242_v52 = vmul.f32 %v6094_v8, %v3473_v7  ;;  %vm4248_vm12 = vweird.f32 %v6094_v8  ;;  %v2198_v7 = vadd.f32 %v2197_v15, %v1929_v32 }
 0x9ea   :  { %vm4249_vm14 = vmor %vm4247_vm13, %vm4248_vm12 }
 0x9eb   :  { %v4243_v50 = vmul.f32 %v6094_v8, %v4242_v52  ;;  %v2466_v52 = vpop.f32.mrf.mxu1 }
 0x9ed   :  { %v4244_v55 = vmul.f32 0.5, %v4243_v50 }
 0x9ef   :  { %v4245_v57 = vsub.f32 1.5, %v4244_v55 }
 0x9f1   :  { %v4246_v35 = vmul.f32 %v6094_v8, %v4245_v57 }
 0x9f3   :  { %v5044_v47 = vpop.permute.xlu1 %5043  ;;  %v4250_v4 = vsel %vm4249_vm14, %v6094_v8, %v4246_v35 }
 0x9f4   :  { %v10576_v25 = vpop.xlane.xlu2 %2987  ;;  %v4481_v29 = vmul.f32 %v4397_v3, %v4250_v4  ;;  %v5221_v33 = vmul.f32 %v5044_v47, %v9865_v63  ;;  %v10594_v63 = vadd.f32 %v2466_v52, %v2198_v7  ;;  %v4617_v3 = vmul.f32 %v4449_v56, %v10524_v37  ;;  %v4555_v37 = vld [vmem:[%s10952_s3 + $0x210] sm:$0xff] }
 0x9f6   :  { %5123 = vperm.xlu0 %5954, %v4481_v29   ;;  %v4649_v46 = vmul.f32 %v4481_v29, %v3137_v48  ;;  %v2787_v48 = vmul.f32 %v11351_v11, %v11351_v11  ;;  %v2719_v27 = vsel %vm2472_vm1, %v10594_v63, 0.0  ;;  %v2807_v55 = vmul.f32 %v10594_v63, %v10594_v63 }
 0x9f7   :  { %v4701_v47 = vsub.f32 %v4533_v23, %v4617_v3  ;;  %v4561_v3 = vld [vmem:[%s10952_s3 + $0x240] sm:$0xff] }
 0x9f8   :  { %v4733_v1 = vsub.f32 %v4565_v31, %v4649_v46  ;;  %v2995_v50 = vsel %vm2472_vm1, %v2787_v48, 0.0  ;;  %v3055_v57 = vsel %vm2472_vm1, %v2807_v55, 0.0  ;;  %v3192_v46 = vmul.f32 0.020408163, %v10127_v28  ;;  %v11354_v48 = vld [vmem:[#allocation13_spill] sm:$0xff] }
 0x9fb   :  { %v5548_v36 = vpop.permute.xlu1 %5547 }
 0x9fc   :  { %v5725_v42 = vadd.f32 %v5548_v36, %v5221_v33  ;;  %v5453_v49 = vpop.permute.xlu2 %5452  ;;  %v3276_v33 = vmul.f32 %v10616_v5, %v10616_v5 }
 0x9fd   :  { %v5706_v8 = vadd.f32 %v5453_v49, %v5202_v20 }
 0x9fe   :  { %5809 = vst.msk [vmem:[%s10953_s4 + $0x1e0] sm:$0xff] %vm2472_vm1, %v5725_v42  ;;  %5627 = vperm.xlu0 %5954, %v4733_v1   ;;  %v3360_v26 = vsub.f32 %v3192_v46, %v3276_v33  ;;  %v4726_v42 = vsub.f32 %v4558_v19, %v10274_v0 }
 0x9ff   :  { %5790 = vst.msk [vmem:[%s10953_s4 + $0x148] sm:$0xff] %vm2472_vm1, %v5706_v8 }
 0xa00   :  { %v3444_v36 = vadd.f32 1e-05, %v3360_v26 }
 0xa02   :  { %vm3957_vm5 = vweird.f32 %v3444_v36 }
 0xa03   :  { %2996 = vadd.xlane.f32.xlu2 %v2995_v50  ;;  %v2668_v50 = vsel %vm2472_vm1, %v11354_v48, 0.0 }
 0xa06   :  { %2720 = vadd.xlane.f32.xlu1 %v2719_v27  ;;  %v4400_v27 = vld [vmem:[%s10951_s2 + $0x278] sm:$0xff] }
 0xa0e   :  { %3056 = vadd.xlane.f32.xlu1 %v3055_v57 }
 0xa15   :  { %v5109_v35 = vpop.permute.xlu0 %5108 }
 0xa16   :  { %v5234_v4 = vmul.f32 %v5109_v35, %v11345_v9  ;;  %v4723_v9 = vsub.f32 %v4555_v37, %v10196_v62 }
 0xa1b   :  { %5467 = vperm.xlu2 %5956, %v4701_v47  }
 0xa1d   :  { %v5613_v29 = vpop.permute.xlu0 %5612 }
 0xa1e   :  { %v5738_v38 = vadd.f32 %v5613_v29, %v5234_v4  ;;  %v4568_v4 = vld [vmem:[%s10952_s3 + $0x278] sm:$0xff] }
 0xa20   :  { %5822 = vst.msk [vmem:[%s10953_s4 + $0x248] sm:$0xff] %vm2472_vm1, %v5738_v38  ;;  %v4729_v38 = vsub.f32 %v4561_v3, %v10353_v58  ;;  %v4368_v58 = vld [vmem:[%s10951_s2 + $0x178] sm:$0xff] }
 0xa26   :  { %v2712_v2 = vpop.xlane.xlu1 %2711 }
 0xa27   :  { %5073 = vperm.xlu1 %5955, %v10192_v6   ;;  %v3140_v56 = vmul.f32 0.020408163, %v2712_v2 }
 0xa29   :  { %v3308_v31 = vmul.f32 %v3140_v56, %v3140_v56 }
 0xa2e   :  { %v3048_v32 = vpop.xlane.xlu1 %3047 }
 0xa2f   :  { %v3224_v15 = vmul.f32 0.020408163, %v3048_v32  ;;  %5577 = vperm.xlu1 %5955, %v4723_v9   ;;  %v4564_v32 = vld [vmem:[%s10952_s3 + $0x258] sm:$0xff] }
 0xa31   :  { %v3392_v6 = vsub.f32 %v3224_v15, %v3308_v31  ;;  %v4732_v31 = vsub.f32 %v4564_v32, %v10416_v24  ;;  %v11356_v32 = vld [vmem:[#allocation82_spill] sm:$0xff] }
 0xa33   :  { %v3476_v20 = vadd.f32 1e-05, %v3392_v6 }
 0xa35   :  { %6095 = vrsqrt.f32 %v3476_v20  ;;  %vm4277_vm2 = vweird.f32 %v3476_v20  ;;  %v10653_v15 = vpop.xlane.xlu2 %2660 }
 0xa36   :  { %6097 = vrsqrt.f32 %v3444_v36 }
 0xa37   :  { %5088 = vperm.xlu1 %5955, %v10268_v51  }
 0xa3b   :  { %v6096_v28 = vpop.eup %6095 }
 0xa3c   :  { %v4272_v62 = vmul.f32 %v6096_v28, %v3476_v20  ;;  %v6098_v1 = vpop.eup %6097  ;;  %vm4278_vm15 = vweird.f32 %v6096_v28 }
 0xa3d   :  { %v3952_v52 = vmul.f32 %v6098_v1, %v3444_v36  ;;  %vm4279_vm3 = vmor %vm4277_vm2, %vm4278_vm15  ;;  %vm3958_vm4 = vweird.f32 %v6098_v1  ;;  %v4964_v26 = vpop.permute.xlu2 %4963 }
 0xa3e   :  { %v4273_v49 = vmul.f32 %v6096_v28, %v4272_v62  ;;  %vm3959_vm6 = vmor %vm3957_vm5, %vm3958_vm4 }
 0xa3f   :  { %5592 = vperm.xlu1 %5955, %v4726_v42   ;;  %v3953_v57 = vmul.f32 %v6098_v1, %v3952_v52 }
 0xa40   :  { %v4274_v7 = vmul.f32 0.5, %v4273_v49 }
 0xa41   :  { %v3954_v23 = vmul.f32 0.5, %v3953_v57 }
 0xa42   :  { %v4275_v8 = vsub.f32 1.5, %v4274_v7 }
 0xa43   :  { %v3955_v37 = vsub.f32 1.5, %v3954_v23  ;;  %v4536_v23 = vld [vmem:[%s10952_s3 + $0x178] sm:$0xff] }
 0xa44   :  { %v4276_v51 = vmul.f32 %v6096_v28, %v4275_v8  ;;  %2669 = vadd.xlane.f32.xlu2 %v2668_v50 }
 0xa46   :  { %v5059_v55 = vpop.permute.xlu1 %5058  ;;  %v4280_v0 = vsel %vm4279_vm3, %v6096_v28, %v4276_v51  ;;  %v5205_v28 = vmul.f32 %v4964_v26, %v11289_v41 }
 0xa47   :  { %5103 = vperm.xlu1 %5955, %v10349_v22   ;;  %v4484_v35 = vmul.f32 %v4400_v27, %v4280_v0  ;;  %v5224_v29 = vmul.f32 %v5059_v55, %v9947_v45 }
 0xa49   :  { %5138 = vperm.xlu0 %5954, %v4484_v35   ;;  %v4652_v47 = vmul.f32 %v4484_v35, %v3140_v56  ;;  %v3956_v56 = vmul.f32 %v6098_v1, %v3955_v37  ;;  %v4403_v35 = vld [vmem:[%s10951_s2 + $0x290] sm:$0xff] }
 0xa4a   :  { %v4571_v37 = vld [vmem:[%s10952_s3 + $0x290] sm:$0xff] }
 0xa4b   :  { %v4736_v22 = vsub.f32 %v4568_v4, %v4652_v47  ;;  %v3960_v45 = vsel %vm3959_vm6, %v6098_v1, %v3956_v56  ;;  %v2790_v1 = vmul.f32 %v11354_v48, %v11354_v48 }
 0xa4c   :  { %v4452_v46 = vmul.f32 %v4368_v58, %v3960_v45 }
 0xa4d   :  { %v3004_v41 = vsel %vm2472_vm1, %v2790_v1, 0.0 }
 0xa4e   :  { %v5563_v2 = vpop.permute.xlu1 %5562  ;;  %v4620_v3 = vmul.f32 %v4452_v46, %v10616_v5 }
 0xa4f   :  { %v5728_v9 = vadd.f32 %v5563_v2, %v5224_v29  ;;  %5607 = vperm.xlu1 %5955, %v4729_v38  }
 0xa50   :  { %v4704_v38 = vsub.f32 %v4536_v23, %v4620_v3  ;;  %v4371_v3 = vld [vmem:[%s10951_s2 + $0x190] sm:$0xff] }
 0xa51   :  { %5812 = vst.msk [vmem:[%s10953_s4 + $0x1f8] sm:$0xff] %vm2472_vm1, %v5728_v9  ;;  %5642 = vperm.xlu0 %5954, %v4736_v22   ;;  %v11355_v9 = vld [vmem:[#allocation42_spill] sm:$0xff] }
 0xa57   :  { %5118 = vperm.xlu1 %5955, %v10411_v21   ;;  %v4567_v21 = vld [vmem:[%s10952_s3 + $0x270] sm:$0xff] }
 0xa58   :  { %v4735_v6 = vsub.f32 %v4567_v21, %v10488_v16  ;;  %v4570_v16 = vld [vmem:[%s10952_s3 + $0x288] sm:$0xff] }
 0xa5c   :  { %4978 = vperm.xlu2 %5956, %v4452_v46   ;;  %v10696_v46 = vmul.f32 0.020408163, %v10247_v53  ;;  %v11358_v53 = vld [vmem:[#allocation78_spill] sm:$0xff] }
 0xa5e   :  { %v3279_v26 = vmul.f32 %v10696_v46, %v10696_v46 }
 0xa5f   :  { %5622 = vperm.xlu1 %5955, %v4732_v31   ;;  %v3195_v31 = vmul.f32 0.020408163, %v11356_v32 }
 0xa67   :  { %5133 = vperm.xlu1 %5955, %v10484_v17  }
 0xa68   :  { %v5124_v33 = vpop.permute.xlu0 %5123 }
 0xa69   :  { %v5237_v20 = vmul.f32 %v5124_v33, %v11348_v40  ;;  %v4738_v40 = vsub.f32 %v4570_v16, %v10540_v14  ;;  %v11357_v33 = vld [vmem:[#allocation67_spill] sm:$0xff] }
 0xa6f   :  { %5637 = vperm.xlu1 %5955, %v4735_v6  }
 0xa70   :  { %v5628_v36 = vpop.permute.xlu0 %5627 }
 0xa71   :  { %v5741_v19 = vadd.f32 %v5628_v36, %v5237_v20  ;;  %v3363_v36 = vsub.f32 %v3195_v31, %v3279_v26 }
 0xa73   :  { %5825 = vst.msk [vmem:[%s10953_s4 + $0x260] sm:$0xff] %vm2472_vm1, %v5741_v19  ;;  %v3447_v19 = vadd.f32 1e-05, %v3363_v36 }
 0xa75   :  { %vm3987_vm10 = vweird.f32 %v3447_v19 }
 0xa76   :  { %v10665_v24 = vpop.xlane.xlu2 %2996 }
 0xa77   :  { %5148 = vperm.xlu1 %5955, %v10536_v44  }
 0xa79   :  { %v2721_v17 = vpop.xlane.xlu1 %2720 }
 0xa7a   :  { %v3143_v62 = vmul.f32 0.020408163, %v2721_v17 }
 0xa7c   :  { %v3311_v7 = vmul.f32 %v3143_v62, %v3143_v62 }
 0xa7e   :  { %v5468_v42 = vpop.permute.xlu2 %5467 }
 0xa7f   :  { %v5709_v49 = vadd.f32 %v5468_v42, %v5205_v28  ;;  %5652 = vperm.xlu1 %5955, %v4738_v40  }
 0xa81   :  { %5793 = vst.msk [vmem:[%s10953_s4 + $0x160] sm:$0xff] %vm2472_vm1, %v5709_v49  ;;  %v3057_v44 = vpop.xlane.xlu1 %3056 }
 0xa82   :  { %v3227_v8 = vmul.f32 0.020408163, %v3057_v44 }
 0xa84   :  { %v3395_v52 = vsub.f32 %v3227_v8, %v3311_v7  ;;  %v11359_v8 = vld [vmem:[#allocation19_spill] sm:$0xff] }
 0xa85   :  { %3005 = vadd.xlane.f32.xlu2 %v3004_v41  ;;  %v2793_v32 = vmul.f32 %v11359_v8, %v11359_v8 }
 0xa86   :  { %v3479_v14 = vadd.f32 1e-05, %v3395_v52  ;;  %v2677_v52 = vsel %vm2472_vm1, %v11359_v8, 0.0 }
 0xa88   :  { %6099 = vrsqrt.f32 %v3479_v14  ;;  %vm4307_vm8 = vweird.f32 %v3479_v14 }
 0xa89   :  { %6101 = vrsqrt.f32 %v3447_v19 }
 0xa8e   :  { %v6100_v50 = vpop.eup %6099 }
 0xa8f   :  { %v4302_v51 = vmul.f32 %v6100_v50, %v3479_v14  ;;  %vm4308_vm7 = vweird.f32 %v6100_v50 }
 0xa90   :  { %vm4309_vm9 = vmor %vm4307_vm8, %vm4308_vm7 }
 0xa91   :  { %v4303_v27 = vmul.f32 %v6100_v50, %v4302_v51 }
 0xa93   :  { %v4304_v55 = vmul.f32 0.5, %v4303_v27 }
 0xa95   :  { %v4305_v0 = vsub.f32 1.5, %v4304_v55 }
 0xa97   :  { %v4306_v57 = vmul.f32 %v6100_v50, %v4305_v0 }
 0xa99   :  { %v5074_v47 = vpop.permute.xlu1 %5073  ;;  %v4310_v4 = vsel %vm4309_vm9, %v6100_v50, %v4306_v57 }
 0xa9a   :  { %v4487_v29 = vmul.f32 %v4403_v35, %v4310_v4  ;;  %v5227_v22 = vmul.f32 %v5074_v47, %v11355_v9 }
 0xa9c   :  { %5153 = vperm.xlu0 %5954, %v4487_v29   ;;  %v4655_v2 = vmul.f32 %v4487_v29, %v3143_v62  ;;  %v6102_v62 = vpop.eup %6101 }
 0xa9d   :  { %5482 = vperm.xlu2 %5956, %v4704_v38   ;;  %v3982_v7 = vmul.f32 %v6102_v62, %v3447_v19  ;;  %vm3988_vm0 = vweird.f32 %v6102_v62  ;;  %v3114_v19 = vmul.f32 0.020408163, %v10374_v13 }
 0xa9e   :  { %v4739_v45 = vsub.f32 %v4571_v37, %v4655_v2  ;;  %vm3989_vm11 = vmor %vm3987_vm10, %vm3988_vm0 }
 0xa9f   :  { %v3983_v41 = vmul.f32 %v6102_v62, %v3982_v7 }
 0xaa1   :  { %v5578_v56 = vpop.permute.xlu1 %5577  ;;  %v3984_v14 = vmul.f32 0.5, %v3983_v41 }
 0xaa2   :  { %v5731_v5 = vadd.f32 %v5578_v56, %v5227_v22  ;;  %v11360_v56 = vld [vmem:[#allocation62_spill] sm:$0xff] }
 0xaa3   :  { %v3985_v51 = vsub.f32 1.5, %v3984_v14 }
 0xaa4   :  { %5815 = vst.msk [vmem:[%s10953_s4 + $0x210] sm:$0xff] %vm2472_vm1, %v5731_v5  ;;  %5657 = vperm.xlu0 %5954, %v4739_v45  }
 0xaa5   :  { %v3986_v0 = vmul.f32 %v6102_v62, %v3985_v51 }
 0xaa7   :  { %v3990_v35 = vsel %vm3989_vm11, %v6102_v62, %v3986_v0  ;;  %v11361_v62 = vld [vmem:[#allocation32_spill] sm:$0xff]  ;;  %v11362_v0 = vld [vmem:[#allocation65_spill] sm:$0xff] }
 0xaa8   :  { %v4455_v23 = vmul.f32 %v4371_v3, %v3990_v35 }
 0xaa9   :  { %v5089_v58 = vpop.permute.xlu1 %5088 }
 0xaaa   :  { %v5230_v21 = vmul.f32 %v5089_v58, %v11357_v33  ;;  %v4623_v26 = vmul.f32 %v4455_v23, %v10696_v46 }
 0xab1   :  { %v5593_v6 = vpop.permute.xlu1 %5592 }
 0xab2   :  { %v5734_v20 = vadd.f32 %v5593_v6, %v5230_v21 }
 0xab4   :  { %5818 = vst.msk [vmem:[%s10953_s4 + $0x228] sm:$0xff] %vm2472_vm1, %v5734_v20  ;;  %v4539_v20 = vld [vmem:[%s10952_s3 + $0x190] sm:$0xff] }
 0xab5   :  { %v4707_v36 = vsub.f32 %v4539_v20, %v4623_v26 }
 0xab7   :  { %v10731_v29 = vpop.xlane.xlu2 %2669 }
 0xab9   :  { %v5104_v17 = vpop.permute.xlu1 %5103 }
 0xaba   :  { %v5233_v28 = vmul.f32 %v5104_v17, %v11358_v53  ;;  %v3198_v17 = vmul.f32 0.020408163, %v10384_v59  ;;  %v4374_v59 = vld [vmem:[%s10951_s2 + $0x1a8] sm:$0xff] }
 0xabb   :  { %v5139_v16 = vpop.permute.xlu0 %5138 }
 0xabc   :  { %v5240_v42 = vmul.f32 %v5139_v16, %v11350_v12 }
 0xabf   :  { %v4979_v2 = vpop.permute.xlu2 %4978 }
 0xac0   :  { %v5208_v5 = vmul.f32 %v4979_v2, %v11360_v56 }
 0xac1   :  { %v5608_v40 = vpop.permute.xlu1 %5607 }
 0xac2   :  { %v5737_v49 = vadd.f32 %v5608_v40, %v5233_v28 }
 0xac3   :  { %v5643_v1 = vpop.permute.xlu0 %5642 }
 0xac4   :  { %5821 = vst.msk [vmem:[%s10953_s4 + $0x240] sm:$0xff] %vm2472_vm1, %v5737_v49  ;;  %v5744_v44 = vadd.f32 %v5643_v1, %v5240_v42  ;;  %v2686_v42 = vsel %vm2472_vm1, %v11361_v62, 0.0 }
 0xac6   :  { %5828 = vst.msk [vmem:[%s10953_s4 + $0x278] sm:$0xff] %vm2472_vm1, %v5744_v44  ;;  %2678 = vadd.xlane.f32.xlu2 %v2677_v52 }
 0xac9   :  { %v5119_v12 = vpop.permute.xlu1 %5118 }
 0xaca   :  { %v5236_v50 = vmul.f32 %v5119_v12, %v10277_v39 }
 0xad1   :  { %v5623_v27 = vpop.permute.xlu1 %5622 }
 0xad2   :  { %v5740_v55 = vadd.f32 %v5623_v27, %v5236_v50 }
 0xad4   :  { %5824 = vst.msk [vmem:[%s10953_s4 + $0x258] sm:$0xff] %vm2472_vm1, %v5740_v55 }
 0xad9   :  { %v5134_v57 = vpop.permute.xlu1 %5133 }
 0xada   :  { %v5239_v39 = vmul.f32 %v5134_v57, %v10356_v61 }
 0xade   :  { %4993 = vperm.xlu2 %5956, %v4455_v23   ;;  %v2796_v23 = vmul.f32 %v11361_v62, %v11361_v62 }
 0xae1   :  { %v5638_v47 = vpop.permute.xlu1 %5637 }
 0xae2   :  { %v5743_v4 = vadd.f32 %v5638_v47, %v5239_v39 }
 0xae4   :  { %5827 = vst.msk [vmem:[%s10953_s4 + $0x270] sm:$0xff] %vm2472_vm1, %v5743_v4  ;;  %v3022_v4 = vsel %vm2472_vm1, %v2796_v23, 0.0 }
 0xae9   :  { %v5149_v38 = vpop.permute.xlu1 %5148 }
 0xaea   :  { %v5242_v37 = vmul.f32 %v5149_v38, %v10418_v54  ;;  %v3013_v54 = vsel %vm2472_vm1, %v2793_v32, 0.0  ;;  %v4542_v32 = vld [vmem:[%s10952_s3 + $0x1a8] sm:$0xff] }
 0xaf1   :  { %v5653_v9 = vpop.permute.xlu1 %5652 }
 0xaf2   :  { %v5746_v22 = vadd.f32 %v5653_v9, %v5242_v37 }
 0xaf4   :  { %5830 = vst.msk [vmem:[%s10953_s4 + $0x288] sm:$0xff] %vm2472_vm1, %v5746_v22  ;;  %v4389_v22 = vld [vmem:[%s10951_s2 + $0x220] sm:$0xff] }
 0xaf8   :  { %v10738_v61 = vpop.xlane.xlu2 %3005 }
 0xb00   :  { %v5483_v45 = vpop.permute.xlu2 %5482 }
 0xb01   :  { %v5712_v58 = vadd.f32 %v5483_v45, %v5208_v5 }
 0xb03   :  { %5796 = vst.msk [vmem:[%s10953_s4 + $0x178] sm:$0xff] %vm2472_vm1, %v5712_v58 }
 0xb07   :  { %3014 = vadd.xlane.f32.xlu2 %v3013_v54 }
 0xb0e   :  { %v5154_v31 = vpop.permute.xlu0 %5153 }
 0xb0f   :  { %v5243_v33 = vmul.f32 %v5154_v31, %v10594_v63  ;;  %v3282_v63 = vmul.f32 %v3114_v19, %v3114_v19  ;;  %v3117_v31 = vmul.f32 0.020408163, %v10482_v60 }
 0xb11   :  { %v3366_v16 = vsub.f32 %v3198_v17, %v3282_v63  ;;  %v11363_v17 = vld [vmem:[#allocation46_spill] sm:$0xff] }
 0xb12   :  { %v2695_v63 = vsel %vm2472_vm1, %v11363_v17, 0.0 }
 0xb13   :  { %v3450_v53 = vadd.f32 1e-05, %v3366_v16 }
 0xb15   :  { %6103 = vrsqrt.f32 %v3450_v53  ;;  %vm4017_vm13 = vweird.f32 %v3450_v53 }
 0xb16   :  { %v5658_v21 = vpop.permute.xlu0 %5657 }
 0xb17   :  { %v5747_v6 = vadd.f32 %v5658_v21, %v5243_v33  ;;  %v3201_v33 = vmul.f32 0.020408163, %v10497_v34  ;;  %v3285_v21 = vmul.f32 %v3117_v31, %v3117_v31  ;;  %v4377_v34 = vld [vmem:[%s10951_s2 + $0x1c0] sm:$0xff] }
 0xb19   :  { %5831 = vst.msk [vmem:[%s10953_s4 + $0x290] sm:$0xff] %vm2472_vm1, %v5747_v6  ;;  %v3369_v6 = vsub.f32 %v3201_v33, %v3285_v21 }
 0xb1b   :  { %v6104_v28 = vpop.eup %6103  ;;  %v3453_v26 = vadd.f32 1e-05, %v3369_v6 }
 0xb1c   :  { %v4012_v40 = vmul.f32 %v6104_v28, %v3450_v53  ;;  %vm4018_vm12 = vweird.f32 %v6104_v28 }
 0xb1d   :  { %vm4019_vm14 = vmor %vm4017_vm13, %vm4018_vm12  ;;  %vm4047_vm5 = vweird.f32 %v3453_v26 }
 0xb1e   :  { %v4013_v46 = vmul.f32 %v6104_v28, %v4012_v40 }
 0xb1f   :  { %5497 = vperm.xlu2 %5956, %v4707_v36  }
 0xb20   :  { %v4014_v49 = vmul.f32 0.5, %v4013_v46 }
 0xb22   :  { %v4015_v1 = vsub.f32 1.5, %v4014_v49 }
 0xb24   :  { %v4016_v44 = vmul.f32 %v6104_v28, %v4015_v1 }
 0xb26   :  { %v4020_v13 = vsel %vm4019_vm14, %v6104_v28, %v4016_v44 }
 0xb27   :  { %v4458_v7 = vmul.f32 %v4374_v59, %v4020_v13 }
 0xb29   :  { %v4626_v58 = vmul.f32 %v4458_v7, %v3114_v19 }
 0xb2b   :  { %v4710_v54 = vsub.f32 %v4542_v32, %v4626_v58 }
 0xb39   :  { %v2679_v52 = vpop.xlane.xlu2 %2678 }
 0xb3a   :  { %v3129_v12 = vmul.f32 0.020408163, %v2679_v52 }
 0xb3c   :  { %v3297_v50 = vmul.f32 %v3129_v12, %v3129_v12 }
 0xb41   :  { %v4994_v41 = vpop.permute.xlu2 %4993 }
 0xb42   :  { %v5211_v57 = vmul.f32 %v4994_v41, %v11362_v0 }
 0xb48   :  { %2687 = vadd.xlane.f32.xlu2 %v2686_v42 }
 0xb60   :  { %5008 = vperm.xlu2 %5956, %v4458_v7  }
 0xb7a   :  { %v3015_v14 = vpop.xlane.xlu2 %3014 }
 0xb7b   :  { %v3213_v51 = vmul.f32 0.020408163, %v3015_v14  ;;  %v2799_v14 = vmul.f32 %v11363_v17, %v11363_v17 }
 0xb7d   :  { %v3381_v27 = vsub.f32 %v3213_v51, %v3297_v50 }
 0xb7f   :  { %v3465_v55 = vadd.f32 1e-05, %v3381_v27  ;;  %v3031_v27 = vsel %vm2472_vm1, %v2799_v14, 0.0 }
 0xb81   :  { %6105 = vrsqrt.f32 %v3465_v55  ;;  %vm4167_vm2 = vweird.f32 %v3465_v55 }
 0xb82   :  { %v5498_v35 = vpop.permute.xlu2 %5497  ;;  %6107 = vrsqrt.f32 %v3453_v26 }
 0xb83   :  { %v5715_v3 = vadd.f32 %v5498_v35, %v5211_v57  ;;  %v4392_v35 = vld [vmem:[%s10951_s2 + $0x238] sm:$0xff] }
 0xb85   :  { %5799 = vst.msk [vmem:[%s10953_s4 + $0x190] sm:$0xff] %vm2472_vm1, %v5715_v3 }
 0xb87   :  { %v6106_v39 = vpop.eup %6105 }
 0xb88   :  { %v4162_v47 = vmul.f32 %v6106_v39, %v3465_v55  ;;  %vm4168_vm15 = vweird.f32 %v6106_v39  ;;  %v6108_v20 = vpop.eup %6107 }
 0xb89   :  { %3023 = vadd.xlane.f32.xlu2 %v3022_v4  ;;  %vm4169_vm3 = vmor %vm4167_vm2, %vm4168_vm15  ;;  %v4042_v36 = vmul.f32 %v6108_v20, %v3453_v26  ;;  %vm4048_vm4 = vweird.f32 %v6108_v20  ;;  %v4545_v4 = vld [vmem:[%s10952_s3 + $0x1c0] sm:$0xff] }
 0xb8a   :  { %v4163_v38 = vmul.f32 %v6106_v39, %v4162_v47  ;;  %vm4049_vm6 = vmor %vm4047_vm5, %vm4048_vm4 }
 0xb8b   :  { %v4043_v19 = vmul.f32 %v6108_v20, %v4042_v36 }
 0xb8c   :  { %v4164_v2 = vmul.f32 0.5, %v4163_v38 }
 0xb8d   :  { %v4044_v16 = vmul.f32 0.5, %v4043_v19 }
 0xb8e   :  { %v4165_v37 = vsub.f32 1.5, %v4164_v2  ;;  %v3120_v2 = vmul.f32 0.020408163, %v10571_v18 }
 0xb8f   :  { %v4045_v53 = vsub.f32 1.5, %v4044_v16 }
 0xb90   :  { %v4166_v9 = vmul.f32 %v6106_v39, %v4165_v37  ;;  %v3204_v37 = vmul.f32 0.020408163, %v10576_v25  ;;  %v4380_v25 = vld [vmem:[%s10951_s2 + $0x1d8] sm:$0xff] }
 0xb91   :  { %v4046_v28 = vmul.f32 %v6108_v20, %v4045_v53 }
 0xb92   :  { %v4170_v56 = vsel %vm4169_vm3, %v6106_v39, %v4166_v9  ;;  %v3288_v9 = vmul.f32 %v3120_v2, %v3120_v2 }
 0xb93   :  { %v10775_v5 = vmul.f32 %v4389_v22, %v4170_v56  ;;  %v4050_v60 = vsel %vm4049_vm6, %v6108_v20, %v4046_v28 }
 0xb94   :  { %v4461_v40 = vmul.f32 %v4377_v34, %v4050_v60  ;;  %v3372_v22 = vsub.f32 %v3204_v37, %v3288_v9 }
 0xb95   :  { %v10778_v45 = vmul.f32 %v10775_v5, %v3129_v12 }
 0xb96   :  { %v4629_v47 = vmul.f32 %v4461_v40, %v3117_v31  ;;  %v3456_v56 = vadd.f32 1e-05, %v3372_v22 }
 0xb98   :  { %v4713_v38 = vsub.f32 %v4545_v4, %v4629_v47  ;;  %vm4077_vm10 = vweird.f32 %v3456_v56 }
 0xba1   :  { %5512 = vperm.xlu2 %5956, %v4710_v54   ;;  %v11364_v54 = vld [vmem:[#allocation58_spill] sm:$0xff] }
 0xba2   :  { %v2704_v33 = vsel %vm2472_vm1, %v11364_v54, 0.0 }
 0xbbb   :  { %v2688_v42 = vpop.xlane.xlu2 %2687 }
 0xbbc   :  { %v3132_v49 = vmul.f32 0.020408163, %v2688_v42 }
 0xbbe   :  { %v3300_v44 = vmul.f32 %v3132_v49, %v3132_v49 }
 0xbc3   :  { %v5009_v46 = vpop.permute.xlu2 %5008 }
 0xbc4   :  { %v5214_v52 = vmul.f32 %v5009_v46, %v11328_v43 }
 0xbca   :  { %2696 = vadd.xlane.f32.xlu2 %v2695_v63 }
 0xbe2   :  { %5023 = vperm.xlu2 %5956, %v4461_v40  }
 0xbfc   :  { %v3024_v1 = vpop.xlane.xlu2 %3023 }
 0xbfd   :  { %v3216_v13 = vmul.f32 0.020408163, %v3024_v1 }
 0xbff   :  { %v3384_v59 = vsub.f32 %v3216_v13, %v3300_v44 }
 0xc01   :  { %v3468_v7 = vadd.f32 1e-05, %v3384_v59 }
 0xc03   :  { %6109 = vrsqrt.f32 %v3468_v7  ;;  %vm4197_vm8 = vweird.f32 %v3468_v7 }
 0xc04   :  { %v5513_v41 = vpop.permute.xlu2 %5512  ;;  %6111 = vrsqrt.f32 %v3456_v56 }
 0xc05   :  { %v5718_v12 = vadd.f32 %v5513_v41, %v5214_v52  ;;  %v4395_v41 = vld [vmem:[%s10951_s2 + $0x250] sm:$0xff] }
 0xc07   :  { %5802 = vst.msk [vmem:[%s10953_s4 + $0x1a8] sm:$0xff] %vm2472_vm1, %v5718_v12 }
 0xc09   :  { %v6110_v50 = vpop.eup %6109 }
 0xc0a   :  { %v4192_v51 = vmul.f32 %v6110_v50, %v3468_v7  ;;  %vm4198_vm7 = vweird.f32 %v6110_v50  ;;  %v6112_v58 = vpop.eup %6111 }
 0xc0b   :  { %3032 = vadd.xlane.f32.xlu2 %v3031_v27  ;;  %vm4199_vm9 = vmor %vm4197_vm8, %vm4198_vm7  ;;  %v4072_v32 = vmul.f32 %v6112_v58, %v3456_v56  ;;  %vm4078_vm0 = vweird.f32 %v6112_v58  ;;  %v4548_v27 = vld [vmem:[%s10952_s3 + $0x1d8] sm:$0xff] }
 0xc0c   :  { %v4193_v55 = vmul.f32 %v6110_v50, %v4192_v51  ;;  %vm4079_vm11 = vmor %vm4077_vm10, %vm4078_vm0 }
 0xc0d   :  { %v4073_v31 = vmul.f32 %v6112_v58, %v4072_v32 }
 0xc0e   :  { %v4194_v0 = vmul.f32 0.5, %v4193_v55 }
 0xc0f   :  { %v4074_v21 = vmul.f32 0.5, %v4073_v31 }
 0xc10   :  { %v4195_v57 = vsub.f32 1.5, %v4194_v0  ;;  %v3123_v0 = vmul.f32 0.020408163, %v10653_v15 }
 0xc11   :  { %v4075_v6 = vsub.f32 1.5, %v4074_v21 }
 0xc12   :  { %v4196_v43 = vmul.f32 %v6110_v50, %v4195_v57  ;;  %v3207_v57 = vmul.f32 0.020408163, %v10665_v24  ;;  %v4383_v24 = vld [vmem:[%s10951_s2 + $0x1f0] sm:$0xff] }
 0xc13   :  { %v4076_v26 = vmul.f32 %v6112_v58, %v4075_v6 }
 0xc14   :  { %v4200_v3 = vsel %vm4199_vm9, %v6110_v50, %v4196_v43  ;;  %v3291_v43 = vmul.f32 %v3123_v0, %v3123_v0 }
 0xc15   :  { %v10801_v23 = vmul.f32 %v4392_v35, %v4200_v3  ;;  %v4080_v18 = vsel %vm4079_vm11, %v6112_v58, %v4076_v26 }
 0xc16   :  { %v4464_v20 = vmul.f32 %v4380_v25, %v4080_v18  ;;  %v3375_v35 = vsub.f32 %v3207_v57, %v3291_v43 }
 0xc17   :  { %v10804_v39 = vmul.f32 %v10801_v23, %v3132_v49  ;;  %v2802_v49 = vmul.f32 %v11364_v54, %v11364_v54 }
 0xc18   :  { %v4632_v51 = vmul.f32 %v4464_v20, %v3120_v2  ;;  %v3459_v3 = vadd.f32 1e-05, %v3375_v35  ;;  %v2200_v35 = vpop.f32.mrf.mxu0 }
 0xc19   :  { %v3040_v13 = vsel %vm2472_vm1, %v2802_v49, 0.0 }
 0xc1a   :  { %v4716_v55 = vsub.f32 %v4548_v27, %v4632_v51  ;;  %vm4107_vm2 = vweird.f32 %v3459_v3  ;;  %v11366_v51 = vld [vmem:[#allocation76_spill] sm:$0xff] }
 0xc23   :  { %5527 = vperm.xlu2 %5956, %v4713_v38   ;;  %v11365_v38 = vld [vmem:[#allocation39_spill] sm:$0xff] }
 0xc24   :  { %v2713_v37 = vsel %vm2472_vm1, %v11365_v38, 0.0 }
 0xc3d   :  { %v2697_v36 = vpop.xlane.xlu2 %2696 }
 0xc3e   :  { %v3135_v19 = vmul.f32 0.020408163, %v2697_v36 }
 0xc40   :  { %v3303_v53 = vmul.f32 %v3135_v19, %v3135_v19 }
 0xc45   :  { %v5024_v63 = vpop.permute.xlu2 %5023 }
 0xc46   :  { %v5217_v40 = vmul.f32 %v5024_v63, %v11339_v10 }
 0xc4c   :  { %2705 = vadd.xlane.f32.xlu2 %v2704_v33 }
 0xc64   :  { %5038 = vperm.xlu2 %5956, %v4464_v20  }
 0xc7e   :  { %v3033_v16 = vpop.xlane.xlu2 %3032 }
 0xc7f   :  { %v3219_v28 = vmul.f32 0.020408163, %v3033_v16 }
 0xc81   :  { %v3387_v60 = vsub.f32 %v3219_v28, %v3303_v53 }
 0xc83   :  { %v3471_v34 = vadd.f32 1e-05, %v3387_v60 }
 0xc85   :  { %6113 = vrsqrt.f32 %v3471_v34  ;;  %vm4227_vm13 = vweird.f32 %v3471_v34 }
 0xc86   :  { %v5528_v42 = vpop.permute.xlu2 %5527  ;;  %6115 = vrsqrt.f32 %v3459_v3 }
 0xc87   :  { %v5721_v46 = vadd.f32 %v5528_v42, %v5217_v40  ;;  %v4398_v42 = vld [vmem:[%s10951_s2 + $0x268] sm:$0xff] }
 0xc89   :  { %5805 = vst.msk [vmem:[%s10953_s4 + $0x1c0] sm:$0xff] %vm2472_vm1, %v5721_v46 }
 0xc8b   :  { %v6114_v1 = vpop.eup %6113 }
 0xc8c   :  { %v4222_v44 = vmul.f32 %v6114_v1, %v3471_v34  ;;  %vm4228_vm12 = vweird.f32 %v6114_v1  ;;  %v6116_v47 = vpop.eup %6115 }
 0xc8d   :  { %3041 = vadd.xlane.f32.xlu2 %v3040_v13  ;;  %vm4229_vm14 = vmor %vm4227_vm13, %vm4228_vm12  ;;  %v4102_v4 = vmul.f32 %v6116_v47, %v3459_v3  ;;  %vm4108_vm15 = vweird.f32 %v6116_v47  ;;  %v4551_v13 = vld [vmem:[%s10952_s3 + $0x1f0] sm:$0xff]  ;;  %v2469_v3 = vpop.f32.mrf.mxu1 }
 0xc8e   :  { %v4223_v59 = vmul.f32 %v6114_v1, %v4222_v44  ;;  %vm4109_vm3 = vmor %vm4107_vm2, %vm4108_vm15 }
 0xc8f   :  { %v4103_v2 = vmul.f32 %v6116_v47, %v4102_v4 }
 0xc90   :  { %v4224_v7 = vmul.f32 0.5, %v4223_v59 }
 0xc91   :  { %v4104_v9 = vmul.f32 0.5, %v4103_v2 }
 0xc92   :  { %v4225_v52 = vsub.f32 1.5, %v4224_v7  ;;  %v3126_v7 = vmul.f32 0.020408163, %v10731_v29 }
 0xc93   :  { %v4105_v22 = vsub.f32 1.5, %v4104_v9 }
 0xc94   :  { %v4226_v10 = vmul.f32 %v6114_v1, %v4225_v52  ;;  %v3210_v52 = vmul.f32 0.020408163, %v10738_v61 }
 0xc95   :  { %v4106_v56 = vmul.f32 %v6116_v47, %v4105_v22 }
 0xc96   :  { %v4230_v12 = vsel %vm4229_vm14, %v6114_v1, %v4226_v10  ;;  %v1662_v10 = vpop.f32.mrf.mxu2 }
 0xc97   :  { %v10827_v14 = vmul.f32 %v4395_v41, %v4230_v12  ;;  %v4110_v15 = vsel %vm4109_vm3, %v6116_v47, %v4106_v56  ;;  %v3294_v41 = vmul.f32 %v3126_v7, %v3126_v7  ;;  %v1663_v27 = vadd.f32 %v1662_v10, %v11366_v51 }
 0xc98   :  { %v4467_v58 = vmul.f32 %v4383_v24, %v4110_v15  ;;  %v4386_v15 = vld [vmem:[%s10951_s2 + $0x208] sm:$0xff] }
 0xc99   :  { %v10830_v50 = vmul.f32 %v10827_v14, %v3135_v19  ;;  %v2805_v19 = vmul.f32 %v11365_v38, %v11365_v38  ;;  %v3378_v12 = vsub.f32 %v3210_v52, %v3294_v41  ;;  %v4557_v52 = vld [vmem:[%s10952_s3 + $0x220] sm:$0xff] }
 0xc9a   :  { %v4635_v44 = vmul.f32 %v4467_v58, %v3123_v0  ;;  %v4725_v10 = vsub.f32 %v4557_v52, %v10778_v45  ;;  %v4566_v45 = vld [vmem:[%s10952_s3 + $0x268] sm:$0xff] }
 0xc9b   :  { %v3049_v28 = vsel %vm2472_vm1, %v2805_v19, 0.0  ;;  %v3462_v57 = vadd.f32 1e-05, %v3378_v12 }
 0xc9c   :  { %v4719_v59 = vsub.f32 %v4551_v13, %v4635_v44  ;;  %v4554_v13 = vld [vmem:[%s10952_s3 + $0x208] sm:$0xff] }
 0xc9d   :  { %vm4137_vm8 = vweird.f32 %v3462_v57 }
 0xca5   :  { %5542 = vperm.xlu2 %5956, %v4716_v55   ;;  %v1931_v55 = vpop.f32.mrf.mxu3 }
 0xca6   :  { %v1932_v43 = vadd.f32 %v1931_v55, %v1663_v27 }
 0xca8   :  { %v2201_v0 = vadd.f32 %v2200_v35, %v1932_v43 }
 0xcaa   :  { %v10864_v47 = vadd.f32 %v2469_v3, %v2201_v0 }
 0xcac   :  { %v2722_v29 = vsel %vm2472_vm1, %v10864_v47, 0.0 }
 0xcbf   :  { %v2706_v32 = vpop.xlane.xlu2 %2705 }
 0xcc0   :  { %v3138_v31 = vmul.f32 0.020408163, %v2706_v32 }
 0xcc2   :  { %v3306_v6 = vmul.f32 %v3138_v31, %v3138_v31 }
 0xcc7   :  { %v5039_v33 = vpop.permute.xlu2 %5038 }
 0xcc8   :  { %v5220_v20 = vmul.f32 %v5039_v33, %v11346_v30 }
 0xcce   :  { %2714 = vadd.xlane.f32.xlu2 %v2713_v37 }
 0xce6   :  { %5053 = vperm.xlu2 %5956, %v4467_v58  }
 0xd00   :  { %v3042_v21 = vpop.xlane.xlu2 %3041 }
 0xd01   :  { %v3222_v26 = vmul.f32 0.020408163, %v3042_v21 }
 0xd03   :  { %v3390_v18 = vsub.f32 %v3222_v26, %v3306_v6 }
 0xd05   :  { %v3474_v25 = vadd.f32 1e-05, %v3390_v18 }
 0xd07   :  { %6117 = vrsqrt.f32 %v3474_v25  ;;  %vm4257_vm5 = vweird.f32 %v3474_v25 }
 0xd08   :  { %v5543_v36 = vpop.permute.xlu2 %5542  ;;  %6119 = vrsqrt.f32 %v3462_v57 }
 0xd09   :  { %v5724_v63 = vadd.f32 %v5543_v36, %v5220_v20 }
 0xd0b   :  { %5808 = vst.msk [vmem:[%s10953_s4 + $0x1d8] sm:$0xff] %vm2472_vm1, %v5724_v63  ;;  %v2808_v63 = vmul.f32 %v10864_v47, %v10864_v47 }
 0xd0d   :  { %v6118_v16 = vpop.eup %6117 }
 0xd0e   :  { %v4252_v53 = vmul.f32 %v6118_v16, %v3474_v25  ;;  %vm4258_vm4 = vweird.f32 %v6118_v16  ;;  %v6120_v4 = vpop.eup %6119 }
 0xd0f   :  { %3050 = vadd.xlane.f32.xlu2 %v3049_v28  ;;  %vm4259_vm6 = vmor %vm4257_vm5, %vm4258_vm4  ;;  %v4132_v37 = vmul.f32 %v6120_v4, %v3462_v57  ;;  %vm4138_vm7 = vweird.f32 %v6120_v4 }
 0xd10   :  { %v4253_v60 = vmul.f32 %v6118_v16, %v4252_v53  ;;  %vm4139_vm9 = vmor %vm4137_vm8, %vm4138_vm7  ;;  %v3058_v53 = vsel %vm2472_vm1, %v2808_v63, 0.0 }
 0xd11   :  { %v4133_v61 = vmul.f32 %v6120_v4, %v4132_v37 }
 0xd12   :  { %v4254_v34 = vmul.f32 0.5, %v4253_v60 }
 0xd13   :  { %v4134_v2 = vmul.f32 0.5, %v4133_v61 }
 0xd14   :  { %v4255_v40 = vsub.f32 1.5, %v4254_v34 }
 0xd15   :  { %v4135_v9 = vsub.f32 1.5, %v4134_v2 }
 0xd16   :  { %v4256_v30 = vmul.f32 %v6118_v16, %v4255_v40  ;;  %v4401_v40 = vld [vmem:[%s10951_s2 + $0x280] sm:$0xff] }
 0xd17   :  { %v4136_v22 = vmul.f32 %v6120_v4, %v4135_v9 }
 0xd18   :  { %v4260_v46 = vsel %vm4259_vm6, %v6118_v16, %v4256_v30 }
 0xd19   :  { %v10853_v49 = vmul.f32 %v4398_v42, %v4260_v46  ;;  %v4140_v56 = vsel %vm4139_vm9, %v6120_v4, %v4136_v22 }
 0xd1a   :  { %v4470_v24 = vmul.f32 %v4386_v15, %v4140_v56 }
 0xd1b   :  { %v10856_v1 = vmul.f32 %v10853_v49, %v3138_v31 }
 0xd1c   :  { %v4638_v44 = vmul.f32 %v4470_v24, %v3126_v7  ;;  %v4560_v7 = vld [vmem:[%s10952_s3 + $0x238] sm:$0xff] }
 0xd1d   :  { %v4728_v41 = vsub.f32 %v4560_v7, %v10804_v39 }
 0xd27   :  { %5557 = vperm.xlu2 %5956, %v4719_v59   ;;  %v4722_v59 = vsub.f32 %v4554_v13, %v4638_v44 }
 0xd41   :  { %v2715_v58 = vpop.xlane.xlu2 %2714 }
 0xd42   :  { %v3141_v33 = vmul.f32 0.020408163, %v2715_v58 }
 0xd44   :  { %v3309_v21 = vmul.f32 %v3141_v33, %v3141_v33 }
 0xd49   :  { %v5054_v32 = vpop.permute.xlu2 %5053 }
 0xd4a   :  { %v5223_v25 = vmul.f32 %v5054_v32, %v11351_v11 }
 0xd50   :  { %2723 = vadd.xlane.f32.xlu2 %v2722_v29 }
 0xd68   :  { %5068 = vperm.xlu2 %5956, %v4470_v24  }
 0xd82   :  { %v3051_v31 = vpop.xlane.xlu2 %3050 }
 0xd83   :  { %v3225_v6 = vmul.f32 0.020408163, %v3051_v31  ;;  %v4572_v31 = vld [vmem:[%s10952_s3 + $0x298] sm:$0xff] }
 0xd85   :  { %v3393_v26 = vsub.f32 %v3225_v6, %v3309_v21 }
 0xd87   :  { %v3477_v18 = vadd.f32 1e-05, %v3393_v26 }
 0xd89   :  { %6121 = vrsqrt.f32 %v3477_v18  ;;  %vm4287_vm10 = vweird.f32 %v3477_v18 }
 0xd8a   :  { %v5558_v20 = vpop.permute.xlu2 %5557 }
 0xd8b   :  { %v5727_v36 = vadd.f32 %v5558_v20, %v5223_v25 }
 0xd8d   :  { %5811 = vst.msk [vmem:[%s10953_s4 + $0x1f0] sm:$0xff] %vm2472_vm1, %v5727_v36 }
 0xd8f   :  { %v6122_v19 = vpop.eup %6121 }
 0xd90   :  { %v4282_v16 = vmul.f32 %v6122_v19, %v3477_v18  ;;  %vm4288_vm0 = vweird.f32 %v6122_v19 }
 0xd91   :  { %3059 = vadd.xlane.f32.xlu2 %v3058_v53  ;;  %vm4289_vm11 = vmor %vm4287_vm10, %vm4288_vm0 }
 0xd92   :  { %v4283_v28 = vmul.f32 %v6122_v19, %v4282_v16 }
 0xd94   :  { %v4284_v60 = vmul.f32 0.5, %v4283_v28 }
 0xd96   :  { %v4285_v34 = vsub.f32 1.5, %v4284_v60 }
 0xd98   :  { %v4286_v11 = vmul.f32 %v6122_v19, %v4285_v34 }
 0xd9a   :  { %v4290_v30 = vsel %vm4289_vm11, %v6122_v19, %v4286_v11 }
 0xd9b   :  { %v4485_v42 = vmul.f32 %v4401_v40, %v4290_v30 }
 0xd9d   :  { %v4653_v46 = vmul.f32 %v4485_v42, %v3141_v33 }
 0xda9   :  { %5572 = vperm.xlu2 %5956, %v4722_v59  }
 0xdb1   :  { %5083 = vperm.xlu2 %5956, %v10775_v5   ;;  %v4563_v5 = vld [vmem:[%s10952_s3 + $0x250] sm:$0xff] }
 0xdb2   :  { %v4731_v12 = vsub.f32 %v4563_v5, %v10830_v50 }
 0xdb9   :  { %5587 = vperm.xlu2 %5956, %v4725_v10  }
 0xdc1   :  { %5098 = vperm.xlu2 %5956, %v10801_v23   ;;  %v4734_v23 = vsub.f32 %v4566_v45, %v10856_v1 }
 0xdc3   :  { %v2724_v39 = vpop.xlane.xlu2 %2723 }
 0xdc4   :  { %v3144_v50 = vmul.f32 0.020408163, %v2724_v39 }
 0xdc6   :  { %v3312_v57 = vmul.f32 %v3144_v50, %v3144_v50 }
 0xdc9   :  { %5602 = vperm.xlu2 %5956, %v4728_v41  }
 0xdcb   :  { %v5069_v27 = vpop.permute.xlu2 %5068 }
 0xdcc   :  { %v5226_v0 = vmul.f32 %v5069_v27, %v11354_v48  ;;  %v4404_v48 = vld [vmem:[%s10951_s2 + $0x298] sm:$0xff] }
 0xdd1   :  { %5113 = vperm.xlu2 %5956, %v10827_v14   ;;  %v4569_v14 = vld [vmem:[%s10952_s3 + $0x280] sm:$0xff] }
 0xdd2   :  { %v4737_v51 = vsub.f32 %v4569_v14, %v4653_v46 }
 0xdd9   :  { %5617 = vperm.xlu2 %5956, %v4731_v12  }
 0xde1   :  { %5128 = vperm.xlu2 %5956, %v10853_v49  }
 0xde9   :  { %5632 = vperm.xlu2 %5956, %v4734_v23  }
 0xdf1   :  { %5143 = vperm.xlu2 %5956, %v4485_v42  }
 0xdf9   :  { %5647 = vperm.xlu2 %5956, %v4737_v51  }
 0xe04   :  { %v3060_v55 = vpop.xlane.xlu2 %3059 }
 0xe05   :  { %v3228_v49 = vmul.f32 0.020408163, %v3060_v55 }
 0xe07   :  { %v3396_v43 = vsub.f32 %v3228_v49, %v3312_v57 }
 0xe09   :  { %v3480_v35 = vadd.f32 1e-05, %v3396_v43 }
 0xe0b   :  { %6123 = vrsqrt.f32 %v3480_v35  ;;  %vm4317_vm13 = vweird.f32 %v3480_v35 }
 0xe0c   :  { %v5573_v1 = vpop.permute.xlu2 %5572 }
 0xe0d   :  { %v5730_v3 = vadd.f32 %v5573_v1, %v5226_v0 }
 0xe0f   :  { %5814 = vst.msk [vmem:[%s10953_s4 + $0x208] sm:$0xff] %vm2472_vm1, %v5730_v3 }
 0xe11   :  { %v6124_v4 = vpop.eup %6123 }
 0xe12   :  { %v4312_v37 = vmul.f32 %v6124_v4, %v3480_v35  ;;  %vm4318_vm12 = vweird.f32 %v6124_v4 }
 0xe13   :  { %vm4319_vm14 = vmor %vm4317_vm13, %vm4318_vm12 }
 0xe14   :  { %v4313_v29 = vmul.f32 %v6124_v4, %v4312_v37  ;;  %v5084_v61 = vpop.permute.xlu2 %5083 }
 0xe15   :  { %v5229_v56 = vmul.f32 %v5084_v61, %v11359_v8 }
 0xe16   :  { %v4314_v2 = vmul.f32 0.5, %v4313_v29 }
 0xe18   :  { %v4315_v9 = vsub.f32 1.5, %v4314_v2 }
 0xe1a   :  { %v4316_v22 = vmul.f32 %v6124_v4, %v4315_v9 }
 0xe1c   :  { %v5588_v15 = vpop.permute.xlu2 %5587  ;;  %v4320_v24 = vsel %vm4319_vm14, %v6124_v4, %v4316_v22 }
 0xe1d   :  { %v5733_v58 = vadd.f32 %v5588_v15, %v5229_v56  ;;  %v4488_v32 = vmul.f32 %v4404_v48, %v4320_v24 }
 0xe1f   :  { %5817 = vst.msk [vmem:[%s10953_s4 + $0x220] sm:$0xff] %vm2472_vm1, %v5733_v58  ;;  %5158 = vperm.xlu2 %5956, %v4488_v32   ;;  %v4656_v33 = vmul.f32 %v4488_v32, %v3144_v50 }
 0xe21   :  { %v4740_v6 = vsub.f32 %v4572_v31, %v4656_v33 }
 0xe24   :  { %v5099_v21 = vpop.permute.xlu2 %5098 }
 0xe25   :  { %v5232_v8 = vmul.f32 %v5099_v21, %v11361_v62 }
 0xe27   :  { %5662 = vperm.xlu2 %5956, %v4740_v6  }
 0xe2c   :  { %v5603_v26 = vpop.permute.xlu2 %5602 }
 0xe2d   :  { %v5736_v18 = vadd.f32 %v5603_v26, %v5232_v8 }
 0xe2f   :  { %5820 = vst.msk [vmem:[%s10953_s4 + $0x238] sm:$0xff] %vm2472_vm1, %v5736_v18 }
 0xe34   :  { %v5114_v25 = vpop.permute.xlu2 %5113 }
 0xe35   :  { %v5235_v20 = vmul.f32 %v5114_v25, %v11363_v17 }
 0xe3c   :  { %v5618_v36 = vpop.permute.xlu2 %5617 }
 0xe3d   :  { %v5739_v63 = vadd.f32 %v5618_v36, %v5235_v20 }
 0xe3f   :  { %5823 = vst.msk [vmem:[%s10953_s4 + $0x250] sm:$0xff] %vm2472_vm1, %v5739_v63 }
 0xe44   :  { %v5129_v19 = vpop.permute.xlu2 %5128 }
 0xe45   :  { %v5238_v62 = vmul.f32 %v5129_v19, %v11364_v54 }
 0xe4c   :  { %v5633_v16 = vpop.permute.xlu2 %5632 }
 0xe4d   :  { %v5742_v53 = vadd.f32 %v5633_v16, %v5238_v62 }
 0xe4f   :  { %5826 = vst.msk [vmem:[%s10953_s4 + $0x268] sm:$0xff] %vm2472_vm1, %v5742_v53 }
 0xe54   :  { %v5144_v28 = vpop.permute.xlu2 %5143 }
 0xe55   :  { %v5241_v17 = vmul.f32 %v5144_v28, %v11365_v38 }
 0xe5c   :  { %v5648_v60 = vpop.permute.xlu2 %5647 }
 0xe5d   :  { %v5745_v34 = vadd.f32 %v5648_v60, %v5241_v17 }
 0xe5f   :  { %5829 = vst.msk [vmem:[%s10953_s4 + $0x280] sm:$0xff] %vm2472_vm1, %v5745_v34 }
 0xe79   :  { %v5159_v11 = vpop.permute.xlu2 %5158 }
 0xe7a   :  { %v5244_v54 = vmul.f32 %v5159_v11, %v10864_v47 }
 0xe81   :  { %v5663_v40 = vpop.permute.xlu2 %5662 }
 0xe82   :  { %v5748_v30 = vadd.f32 %v5663_v40, %v5244_v54 }
 0xe84   :  { %5832 = vst.msk [vmem:[%s10953_s4 + $0x298] sm:$0xff] %vm2472_vm1, %v5748_v30 }

</bundles_post_ra>
